<compile_context>
chip_gen: v5e
topology: v5e:2x2
jax: 0.10.0
libtpu: 0.0.40
codegen_flags: <defaults>
</compile_context>

<pallas_src>
import jax
import jax.numpy as jnp
from jax.experimental import pallas as pl
from jax.experimental.pallas import tpu as pltpu

# ---- small synthetic DistilBERT config ----
VOCAB    = 128
MAX_POS  = 32
HIDDEN   = 32      # bert.config.hidden_size
N_LAYERS = 2
N_HEADS  = 4
DH       = HIDDEN // N_HEADS
FFN      = 64
OUT_DIM  = 16      # TextEncoder output_dim (kept small for the demo)
OUT_PAD  = 128     # lane-dense padded fc width (sliced back to OUT_DIM)
EPS      = 1e-12


def _layernorm(x, g, b):
    mu = jnp.mean(x, axis=-1, keepdims=True)
    var = jnp.mean((x - mu) ** 2, axis=-1, keepdims=True)
    return (x - mu) * jax.lax.rsqrt(var + EPS) * g + b


def _gelu(x):
    # tanh-approx GELU.
    # TODO(synk): exact erf-GELU (HF DistilBERT default) if bit-exactness vs. HF matters.
    c = 0.7978845608028654  # sqrt(2/pi)
    return 0.5 * x * (1.0 + jnp.tanh(c * (x + 0.044715 * x * x * x)))


def text_encoder_kernel(
    x_ref, mask_ref,
    ln_emb_ref,
    w_qkv_ref, b_qkv_ref, w_o_ref, vecs_ref,
    w1_ref, b1_ref, w2_ref,
    wfc_ref, bfc_ref,
    out_ref,
):
    BT, S, H = x_ref.shape
    NH, D = N_HEADS, DH
    bf16 = jnp.bfloat16

    x = x_ref[...].reshape(BT * S, H)                    # [BT*S, H] f32

    # Additive key mask, materialized ONCE per grid step for the batched-head
    # score shape [NH*BT, S, S] (batch index n = h*BT + b), reused by all layers.
    neg = jnp.broadcast_to(
        ((1.0 - mask_ref[...]) * (-1e9)).reshape(1, BT, 1, S),
        (NH, BT, S, S)).reshape(NH * BT, S, S)

    ln_emb = ln_emb_ref[...]                             # [2, H] (gamma, beta)
    x = _layernorm(x, ln_emb[0:1, :], ln_emb[1:2, :])    # embedding LayerNorm

    for l in range(N_LAYERS):
        vecs_l = vecs_ref[l]                             # [6,H]: bo, ln1_g, ln1_b, b2, ln2_g, ln2_b
        xb = x.astype(bf16)

        # ---- multi-head self attention ----
        # Fused QKV projection: one [BT*S,H] x [H,3H] matmul; 1/sqrt(D) is
        # already folded into the q columns / bias at pack time.
        qkv = jnp.dot(xb, w_qkv_ref[l],
                      preferred_element_type=jnp.float32) + b_qkv_ref[l]   # [BT*S, 3H]

        def gather_heads(base):
            # per-head 8-lane column slices, stacked over heads on the leading
            # (batch) axis: [NH*BT, S, D], batch index n = h*BT + b
            return jnp.concatenate(
                [qkv[:, base + h * D: base + (h + 1) * D].reshape(BT, S, D)
                 for h in range(NH)], axis=0)

        qh = gather_heads(0).astype(bf16)                # [NH*BT, S, D]
        kh = gather_heads(H).astype(bf16)
        vh = gather_heads(2 * H).astype(bf16)

        s = jnp.einsum('nqd,nkd->nqk', qh, kh,
                       preferred_element_type=jnp.float32)                 # [NH*BT, S, S]
        s = s + neg
        s = s - jnp.max(s, axis=-1, keepdims=True)                         # stable softmax
        e = jnp.exp(s)
        p = (e * pl.reciprocal(jnp.sum(e, axis=-1, keepdims=True),
                               approx=True)).astype(bf16)
        ctx = jnp.einsum('nqk,nkd->nqd', p, vh,
                         preferred_element_type=jnp.float32)               # [NH*BT, S, D]

        # merge heads back to [BT*S, H] with head-major columns (matches W_o)
        ctx = ctx.reshape(NH, BT * S, D)
        ctx = jnp.concatenate([ctx[h] for h in range(NH)], axis=-1)        # [BT*S, H]

        # single fused output projection across heads
        attn = jnp.dot(ctx.astype(bf16), w_o_ref[l],
                       preferred_element_type=jnp.float32) + vecs_l[0:1, :]
        x = _layernorm(x + attn, vecs_l[1:2, :], vecs_l[2:3, :])

        # ---- feed-forward ----
        xb = x.astype(bf16)
        hdn = _gelu(jnp.dot(xb, w1_ref[l],
                            preferred_element_type=jnp.float32) + b1_ref[l])
        ffn = jnp.dot(hdn.astype(bf16), w2_ref[l],
                      preferred_element_type=jnp.float32) + vecs_l[3:4, :]
        x = _layernorm(x + ffn, vecs_l[4:5, :], vecs_l[5:6, :])

    # last_hidden_state[:, 0, :]  ->  fc (lane-dense padded output)
    cls = x.reshape(BT, S, H)[:, 0, :]                                     # [BT, H]
    out = jnp.dot(cls.astype(bf16), wfc_ref[...],
                  preferred_element_type=jnp.float32) + bfc_ref[...]       # [BT, OUT_PAD]
    out_ref[...] = out


def pack_params(params):
    """One-time repacking of the parameter pytree into a few dense slabs.

    - Q/K/V weights fused into one [L, H, 3H] slab; 1/sqrt(DH) folded into the
      q columns and q bias (offline weight transform, zero runtime cost).
    - all per-layer H-wide vectors (biases / LN affine) in one [L, 6, H] slab.
    - matmul operand slabs cast to bf16 (kernel accumulates in f32).
    - fc weight/bias zero-padded to OUT_PAD lanes for lane-dense stores.
    """
    bf16 = jnp.bfloat16
    scale = 1.0 / (DH ** 0.5)

    w_qkv = jnp.concatenate(
        [params["wq"] * scale, params["wk"], params["wv"]], axis=-1)       # [L, H, 3H]
    b_qkv = jnp.concatenate(
        [params["bq"] * scale, params["bk"], params["bv"]], axis=-1)       # [L, 1, 3H]

    vecs = jnp.stack([params["bo"][:, 0, :], params["ln1_g"][:, 0, :],
                      params["ln1_b"][:, 0, :], params["b2"][:, 0, :],
                      params["ln2_g"][:, 0, :], params["ln2_b"][:, 0, :]],
                     axis=1)                                               # [L, 6, H]

    ln_emb = jnp.concatenate([params["emb_g"], params["emb_b"]], axis=0)   # [2, H]

    wfc = jnp.zeros((HIDDEN, OUT_PAD), jnp.float32).at[:, :OUT_DIM].set(params["wfc"])
    bfc = jnp.zeros((1, OUT_PAD), jnp.float32).at[:, :OUT_DIM].set(params["bfc"])

    return {
        "word_emb": params["word_emb"],
        "pos_emb":  params["pos_emb"],
        "ln_emb":   ln_emb,
        "w_qkv":    w_qkv.astype(bf16),
        "b_qkv":    b_qkv,
        "w_o":      params["wo"].astype(bf16),     # [L, H, H]
        "vecs":     vecs,
        "w1":       params["w1"].astype(bf16),
        "b1":       params["b1"],
        "w2":       params["w2"].astype(bf16),
        "wfc":      wfc.astype(bf16),
        "bfc":      bfc,
    }


def _round_up(x, m):
    return -(-x // m) * m


def text_encoder_forward(packed, input_ids, attention_mask, *, block_b=None):
    B, S = input_ids.shape
    assert S <= MAX_POS, f"sequence length {S} exceeds MAX_POS={MAX_POS}"
    if block_b is None:
        # ~512 rows of work per grid step, but never pad a tiny batch past the
        # 8-sublane granule (B=2 -> BT=8, not 16/64).
        block_b = min(max(1, 512 // S), _round_up(B, 8))
    BT = block_b
    Bp = _round_up(B, BT)

    # glue: embedding gather stays in plain JAX
    x = packed["word_emb"][input_ids] + packed["pos_emb"][jnp.arange(S)][None, :, :]
    x = x.astype(jnp.float32)
    mask = attention_mask.astype(jnp.float32).reshape(B, 1, S)
    if Bp != B:
        x = jnp.concatenate([x, jnp.zeros((Bp - B, S, HIDDEN), jnp.float32)], axis=0)
        # padded rows attend everywhere (all-ones mask) so softmax stays
        # well-formed; their outputs are sliced away below.
        mask = jnp.concatenate([mask, jnp.ones((Bp - B, 1, S), jnp.float32)], axis=0)

    weight_names = ["ln_emb", "w_qkv", "b_qkv", "w_o", "vecs",
                    "w1", "b1", "w2", "wfc", "bfc"]
    weights = [packed[n] for n in weight_names]

    def full_spec(shape):
        nd = len(shape)
        return pl.BlockSpec(shape, lambda b, _nd=nd: (0,) * _nd)

    in_specs = [
        pl.BlockSpec((BT, S, HIDDEN), lambda b: (b, 0, 0)),    # x
        pl.BlockSpec((BT, 1, S), lambda b: (b, 0, 0)),         # mask
    ] + [full_spec(w.shape) for w in weights]

    out = pl.pallas_call(
        text_encoder_kernel,
        grid=(Bp // BT,),
        in_specs=in_specs,
        out_specs=pl.BlockSpec((BT, OUT_PAD), lambda b: (b, 0)),
        out_shape=jax.ShapeDtypeStruct((Bp, OUT_PAD), jnp.float32),
        compiler_params=pltpu.CompilerParams(
            dimension_semantics=("parallel",)),                # batch axis: both TCs on v7x
    )(x, mask, *weights)
    return out[:B, :OUT_DIM]                                   # [B, OUT_DIM]


def init_params(key):
    ks = iter(jax.random.split(key, 32))
    n = lambda shape: (0.02 * jax.random.normal(next(ks), shape)).astype(jnp.float32)
    ones = lambda shape: jnp.ones(shape, jnp.float32)
    zeros = lambda shape: jnp.zeros(shape, jnp.float32)
    L, H, F = N_LAYERS, HIDDEN, FFN
    return {
        "word_emb": n((VOCAB, H)),
        "pos_emb":  n((MAX_POS, H)),
        "emb_g": ones((1, H)), "emb_b": zeros((1, H)),
        "wq": n((L, H, H)), "bq": zeros((L, 1, H)),
        "wk": n((L, H, H)), "bk": zeros((L, 1, H)),
        "wv": n((L, H, H)), "bv": zeros((L, 1, H)),
        "wo": n((L, H, H)), "bo": zeros((L, 1, H)),
        "ln1_g": ones((L, 1, H)), "ln1_b": zeros((L, 1, H)),
        "w1": n((L, H, F)), "b1": zeros((L, 1, F)),
        "w2": n((L, F, H)), "b2": zeros((L, 1, H)),
        "ln2_g": ones((L, 1, H)), "ln2_b": zeros((L, 1, H)),
        "wfc": n((H, OUT_DIM)), "bfc": zeros((1, OUT_DIM)),
    }


if __name__ == "__main__":
    key = jax.random.PRNGKey(0)
    params = init_params(key)
    packed = pack_params(params)     # one-time parameter repacking (outside the hot path)

    B, S = 2, 8
    input_ids = jax.random.randint(jax.random.PRNGKey(1), (B, S), 0, VOCAB, dtype=jnp.int32)
    # second sequence has 3 padding positions
    attention_mask = jnp.array(
        [[1, 1, 1, 1, 1, 1, 1, 1],
         [1, 1, 1, 1, 1, 0, 0, 0]], dtype=jnp.int32)

    out = text_encoder_forward(packed, input_ids, attention_mask)
    out = jax.block_until_ready(out)
    assert out.shape == (B, OUT_DIM), out.shape
    assert jnp.all(jnp.isfinite(out))
    print("KERNEL_OK")
</pallas_src>

<mosaic_0001>
module attributes {stable_mosaic.version = 11 : i64} {
  func.func @text_encoder_kernel(%arg0: i32, %arg1: memref<8x8x32xf32, #tpu.memory_space<vmem>>, %arg2: memref<8x1x8xf32, #tpu.memory_space<vmem>>, %arg3: memref<2x32xf32, #tpu.memory_space<vmem>>, %arg4: memref<2x32x96xbf16, #tpu.memory_space<vmem>>, %arg5: memref<2x1x96xf32, #tpu.memory_space<vmem>>, %arg6: memref<2x32x32xbf16, #tpu.memory_space<vmem>>, %arg7: memref<2x6x32xf32, #tpu.memory_space<vmem>>, %arg8: memref<2x32x64xbf16, #tpu.memory_space<vmem>>, %arg9: memref<2x1x64xf32, #tpu.memory_space<vmem>>, %arg10: memref<2x64x32xbf16, #tpu.memory_space<vmem>>, %arg11: memref<32x128xbf16, #tpu.memory_space<vmem>>, %arg12: memref<1x128xf32, #tpu.memory_space<vmem>>, %arg13: memref<8x128xf32, #tpu.memory_space<vmem>>) attributes {dimension_semantics = [#tpu.dimension_semantics<parallel>], iteration_bounds = array<i64: 1>, scalar_prefetch = 0 : i64, scratch_operands = 0 : i64, tpu.core_type = #tpu.core_type<tc>, window_params = [{transform_indices = @transform_0, window_bounds = array<i64: 8, 8, 32>}, {transform_indices = @transform_1, window_bounds = array<i64: 8, 1, 8>}, {pipeline_mode = #tpu.pipeline_mode<synchronous>, transform_indices = @transform_2, window_bounds = array<i64: 2, 32>}, {pipeline_mode = #tpu.pipeline_mode<synchronous>, transform_indices = @transform_3, window_bounds = array<i64: 2, 32, 96>}, {pipeline_mode = #tpu.pipeline_mode<synchronous>, transform_indices = @transform_4, window_bounds = array<i64: 2, 1, 96>}, {pipeline_mode = #tpu.pipeline_mode<synchronous>, transform_indices = @transform_5, window_bounds = array<i64: 2, 32, 32>}, {pipeline_mode = #tpu.pipeline_mode<synchronous>, transform_indices = @transform_6, window_bounds = array<i64: 2, 6, 32>}, {pipeline_mode = #tpu.pipeline_mode<synchronous>, transform_indices = @transform_7, window_bounds = array<i64: 2, 32, 64>}, {pipeline_mode = #tpu.pipeline_mode<synchronous>, transform_indices = @transform_8, window_bounds = array<i64: 2, 1, 64>}, {pipeline_mode = #tpu.pipeline_mode<synchronous>, transform_indices = @transform_9, window_bounds = array<i64: 2, 64, 32>}, {pipeline_mode = #tpu.pipeline_mode<synchronous>, transform_indices = @transform_10, window_bounds = array<i64: 32, 128>}, {pipeline_mode = #tpu.pipeline_mode<synchronous>, transform_indices = @transform_11, window_bounds = array<i64: 1, 128>}, {transform_indices = @transform_12, window_bounds = array<i64: 8, 128>}]} {
    %c0 = arith.constant 0 : index
    %c0_0 = arith.constant 0 : index
    %c0_1 = arith.constant 0 : index
    %0 = vector.load %arg1[%c0, %c0_0, %c0_1] : memref<8x8x32xf32, #tpu.memory_space<vmem>>, vector<8x8x32xf32>
    %1 = vector.shape_cast %0 : vector<8x8x32xf32> to vector<64x32xf32>
    %c0_2 = arith.constant 0 : index
    %c0_3 = arith.constant 0 : index
    %c0_4 = arith.constant 0 : index
    %2 = vector.load %arg2[%c0_2, %c0_3, %c0_4] : memref<8x1x8xf32, #tpu.memory_space<vmem>>, vector<8x1x8xf32>
    %cst = arith.constant 1.000000e+00 : f32
    %3 = vector.broadcast %cst : f32 to vector<8x1x8xf32>
    %4 = arith.subf %3, %2 : vector<8x1x8xf32>
    %cst_5 = arith.constant -1.000000e+09 : f32
    %5 = vector.broadcast %cst_5 : f32 to vector<8x1x8xf32>
    %6 = arith.mulf %4, %5 : vector<8x1x8xf32>
    %7 = vector.shape_cast %6 : vector<8x1x8xf32> to vector<1x8x1x8xf32>
    %8 = vector.shape_cast %7 : vector<1x8x1x8xf32> to vector<1x8x1x8xf32>
    %9 = vector.broadcast %8 : vector<1x8x1x8xf32> to vector<4x8x8x8xf32>
    %10 = vector.shape_cast %9 : vector<4x8x8x8xf32> to vector<32x8x8xf32>
    %c0_6 = arith.constant 0 : index
    %c0_7 = arith.constant 0 : index
    %11 = vector.load %arg3[%c0_6, %c0_7] : memref<2x32xf32, #tpu.memory_space<vmem>>, vector<2x32xf32>
    %12 = vector.extract_strided_slice %11 {offsets = [0, 0], sizes = [1, 32], strides = [1, 1]} : vector<2x32xf32> to vector<1x32xf32>
    %13 = vector.extract_strided_slice %11 {offsets = [1, 0], sizes = [1, 32], strides = [1, 1]} : vector<2x32xf32> to vector<1x32xf32>
    %cst_8 = arith.constant dense<0.000000e+00> : vector<64xf32>
    %14 = vector.multi_reduction <add>, %1, %cst_8 [1] : vector<64x32xf32> to vector<64xf32>
    %15 = vector.shape_cast %14 : vector<64xf32> to vector<64x1xf32>
    %cst_9 = arith.constant 3.200000e+01 : f32
    %16 = vector.broadcast %cst_9 : f32 to vector<64x1xf32>
    %17 = arith.divf %15, %16 : vector<64x1xf32>
    %18 = vector.broadcast %17 : vector<64x1xf32> to vector<64x32xf32>
    %19 = arith.subf %1, %18 : vector<64x32xf32>
    %20 = arith.mulf %19, %19 : vector<64x32xf32>
    %cst_10 = arith.constant dense<0.000000e+00> : vector<64xf32>
    %21 = vector.multi_reduction <add>, %20, %cst_10 [1] : vector<64x32xf32> to vector<64xf32>
    %22 = vector.shape_cast %21 : vector<64xf32> to vector<64x1xf32>
    %cst_11 = arith.constant 3.200000e+01 : f32
    %23 = vector.broadcast %cst_11 : f32 to vector<64x1xf32>
    %24 = arith.divf %22, %23 : vector<64x1xf32>
    %25 = vector.broadcast %17 : vector<64x1xf32> to vector<64x32xf32>
    %26 = arith.subf %1, %25 : vector<64x32xf32>
    %cst_12 = arith.constant 9.99999996E-13 : f32
    %27 = vector.broadcast %cst_12 : f32 to vector<64x1xf32>
    %28 = arith.addf %24, %27 : vector<64x1xf32>
    %29 = math.rsqrt %28 : vector<64x1xf32>
    %30 = vector.broadcast %29 : vector<64x1xf32> to vector<64x32xf32>
    %31 = arith.mulf %26, %30 : vector<64x32xf32>
    %32 = vector.broadcast %12 : vector<1x32xf32> to vector<64x32xf32>
    %33 = arith.mulf %31, %32 : vector<64x32xf32>
    %34 = vector.broadcast %13 : vector<1x32xf32> to vector<64x32xf32>
    %35 = arith.addf %33, %34 : vector<64x32xf32>
    %c0_13 = arith.constant 0 : index
    %c0_14 = arith.constant 0 : index
    %c0_15 = arith.constant 0 : index
    %36 = vector.load %arg7[%c0_13, %c0_14, %c0_15] : memref<2x6x32xf32, #tpu.memory_space<vmem>>, vector<1x6x32xf32>
    %37 = vector.shape_cast %36 : vector<1x6x32xf32> to vector<6x32xf32>
    %38 = arith.truncf %35 : vector<64x32xf32> to vector<64x32xbf16>
    %c0_16 = arith.constant 0 : index
    %c0_17 = arith.constant 0 : index
    %c0_18 = arith.constant 0 : index
    %39 = vector.load %arg4[%c0_16, %c0_17, %c0_18] : memref<2x32x96xbf16, #tpu.memory_space<vmem>>, vector<1x32x96xbf16>
    %40 = vector.shape_cast %39 : vector<1x32x96xbf16> to vector<32x96xbf16>
    %cst_19 = arith.constant dense<0.000000e+00> : vector<64x96xf32>
    %41 = tpu.matmul %38, %40, %cst_19 {dimension_numbers = #tpu.dot_dimension_numbers<[1], [0], [0], [1], [0, 0, 1, 1], [], []>} : vector<64x32xbf16>, vector<32x96xbf16>, vector<64x96xf32> -> vector<64x96xf32>
    %c0_20 = arith.constant 0 : index
    %c0_21 = arith.constant 0 : index
    %c0_22 = arith.constant 0 : index
    %42 = vector.load %arg5[%c0_20, %c0_21, %c0_22] : memref<2x1x96xf32, #tpu.memory_space<vmem>>, vector<1x1x96xf32>
    %43 = vector.shape_cast %42 : vector<1x1x96xf32> to vector<1x96xf32>
    %44 = vector.broadcast %43 : vector<1x96xf32> to vector<64x96xf32>
    %45 = arith.addf %41, %44 : vector<64x96xf32>
    %46 = vector.extract_strided_slice %45 {offsets = [0, 0], sizes = [64, 8], strides = [1, 1]} : vector<64x96xf32> to vector<64x8xf32>
    %47 = vector.shape_cast %46 : vector<64x8xf32> to vector<8x8x8xf32>
    %48 = vector.extract_strided_slice %45 {offsets = [0, 8], sizes = [64, 8], strides = [1, 1]} : vector<64x96xf32> to vector<64x8xf32>
    %49 = vector.shape_cast %48 : vector<64x8xf32> to vector<8x8x8xf32>
    %50 = vector.extract_strided_slice %45 {offsets = [0, 16], sizes = [64, 8], strides = [1, 1]} : vector<64x96xf32> to vector<64x8xf32>
    %51 = vector.shape_cast %50 : vector<64x8xf32> to vector<8x8x8xf32>
    %52 = vector.extract_strided_slice %45 {offsets = [0, 24], sizes = [64, 8], strides = [1, 1]} : vector<64x96xf32> to vector<64x8xf32>
    %53 = vector.shape_cast %52 : vector<64x8xf32> to vector<8x8x8xf32>
    %54 = tpu.concatenate %47, %49, %51, %53 in 0 : vector<8x8x8xf32>, vector<8x8x8xf32>, vector<8x8x8xf32>, vector<8x8x8xf32> -> vector<32x8x8xf32>
    %55 = arith.truncf %54 : vector<32x8x8xf32> to vector<32x8x8xbf16>
    %56 = vector.extract_strided_slice %45 {offsets = [0, 32], sizes = [64, 8], strides = [1, 1]} : vector<64x96xf32> to vector<64x8xf32>
    %57 = vector.shape_cast %56 : vector<64x8xf32> to vector<8x8x8xf32>
    %58 = vector.extract_strided_slice %45 {offsets = [0, 40], sizes = [64, 8], strides = [1, 1]} : vector<64x96xf32> to vector<64x8xf32>
    %59 = vector.shape_cast %58 : vector<64x8xf32> to vector<8x8x8xf32>
    %60 = vector.extract_strided_slice %45 {offsets = [0, 48], sizes = [64, 8], strides = [1, 1]} : vector<64x96xf32> to vector<64x8xf32>
    %61 = vector.shape_cast %60 : vector<64x8xf32> to vector<8x8x8xf32>
    %62 = vector.extract_strided_slice %45 {offsets = [0, 56], sizes = [64, 8], strides = [1, 1]} : vector<64x96xf32> to vector<64x8xf32>
    %63 = vector.shape_cast %62 : vector<64x8xf32> to vector<8x8x8xf32>
    %64 = tpu.concatenate %57, %59, %61, %63 in 0 : vector<8x8x8xf32>, vector<8x8x8xf32>, vector<8x8x8xf32>, vector<8x8x8xf32> -> vector<32x8x8xf32>
    %65 = arith.truncf %64 : vector<32x8x8xf32> to vector<32x8x8xbf16>
    %66 = vector.extract_strided_slice %45 {offsets = [0, 64], sizes = [64, 8], strides = [1, 1]} : vector<64x96xf32> to vector<64x8xf32>
    %67 = vector.shape_cast %66 : vector<64x8xf32> to vector<8x8x8xf32>
    %68 = vector.extract_strided_slice %45 {offsets = [0, 72], sizes = [64, 8], strides = [1, 1]} : vector<64x96xf32> to vector<64x8xf32>
    %69 = vector.shape_cast %68 : vector<64x8xf32> to vector<8x8x8xf32>
    %70 = vector.extract_strided_slice %45 {offsets = [0, 80], sizes = [64, 8], strides = [1, 1]} : vector<64x96xf32> to vector<64x8xf32>
    %71 = vector.shape_cast %70 : vector<64x8xf32> to vector<8x8x8xf32>
    %72 = vector.extract_strided_slice %45 {offsets = [0, 88], sizes = [64, 8], strides = [1, 1]} : vector<64x96xf32> to vector<64x8xf32>
    %73 = vector.shape_cast %72 : vector<64x8xf32> to vector<8x8x8xf32>
    %74 = tpu.concatenate %67, %69, %71, %73 in 0 : vector<8x8x8xf32>, vector<8x8x8xf32>, vector<8x8x8xf32>, vector<8x8x8xf32> -> vector<32x8x8xf32>
    %75 = arith.truncf %74 : vector<32x8x8xf32> to vector<32x8x8xbf16>
    "tpu.trace_start"() <{level = 10 : i32, message = "nqd,nkd->nqk"}> : () -> ()
    %cst_23 = arith.constant dense<0.000000e+00> : vector<32x8x8xf32>
    %76 = tpu.matmul %55, %65, %cst_23 {dimension_numbers = #tpu.dot_dimension_numbers<[2], [2], [1], [1], [0, 0, 0, 1, 1, 1], [0], [0]>} : vector<32x8x8xbf16>, vector<32x8x8xbf16>, vector<32x8x8xf32> -> vector<32x8x8xf32>
    "tpu.trace_stop"() : () -> ()
    %77 = arith.addf %76, %10 : vector<32x8x8xf32>
    %cst_24 = arith.constant dense<0xFF800000> : vector<32x8xf32>
    %78 = vector.multi_reduction <maximumf>, %77, %cst_24 [2] : vector<32x8x8xf32> to vector<32x8xf32>
    %79 = vector.shape_cast %78 : vector<32x8xf32> to vector<32x8x1xf32>
    %80 = vector.broadcast %79 : vector<32x8x1xf32> to vector<32x8x8xf32>
    %81 = arith.subf %77, %80 : vector<32x8x8xf32>
    %82 = math.exp %81 : vector<32x8x8xf32>
    %cst_25 = arith.constant dense<0.000000e+00> : vector<32x8xf32>
    %83 = vector.multi_reduction <add>, %82, %cst_25 [2] : vector<32x8x8xf32> to vector<32x8xf32>
    %84 = vector.shape_cast %83 : vector<32x8xf32> to vector<32x8x1xf32>
    %85 = tpu.reciprocal %84 {approx = true} : vector<32x8x1xf32> -> vector<32x8x1xf32>
    %86 = vector.broadcast %85 : vector<32x8x1xf32> to vector<32x8x8xf32>
    %87 = arith.mulf %82, %86 : vector<32x8x8xf32>
    %88 = arith.truncf %87 : vector<32x8x8xf32> to vector<32x8x8xbf16>
    "tpu.trace_start"() <{level = 10 : i32, message = "nqk,nkd->nqd"}> : () -> ()
    %cst_26 = arith.constant dense<0.000000e+00> : vector<32x8x8xf32>
    %89 = tpu.matmul %88, %75, %cst_26 {dimension_numbers = #tpu.dot_dimension_numbers<[2], [1], [1], [2], [0, 0, 0, 1, 1, 2], [0], [0]>} : vector<32x8x8xbf16>, vector<32x8x8xbf16>, vector<32x8x8xf32> -> vector<32x8x8xf32>
    "tpu.trace_stop"() : () -> ()
    %90 = vector.shape_cast %89 : vector<32x8x8xf32> to vector<4x64x8xf32>
    %91 = vector.extract_strided_slice %90 {offsets = [0, 0, 0], sizes = [1, 64, 8], strides = [1, 1, 1]} : vector<4x64x8xf32> to vector<1x64x8xf32>
    %92 = vector.shape_cast %91 : vector<1x64x8xf32> to vector<64x8xf32>
    %93 = vector.extract_strided_slice %90 {offsets = [1, 0, 0], sizes = [1, 64, 8], strides = [1, 1, 1]} : vector<4x64x8xf32> to vector<1x64x8xf32>
    %94 = vector.shape_cast %93 : vector<1x64x8xf32> to vector<64x8xf32>
    %95 = vector.extract_strided_slice %90 {offsets = [2, 0, 0], sizes = [1, 64, 8], strides = [1, 1, 1]} : vector<4x64x8xf32> to vector<1x64x8xf32>
    %96 = vector.shape_cast %95 : vector<1x64x8xf32> to vector<64x8xf32>
    %97 = vector.extract_strided_slice %90 {offsets = [3, 0, 0], sizes = [1, 64, 8], strides = [1, 1, 1]} : vector<4x64x8xf32> to vector<1x64x8xf32>
    %98 = vector.shape_cast %97 : vector<1x64x8xf32> to vector<64x8xf32>
    %99 = tpu.concatenate %92, %94, %96, %98 in 1 : vector<64x8xf32>, vector<64x8xf32>, vector<64x8xf32>, vector<64x8xf32> -> vector<64x32xf32>
    %100 = arith.truncf %99 : vector<64x32xf32> to vector<64x32xbf16>
    %c0_27 = arith.constant 0 : index
    %c0_28 = arith.constant 0 : index
    %c0_29 = arith.constant 0 : index
    %101 = vector.load %arg6[%c0_27, %c0_28, %c0_29] : memref<2x32x32xbf16, #tpu.memory_space<vmem>>, vector<1x32x32xbf16>
    %102 = vector.shape_cast %101 : vector<1x32x32xbf16> to vector<32x32xbf16>
    %cst_30 = arith.constant dense<0.000000e+00> : vector<64x32xf32>
    %103 = tpu.matmul %100, %102, %cst_30 {dimension_numbers = #tpu.dot_dimension_numbers<[1], [0], [0], [1], [0, 0, 1, 1], [], []>} : vector<64x32xbf16>, vector<32x32xbf16>, vector<64x32xf32> -> vector<64x32xf32>
    %104 = vector.extract_strided_slice %37 {offsets = [0, 0], sizes = [1, 32], strides = [1, 1]} : vector<6x32xf32> to vector<1x32xf32>
    %105 = vector.broadcast %104 : vector<1x32xf32> to vector<64x32xf32>
    %106 = arith.addf %103, %105 : vector<64x32xf32>
    %107 = arith.addf %35, %106 : vector<64x32xf32>
    %108 = vector.extract_strided_slice %37 {offsets = [1, 0], sizes = [1, 32], strides = [1, 1]} : vector<6x32xf32> to vector<1x32xf32>
    %109 = vector.extract_strided_slice %37 {offsets = [2, 0], sizes = [1, 32], strides = [1, 1]} : vector<6x32xf32> to vector<1x32xf32>
    %cst_31 = arith.constant dense<0.000000e+00> : vector<64xf32>
    %110 = vector.multi_reduction <add>, %107, %cst_31 [1] : vector<64x32xf32> to vector<64xf32>
    %111 = vector.shape_cast %110 : vector<64xf32> to vector<64x1xf32>
    %cst_32 = arith.constant 3.200000e+01 : f32
    %112 = vector.broadcast %cst_32 : f32 to vector<64x1xf32>
    %113 = arith.divf %111, %112 : vector<64x1xf32>
    %114 = vector.broadcast %113 : vector<64x1xf32> to vector<64x32xf32>
    %115 = arith.subf %107, %114 : vector<64x32xf32>
    %116 = arith.mulf %115, %115 : vector<64x32xf32>
    %cst_33 = arith.constant dense<0.000000e+00> : vector<64xf32>
    %117 = vector.multi_reduction <add>, %116, %cst_33 [1] : vector<64x32xf32> to vector<64xf32>
    %118 = vector.shape_cast %117 : vector<64xf32> to vector<64x1xf32>
    %cst_34 = arith.constant 3.200000e+01 : f32
    %119 = vector.broadcast %cst_34 : f32 to vector<64x1xf32>
    %120 = arith.divf %118, %119 : vector<64x1xf32>
    %121 = vector.broadcast %113 : vector<64x1xf32> to vector<64x32xf32>
    %122 = arith.subf %107, %121 : vector<64x32xf32>
    %cst_35 = arith.constant 9.99999996E-13 : f32
    %123 = vector.broadcast %cst_35 : f32 to vector<64x1xf32>
    %124 = arith.addf %120, %123 : vector<64x1xf32>
    %125 = math.rsqrt %124 : vector<64x1xf32>
    %126 = vector.broadcast %125 : vector<64x1xf32> to vector<64x32xf32>
    %127 = arith.mulf %122, %126 : vector<64x32xf32>
    %128 = vector.broadcast %108 : vector<1x32xf32> to vector<64x32xf32>
    %129 = arith.mulf %127, %128 : vector<64x32xf32>
    %130 = vector.broadcast %109 : vector<1x32xf32> to vector<64x32xf32>
    %131 = arith.addf %129, %130 : vector<64x32xf32>
    %132 = arith.truncf %131 : vector<64x32xf32> to vector<64x32xbf16>
    %c0_36 = arith.constant 0 : index
    %c0_37 = arith.constant 0 : index
    %c0_38 = arith.constant 0 : index
    %133 = vector.load %arg8[%c0_36, %c0_37, %c0_38] : memref<2x32x64xbf16, #tpu.memory_space<vmem>>, vector<1x32x64xbf16>
    %134 = vector.shape_cast %133 : vector<1x32x64xbf16> to vector<32x64xbf16>
    %cst_39 = arith.constant dense<0.000000e+00> : vector<64x64xf32>
    %135 = tpu.matmul %132, %134, %cst_39 {dimension_numbers = #tpu.dot_dimension_numbers<[1], [0], [0], [1], [0, 0, 1, 1], [], []>} : vector<64x32xbf16>, vector<32x64xbf16>, vector<64x64xf32> -> vector<64x64xf32>
    %c0_40 = arith.constant 0 : index
    %c0_41 = arith.constant 0 : index
    %c0_42 = arith.constant 0 : index
    %136 = vector.load %arg9[%c0_40, %c0_41, %c0_42] : memref<2x1x64xf32, #tpu.memory_space<vmem>>, vector<1x1x64xf32>
    %137 = vector.shape_cast %136 : vector<1x1x64xf32> to vector<1x64xf32>
    %138 = vector.broadcast %137 : vector<1x64xf32> to vector<64x64xf32>
    %139 = arith.addf %135, %138 : vector<64x64xf32>
    %cst_43 = arith.constant 5.000000e-01 : f32
    %140 = vector.broadcast %cst_43 : f32 to vector<64x64xf32>
    %141 = arith.mulf %140, %139 : vector<64x64xf32>
    %cst_44 = arith.constant 4.471500e-02 : f32
    %142 = vector.broadcast %cst_44 : f32 to vector<64x64xf32>
    %143 = arith.mulf %142, %139 : vector<64x64xf32>
    %144 = arith.mulf %143, %139 : vector<64x64xf32>
    %145 = arith.mulf %144, %139 : vector<64x64xf32>
    %146 = arith.addf %139, %145 : vector<64x64xf32>
    %cst_45 = arith.constant 0.797884583 : f32
    %147 = vector.broadcast %cst_45 : f32 to vector<64x64xf32>
    %148 = arith.mulf %147, %146 : vector<64x64xf32>
    %149 = math.tanh %148 : vector<64x64xf32>
    %cst_46 = arith.constant 1.000000e+00 : f32
    %150 = vector.broadcast %cst_46 : f32 to vector<64x64xf32>
    %151 = arith.addf %150, %149 : vector<64x64xf32>
    %152 = arith.mulf %141, %151 : vector<64x64xf32>
    %153 = arith.truncf %152 : vector<64x64xf32> to vector<64x64xbf16>
    %c0_47 = arith.constant 0 : index
    %c0_48 = arith.constant 0 : index
    %c0_49 = arith.constant 0 : index
    %154 = vector.load %arg10[%c0_47, %c0_48, %c0_49] : memref<2x64x32xbf16, #tpu.memory_space<vmem>>, vector<1x64x32xbf16>
    %155 = vector.shape_cast %154 : vector<1x64x32xbf16> to vector<64x32xbf16>
    %cst_50 = arith.constant dense<0.000000e+00> : vector<64x32xf32>
    %156 = tpu.matmul %153, %155, %cst_50 {dimension_numbers = #tpu.dot_dimension_numbers<[1], [0], [0], [1], [0, 0, 1, 1], [], []>} : vector<64x64xbf16>, vector<64x32xbf16>, vector<64x32xf32> -> vector<64x32xf32>
    %157 = vector.extract_strided_slice %37 {offsets = [3, 0], sizes = [1, 32], strides = [1, 1]} : vector<6x32xf32> to vector<1x32xf32>
    %158 = vector.broadcast %157 : vector<1x32xf32> to vector<64x32xf32>
    %159 = arith.addf %156, %158 : vector<64x32xf32>
    %160 = arith.addf %131, %159 : vector<64x32xf32>
    %161 = vector.extract_strided_slice %37 {offsets = [4, 0], sizes = [1, 32], strides = [1, 1]} : vector<6x32xf32> to vector<1x32xf32>
    %162 = vector.extract_strided_slice %37 {offsets = [5, 0], sizes = [1, 32], strides = [1, 1]} : vector<6x32xf32> to vector<1x32xf32>
    %cst_51 = arith.constant dense<0.000000e+00> : vector<64xf32>
    %163 = vector.multi_reduction <add>, %160, %cst_51 [1] : vector<64x32xf32> to vector<64xf32>
    %164 = vector.shape_cast %163 : vector<64xf32> to vector<64x1xf32>
    %cst_52 = arith.constant 3.200000e+01 : f32
    %165 = vector.broadcast %cst_52 : f32 to vector<64x1xf32>
    %166 = arith.divf %164, %165 : vector<64x1xf32>
    %167 = vector.broadcast %166 : vector<64x1xf32> to vector<64x32xf32>
    %168 = arith.subf %160, %167 : vector<64x32xf32>
    %169 = arith.mulf %168, %168 : vector<64x32xf32>
    %cst_53 = arith.constant dense<0.000000e+00> : vector<64xf32>
    %170 = vector.multi_reduction <add>, %169, %cst_53 [1] : vector<64x32xf32> to vector<64xf32>
    %171 = vector.shape_cast %170 : vector<64xf32> to vector<64x1xf32>
    %cst_54 = arith.constant 3.200000e+01 : f32
    %172 = vector.broadcast %cst_54 : f32 to vector<64x1xf32>
    %173 = arith.divf %171, %172 : vector<64x1xf32>
    %174 = vector.broadcast %166 : vector<64x1xf32> to vector<64x32xf32>
    %175 = arith.subf %160, %174 : vector<64x32xf32>
    %cst_55 = arith.constant 9.99999996E-13 : f32
    %176 = vector.broadcast %cst_55 : f32 to vector<64x1xf32>
    %177 = arith.addf %173, %176 : vector<64x1xf32>
    %178 = math.rsqrt %177 : vector<64x1xf32>
    %179 = vector.broadcast %178 : vector<64x1xf32> to vector<64x32xf32>
    %180 = arith.mulf %175, %179 : vector<64x32xf32>
    %181 = vector.broadcast %161 : vector<1x32xf32> to vector<64x32xf32>
    %182 = arith.mulf %180, %181 : vector<64x32xf32>
    %183 = vector.broadcast %162 : vector<1x32xf32> to vector<64x32xf32>
    %184 = arith.addf %182, %183 : vector<64x32xf32>
    %c1 = arith.constant 1 : index
    %c0_56 = arith.constant 0 : index
    %c0_57 = arith.constant 0 : index
    %185 = vector.load %arg7[%c1, %c0_56, %c0_57] : memref<2x6x32xf32, #tpu.memory_space<vmem>>, vector<1x6x32xf32>
    %186 = vector.shape_cast %185 : vector<1x6x32xf32> to vector<6x32xf32>
    %187 = arith.truncf %184 : vector<64x32xf32> to vector<64x32xbf16>
    %c1_58 = arith.constant 1 : index
    %c0_59 = arith.constant 0 : index
    %c0_60 = arith.constant 0 : index
    %188 = vector.load %arg4[%c1_58, %c0_59, %c0_60] : memref<2x32x96xbf16, #tpu.memory_space<vmem>>, vector<1x32x96xbf16>
    %189 = vector.shape_cast %188 : vector<1x32x96xbf16> to vector<32x96xbf16>
    %cst_61 = arith.constant dense<0.000000e+00> : vector<64x96xf32>
    %190 = tpu.matmul %187, %189, %cst_61 {dimension_numbers = #tpu.dot_dimension_numbers<[1], [0], [0], [1], [0, 0, 1, 1], [], []>} : vector<64x32xbf16>, vector<32x96xbf16>, vector<64x96xf32> -> vector<64x96xf32>
    %c1_62 = arith.constant 1 : index
    %c0_63 = arith.constant 0 : index
    %c0_64 = arith.constant 0 : index
    %191 = vector.load %arg5[%c1_62, %c0_63, %c0_64] : memref<2x1x96xf32, #tpu.memory_space<vmem>>, vector<1x1x96xf32>
    %192 = vector.shape_cast %191 : vector<1x1x96xf32> to vector<1x96xf32>
    %193 = vector.broadcast %192 : vector<1x96xf32> to vector<64x96xf32>
    %194 = arith.addf %190, %193 : vector<64x96xf32>
    %195 = vector.extract_strided_slice %194 {offsets = [0, 0], sizes = [64, 8], strides = [1, 1]} : vector<64x96xf32> to vector<64x8xf32>
    %196 = vector.shape_cast %195 : vector<64x8xf32> to vector<8x8x8xf32>
    %197 = vector.extract_strided_slice %194 {offsets = [0, 8], sizes = [64, 8], strides = [1, 1]} : vector<64x96xf32> to vector<64x8xf32>
    %198 = vector.shape_cast %197 : vector<64x8xf32> to vector<8x8x8xf32>
    %199 = vector.extract_strided_slice %194 {offsets = [0, 16], sizes = [64, 8], strides = [1, 1]} : vector<64x96xf32> to vector<64x8xf32>
    %200 = vector.shape_cast %199 : vector<64x8xf32> to vector<8x8x8xf32>
    %201 = vector.extract_strided_slice %194 {offsets = [0, 24], sizes = [64, 8], strides = [1, 1]} : vector<64x96xf32> to vector<64x8xf32>
    %202 = vector.shape_cast %201 : vector<64x8xf32> to vector<8x8x8xf32>
    %203 = tpu.concatenate %196, %198, %200, %202 in 0 : vector<8x8x8xf32>, vector<8x8x8xf32>, vector<8x8x8xf32>, vector<8x8x8xf32> -> vector<32x8x8xf32>
    %204 = arith.truncf %203 : vector<32x8x8xf32> to vector<32x8x8xbf16>
    %205 = vector.extract_strided_slice %194 {offsets = [0, 32], sizes = [64, 8], strides = [1, 1]} : vector<64x96xf32> to vector<64x8xf32>
    %206 = vector.shape_cast %205 : vector<64x8xf32> to vector<8x8x8xf32>
    %207 = vector.extract_strided_slice %194 {offsets = [0, 40], sizes = [64, 8], strides = [1, 1]} : vector<64x96xf32> to vector<64x8xf32>
    %208 = vector.shape_cast %207 : vector<64x8xf32> to vector<8x8x8xf32>
    %209 = vector.extract_strided_slice %194 {offsets = [0, 48], sizes = [64, 8], strides = [1, 1]} : vector<64x96xf32> to vector<64x8xf32>
    %210 = vector.shape_cast %209 : vector<64x8xf32> to vector<8x8x8xf32>
    %211 = vector.extract_strided_slice %194 {offsets = [0, 56], sizes = [64, 8], strides = [1, 1]} : vector<64x96xf32> to vector<64x8xf32>
    %212 = vector.shape_cast %211 : vector<64x8xf32> to vector<8x8x8xf32>
    %213 = tpu.concatenate %206, %208, %210, %212 in 0 : vector<8x8x8xf32>, vector<8x8x8xf32>, vector<8x8x8xf32>, vector<8x8x8xf32> -> vector<32x8x8xf32>
    %214 = arith.truncf %213 : vector<32x8x8xf32> to vector<32x8x8xbf16>
    %215 = vector.extract_strided_slice %194 {offsets = [0, 64], sizes = [64, 8], strides = [1, 1]} : vector<64x96xf32> to vector<64x8xf32>
    %216 = vector.shape_cast %215 : vector<64x8xf32> to vector<8x8x8xf32>
    %217 = vector.extract_strided_slice %194 {offsets = [0, 72], sizes = [64, 8], strides = [1, 1]} : vector<64x96xf32> to vector<64x8xf32>
    %218 = vector.shape_cast %217 : vector<64x8xf32> to vector<8x8x8xf32>
    %219 = vector.extract_strided_slice %194 {offsets = [0, 80], sizes = [64, 8], strides = [1, 1]} : vector<64x96xf32> to vector<64x8xf32>
    %220 = vector.shape_cast %219 : vector<64x8xf32> to vector<8x8x8xf32>
    %221 = vector.extract_strided_slice %194 {offsets = [0, 88], sizes = [64, 8], strides = [1, 1]} : vector<64x96xf32> to vector<64x8xf32>
    %222 = vector.shape_cast %221 : vector<64x8xf32> to vector<8x8x8xf32>
    %223 = tpu.concatenate %216, %218, %220, %222 in 0 : vector<8x8x8xf32>, vector<8x8x8xf32>, vector<8x8x8xf32>, vector<8x8x8xf32> -> vector<32x8x8xf32>
    %224 = arith.truncf %223 : vector<32x8x8xf32> to vector<32x8x8xbf16>
    "tpu.trace_start"() <{level = 10 : i32, message = "nqd,nkd->nqk"}> : () -> ()
    %cst_65 = arith.constant dense<0.000000e+00> : vector<32x8x8xf32>
    %225 = tpu.matmul %204, %214, %cst_65 {dimension_numbers = #tpu.dot_dimension_numbers<[2], [2], [1], [1], [0, 0, 0, 1, 1, 1], [0], [0]>} : vector<32x8x8xbf16>, vector<32x8x8xbf16>, vector<32x8x8xf32> -> vector<32x8x8xf32>
    "tpu.trace_stop"() : () -> ()
    %226 = arith.addf %225, %10 : vector<32x8x8xf32>
    %cst_66 = arith.constant dense<0xFF800000> : vector<32x8xf32>
    %227 = vector.multi_reduction <maximumf>, %226, %cst_66 [2] : vector<32x8x8xf32> to vector<32x8xf32>
    %228 = vector.shape_cast %227 : vector<32x8xf32> to vector<32x8x1xf32>
    %229 = vector.broadcast %228 : vector<32x8x1xf32> to vector<32x8x8xf32>
    %230 = arith.subf %226, %229 : vector<32x8x8xf32>
    %231 = math.exp %230 : vector<32x8x8xf32>
    %cst_67 = arith.constant dense<0.000000e+00> : vector<32x8xf32>
    %232 = vector.multi_reduction <add>, %231, %cst_67 [2] : vector<32x8x8xf32> to vector<32x8xf32>
    %233 = vector.shape_cast %232 : vector<32x8xf32> to vector<32x8x1xf32>
    %234 = tpu.reciprocal %233 {approx = true} : vector<32x8x1xf32> -> vector<32x8x1xf32>
    %235 = vector.broadcast %234 : vector<32x8x1xf32> to vector<32x8x8xf32>
    %236 = arith.mulf %231, %235 : vector<32x8x8xf32>
    %237 = arith.truncf %236 : vector<32x8x8xf32> to vector<32x8x8xbf16>
    "tpu.trace_start"() <{level = 10 : i32, message = "nqk,nkd->nqd"}> : () -> ()
    %cst_68 = arith.constant dense<0.000000e+00> : vector<32x8x8xf32>
    %238 = tpu.matmul %237, %224, %cst_68 {dimension_numbers = #tpu.dot_dimension_numbers<[2], [1], [1], [2], [0, 0, 0, 1, 1, 2], [0], [0]>} : vector<32x8x8xbf16>, vector<32x8x8xbf16>, vector<32x8x8xf32> -> vector<32x8x8xf32>
    "tpu.trace_stop"() : () -> ()
    %239 = vector.shape_cast %238 : vector<32x8x8xf32> to vector<4x64x8xf32>
    %240 = vector.extract_strided_slice %239 {offsets = [0, 0, 0], sizes = [1, 64, 8], strides = [1, 1, 1]} : vector<4x64x8xf32> to vector<1x64x8xf32>
    %241 = vector.shape_cast %240 : vector<1x64x8xf32> to vector<64x8xf32>
    %242 = vector.extract_strided_slice %239 {offsets = [1, 0, 0], sizes = [1, 64, 8], strides = [1, 1, 1]} : vector<4x64x8xf32> to vector<1x64x8xf32>
    %243 = vector.shape_cast %242 : vector<1x64x8xf32> to vector<64x8xf32>
    %244 = vector.extract_strided_slice %239 {offsets = [2, 0, 0], sizes = [1, 64, 8], strides = [1, 1, 1]} : vector<4x64x8xf32> to vector<1x64x8xf32>
    %245 = vector.shape_cast %244 : vector<1x64x8xf32> to vector<64x8xf32>
    %246 = vector.extract_strided_slice %239 {offsets = [3, 0, 0], sizes = [1, 64, 8], strides = [1, 1, 1]} : vector<4x64x8xf32> to vector<1x64x8xf32>
    %247 = vector.shape_cast %246 : vector<1x64x8xf32> to vector<64x8xf32>
    %248 = tpu.concatenate %241, %243, %245, %247 in 1 : vector<64x8xf32>, vector<64x8xf32>, vector<64x8xf32>, vector<64x8xf32> -> vector<64x32xf32>
    %249 = arith.truncf %248 : vector<64x32xf32> to vector<64x32xbf16>
    %c1_69 = arith.constant 1 : index
    %c0_70 = arith.constant 0 : index
    %c0_71 = arith.constant 0 : index
    %250 = vector.load %arg6[%c1_69, %c0_70, %c0_71] : memref<2x32x32xbf16, #tpu.memory_space<vmem>>, vector<1x32x32xbf16>
    %251 = vector.shape_cast %250 : vector<1x32x32xbf16> to vector<32x32xbf16>
    %cst_72 = arith.constant dense<0.000000e+00> : vector<64x32xf32>
    %252 = tpu.matmul %249, %251, %cst_72 {dimension_numbers = #tpu.dot_dimension_numbers<[1], [0], [0], [1], [0, 0, 1, 1], [], []>} : vector<64x32xbf16>, vector<32x32xbf16>, vector<64x32xf32> -> vector<64x32xf32>
    %253 = vector.extract_strided_slice %186 {offsets = [0, 0], sizes = [1, 32], strides = [1, 1]} : vector<6x32xf32> to vector<1x32xf32>
    %254 = vector.broadcast %253 : vector<1x32xf32> to vector<64x32xf32>
    %255 = arith.addf %252, %254 : vector<64x32xf32>
    %256 = arith.addf %184, %255 : vector<64x32xf32>
    %257 = vector.extract_strided_slice %186 {offsets = [1, 0], sizes = [1, 32], strides = [1, 1]} : vector<6x32xf32> to vector<1x32xf32>
    %258 = vector.extract_strided_slice %186 {offsets = [2, 0], sizes = [1, 32], strides = [1, 1]} : vector<6x32xf32> to vector<1x32xf32>
    %cst_73 = arith.constant dense<0.000000e+00> : vector<64xf32>
    %259 = vector.multi_reduction <add>, %256, %cst_73 [1] : vector<64x32xf32> to vector<64xf32>
    %260 = vector.shape_cast %259 : vector<64xf32> to vector<64x1xf32>
    %cst_74 = arith.constant 3.200000e+01 : f32
    %261 = vector.broadcast %cst_74 : f32 to vector<64x1xf32>
    %262 = arith.divf %260, %261 : vector<64x1xf32>
    %263 = vector.broadcast %262 : vector<64x1xf32> to vector<64x32xf32>
    %264 = arith.subf %256, %263 : vector<64x32xf32>
    %265 = arith.mulf %264, %264 : vector<64x32xf32>
    %cst_75 = arith.constant dense<0.000000e+00> : vector<64xf32>
    %266 = vector.multi_reduction <add>, %265, %cst_75 [1] : vector<64x32xf32> to vector<64xf32>
    %267 = vector.shape_cast %266 : vector<64xf32> to vector<64x1xf32>
    %cst_76 = arith.constant 3.200000e+01 : f32
    %268 = vector.broadcast %cst_76 : f32 to vector<64x1xf32>
    %269 = arith.divf %267, %268 : vector<64x1xf32>
    %270 = vector.broadcast %262 : vector<64x1xf32> to vector<64x32xf32>
    %271 = arith.subf %256, %270 : vector<64x32xf32>
    %cst_77 = arith.constant 9.99999996E-13 : f32
    %272 = vector.broadcast %cst_77 : f32 to vector<64x1xf32>
    %273 = arith.addf %269, %272 : vector<64x1xf32>
    %274 = math.rsqrt %273 : vector<64x1xf32>
    %275 = vector.broadcast %274 : vector<64x1xf32> to vector<64x32xf32>
    %276 = arith.mulf %271, %275 : vector<64x32xf32>
    %277 = vector.broadcast %257 : vector<1x32xf32> to vector<64x32xf32>
    %278 = arith.mulf %276, %277 : vector<64x32xf32>
    %279 = vector.broadcast %258 : vector<1x32xf32> to vector<64x32xf32>
    %280 = arith.addf %278, %279 : vector<64x32xf32>
    %281 = arith.truncf %280 : vector<64x32xf32> to vector<64x32xbf16>
    %c1_78 = arith.constant 1 : index
    %c0_79 = arith.constant 0 : index
    %c0_80 = arith.constant 0 : index
    %282 = vector.load %arg8[%c1_78, %c0_79, %c0_80] : memref<2x32x64xbf16, #tpu.memory_space<vmem>>, vector<1x32x64xbf16>
    %283 = vector.shape_cast %282 : vector<1x32x64xbf16> to vector<32x64xbf16>
    %cst_81 = arith.constant dense<0.000000e+00> : vector<64x64xf32>
    %284 = tpu.matmul %281, %283, %cst_81 {dimension_numbers = #tpu.dot_dimension_numbers<[1], [0], [0], [1], [0, 0, 1, 1], [], []>} : vector<64x32xbf16>, vector<32x64xbf16>, vector<64x64xf32> -> vector<64x64xf32>
    %c1_82 = arith.constant 1 : index
    %c0_83 = arith.constant 0 : index
    %c0_84 = arith.constant 0 : index
    %285 = vector.load %arg9[%c1_82, %c0_83, %c0_84] : memref<2x1x64xf32, #tpu.memory_space<vmem>>, vector<1x1x64xf32>
    %286 = vector.shape_cast %285 : vector<1x1x64xf32> to vector<1x64xf32>
    %287 = vector.broadcast %286 : vector<1x64xf32> to vector<64x64xf32>
    %288 = arith.addf %284, %287 : vector<64x64xf32>
    %cst_85 = arith.constant 5.000000e-01 : f32
    %289 = vector.broadcast %cst_85 : f32 to vector<64x64xf32>
    %290 = arith.mulf %289, %288 : vector<64x64xf32>
    %cst_86 = arith.constant 4.471500e-02 : f32
    %291 = vector.broadcast %cst_86 : f32 to vector<64x64xf32>
    %292 = arith.mulf %291, %288 : vector<64x64xf32>
    %293 = arith.mulf %292, %288 : vector<64x64xf32>
    %294 = arith.mulf %293, %288 : vector<64x64xf32>
    %295 = arith.addf %288, %294 : vector<64x64xf32>
    %cst_87 = arith.constant 0.797884583 : f32
    %296 = vector.broadcast %cst_87 : f32 to vector<64x64xf32>
    %297 = arith.mulf %296, %295 : vector<64x64xf32>
    %298 = math.tanh %297 : vector<64x64xf32>
    %cst_88 = arith.constant 1.000000e+00 : f32
    %299 = vector.broadcast %cst_88 : f32 to vector<64x64xf32>
    %300 = arith.addf %299, %298 : vector<64x64xf32>
    %301 = arith.mulf %290, %300 : vector<64x64xf32>
    %302 = arith.truncf %301 : vector<64x64xf32> to vector<64x64xbf16>
    %c1_89 = arith.constant 1 : index
    %c0_90 = arith.constant 0 : index
    %c0_91 = arith.constant 0 : index
    %303 = vector.load %arg10[%c1_89, %c0_90, %c0_91] : memref<2x64x32xbf16, #tpu.memory_space<vmem>>, vector<1x64x32xbf16>
    %304 = vector.shape_cast %303 : vector<1x64x32xbf16> to vector<64x32xbf16>
    %cst_92 = arith.constant dense<0.000000e+00> : vector<64x32xf32>
    %305 = tpu.matmul %302, %304, %cst_92 {dimension_numbers = #tpu.dot_dimension_numbers<[1], [0], [0], [1], [0, 0, 1, 1], [], []>} : vector<64x64xbf16>, vector<64x32xbf16>, vector<64x32xf32> -> vector<64x32xf32>
    %306 = vector.extract_strided_slice %186 {offsets = [3, 0], sizes = [1, 32], strides = [1, 1]} : vector<6x32xf32> to vector<1x32xf32>
    %307 = vector.broadcast %306 : vector<1x32xf32> to vector<64x32xf32>
    %308 = arith.addf %305, %307 : vector<64x32xf32>
    %309 = arith.addf %280, %308 : vector<64x32xf32>
    %310 = vector.extract_strided_slice %186 {offsets = [4, 0], sizes = [1, 32], strides = [1, 1]} : vector<6x32xf32> to vector<1x32xf32>
    %311 = vector.extract_strided_slice %186 {offsets = [5, 0], sizes = [1, 32], strides = [1, 1]} : vector<6x32xf32> to vector<1x32xf32>
    %cst_93 = arith.constant dense<0.000000e+00> : vector<64xf32>
    %312 = vector.multi_reduction <add>, %309, %cst_93 [1] : vector<64x32xf32> to vector<64xf32>
    %313 = vector.shape_cast %312 : vector<64xf32> to vector<64x1xf32>
    %cst_94 = arith.constant 3.200000e+01 : f32
    %314 = vector.broadcast %cst_94 : f32 to vector<64x1xf32>
    %315 = arith.divf %313, %314 : vector<64x1xf32>
    %316 = vector.broadcast %315 : vector<64x1xf32> to vector<64x32xf32>
    %317 = arith.subf %309, %316 : vector<64x32xf32>
    %318 = arith.mulf %317, %317 : vector<64x32xf32>
    %cst_95 = arith.constant dense<0.000000e+00> : vector<64xf32>
    %319 = vector.multi_reduction <add>, %318, %cst_95 [1] : vector<64x32xf32> to vector<64xf32>
    %320 = vector.shape_cast %319 : vector<64xf32> to vector<64x1xf32>
    %cst_96 = arith.constant 3.200000e+01 : f32
    %321 = vector.broadcast %cst_96 : f32 to vector<64x1xf32>
    %322 = arith.divf %320, %321 : vector<64x1xf32>
    %323 = vector.broadcast %315 : vector<64x1xf32> to vector<64x32xf32>
    %324 = arith.subf %309, %323 : vector<64x32xf32>
    %cst_97 = arith.constant 9.99999996E-13 : f32
    %325 = vector.broadcast %cst_97 : f32 to vector<64x1xf32>
    %326 = arith.addf %322, %325 : vector<64x1xf32>
    %327 = math.rsqrt %326 : vector<64x1xf32>
    %328 = vector.broadcast %327 : vector<64x1xf32> to vector<64x32xf32>
    %329 = arith.mulf %324, %328 : vector<64x32xf32>
    %330 = vector.broadcast %310 : vector<1x32xf32> to vector<64x32xf32>
    %331 = arith.mulf %329, %330 : vector<64x32xf32>
    %332 = vector.broadcast %311 : vector<1x32xf32> to vector<64x32xf32>
    %333 = arith.addf %331, %332 : vector<64x32xf32>
    %334 = vector.shape_cast %333 : vector<64x32xf32> to vector<8x8x32xf32>
    %335 = vector.extract_strided_slice %334 {offsets = [0, 0, 0], sizes = [8, 1, 32], strides = [1, 1, 1]} : vector<8x8x32xf32> to vector<8x1x32xf32>
    %336 = vector.shape_cast %335 : vector<8x1x32xf32> to vector<8x32xf32>
    %337 = arith.truncf %336 : vector<8x32xf32> to vector<8x32xbf16>
    %c0_98 = arith.constant 0 : index
    %c0_99 = arith.constant 0 : index
    %338 = vector.load %arg11[%c0_98, %c0_99] : memref<32x128xbf16, #tpu.memory_space<vmem>>, vector<32x128xbf16>
    %cst_100 = arith.constant dense<0.000000e+00> : vector<8x128xf32>
    %339 = tpu.matmul %337, %338, %cst_100 {dimension_numbers = #tpu.dot_dimension_numbers<[1], [0], [0], [1], [0, 0, 1, 1], [], []>} : vector<8x32xbf16>, vector<32x128xbf16>, vector<8x128xf32> -> vector<8x128xf32>
    %c0_101 = arith.constant 0 : index
    %c0_102 = arith.constant 0 : index
    %340 = vector.load %arg12[%c0_101, %c0_102] : memref<1x128xf32, #tpu.memory_space<vmem>>, vector<1x128xf32>
    %341 = vector.broadcast %340 : vector<1x128xf32> to vector<8x128xf32>
    %342 = arith.addf %339, %341 : vector<8x128xf32>
    %c0_103 = arith.constant 0 : index
    %c0_104 = arith.constant 0 : index
    %343 = vector.load %arg13[%c0_103, %c0_104] : memref<8x128xf32, #tpu.memory_space<vmem>>, vector<8x128xf32>
    tpu.vector_store %arg13[%c0_103, %c0_104], %342 {strides = array<i32>} : memref<8x128xf32, #tpu.memory_space<vmem>>, vector<8x128xf32>,
    return
  }
  func.func @transform_0(%arg0: i32) -> (i32, i32, i32) {
    %c0_i32 = arith.constant 0 : i32
    %c0_i32_0 = arith.constant 0 : i32
    %c0_i32_1 = arith.constant 0 : i32
    return %arg0, %c0_i32, %c0_i32_0 : i32, i32, i32
  }
  func.func @transform_1(%arg0: i32) -> (i32, i32, i32) {
    %c0_i32 = arith.constant 0 : i32
    %c0_i32_0 = arith.constant 0 : i32
    %c0_i32_1 = arith.constant 0 : i32
    return %arg0, %c0_i32, %c0_i32_0 : i32, i32, i32
  }
  func.func @transform_2(%arg0: i32) -> (i32, i32) {
    %c0_i32 = arith.constant 0 : i32
    %c0_i32_0 = arith.constant 0 : i32
    %c0_i32_1 = arith.constant 0 : i32
    return %c0_i32, %c0_i32_0 : i32, i32
  }
  func.func @transform_3(%arg0: i32) -> (i32, i32, i32) {
    %c0_i32 = arith.constant 0 : i32
    %c0_i32_0 = arith.constant 0 : i32
    %c0_i32_1 = arith.constant 0 : i32
    %c0_i32_2 = arith.constant 0 : i32
    return %c0_i32, %c0_i32_0, %c0_i32_1 : i32, i32, i32
  }
  func.func @transform_4(%arg0: i32) -> (i32, i32, i32) {
    %c0_i32 = arith.constant 0 : i32
    %c0_i32_0 = arith.constant 0 : i32
    %c0_i32_1 = arith.constant 0 : i32
    %c0_i32_2 = arith.constant 0 : i32
    return %c0_i32, %c0_i32_0, %c0_i32_1 : i32, i32, i32
  }
  func.func @transform_5(%arg0: i32) -> (i32, i32, i32) {
    %c0_i32 = arith.constant 0 : i32
    %c0_i32_0 = arith.constant 0 : i32
    %c0_i32_1 = arith.constant 0 : i32
    %c0_i32_2 = arith.constant 0 : i32
    return %c0_i32, %c0_i32_0, %c0_i32_1 : i32, i32, i32
  }
  func.func @transform_6(%arg0: i32) -> (i32, i32, i32) {
    %c0_i32 = arith.constant 0 : i32
    %c0_i32_0 = arith.constant 0 : i32
    %c0_i32_1 = arith.constant 0 : i32
    %c0_i32_2 = arith.constant 0 : i32
    return %c0_i32, %c0_i32_0, %c0_i32_1 : i32, i32, i32
  }
  func.func @transform_7(%arg0: i32) -> (i32, i32, i32) {
    %c0_i32 = arith.constant 0 : i32
    %c0_i32_0 = arith.constant 0 : i32
    %c0_i32_1 = arith.constant 0 : i32
    %c0_i32_2 = arith.constant 0 : i32
    return %c0_i32, %c0_i32_0, %c0_i32_1 : i32, i32, i32
  }
  func.func @transform_8(%arg0: i32) -> (i32, i32, i32) {
    %c0_i32 = arith.constant 0 : i32
    %c0_i32_0 = arith.constant 0 : i32
    %c0_i32_1 = arith.constant 0 : i32
    %c0_i32_2 = arith.constant 0 : i32
    return %c0_i32, %c0_i32_0, %c0_i32_1 : i32, i32, i32
  }
  func.func @transform_9(%arg0: i32) -> (i32, i32, i32) {
    %c0_i32 = arith.constant 0 : i32
    %c0_i32_0 = arith.constant 0 : i32
    %c0_i32_1 = arith.constant 0 : i32
    %c0_i32_2 = arith.constant 0 : i32
    return %c0_i32, %c0_i32_0, %c0_i32_1 : i32, i32, i32
  }
  func.func @transform_10(%arg0: i32) -> (i32, i32) {
    %c0_i32 = arith.constant 0 : i32
    %c0_i32_0 = arith.constant 0 : i32
    %c0_i32_1 = arith.constant 0 : i32
    return %c0_i32, %c0_i32_0 : i32, i32
  }
  func.func @transform_11(%arg0: i32) -> (i32, i32) {
    %c0_i32 = arith.constant 0 : i32
    %c0_i32_0 = arith.constant 0 : i32
    %c0_i32_1 = arith.constant 0 : i32
    return %c0_i32, %c0_i32_0 : i32, i32
  }
  func.func @transform_12(%arg0: i32) -> (i32, i32) {
    %c0_i32 = arith.constant 0 : i32
    %c0_i32_0 = arith.constant 0 : i32
    return %arg0, %c0_i32 : i32, i32
  }
}

</mosaic_0001>

<bundles_post_ra>
// kernel: tpu_custom_call.1
= control target key start
LH: loop header
LB: loop body
LE: loop exit
PB: predicated region body
PF: predicated region fallthrough
CT: control target
= control target key end

     0   :  { %17 = vsyncpa [#allocation3], 0  ;;  %s10168_s0 = inlined_call_operand.vmem [shape: f32[8,8,32], index: 0, kind: input, shape index: {}]   ;;  %s10169_s1 = inlined_call_operand.hbm [shape: f32[8,1,8], index: 1, kind: input, shape index: {}]   ;;  %s10170_s2 = inlined_call_operand.vmem [shape: f32[2,32], index: 2, kind: input, shape index: {}]   ;;  %s10171_s3 = inlined_call_operand.vmem [shape: bf16[2,32,96], index: 3, kind: input, shape index: {}]   ;;  %s10172_s4 = inlined_call_operand.vmem [shape: f32[2,1,96], index: 4, kind: input, shape index: {}]   ;;  %s10173_s5 = inlined_call_operand.hbm [shape: bf16[2,32,32], index: 5, kind: input, shape index: {}]   ;;  %s10174_s6 = inlined_call_operand.vmem [shape: f32[2,6,32], index: 6, kind: input, shape index: {}]   ;;  %s10175_s7 = inlined_call_operand.hbm [shape: bf16[2,32,64], index: 7, kind: input, shape index: {}]   ;;  %s10176_s8 = inlined_call_operand.hbm [shape: f32[2,1,64], index: 8, kind: input, shape index: {}]   ;;  %s10177_s9 = inlined_call_operand.vmem [shape: bf16[2,64,32], index: 9, kind: input, shape index: {}]   ;;  %s10178_s10 = inlined_call_operand.hbm [shape: bf16[32,128], index: 10, kind: input, shape index: {}]   ;;  %s10179_s11 = inlined_call_operand.vmem [shape: f32[1,128], index: 11, kind: input, shape index: {}]   ;;  %s10180_s12 = inlined_call_operand.hbm [shape: f32[8,128], index: 12, kind: output, shape index: {}]  }
   0x1   :  { %18 = vsyncpa [#allocation6], 0 }
   0x2   :  { %19 = vsyncpa [#allocation9], 0  ;;  %s46_s23 = sshll.u32 %s10173_s5, 4  ;;  %s47_s23 = int_to_ptr.hbm [resolvable:$true] %s46_s23 }
   0x3   :  { %20 = vsyncpa [#allocation4], 0  ;;  %s7170_s24 = smov [#allocation5]   ;;  %s7171_s26 = smov 64  }
   0x4   :  { %s48_s25 = sshll.u32 %s7170_s24, 4  ;;  %s7172_s27 = smov 4   ;;  %s49_s25 = int_to_ptr.vmem [resolvable:$true] %s48_s25 }
   0x5   :  { %54 = dma.hbm_to_vmem [thread:$0]  %s47_s23, 512, %s49_s25, [#allocation6], %s7171_s26, %s7171_s26, %s7172_s27  }
   0x6   :  { %s74_s30 = sshll.u32 %s10176_s8, 4  ;;  %s7173_s13 = smov [#allocation8]   ;;  %s75_s30 = int_to_ptr.hbm [resolvable:$true] %s74_s30 }
   0x7   :  { %s76_s14 = sshll.u32 %s7173_s13, 4  ;;  %s27_s16 = sshll.u32 %s10169_s1, 4  ;;  %s77_s14 = int_to_ptr.vmem [resolvable:$true] %s76_s14  ;;  %s28_s16 = int_to_ptr.hbm [resolvable:$true] %s27_s16 }
   0x8   :  { %s7174_s17 = smov 16   ;;  %s7175_s18 = smov 1  }
   0x9   :  { %82 = dma.hbm_to_vmem [thread:$0]  %s75_s30, 32, %s77_s14, [#allocation9], %s7174_s17, %s7174_s17, %s7175_s18  }
   0xa   :  { %s61_s21 = sshll.u32 %s10175_s7, 4  ;;  %s7176_s22 = smov [#allocation2]   ;;  %s62_s21 = int_to_ptr.hbm [resolvable:$true] %s61_s21 }
   0xb   :  { %s29_s8 = sshll.u32 %s7176_s22, 4  ;;  %s7177_s23 = smov [#allocation7]   ;;  %s30_s8 = int_to_ptr.vmem [resolvable:$true] %s29_s8 }
   0xc   :  { %35 = dma.hbm_to_vmem [thread:$0]  %s28_s16, 128, %s30_s8, [#allocation3], %s7174_s17, %s7174_s17, %s7175_s18  }
   0xd   :  { %s63_s1 = sshll.u32 %s7177_s23, 4  ;;  %s89_s28 = sshll.u32 %s10178_s10, 4  ;;  %s64_s1 = int_to_ptr.vmem [resolvable:$true] %s63_s1  ;;  %s90_s28 = int_to_ptr.hbm [resolvable:$true] %s89_s28 }
   0xe   :  { %69 = dma.hbm_to_vmem [thread:$0]  %s62_s21, 512, %s64_s1, [#allocation6], %s7171_s26, %s7171_s26, %s7172_s27  }
   0xf   :  { %s7178_s7 = smov [#allocation10]  }
  0x10   :  { %s91_s29 = sshll.u32 %s7178_s7, 4  ;;  %s92_s29 = int_to_ptr.vmem [resolvable:$true] %s91_s29 }
  0x11   :  { %97 = dma.hbm_to_vmem [thread:$0]  %s90_s28, 256, %s92_s29, [#allocation9], %s7171_s26, %s7171_s26, %s7172_s27  }
  0x12   :  { %7162 = dma.done.wait [#allocation3], 128  }
  0x13   :  { %7163 = vsyncadd [#allocation3], 4294967168 }
  0x14   :  { %7164 = dma.done.wait [#allocation6], 1024  }
  0x15   :  { %7165 = vsyncadd [#allocation6], 4294966272 }
  0x16   :  { %7166 = dma.done.wait [#allocation9], 288  }
  0x17   :  { %7167 = vsyncadd [#allocation9], 4294967008  ;;  %vm178_vm0 = vcmask 261120   ;;  %v125_v0 = vld [vmem:[%s10168_s0 + $0x20] sm:$0xff]  ;;  %v123_v1 = vld [vmem:[%s10168_s0 + $0x10] sm:$0xff]  ;;  %v7179_v14 = vmov 32.0  }
  0x18   :  { %v121_v2 = vld [vmem:[%s10168_s0] sm:$0xff]  ;;  %v191_v3 = vsel %vm178_vm0, %v125_v0, 0.0  ;;  %v185_v4 = vsel %vm178_vm0, %v123_v1, 0.0  ;;  %v126_v6 = vld [vmem:[%s10168_s0 + $0x28] sm:$0xff]  ;;  %v124_v7 = vld [vmem:[%s10168_s0 + $0x18] sm:$0xff]  ;;  %6647 = vrcp.f32 %v7179_v14  ;;  %s7180_s30 = smov 96  }
  0x19   :  { %v179_v5 = vsel %vm178_vm0, %v121_v2, 0.0  ;;  %192 = vadd.xlane.f32.xlu2 %v191_v3  ;;  %186 = vadd.xlane.f32.xlu1 %v185_v4  ;;  %v122_v8 = vld [vmem:[%s10168_s0 + $0x8] sm:$0xff]  ;;  %v194_v9 = vsel %vm178_vm0, %v126_v6, 0.0  ;;  %v188_v10 = vsel %vm178_vm0, %v124_v7, 0.0  ;;  %v127_v12 = vld [vmem:[%s10168_s0 + $0x30] sm:$0xff]  ;;  %v128_v36 = vld [vmem:[%s10168_s0 + $0x38] sm:$0xff] }
  0x1a   :  { %180 = vadd.xlane.f32.xlu0 %v179_v5  ;;  %v182_v11 = vsel %vm178_vm0, %v122_v8, 0.0  ;;  %v197_v13 = vsel %vm178_vm0, %v127_v12, 0.0  ;;  %v200_v41 = vsel %vm178_vm0, %v128_v36, 0.0  ;;  %v6364_v58 = vld [vmem:[%s10171_s3 + $0x8] sm:$0xff]  ;;  %v6363_v62 = vld [vmem:[%s10171_s3] sm:$0xff]  ;;  %s7181_s13 = smov 120  }
  0x1b   :  { %423 = vmatpush.bf16.msra.mxu0 %v6364_v58  ;;  %s7182_s14 = smov 104   ;;  %s7183_s15 = smov 112  }
  0x1c   :  { %s7184_s5 = smov 8   ;;  %s7185_s27 = smov 24  }
  0x1d   :  { %s7186_s18 = smov [#allocation11]   ;;  %s6088_s22 = sshll.u32 %s10180_s12, 4  ;;  %s6089_s22 = int_to_ptr.hbm [resolvable:$true] %s6088_s22 }
  0x1e   :  { %v6648_v15 = vpop.eup %6647  ;;  %s6086_s19 = sshll.u32 %s7186_s18, 4  ;;  %s6087_s19 = int_to_ptr.vmem [resolvable:$true] %s6086_s19 }
  0x1f   :  { %v204_v16 = vmul.f32 32.0, %v6648_v15  ;;  %vm208_vm1 = vweird.f32 %v6648_v15  ;;  %424 = vmatpush.bf16.msra.mxu0 %v6363_v62 }
  0x21   :  { %195 = vadd.xlane.f32.xlu2 %v194_v9  ;;  %189 = vadd.xlane.f32.xlu1 %v188_v10  ;;  %v205_v17 = vsub.f32 1.0, %v204_v16 }
  0x22   :  { %183 = vadd.xlane.f32.xlu0 %v182_v11 }
  0x23   :  { %v206_v18 = vmul.f32 %v6648_v15, %v205_v17 }
  0x25   :  { %v207_v19 = vadd.f32 %v6648_v15, %v206_v18 }
  0x27   :  { %v7308_v20 = vsel %vm208_vm1, %v6648_v15, %v207_v19 }
  0x28   :  { %10216 = vst [vmem:[#allocation16_spill] sm:$0xff] %v7308_v20 }
  0x29   :  { %198 = vadd.xlane.f32.xlu2 %v197_v13 }
  0x8c   :  { %v193_v21 = vpop.xlane.xlu2 %192  ;;  %v187_v22 = vpop.xlane.xlu1 %186 }
  0x8d   :  { %v181_v23 = vpop.xlane.xlu0 %180  ;;  %v214_v32 = vmul.f32 %v7308_v20, %v193_v21  ;;  %v212_v33 = vmul.f32 %v7308_v20, %v187_v22 }
  0x8e   :  { %v210_v24 = vmul.f32 %v7308_v20, %v181_v23 }
  0x8f   :  { %v7329_v39 = vsub.f32 %v125_v0, %v214_v32  ;;  %v7331_v40 = vsub.f32 %v123_v1, %v212_v33  ;;  %v177_v32 = vld [vmem:[%s10170_s2] sm:$0x3] }
  0x90   :  { %v7311_v25 = vsub.f32 %v121_v2, %v210_v24 }
  0x91   :  { %v230_v48 = vmul.f32 %v7329_v39, %v7329_v39  ;;  %v228_v49 = vmul.f32 %v7331_v40, %v7331_v40 }
  0x92   :  { %v226_v26 = vmul.f32 %v7311_v25, %v7311_v25 }
  0x93   :  { %v246_v53 = vsel %vm178_vm0, %v230_v48, 0.0  ;;  %v240_v54 = vsel %vm178_vm0, %v228_v49, 0.0 }
  0x94   :  { %v196_v27 = vpop.xlane.xlu2 %195  ;;  %v190_v28 = vpop.xlane.xlu1 %189  ;;  %v234_v29 = vsel %vm178_vm0, %v226_v26, 0.0 }
  0x95   :  { %v213_v30 = vmul.f32 %v7308_v20, %v190_v28  ;;  %235 = vadd.xlane.f32.xlu0 %v234_v29  ;;  %v184_v31 = vpop.xlane.xlu0 %183  ;;  %v215_v47 = vmul.f32 %v7308_v20, %v196_v27 }
  0x96   :  { %v211_v34 = vmul.f32 %v7308_v20, %v184_v31 }
  0x97   :  { %v7320_v35 = vsub.f32 %v124_v7, %v213_v30  ;;  %v7348_v52 = vsub.f32 %v126_v6, %v215_v47 }
  0x98   :  { %v7325_v37 = vsub.f32 %v122_v8, %v211_v34 }
  0x99   :  { %v229_v38 = vmul.f32 %v7320_v35, %v7320_v35  ;;  %v231_v56 = vmul.f32 %v7348_v52, %v7348_v52 }
  0x9a   :  { %v227_v42 = vmul.f32 %v7325_v37, %v7325_v37 }
  0x9b   :  { %v243_v43 = vsel %vm178_vm0, %v229_v38, 0.0  ;;  %v249_v57 = vsel %vm178_vm0, %v231_v56, 0.0 }
  0x9c   :  { %v199_v44 = vpop.xlane.xlu2 %198  ;;  %244 = vadd.xlane.f32.xlu2 %v243_v43  ;;  %v237_v45 = vsel %vm178_vm0, %v227_v42, 0.0  ;;  %v7393_v43 = vperm.slane %v177_v32, 0 }
  0x9d   :  { %v216_v46 = vmul.f32 %v7308_v20, %v199_v44  ;;  %201 = vadd.xlane.f32.xlu0 %v200_v41  ;;  %238 = vadd.xlane.f32.xlu1 %v237_v45 }
  0x9f   :  { %v7344_v50 = vsub.f32 %v127_v12, %v216_v46 }
  0xa1   :  { %v232_v51 = vmul.f32 %v7344_v50, %v7344_v50 }
  0xa3   :  { %v252_v55 = vsel %vm178_vm0, %v232_v51, 0.0 }
  0xa4   :  { %253 = vadd.xlane.f32.xlu2 %v252_v55  ;;  %v7399_v55 = vperm.slane %v177_v32, 1 }
  0xa5   :  { %247 = vadd.xlane.f32.xlu0 %v246_v53  ;;  %241 = vadd.xlane.f32.xlu1 %v240_v54 }
  0xad   :  { %250 = vadd.xlane.f32.xlu1 %v249_v57 }
 0x108   :  { %v236_v59 = vpop.xlane.xlu0 %235 }
 0x109   :  { %v258_v60 = vmul.f32 %v236_v59, %v7308_v20 }
 0x10b   :  { %v266_v61 = vadd.f32 1e-12, %v258_v60 }
 0x10d   :  { %6649 = vrsqrt.f32 %v266_v61  ;;  %vm280_vm3 = vweird.f32 %v266_v61 }
 0x10f   :  { %v245_v63 = vpop.xlane.xlu2 %244 }
 0x110   :  { %v261_v0 = vmul.f32 %v245_v63, %v7308_v20  ;;  %v239_v1 = vpop.xlane.xlu1 %238  ;;  %v202_v2 = vpop.xlane.xlu0 %201 }
 0x111   :  { %v259_v3 = vmul.f32 %v239_v1, %v7308_v20  ;;  %v217_v4 = vmul.f32 %v7308_v20, %v202_v2 }
 0x112   :  { %v7366_v5 = vadd.f32 1e-12, %v261_v0 }
 0x113   :  { %v6650_v6 = vpop.eup %6649  ;;  %v267_v7 = vadd.f32 1e-12, %v259_v3  ;;  %v7368_v8 = vsub.f32 %v128_v36, %v217_v4 }
 0x114   :  { %v275_v9 = vmul.f32 %v6650_v6, %v266_v61  ;;  %6651 = vrsqrt.f32 %v7366_v5  ;;  %vm281_vm2 = vweird.f32 %v6650_v6  ;;  %vm310_vm10 = vweird.f32 %v7366_v5 }
 0x115   :  { %6653 = vrsqrt.f32 %v267_v7  ;;  %v233_v10 = vmul.f32 %v7368_v8, %v7368_v8  ;;  %vm7380_vm4 = vmor %vm280_vm3, %vm281_vm2  ;;  %vm290_vm5 = vweird.f32 %v267_v7 }
 0x116   :  { %v276_v11 = vmul.f32 %v6650_v6, %v275_v9 }
 0x117   :  { %v255_v12 = vsel %vm178_vm0, %v233_v10, 0.0 }
 0x118   :  { %v277_v13 = vmul.f32 0.5, %v276_v11  ;;  %v242_v14 = vpop.xlane.xlu1 %241  ;;  %256 = vadd.xlane.f32.xlu0 %v255_v12  ;;  %v248_v16 = vpop.xlane.xlu0 %247 }
 0x119   :  { %v260_v15 = vmul.f32 %v242_v14, %v7308_v20  ;;  %v262_v23 = vmul.f32 %v248_v16, %v7308_v20 }
 0x11a   :  { %v7375_v17 = vpop.eup %6651  ;;  %v278_v18 = vsub.f32 1.5, %v277_v13 }
 0x11b   :  { %v6654_v19 = vpop.eup %6653  ;;  %v268_v21 = vadd.f32 1e-12, %v260_v15  ;;  %v305_v26 = vmul.f32 %v7375_v17, %v7366_v5  ;;  %v7384_v30 = vadd.f32 1e-12, %v262_v23  ;;  %vm311_vm11 = vweird.f32 %v7375_v17 }
 0x11c   :  { %v285_v22 = vmul.f32 %v6654_v19, %v267_v7  ;;  %v279_v24 = vmul.f32 %v6650_v6, %v278_v18  ;;  %vm291_vm6 = vweird.f32 %v6654_v19  ;;  %vm312_vm13 = vmor %vm310_vm10, %vm311_vm11  ;;  %vm563_vm11 = vcmask 64512  }
 0x11d   :  { %6655 = vrsqrt.f32 %v268_v21  ;;  %v306_v34 = vmul.f32 %v7375_v17, %v305_v26  ;;  %vm292_vm7 = vmor %vm290_vm5, %vm291_vm6  ;;  %vm300_vm8 = vweird.f32 %v268_v21  ;;  %vm320_vm1 = vweird.f32 %v7384_v30 }
 0x11e   :  { %v286_v27 = vmul.f32 %v6654_v19, %v285_v22  ;;  %v283_v33 = vsel %vm7380_vm4, %v6650_v6, %v279_v24  ;;  %6657 = vrsqrt.f32 %v7384_v30 }
 0x11f   :  { %v354_v46 = vmul.f32 %v283_v33, %v7311_v25  ;;  %v307_v47 = vmul.f32 0.5, %v306_v34 }
 0x120   :  { %v287_v29 = vmul.f32 0.5, %v286_v27  ;;  %v251_v31 = vpop.xlane.xlu1 %250 }
 0x121   :  { %v263_v36 = vmul.f32 %v251_v31, %v7308_v20  ;;  %v363_v54 = vmul.f32 %v7393_v43, %v354_v46  ;;  %v308_v56 = vsub.f32 1.5, %v307_v47 }
 0x122   :  { %v288_v38 = vsub.f32 1.5, %v287_v29  ;;  %v254_v29 = vpop.xlane.xlu2 %253 }
 0x123   :  { %v6656_v41 = vpop.eup %6655  ;;  %v271_v42 = vadd.f32 1e-12, %v263_v36  ;;  %v7408_v61 = vadd.f32 %v7399_v55, %v363_v54  ;;  %v309_v62 = vmul.f32 %v7375_v17, %v308_v56 }
 0x124   :  { %v289_v44 = vmul.f32 %v6654_v19, %v288_v38  ;;  %v295_v45 = vmul.f32 %v6656_v41, %v268_v21  ;;  %vm301_vm9 = vweird.f32 %v6656_v41  ;;  %v6658_v58 = vpop.eup %6657 }
 0x125   :  { %6659 = vrsqrt.f32 %v271_v42  ;;  %vm302_vm12 = vmor %vm300_vm8, %vm301_vm9  ;;  %10220 = vst [vmem:[#allocation18_spill] sm:$0xff] %v7408_v61  ;;  %v315_v63 = vmul.f32 %v6658_v58, %v7384_v30  ;;  %v313_v4 = vsel %vm312_vm13, %v7375_v17, %v309_v62  ;;  %vm330_vm14 = vweird.f32 %v271_v42 }
 0x126   :  { %v293_v48 = vsel %vm292_vm7, %v6654_v19, %v289_v44  ;;  %v296_v49 = vmul.f32 %v6656_v41, %v295_v45  ;;  %v357_v9 = vmul.f32 %v313_v4, %v7320_v35  ;;  %vm321_vm2 = vweird.f32 %v6658_v58 }
 0x127   :  { %v355_v51 = vmul.f32 %v293_v48, %v7325_v37  ;;  %v316_v5 = vmul.f32 %v6658_v58, %v315_v63  ;;  %vm322_vm4 = vmor %vm320_vm1, %vm321_vm2  ;;  %vm2488_vm13 = vcmask 130048  }
 0x128   :  { %v297_v53 = vmul.f32 0.5, %v296_v49  ;;  %v366_v13 = vmul.f32 %v7393_v43, %v357_v9 }
 0x129   :  { %v364_v57 = vmul.f32 %v7393_v43, %v355_v51  ;;  %v317_v10 = vmul.f32 0.5, %v316_v5 }
 0x12a   :  { %v298_v59 = vsub.f32 1.5, %v297_v53 }
 0x12b   :  { %v7405_v25 = vadd.f32 %v7399_v55, %v364_v57  ;;  %v6660_v37 = vpop.eup %6659  ;;  %v318_v14 = vsub.f32 1.5, %v317_v10 }
 0x12c   :  { %v299_v60 = vmul.f32 %v6656_v41, %v298_v59  ;;  %v325_v0 = vmul.f32 %v6660_v37, %v271_v42  ;;  %vm331_vm15 = vweird.f32 %v6660_v37 }
 0x12d   :  { %10219 = vst [vmem:[#allocation17_spill] sm:$0xff] %v7405_v25  ;;  %v381_v1 = vpack.c.bf16 %v7405_v25, %v7408_v61  ;;  %vm332_vm3 = vmor %vm330_vm14, %vm331_vm15  ;;  %v319_v35 = vmul.f32 %v6658_v58, %v318_v14  ;;  %vm2497_vm14 = vcmask 195584  }
 0x12e   :  { %v303_v2 = vsel %vm302_vm12, %v6656_v41, %v299_v60  ;;  %v326_v3 = vmul.f32 %v6660_v37, %v325_v0  ;;  %vm1716_vm12 = vcmask 1043456  }
 0x12f   :  { %6108 = vmatmul.msk.bf16.vlgmr.msra.gmra.mxu0 %vm178_vm0, %v381_v1  ;;  %v356_v6 = vmul.f32 %v303_v2, %v7331_v40  ;;  %v7425_v40 = vadd.f32 %v7399_v55, %v366_v13  ;;  %v323_v19 = vsel %vm322_vm4, %v6658_v58, %v319_v35 }
 0x130   :  { %v327_v7 = vmul.f32 0.5, %v326_v3  ;;  %v358_v22 = vmul.f32 %v323_v19, %v7329_v39 }
 0x131   :  { %v365_v11 = vmul.f32 %v7393_v43, %v356_v6  ;;  %10222 = vst [vmem:[#allocation20_spill] sm:$0xff] %v7425_v40 }
 0x132   :  { %v328_v12 = vsub.f32 1.5, %v327_v7  ;;  %v367_v24 = vmul.f32 %v7393_v43, %v358_v22 }
 0x133   :  { %v7421_v15 = vadd.f32 %v7399_v55, %v365_v11 }
 0x134   :  { %v329_v16 = vmul.f32 %v6660_v37, %v328_v12  ;;  %v7438_v27 = vadd.f32 %v7399_v55, %v367_v24 }
 0x135   :  { %10221 = vst [vmem:[#allocation19_spill] sm:$0xff] %v7421_v15  ;;  %v382_v17 = vpack.c.bf16 %v7425_v40, %v7421_v15 }
 0x136   :  { %v333_v18 = vsel %vm332_vm3, %v6660_v37, %v329_v16  ;;  %10224 = vst [vmem:[#allocation22_spill] sm:$0xff] %v7438_v27 }
 0x137   :  { %v359_v21 = vmul.f32 %v333_v18, %v7348_v52  ;;  %v264_v52 = vmul.f32 %v254_v29, %v7308_v20 }
 0x139   :  { %v368_v23 = vmul.f32 %v7393_v43, %v359_v21  ;;  %v272_v30 = vadd.f32 1e-12, %v264_v52 }
 0x13b   :  { %v7435_v26 = vadd.f32 %v7399_v55, %v368_v23  ;;  %6661 = vrsqrt.f32 %v272_v30  ;;  %vm340_vm5 = vweird.f32 %v272_v30 }
 0x13d   :  { %10223 = vst [vmem:[#allocation21_spill] sm:$0xff] %v7435_v26  ;;  %v383_v28 = vpack.c.bf16 %v7435_v26, %v7438_v27 }
 0x13f   :  { %6109 = vmatmul.msk.bf16.gmra.mxu0 %vm178_vm0, %v382_v17 }
 0x141   :  { %v6662_v39 = vpop.eup %6661 }
 0x142   :  { %v335_v31 = vmul.f32 %v6662_v39, %v272_v30  ;;  %vm341_vm6 = vweird.f32 %v6662_v39 }
 0x143   :  { %vm342_vm7 = vmor %vm340_vm5, %vm341_vm6 }
 0x144   :  { %v336_v32 = vmul.f32 %v6662_v39, %v335_v31 }
 0x146   :  { %v337_v38 = vmul.f32 0.5, %v336_v32 }
 0x148   :  { %v338_v41 = vsub.f32 1.5, %v337_v38 }
 0x14a   :  { %v339_v44 = vmul.f32 %v6662_v39, %v338_v41 }
 0x14c   :  { %v343_v47 = vsel %vm342_vm7, %v6662_v39, %v339_v44 }
 0x14d   :  { %v360_v51 = vmul.f32 %v343_v47, %v7344_v50  ;;  %v7461_v50 = vld [vmem:[%s10172_s4] ss:$0 sm:$0xff] }
 0x14f   :  { %6110 = vmatmul.msk.bf16.gmra.mxu0 %vm178_vm0, %v383_v28  ;;  %v369_v57 = vmul.f32 %v7393_v43, %v360_v51 }
 0x151   :  { %v7450_v59 = vadd.f32 %v7399_v55, %v369_v57 }
 0x153   :  { %10225 = vst [vmem:[#allocation23_spill] sm:$0xff] %v7450_v59 }
 0x18b   :  { %v257_v33 = vpop.xlane.xlu0 %256 }
 0x18c   :  { %v265_v34 = vmul.f32 %v257_v33, %v7308_v20 }
 0x18e   :  { %v273_v36 = vadd.f32 1e-12, %v265_v34 }
 0x190   :  { %6663 = vrsqrt.f32 %v273_v36  ;;  %vm350_vm9 = vweird.f32 %v273_v36 }
 0x196   :  { %v6664_v42 = vpop.eup %6663 }
 0x197   :  { %v345_v45 = vmul.f32 %v6664_v42, %v273_v36  ;;  %vm351_vm8 = vweird.f32 %v6664_v42 }
 0x198   :  { %vm352_vm10 = vmor %vm350_vm9, %vm351_vm8 }
 0x199   :  { %v346_v46 = vmul.f32 %v6664_v42, %v345_v45 }
 0x19b   :  { %v347_v48 = vmul.f32 0.5, %v346_v46 }
 0x19d   :  { %v348_v49 = vsub.f32 1.5, %v347_v48 }
 0x19f   :  { %v349_v53 = vmul.f32 %v6664_v42, %v348_v49 }
 0x1a1   :  { %v353_v54 = vsel %vm352_vm10, %v6664_v42, %v349_v53 }
 0x1a2   :  { %v361_v56 = vmul.f32 %v353_v54, %v7368_v8 }
 0x1a4   :  { %v370_v58 = vmul.f32 %v7393_v43, %v361_v56 }
 0x1a6   :  { %v7453_v37 = vadd.f32 %v7399_v55, %v370_v58 }
 0x1a8   :  { %10226 = vst [vmem:[#allocation24_spill] sm:$0xff] %v7453_v37  ;;  %v384_v60 = vpack.c.bf16 %v7453_v37, %v7450_v59 }
 0x1aa   :  { %6111 = vmatmul.msk.bf16.gmra.mxu0 %vm178_vm0, %v384_v60 }
 0x1ac   :  { %v426_v8 = vpop.f32.mrf.mxu0 }
 0x1ad   :  { %v427_v62 = vadd.f32 %v7461_v50, %v426_v8 }
 0x1af   :  { %v7464_v43 = vpack.c.bf16 %v427_v62, %v427_v62 }
 0x1b1   :  { %v559_v63 = vunpack.c.l.b16 %v7464_v43 }
 0x1b3   :  { %v7467_v0 = vpack.c.b16 %v559_v63, %v559_v63 }
 0x1b4   :  { %v428_v55 = vpop.f32.mrf.mxu0 }
 0x1b5   :  { %v429_v1 = vadd.f32 %v7461_v50, %v428_v55  ;;  %561 = vrot.lane.b32.xlu1 %v7467_v0, %s7180_s30 }
 0x1b7   :  { %v7472_v2 = vpack.c.bf16 %v429_v1, %v429_v1  ;;  %v6417_v11 = vpack.i.bf16 %v429_v1, %v427_v62 }
 0x1b9   :  { %v584_v3 = vunpack.c.l.b16 %v7472_v2 }
 0x1bb   :  { %v7475_v4 = vpack.c.b16 %v584_v3, %v584_v3 }
 0x1bc   :  { %v431_v5 = vpop.f32.mrf.mxu0 }
 0x1bd   :  { %v432_v6 = vadd.f32 %v7461_v50, %v431_v5  ;;  %586 = vrot.lane.b32.xlu1 %v7475_v4, %s7180_s30 }
 0x1bf   :  { %v6402_v7 = vpack.i.bf16 %v432_v6, %v429_v1  ;;  %v7480_v9 = vpack.c.bf16 %v432_v6, %v432_v6 }
 0x1c1   :  { %6403 = vrot.lane.b32.xlu2 %v6402_v7, %s7181_s13  ;;  %v608_v10 = vunpack.c.l.b16 %v7480_v9 }
 0x1c3   :  { %v7484_v12 = vpack.c.b16 %v608_v10, %v608_v10 }
 0x1c4   :  { %v433_v13 = vpop.f32.mrf.mxu0 }
 0x1c5   :  { %v434_v14 = vadd.f32 %v7461_v50, %v433_v13  ;;  %6418 = vrot.lane.b32.xlu1 %v6417_v11, %s7182_s14  ;;  %610 = vrot.lane.b32.xlu0 %v7484_v12, %s7180_s30 }
 0x1c7   :  { %v6407_v16 = vpack.i.bf16 %v434_v14, %v427_v62  ;;  %v6427_v35 = vpack.i.bf16 %v434_v14, %v432_v6  ;;  %v7491_v17 = vpack.c.bf16 %v434_v14, %v434_v14 }
 0x1c9   :  { %6408 = vrot.lane.b32.xlu2 %v6407_v16, %s7181_s13  ;;  %v632_v21 = vunpack.c.l.b16 %v7491_v17 }
 0x1cb   :  { %v7500_v24 = vpack.c.b16 %v632_v21, %v632_v21 }
 0x1cc   :  { %v436_v18 = vpop.f32.mrf.mxu0 }
 0x1cd   :  { %v437_v19 = vadd.f32 %v7461_v50, %v436_v18  ;;  %6428 = vrot.lane.b32.xlu1 %v6427_v35, %s7182_s14 }
 0x1cf   :  { %v7496_v22 = vpack.c.bf16 %v437_v19, %v437_v19 }
 0x1d1   :  { %6413 = vrot.lane.b32.xlu2 %v6417_v11, %s7183_s15  ;;  %v656_v23 = vunpack.c.l.b16 %v7496_v22 }
 0x1d3   :  { %v7502_v28 = vpack.c.b16 %v656_v23, %v656_v23 }
 0x1d4   :  { %v438_v29 = vpop.f32.mrf.mxu0 }
 0x1d5   :  { %634 = vrot.lane.b32.xlu1 %v7500_v24, %s7180_s30  ;;  %658 = vrot.lane.b32.xlu0 %v7502_v28, %s7180_s30  ;;  %v439_v52 = vadd.f32 %v7461_v50, %v438_v29 }
 0x1d7   :  { %v6437_v30 = vpack.i.bf16 %v439_v52, %v437_v19  ;;  %v7512_v39 = vpack.c.bf16 %v439_v52, %v439_v52 }
 0x1d9   :  { %6423 = vrot.lane.b32.xlu2 %v6427_v35, %s7183_s15  ;;  %v680_v31 = vunpack.c.l.b16 %v7512_v39 }
 0x1db   :  { %v7516_v32 = vpack.c.b16 %v680_v31, %v680_v31 }
 0x1dd   :  { %6438 = vrot.lane.b32.xlu0 %v6437_v30, %s7183_s15 }
 0x1e1   :  { %6433 = vrot.lane.b32.xlu2 %v6437_v30, %s7181_s13 }
 0x1e5   :  { %6443 = vrot.lane.b32.xlu0 %v6437_v30, %s7182_s14 }
 0x1ed   :  { %682 = vrot.lane.b32.xlu0 %v7516_v32, %s7180_s30 }
 0x21b   :  { %v7520_v33 = vpop.permute.xlu2 %6403 }
 0x21c   :  { %v6405_v8 = vunpack.i.l.bf16 %v7520_v33  ;;  %v6406_v30 = vunpack.i.h.bf16 %v7520_v33 }
 0x21e   :  { %v7554_v3 = vpack.c.bf16 %v6405_v8, %v6405_v8 }
 0x223   :  { %v7522_v34 = vpop.permute.xlu2 %6408 }
 0x224   :  { %v6410_v36 = vunpack.i.l.bf16 %v7522_v34 }
 0x226   :  { %v7525_v38 = vpack.c.bf16 %v6410_v36, %v6410_v36 }
 0x227   :  { %v441_v41 = vpop.f32.mrf.mxu0  ;;  %v562_v42 = vpop.permute.xlu1 %561 }
 0x228   :  { %v442_v44 = vadd.f32 %v7461_v50, %v441_v41  ;;  %v568_v45 = vsel %vm563_vm11, %v562_v42, 0  ;;  %v752_v46 = vunpack.c.l.b16 %v7525_v38 }
 0x229   :  { %577 = vmatpush.bf16.xpose.msra.mxu3 %v568_v45 }
 0x22a   :  { %v7530_v47 = vpack.c.bf16 %v442_v44, %v442_v44  ;;  %v7532_v48 = vpack.c.b16 %v752_v46, %v752_v46 }
 0x22b   :  { %v6414_v63 = vpop.permute.xlu2 %6413 }
 0x22c   :  { %v704_v49 = vunpack.c.l.b16 %v7530_v47  ;;  %754 = vrot.lane.b32.xlu2 %v7532_v48, %s7180_s30  ;;  %v6415_v5 = vunpack.i.l.bf16 %v6414_v63  ;;  %v6416_v7 = vunpack.i.h.bf16 %v6414_v63 }
 0x22e   :  { %v7537_v51 = vpack.c.b16 %v704_v49, %v704_v49  ;;  %v7563_v13 = vpack.c.bf16 %v6415_v5, %v6415_v5  ;;  %v7566_v16 = vpack.c.bf16 %v6416_v7, %v6416_v7 }
 0x22f   :  { %v443_v53 = vpop.f32.mrf.mxu0  ;;  %v587_v54 = vpop.permute.xlu1 %586 }
 0x230   :  { %v444_v56 = vadd.f32 %v7461_v50, %v443_v53  ;;  %706 = vrot.lane.b32.xlu0 %v7537_v51, %s7180_s30  ;;  %6112 = vmatmul.msk.bf16.vlgmr.msra.gmra.mxu3 %vm563_vm11, %v7464_v43  ;;  %v592_v57 = vsel %vm563_vm11, %v587_v54, 0  ;;  %v944_v52 = vunpack.c.l.b16 %v7563_v13  ;;  %v968_v31 = vunpack.c.l.b16 %v7566_v16 }
 0x231   :  { %601 = vmatpush.bf16.xpose.msra.mxu2 %v592_v57  ;;  %v6411_v54 = vunpack.i.h.bf16 %v7522_v34 }
 0x232   :  { %v6447_v58 = vpack.i.bf16 %v444_v56, %v442_v44  ;;  %v7545_v60 = vpack.c.bf16 %v444_v56, %v444_v56  ;;  %v7589_v42 = vpack.c.b16 %v944_v52, %v944_v52  ;;  %v7592_v44 = vpack.c.bf16 %v6406_v30, %v6406_v30 }
 0x233   :  { %v6424_v19 = vpop.permute.xlu2 %6423  ;;  %v7594_v45 = vpack.c.b16 %v968_v31, %v968_v31  ;;  %v7611_v63 = vpack.c.bf16 %v6411_v54, %v6411_v54 }
 0x234   :  { %6448 = vrot.lane.b32.xlu1 %v6447_v58, %s7181_s13  ;;  %v728_v62 = vunpack.c.l.b16 %v7545_v60  ;;  %v6425_v36 = vunpack.i.l.bf16 %v6424_v19  ;;  %v6426_v7 = vunpack.i.h.bf16 %v6424_v19 }
 0x236   :  { %v7556_v6 = vpack.c.b16 %v728_v62, %v728_v62  ;;  %v7603_v56 = vpack.c.bf16 %v6425_v36, %v6425_v36  ;;  %v800_v62 = vunpack.c.l.b16 %v7592_v44  ;;  %v7633_v30 = vpack.c.bf16 %v6426_v7, %v6426_v7 }
 0x237   :  { %v6419_v50 = vpop.permute.xlu1 %6418  ;;  %v611_v55 = vpop.permute.xlu0 %610 }
 0x238   :  { %6453 = vrot.lane.b32.xlu0 %v6447_v58, %s7183_s15  ;;  %v6420_v1 = vunpack.i.l.bf16 %v6419_v50  ;;  %6113 = vmatmul.msk.bf16.vlgmr.msra.gmra.mxu2 %vm563_vm11, %v7472_v2  ;;  %v616_v43 = vsel %vm563_vm11, %v611_v55, 0  ;;  %v6421_v14 = vunpack.i.h.bf16 %v6419_v50  ;;  %v776_v2 = vunpack.c.l.b16 %v7554_v3 }
 0x239   :  { %625 = vmatpush.bf16.xpose.msrb.mxu3 %v616_v43  ;;  %v992_v34 = vunpack.c.l.b16 %v7603_v56 }
 0x23a   :  { %v7558_v10 = vpack.c.bf16 %v6420_v1, %v6420_v1  ;;  %v7577_v21 = vpack.c.bf16 %v6421_v14, %v6421_v14  ;;  %v7580_v29 = vpack.c.b16 %v776_v2, %v776_v2  ;;  %v801_v1 = vpack.c.b16 %v800_v62, %v800_v62 }
 0x23b   :  { %v6434_v8 = vpop.permute.xlu2 %6433  ;;  %v7625_v14 = vpack.c.b16 %v992_v34, %v992_v34  ;;  %v824_v2 = vunpack.c.l.b16 %v7611_v63 }
 0x23c   :  { %730 = vrot.lane.b32.xlu1 %v7556_v6, %s7180_s30  ;;  %v1136_v11 = vunpack.c.l.b16 %v7558_v10  ;;  %v6435_v50 = vunpack.i.l.bf16 %v6434_v8 }
 0x23d   :  { %v7635_v31 = vpack.c.b16 %v824_v2, %v824_v2 }
 0x23e   :  { %v7568_v35 = vpack.c.b16 %v1136_v11, %v1136_v11  ;;  %v7621_v11 = vpack.c.bf16 %v6435_v50, %v6435_v50 }
 0x23f   :  { %v7570_v18 = vpop.permute.xlu1 %6428 }
 0x240   :  { %6458 = vrot.lane.b32.xlu0 %v6447_v58, %s7182_s14  ;;  %1138 = vrot.lane.b32.xlu2 %v7568_v35, %s7180_s30  ;;  %v6430_v23 = vunpack.i.l.bf16 %v7570_v18  ;;  %v848_v36 = vunpack.c.l.b16 %v7621_v11 }
 0x241   :  { %6114 = vmatmul.msk.bf16.vlgmr.msrb.gmra.mxu3 %vm563_vm11, %v7480_v9  ;;  %v1160_v9 = vunpack.c.l.b16 %v7577_v21 }
 0x242   :  { %v7587_v41 = vpack.c.bf16 %v6430_v23, %v6430_v23  ;;  %v6436_v23 = vunpack.i.h.bf16 %v6434_v8 }
 0x243   :  { %v7605_v57 = vpack.c.b16 %v1160_v9, %v1160_v9 }
 0x244   :  { %778 = vrot.lane.b32.xlu1 %v7580_v29, %s7180_s30  ;;  %v1184_v58 = vunpack.c.l.b16 %v7587_v41 }
 0x246   :  { %v7613_v55 = vpack.c.b16 %v1184_v58, %v1184_v58 }
 0x247   :  { %v635_v46 = vpop.permute.xlu1 %634  ;;  %v659_v49 = vpop.permute.xlu0 %658 }
 0x248   :  { %946 = vrot.lane.b32.xlu0 %v7589_v42, %s7180_s30  ;;  %970 = vrot.lane.b32.xlu2 %v7594_v45, %s7180_s30  ;;  %v640_v33 = vsel %vm563_vm11, %v635_v46, 0  ;;  %v664_v53 = vsel %vm563_vm11, %v659_v49, 0 }
 0x249   :  { %649 = vmatpush.bf16.xpose.msra.mxu1 %v640_v33  ;;  %673 = vmatpush.bf16.xpose.msrb.mxu2 %v664_v53  ;;  %v849_v33 = vpack.c.b16 %v848_v36, %v848_v36  ;;  %v1016_v53 = vunpack.c.l.b16 %v7633_v30 }
 0x24b   :  { %v7651_v8 = vpack.c.b16 %v1016_v53, %v1016_v53 }
 0x24c   :  { %1162 = vrot.lane.b32.xlu1 %v7605_v57, %s7180_s30 }
 0x24f   :  { %v6439_v43 = vpop.permute.xlu0 %6438 }
 0x250   :  { %1186 = vrot.lane.b32.xlu0 %v7613_v55, %s7180_s30  ;;  %v6440_v5 = vunpack.i.l.bf16 %v6439_v43  ;;  %6115 = vmatmul.msk.bf16.vlgmr.msra.gmra.mxu1 %vm563_vm11, %v7491_v17  ;;  %v6441_v19 = vunpack.i.h.bf16 %v6439_v43 }
 0x251   :  { %802 = vrot.lane.b32.xlu2 %v801_v1, %s7180_s30  ;;  %6116 = vmatmul.msk.bf16.vlgmr.msrb.gmra.mxu2 %vm563_vm11, %v7496_v22  ;;  %v7638_v22 = vpack.c.bf16 %v6436_v23, %v6436_v23 }
 0x252   :  { %v7628_v52 = vpack.c.bf16 %v6440_v5, %v6440_v5  ;;  %v7646_v49 = vpack.c.bf16 %v6441_v19, %v6441_v19 }
 0x253   :  { %v872_v54 = vunpack.c.l.b16 %v7638_v22 }
 0x254   :  { %994 = vrot.lane.b32.xlu1 %v7625_v14, %s7180_s30  ;;  %v1040_v17 = vunpack.c.l.b16 %v7628_v52  ;;  %v1064_v62 = vunpack.c.l.b16 %v7646_v49 }
 0x255   :  { %v7654_v50 = vpack.c.b16 %v872_v54, %v872_v54 }
 0x256   :  { %v7640_v9 = vpack.c.b16 %v1040_v17, %v1040_v17  ;;  %v1065_v7 = vpack.c.b16 %v1064_v62, %v1064_v62 }
 0x257   :  { %v6444_v46 = vpop.permute.xlu0 %6443 }
 0x258   :  { %826 = vrot.lane.b32.xlu0 %v7635_v31, %s7180_s30  ;;  %v6445_v58 = vunpack.i.l.bf16 %v6444_v46  ;;  %v6446_v54 = vunpack.i.h.bf16 %v6444_v46 }
 0x259   :  { %1042 = vrot.lane.b32.xlu2 %v7640_v9, %s7180_s30 }
 0x25a   :  { %v7661_v5 = vpack.c.bf16 %v6445_v58, %v6445_v58 }
 0x25c   :  { %850 = vrot.lane.b32.xlu1 %v849_v33, %s7180_s30  ;;  %v1232_v2 = vunpack.c.l.b16 %v7661_v5 }
 0x25e   :  { %v7667_v23 = vpack.c.b16 %v1232_v2, %v1232_v2 }
 0x25f   :  { %v683_v34 = vpop.permute.xlu0 %682 }
 0x260   :  { %1018 = vrot.lane.b32.xlu0 %v7651_v8, %s7180_s30  ;;  %v688_v43 = vsel %vm563_vm11, %v683_v34, 0 }
 0x261   :  { %874 = vrot.lane.b32.xlu2 %v7654_v50, %s7180_s30  ;;  %697 = vmatpush.bf16.xpose.msra.mxu3 %v688_v43  ;;  %v7693_v43 = vpack.c.bf16 %v6446_v54, %v6446_v54 }
 0x264   :  { %1066 = vrot.lane.b32.xlu1 %v1065_v7, %s7180_s30 }
 0x268   :  { %6117 = vmatmul.msk.bf16.vlgmr.msra.gmra.mxu3 %vm563_vm11, %v7512_v39 }
 0x26c   :  { %1234 = vrot.lane.b32.xlu1 %v7667_v23, %s7180_s30 }
 0x274   :  { %1754 = vrot.lane.b32.xlu1 %v7484_v12, %s7171_s26 }
 0x27c   :  { %1859 = vrot.lane.b32.xlu1 %v7556_v6, %s7171_s26 }
 0x284   :  { %1922 = vrot.lane.b32.xlu1 %v801_v1, %s7171_s26 }
 0x286   :  { %v755_v17 = vpop.permute.xlu2 %754 }
 0x287   :  { %v760_v19 = vsel %vm563_vm11, %v755_v17, 0 }
 0x288   :  { %769 = vmatpush.bf16.xpose.msrb.mxu3 %v760_v19 }
 0x28c   :  { %1964 = vrot.lane.b32.xlu1 %v849_v33, %s7171_s26 }
 0x28f   :  { %6120 = vmatmul.msk.bf16.vlgmr.msrb.gmra.mxu3 %vm563_vm11, %v7525_v38 }
 0x294   :  { %2048 = vrot.lane.b32.xlu1 %v7589_v42, %s7171_s26 }
 0x29a   :  { %v7682_v39 = vpop.permute.xlu2 %1138 }
 0x29c   :  { %2153 = vrot.lane.b32.xlu1 %v1065_v7, %s7171_s26 }
 0x2a2   :  { %v707_v12 = vpop.permute.xlu0 %706  ;;  %v7685_v6 = vpop.permute.xlu2 %970 }
 0x2a3   :  { %v712_v1 = vsel %vm563_vm11, %v707_v12, 0  ;;  %v976_v15 = vsel %vm563_vm11, %v7685_v6, 0 }
 0x2a4   :  { %721 = vmatpush.bf16.xpose.msrb.mxu1 %v712_v1 }
 0x2a6   :  { %v6449_v36 = vpop.permute.xlu1 %6448 }
 0x2a7   :  { %v6450_v53 = vunpack.i.l.bf16 %v6449_v36  ;;  %v6451_v7 = vunpack.i.h.bf16 %v6449_v36 }
 0x2a9   :  { %v7688_v33 = vpack.c.bf16 %v6450_v53, %v6450_v53  ;;  %v7707_v36 = vpack.c.bf16 %v6451_v7, %v6451_v7  ;;  %v6431_v7 = vunpack.i.h.bf16 %v7570_v18 }
 0x2aa   :  { %v6454_v58 = vpop.permute.xlu0 %6453 }
 0x2ab   :  { %v803_v38 = vpop.permute.xlu2 %802  ;;  %v6456_v62 = vunpack.i.h.bf16 %v6454_v58  ;;  %v6455_v34 = vunpack.i.l.bf16 %v6454_v58  ;;  %6118 = vmatmul.msk.bf16.vlgmr.msrb.gmra.mxu1 %vm563_vm11, %v7530_v47  ;;  %v896_v42 = vunpack.c.l.b16 %v7688_v33  ;;  %v7732_v59 = vpack.c.bf16 %v6431_v7, %v6431_v7 }
 0x2ac   :  { %v808_v53 = vsel %vm563_vm11, %v803_v38, 0 }
 0x2ad   :  { %v7695_v2 = vpack.c.bf16 %v6456_v62, %v6456_v62  ;;  %v7697_v17 = vpack.c.bf16 %v6455_v34, %v6455_v34  ;;  %v7699_v19 = vpack.c.b16 %v896_v42, %v896_v42  ;;  %v1256_v62 = vunpack.c.l.b16 %v7693_v43 }
 0x2ae   :  { %v731_v46 = vpop.permute.xlu1 %730 }
 0x2af   :  { %v736_v12 = vsel %vm563_vm11, %v731_v46, 0  ;;  %898 = vrot.lane.b32.xlu0 %v7699_v19, %s7180_s30  ;;  %v1112_v1 = vunpack.c.l.b16 %v7695_v2  ;;  %v1088_v47 = vunpack.c.l.b16 %v7697_v17 }
 0x2b0   :  { %745 = vmatpush.bf16.xpose.msra.mxu2 %v736_v12 }
 0x2b1   :  { %v7709_v54 = vpack.c.b16 %v1112_v1, %v1112_v1  ;;  %v7711_v58 = vpack.c.b16 %v1088_v47, %v1088_v47  ;;  %v7723_v1 = vpack.c.b16 %v1256_v62, %v1256_v62  ;;  %v920_v47 = vunpack.c.l.b16 %v7707_v36 }
 0x2b2   :  { %v6459_v34 = vpop.permute.xlu0 %6458 }
 0x2b3   :  { %v6461_v42 = vunpack.i.h.bf16 %v6459_v34  ;;  %v1043_v46 = vpop.permute.xlu2 %1042  ;;  %1114 = vrot.lane.b32.xlu1 %v7709_v54, %s7180_s30  ;;  %1090 = vrot.lane.b32.xlu2 %v7711_v58, %s7180_s30  ;;  %v7718_v38 = vpop.f32.mrf.mxu3  ;;  %v7736_v62 = vpack.c.b16 %v920_v47, %v920_v47  ;;  %v1208_v47 = vunpack.c.l.b16 %v7732_v59 }
 0x2b5   :  { %v7721_v12 = vpack.c.bf16 %v6461_v42, %v6461_v42 }
 0x2b7   :  { %6119 = vmatmul.msk.bf16.vlgmr.msra.gmra.mxu2 %vm563_vm11, %v7545_v60  ;;  %1258 = vrot.lane.b32.xlu0 %v7723_v1, %s7180_s30  ;;  %v1304_v20 = vunpack.c.l.b16 %v7721_v12 }
 0x2b8   :  { %817 = vmatpush.bf16.xpose.msrb.mxu2 %v808_v53  ;;  %v779_v53 = vpop.permute.xlu1 %778 }
 0x2b9   :  { %v784_v37 = vsel %vm563_vm11, %v779_v53, 0  ;;  %v7734_v18 = vpack.c.b16 %v1304_v20, %v1304_v20  ;;  %v1048_v53 = vsel %vm563_vm11, %v1043_v46, 0  ;;  %v6460_v20 = vunpack.i.l.bf16 %v6459_v34 }
 0x2ba   :  { %793 = vmatpush.bf16.xpose.msra.mxu1 %v784_v37  ;;  %v947_v42 = vpop.permute.xlu0 %946  ;;  %v7756_v46 = vpack.c.b16 %v1208_v47, %v1208_v47 }
 0x2bb   :  { %10227 = vst [vmem:[#allocation25_spill] sm:$0xff] %v7734_v18  ;;  %v875_v26 = vpop.permute.xlu2 %874  ;;  %1306 = vrot.lane.b32.xlu1 %v7734_v18, %s7180_s30  ;;  %922 = vrot.lane.b32.xlu2 %v7736_v62, %s7180_s30  ;;  %v952_v60 = vsel %vm563_vm11, %v947_v42, 0  ;;  %v581_v7 = vpop.f32.mrf.mxu3  ;;  %v1144_v42 = vsel %vm563_vm11, %v7682_v39, 0 }
 0x2bc   :  { %v880_v37 = vsel %vm563_vm11, %v875_v26, 0  ;;  %v7745_v27 = vpop.f32.mrf.mxu2  ;;  %961 = vmatpush.bf16.xpose.msrb.mxu0 %v952_v60  ;;  %v7754_v26 = vpack.c.bf16 %v6460_v20, %v6460_v20 }
 0x2bf   :  { %1711 = vrot.lane.b32.xlu0 %v7467_v0, %s7171_s26 }
 0x2c0   :  { %v1163_v40 = vpop.permute.xlu1 %1162 }
 0x2c1   :  { %6121 = vmatmul.msk.bf16.vlgmr.msra.gmra.mxu1 %vm563_vm11, %v7554_v3 }
 0x2c2   :  { %889 = vmatpush.bf16.xpose.msrb.mxu1 %v880_v37  ;;  %v7758_v34 = vpop.permute.xlu0 %1186 }
 0x2c3   :  { %6128 = vmatmul.msk.bf16.vlgmr.msrb.gmra.mxu0 %vm563_vm11, %v7563_v13  ;;  %1210 = vrot.lane.b32.xlu2 %v7756_v46, %s7180_s30 }
 0x2c4   :  { %1057 = vmatpush.bf16.xpose.msra.mxu0 %v1048_v53  ;;  %v605_v3 = vpop.f32.mrf.mxu2  ;;  %v627_v6 = vpop.f32.mrf.mxu3 }
 0x2c7   :  { %6122 = vmatmul.msk.bf16.vlgmr.msrb.gmra.mxu2 %vm563_vm11, %v7592_v44  ;;  %1775 = vrot.lane.b32.xlu0 %v7500_v24, %s7171_s26  ;;  %v131_v24 = vld [vmem:[#allocation2 + $0x2] sm:$0x1] }
 0x2c8   :  { %v7767_v0 = vpop.permute.xlu1 %994  ;;  %v139_v44 = vsub.f32 1.0, %v131_v24 }
 0x2ca   :  { %985 = vmatpush.bf16.xpose.msra.mxu1 %v976_v15  ;;  %v1280_v15 = vunpack.c.l.b16 %v7754_v26  ;;  %v827_v60 = vpop.permute.xlu0 %826 }
 0x2cb   :  { %v832_v13 = vsel %vm563_vm11, %v827_v60, 0  ;;  %v134_v60 = vld [vmem:[#allocation2 + $0x5] sm:$0x1] }
 0x2cc   :  { %1153 = vmatpush.bf16.xpose.msrb.mxu0 %v1144_v42  ;;  %v7773_v39 = vpack.c.b16 %v1280_v15, %v1280_v15  ;;  %v629_v53 = vpop.f32.mrf.mxu3  ;;  %841 = vmatpush.bf16.xpose.msra.mxu3 %v832_v13 }
 0x2cd   :  { %v7778_v37 = vpop.f32.mrf.mxu1 }
 0x2ce   :  { %1282 = vrot.lane.b32.xlu2 %v7773_v39, %s7180_s30 }
 0x2cf   :  { %1817 = vrot.lane.b32.xlu0 %v7516_v32, %s7171_s26 }
 0x2d0   :  { %v851_v7 = vpop.permute.xlu1 %850 }
 0x2d1   :  { %v856_v20 = vsel %vm563_vm11, %v851_v7, 0  ;;  %6125 = vmatmul.msk.bf16.vlgmr.msrb.gmra.mxu1 %vm563_vm11, %v7638_v22  ;;  %v147_v22 = vmul.f32 -1e+09, %v139_v44 }
 0x2d3   :  { %6123 = vmatmul.msk.bf16.vlgmr.msra.gmra.mxu3 %vm563_vm11, %v7611_v63  ;;  %6132 = vmatmul.msk.bf16.vlgmr.msra.gmra.mxu0 %vm563_vm11, %v7628_v52  ;;  %v7798_v63 = vperm.slane %v147_v22, 0  ;;  %v1168_v52 = vsel %vm563_vm11, %v1163_v40, 0 }
 0x2d4   :  { %865 = vmatpush.bf16.xpose.msrb.mxu3 %v856_v20  ;;  %v7791_v47 = vpop.f32.mrf.mxu2 }
 0x2d5   :  { %v653_v42 = vpop.f32.mrf.mxu1  ;;  %10228 = vst [vmem:[#allocation26_spill] sm:$0xff] %v7798_v63 }
 0x2d6   :  { %1733 = vrot.lane.b32.xlu2 %v7475_v4, %s7171_s26 }
 0x2d7   :  { %1838 = vrot.lane.b32.xlu0 %v7537_v51, %s7171_s26  ;;  %v7807_v51 = vadd.f32 %v627_v6, %v7798_v63 }
 0x2d8   :  { %v1067_v3 = vpop.permute.xlu1 %1066 }
 0x2d9   :  { %v1072_v32 = vsel %vm563_vm11, %v1067_v3, 0  ;;  %v1333_v40 = vsel %vm563_vm11, %v7807_v51, -inf }
 0x2da   :  { %1081 = vmatpush.bf16.xpose.msrb.mxu1 %v1072_v32  ;;  %v1000_v32 = vsel %vm563_vm11, %v7767_v0, 0 }
 0x2dc   :  { %v677_v4 = vpop.f32.mrf.mxu2 }
 0x2de   :  { %1796 = vrot.lane.b32.xlu2 %v7502_v28, %s7171_s26  ;;  %v142_v28 = vsub.f32 1.0, %v134_v60  ;;  %v130_v60 = vld [vmem:[#allocation2 + $0x1] sm:$0x1] }
 0x2df   :  { %1880 = vrot.lane.b32.xlu0 %v7532_v48, %s7171_s26  ;;  %v138_v0 = vsub.f32 1.0, %v130_v60 }
 0x2e0   :  { %v1235_v15 = vpop.permute.xlu1 %1234  ;;  %v150_v48 = vmul.f32 -1e+09, %v142_v28 }
 0x2e1   :  { %v1240_v13 = vsel %vm563_vm11, %v1235_v15, 0  ;;  %6129 = vmatmul.msk.bf16.vlgmr.msra.gmra.mxu1 %vm563_vm11, %v7566_v16 }
 0x2e2   :  { %1177 = vmatpush.bf16.xpose.msra.mxu1 %v1168_v52  ;;  %1249 = vmatpush.bf16.xpose.msra.mxu0 %v1240_v13  ;;  %v7819_v16 = vperm.slane %v150_v48, 0 }
 0x2e3   :  { %6124 = vmatmul.msk.bf16.vlgmr.msrb.gmra.mxu3 %vm563_vm11, %v7621_v11  ;;  %6136 = vmatmul.msk.bf16.vlgmr.msrb.gmra.mxu0 %vm563_vm11, %v7558_v10 }
 0x2e5   :  { %1334 = vmax.xlane.f32.xlu1 %v1333_v40  ;;  %v132_v40 = vld [vmem:[#allocation2 + $0x3] sm:$0x1] }
 0x2e6   :  { %1901 = vrot.lane.b32.xlu2 %v7580_v29, %s7171_s26 }
 0x2e7   :  { %1943 = vrot.lane.b32.xlu0 %v7635_v31, %s7171_s26 }
 0x2e8   :  { %v7821_v6 = vpop.permute.xlu1 %1754 }
 0x2eb   :  { %v699_v11 = vpop.f32.mrf.mxu3 }
 0x2ec   :  { %v7826_v29 = vadd.f32 %v699_v11, %v7819_v16 }
 0x2ee   :  { %2006 = vrot.lane.b32.xlu2 %v7699_v19, %s7171_s26  ;;  %v1342_v10 = vsel %vm563_vm11, %v7826_v29, -inf }
 0x2ef   :  { %1985 = vrot.lane.b32.xlu0 %v7654_v50, %s7171_s26  ;;  %1343 = vmax.xlane.f32.xlu1 %v1342_v10 }
 0x2f0   :  { %v7838_v19 = vpop.permute.xlu1 %1859 }
 0x2f1   :  { %6133 = vmatmul.msk.bf16.vlgmr.msrb.gmra.mxu1 %vm563_vm11, %v7646_v49 }
 0x2f3   :  { %v701_v31 = vpop.f32.mrf.mxu3  ;;  %6140 = vmatmul.msk.bf16.vlgmr.msra.gmra.mxu0 %vm563_vm11, %v7661_v5 }
 0x2f4   :  { %v146_v31 = vmul.f32 -1e+09, %v138_v0 }
 0x2f6   :  { %2069 = vrot.lane.b32.xlu2 %v7594_v45, %s7171_s26  ;;  %v129_v45 = vld [vmem:[#allocation2] sm:$0x1] }
 0x2f7   :  { %2090 = vrot.lane.b32.xlu0 %v7625_v14, %s7171_s26  ;;  %v137_v14 = vsub.f32 1.0, %v129_v45  ;;  %v140_v45 = vsub.f32 1.0, %v132_v40 }
 0x2f8   :  { %v7844_v50 = vpop.permute.xlu1 %1922 }
 0x2f9   :  { %v145_v5 = vmul.f32 -1e+09, %v137_v14  ;;  %v133_v14 = vld [vmem:[#allocation2 + $0x4] sm:$0x1] }
 0x2fe   :  { %2111 = vrot.lane.b32.xlu2 %v7651_v8, %s7171_s26 }
 0x2ff   :  { %2174 = vrot.lane.b32.xlu0 %v7711_v58, %s7171_s26  ;;  %v7860_v58 = vperm.slane %v145_v5, 0 }
 0x300   :  { %v7854_v49 = vpop.permute.xlu1 %1964 }
 0x301   :  { %6137 = vmatmul.msk.bf16.vlgmr.msra.gmra.mxu1 %vm563_vm11, %v7577_v21  ;;  %10229 = vst [vmem:[#allocation27_spill] sm:$0xff] %v7860_v58 }
 0x306   :  { %2132 = vrot.lane.b32.xlu2 %v7640_v9, %s7171_s26 }
 0x307   :  { %2216 = vrot.lane.b32.xlu0 %v7568_v35, %s7171_s26  ;;  %v1019_v35 = vpop.permute.xlu0 %1018 }
 0x308   :  { %v7862_v21 = vpop.permute.xlu1 %2048 }
 0x30d   :  { %v1091_v8 = vpop.permute.xlu2 %1090 }
 0x30e   :  { %2027 = vrot.lane.b32.xlu2 %v7736_v62, %s7171_s26 }
 0x30f   :  { %2237 = vrot.lane.b32.xlu0 %v7605_v57, %s7171_s26  ;;  %v1024_v57 = vsel %vm563_vm11, %v1019_v35, 0  ;;  %v141_v35 = vsub.f32 1.0, %v133_v14 }
 0x310   :  { %v7873_v44 = vpop.permute.xlu1 %2153 }
 0x312   :  { %v771_v9 = vpop.f32.mrf.mxu3 }
 0x313   :  { %v7867_v53 = vadd.f32 %v771_v9, %v7860_v58  ;;  %v7896_v9 = vperm.slane %v146_v31, 0 }
 0x315   :  { %v923_v7 = vpop.permute.xlu2 %922  ;;  %v1351_v20 = vsel %vm563_vm11, %v7867_v53, -inf  ;;  %10230 = vst [vmem:[#allocation28_spill] sm:$0xff] %v7896_v9 }
 0x316   :  { %2195 = vrot.lane.b32.xlu2 %v7709_v54, %s7171_s26  ;;  %v928_v62 = vsel %vm563_vm11, %v923_v7, 0  ;;  %1352 = vmax.xlane.f32.xlu1 %v1351_v20  ;;  %v7900_v7 = vadd.f32 %v7718_v38, %v7860_v58 }
 0x317   :  { %937 = vmatpush.bf16.xpose.msra.mxu3 %v928_v62  ;;  %v135_v62 = vld [vmem:[#allocation2 + $0x6] sm:$0x1] }
 0x31a   :  { %v773_v24 = vpop.f32.mrf.mxu3 }
 0x31b   :  { %v7905_v24 = vadd.f32 %v7745_v27, %v7896_v9 }
 0x31d   :  { %v1211_v42 = vpop.permute.xlu2 %1210 }
 0x31e   :  { %6127 = vmatmul.msk.bf16.vlgmr.msra.gmra.mxu3 %vm563_vm11, %v7707_v36  ;;  %v1096_v36 = vsel %vm563_vm11, %v1091_v8, 0  ;;  %v1216_v11 = vsel %vm563_vm11, %v1211_v42, 0  ;;  %v149_v42 = vmul.f32 -1e+09, %v141_v35 }
 0x31f   :  { %1033 = vmatpush.bf16.xpose.msrb.mxu3 %v1024_v57 }
 0x320   :  { %v7915_v27 = vperm.slane %v149_v42, 0 }
 0x321   :  { %v899_v54 = vpop.permute.xlu0 %898 }
 0x322   :  { %v904_v3 = vsel %vm563_vm11, %v899_v54, 0  ;;  %v143_v54 = vsub.f32 1.0, %v135_v62  ;;  %10232 = vst [vmem:[#allocation30_spill] sm:$0xff] %v7915_v27 }
 0x323   :  { %913 = vmatpush.bf16.xpose.msra.mxu2 %v904_v3  ;;  %v1327_v3 = vsel %vm563_vm11, %v7900_v7, -inf }
 0x324   :  { %v151_v0 = vmul.f32 -1e+09, %v143_v54 }
 0x325   :  { %v1115_v22 = vpop.permute.xlu1 %1114 }
 0x326   :  { %v1120_v15 = vsel %vm563_vm11, %v1115_v22, 0  ;;  %v1192_v22 = vsel %vm563_vm11, %v7758_v34, 0 }
 0x327   :  { %1129 = vmatpush.bf16.xpose.msra.mxu3 %v1120_v15 }
 0x328   :  { %v7880_v4 = vpop.permute.xlu2 %1282  ;;  %v7883_v52 = vpop.f32.mrf.mxu1 }
 0x329   :  { %v1259_v13 = vpop.permute.xlu0 %1258  ;;  %v1288_v62 = vsel %vm563_vm11, %v7880_v4, 0 }
 0x32a   :  { %v1264_v28 = vsel %vm563_vm11, %v1259_v13, 0  ;;  %6126 = vmatmul.msk.bf16.vlgmr.msra.gmra.mxu2 %vm563_vm11, %v7688_v33 }
 0x32b   :  { %1009 = vmatpush.bf16.xpose.msrb.mxu2 %v1000_v32  ;;  %1273 = vmatpush.bf16.xpose.msrb.mxu1 %v1264_v28  ;;  %v136_v32 = vld [vmem:[#allocation2 + $0x7] sm:$0x1] }
 0x32c   :  { %v144_v13 = vsub.f32 1.0, %v136_v32 }
 0x32d   :  { %v1307_v60 = vpop.permute.xlu1 %1306 }
 0x32e   :  { %6131 = vmatmul.msk.bf16.vlgmr.msrb.gmra.mxu3 %vm563_vm11, %v7633_v30  ;;  %v148_v30 = vmul.f32 -1e+09, %v140_v45  ;;  %v1312_v34 = vsel %vm563_vm11, %v1307_v60, 0 }
 0x32f   :  { %1225 = vmatpush.bf16.xpose.msrb.mxu3 %v1216_v11  ;;  %v7930_v11 = vperm.slane %v151_v0, 0  ;;  %v1760_v0 = vsel %vm1716_vm12, %v7821_v6, 0 }
 0x330   :  { %v1734_v48 = vpop.permute.xlu2 %1733  ;;  %v725_v8 = vpop.f32.mrf.mxu1 }
 0x331   :  { %v1739_v10 = vsel %vm1716_vm12, %v1734_v48, 0  ;;  %v1712_v33 = vpop.permute.xlu0 %1711  ;;  %v152_v48 = vmul.f32 -1e+09, %v144_v13  ;;  %10233 = vst [vmem:[#allocation31_spill] sm:$0xff] %v7930_v11 }
 0x332   :  { %v1718_v5 = vsel %vm1716_vm12, %v1712_v33, 0  ;;  %6141 = vmatmul.msk.bf16.vlgmr.msrb.gmra.mxu1 %vm563_vm11, %v7693_v43  ;;  %v7907_v43 = vperm.slane %v148_v30, 0 }
 0x333   :  { %1105 = vmatpush.bf16.xpose.msra.mxu2 %v1096_v36  ;;  %1748 = vmatpush.bf16.msra.mxu1 %v1739_v10  ;;  %v1330_v36 = vsel %vm563_vm11, %v7905_v24, -inf  ;;  %v7935_v8 = vperm.slane %v152_v48, 0  ;;  %v1865_v48 = vsel %vm1716_vm12, %v7838_v19, 0 }
 0x334   :  { %1727 = vmatpush.bf16.msrb.mxu0 %v1718_v5  ;;  %10231 = vst [vmem:[#allocation29_spill] sm:$0xff] %v7907_v43  ;;  %v7921_v28 = vadd.f32 %v7778_v37, %v7907_v43 }
 0x335   :  { %10234 = vst [vmem:[#allocation32_spill] sm:$0xff] %v7935_v8 }
 0x336   :  { %v1336_v37 = vsel %vm563_vm11, %v7921_v28, -inf }
 0x338   :  { %v1797_v20 = vpop.permute.xlu2 %1796 }
 0x339   :  { %v1802_v57 = vsel %vm1716_vm12, %v1797_v20, 0  ;;  %1328 = vmax.xlane.f32.xlu0 %v1327_v3  ;;  %v1776_v38 = vpop.permute.xlu0 %1775 }
 0x33a   :  { %1811 = vmatpush.bf16.msra.mxu0 %v1802_v57  ;;  %v747_v15 = vpop.f32.mrf.mxu2  ;;  %6130 = vmatmul.msk.bf16.vlgmr.msrb.gmra.mxu2 %vm563_vm11, %v7603_v56  ;;  %v7928_v56 = vadd.f32 %v7791_v47, %v7915_v27  ;;  %v7941_v47 = vadd.f32 %v7883_v52, %v7930_v11  ;;  %v1781_v54 = vsel %vm1716_vm12, %v1776_v38, 0 }
 0x33b   :  { %1201 = vmatpush.bf16.xpose.msrb.mxu2 %v1192_v22  ;;  %v7944_v5 = vadd.f32 %v747_v15, %v7935_v8 }
 0x33c   :  { %v1345_v30 = vsel %vm563_vm11, %v7941_v47, -inf }
 0x33d   :  { %v1348_v52 = vsel %vm563_vm11, %v7944_v5, -inf }
 0x33e   :  { %v795_v40 = vpop.f32.mrf.mxu1  ;;  %6135 = vmatmul.msk.bf16.vlgmr.msra.gmra.mxu3 %vm563_vm11, %v7695_v2  ;;  %v1339_v2 = vsel %vm563_vm11, %v7928_v56, -inf }
 0x33f   :  { %1331 = vmax.xlane.f32.xlu2 %v1330_v36  ;;  %1321 = vmatpush.bf16.xpose.msra.mxu3 %v1312_v34  ;;  %v7970_v15 = vadd.f32 %v795_v40, %v7896_v9 }
 0x340   :  { %v963_v10 = vpop.f32.mrf.mxu0 }
 0x341   :  { %1337 = vmax.xlane.f32.xlu0 %v1336_v37  ;;  %v1818_v31 = vpop.permute.xlu0 %1817  ;;  %v7955_v57 = vadd.f32 %v963_v10, %v7860_v58  ;;  %v1354_v13 = vsel %vm563_vm11, %v7970_v15, -inf }
 0x342   :  { %v1823_v45 = vsel %vm1716_vm12, %v1818_v31, 0  ;;  %v749_v14 = vpop.f32.mrf.mxu2 }
 0x343   :  { %1832 = vmatpush.bf16.msrb.mxu1 %v1823_v45 }
 0x346   :  { %v797_v33 = vpop.f32.mrf.mxu1 }
 0x347   :  { %1340 = vmax.xlane.f32.xlu2 %v1339_v2 }
 0x348   :  { %v965_v35 = vpop.f32.mrf.mxu0 }
 0x349   :  { %1346 = vmax.xlane.f32.xlu0 %v1345_v30  ;;  %v1839_v10 = vpop.permute.xlu0 %1838 }
 0x34a   :  { %v819_v20 = vpop.f32.mrf.mxu2  ;;  %6134 = vmatmul.msk.bf16.vlgmr.msra.gmra.mxu2 %vm563_vm11, %v7697_v17  ;;  %v1375_v17 = vsel %vm563_vm11, %v7955_v57, -inf  ;;  %v1844_v19 = vsel %vm1716_vm12, %v1839_v10, 0 }
 0x34b   :  { %1297 = vmatpush.bf16.xpose.msra.mxu2 %v1288_v62  ;;  %v7961_v4 = vadd.f32 %v819_v20, %v7798_v63 }
 0x34d   :  { %v1357_v22 = vsel %vm563_vm11, %v7961_v4, -inf }
 0x34e   :  { %v891_v42 = vpop.f32.mrf.mxu1  ;;  %6139 = vmatmul.msk.bf16.vlgmr.msrb.gmra.mxu3 %vm563_vm11, %v7732_v59 }
 0x34f   :  { %1349 = vmax.xlane.f32.xlu2 %v1348_v52  ;;  %1790 = vmatpush.bf16.msrb.mxu3 %v1781_v54  ;;  %v7975_v60 = vadd.f32 %v891_v42, %v7819_v16 }
 0x350   :  { %v7965_v3 = vpop.f32.mrf.mxu0 }
 0x351   :  { %1376 = vmax.xlane.f32.xlu0 %v1375_v17  ;;  %v1366_v40 = vsel %vm563_vm11, %v7975_v60, -inf  ;;  %v7996_v2 = vpop.permute.xlu0 %1880 }
 0x352   :  { %v821_v32 = vpop.f32.mrf.mxu2 }
 0x356   :  { %v893_v38 = vpop.f32.mrf.mxu1  ;;  %v7972_v59 = vpop.f32.mrf.mxu3 }
 0x357   :  { %1358 = vmax.xlane.f32.xlu2 %v1357_v22 }
 0x358   :  { %v1061_v36 = vpop.f32.mrf.mxu0 }
 0x359   :  { %1355 = vmax.xlane.f32.xlu0 %v1354_v13  ;;  %v8007_v20 = vpop.permute.xlu0 %1943 }
 0x35a   :  { %6138 = vmatmul.msk.bf16.vlgmr.msrb.gmra.mxu2 %vm563_vm11, %v7587_v41 }
 0x35b   :  { %1769 = vmatpush.bf16.msrb.mxu2 %v1760_v0 }
 0x35e   :  { %v7985_v34 = vpop.f32.mrf.mxu1  ;;  %v845_v37 = vpop.f32.mrf.mxu3  ;;  %6143 = vmatmul.msk.bf16.vlgmr.msra.gmra.mxu3 %vm563_vm11, %v7721_v12 }
 0x35f   :  { %1367 = vmax.xlane.f32.xlu2 %v1366_v40  ;;  %1874 = vmatpush.bf16.msra.mxu3 %v1865_v48  ;;  %v8001_v12 = vpop.permute.xlu2 %1901 }
 0x360   :  { %v1155_v6 = vpop.f32.mrf.mxu0 }
 0x361   :  { %v7992_v31 = vadd.f32 %v1155_v6, %v7860_v58  ;;  %v8011_v17 = vpop.permute.xlu0 %1985 }
 0x363   :  { %v1399_v45 = vsel %vm563_vm11, %v7992_v31, -inf }
 0x366   :  { %v989_v41 = vpop.f32.mrf.mxu1  ;;  %v867_v14 = vpop.f32.mrf.mxu3 }
 0x367   :  { %1400 = vmax.xlane.f32.xlu2 %v1399_v45  ;;  %v8009_v42 = vpop.permute.xlu2 %2006 }
 0x368   :  { %v1157_v33 = vpop.f32.mrf.mxu0 }
 0x369   :  { %v8017_v38 = vpop.permute.xlu0 %2090 }
 0x36a   :  { %6142 = vmatmul.msk.bf16.vlgmr.msra.gmra.mxu2 %vm563_vm11, %v7754_v26 }
 0x36b   :  { %1853 = vmatpush.bf16.msra.mxu2 %v1844_v19 }
 0x36e   :  { %v8003_v35 = vpop.f32.mrf.mxu1  ;;  %v869_v30 = vpop.f32.mrf.mxu3 }
 0x36f   :  { %v8015_v22 = vpop.permute.xlu2 %2069 }
 0x370   :  { %v8005_v62 = vpop.f32.mrf.mxu0 }
 0x371   :  { %v8021_v36 = vpop.permute.xlu0 %2174 }
 0x372   :  { %10235 = vst [vmem:[#allocation33_spill] sm:$0xff] %v8021_v36 }
 0x376   :  { %v1085_v52 = vpop.f32.mrf.mxu1 }
 0x377   :  { %v8019_v13 = vpop.permute.xlu2 %2111 }
 0x378   :  { %v1253_v54 = vpop.f32.mrf.mxu0 }
 0x379   :  { %v8025_v40 = vpop.permute.xlu0 %2216 }
 0x37a   :  { %10237 = vst [vmem:[#allocation35_spill] sm:$0xff] %v8025_v40 }
 0x37e   :  { %v8013_v32 = vpop.f32.mrf.mxu1 }
 0x37f   :  { %v8023_v0 = vpop.permute.xlu2 %2132 }
 0x380   :  { %10236 = vst [vmem:[#allocation34_spill] sm:$0xff] %v8023_v0 }
 0x381   :  { %v8031_v37 = vpop.permute.xlu0 %2237 }
 0x382   :  { %10238 = vst [vmem:[#allocation36_spill] sm:$0xff] %v8031_v37 }
 0x386   :  { %v1181_v26 = vpop.f32.mrf.mxu1 }
 0x387   :  { %v8027_v48 = vpop.permute.xlu2 %2027 }
 0x38f   :  { %v8033_v6 = vpop.permute.xlu2 %2195 }
 0x390   :  { %10239 = vst [vmem:[#allocation37_spill] sm:$0xff] %v8033_v6 }
 0x3a1   :  { %v8029_v10 = vpop.f32.mrf.mxu3 }
 0x3a9   :  { %v941_v41 = vpop.f32.mrf.mxu3 }
 0x3ac   :  { %v1329_v45 = vpop.xlane.xlu0 %1328 }
 0x3ad   :  { %v1423_v33 = vsub.f32 %v7900_v7, %v1329_v45  ;;  %v915_v19 = vpop.f32.mrf.mxu2 }
 0x3af   :  { %v1455_v30 = vmul.f32 1.442695, %v1423_v33  ;;  %v8036_v52 = vpop.f32.mrf.mxu1 }
 0x3b1   :  { %6665 = vpow2.f32 %v1455_v30  ;;  %v8039_v58 = vpop.f32.mrf.mxu3 }
 0x3b2   :  { %v1332_v54 = vpop.xlane.xlu2 %1331 }
 0x3b3   :  { %v1424_v26 = vsub.f32 %v7905_v24, %v1332_v54 }
 0x3b4   :  { %v1338_v61 = vpop.xlane.xlu0 %1337 }
 0x3b5   :  { %v1457_v25 = vmul.f32 1.442695, %v1424_v26  ;;  %v917_v37 = vpop.f32.mrf.mxu2 }
 0x3b6   :  { %v1335_v37 = vpop.xlane.xlu1 %1334 }
 0x3b7   :  { %6667 = vpow2.f32 %v1457_v25  ;;  %v8041_v40 = vpop.eup %6665  ;;  %v1277_v41 = vpop.f32.mrf.mxu1  ;;  %v8052_v25 = vadd.f32 %v7972_v59, %v7907_v43  ;;  %v1425_v26 = vsub.f32 %v7807_v51, %v1335_v37  ;;  %v8074_v37 = vadd.f32 %v7965_v3, %v7915_v27 }
 0x3b8   :  { %v1519_v45 = vsel %vm563_vm11, %v8041_v40, 0.0  ;;  %v8059_v41 = vadd.f32 %v867_v14, %v7915_v27 }
 0x3b9   :  { %1520 = vadd.xlane.f32.xlu1 %v1519_v45  ;;  %v1037_v33 = vpop.f32.mrf.mxu3 }
 0x3ba   :  { %v1341_v6 = vpop.xlane.xlu2 %1340  ;;  %v1360_v33 = vsel %vm563_vm11, %v8052_v25, -inf  ;;  %v1363_v51 = vsel %vm563_vm11, %v8059_v41, -inf }
 0x3bb   :  { %v1427_v7 = vsub.f32 %v7928_v56, %v1341_v6 }
 0x3bc   :  { %v1347_v54 = vpop.xlane.xlu0 %1346 }
 0x3bd   :  { %v8046_v18 = vpop.eup %6667  ;;  %v1463_v24 = vmul.f32 1.442695, %v1427_v7  ;;  %v1429_v56 = vsub.f32 %v7941_v47, %v1347_v54  ;;  %v8055_v6 = vpop.f32.mrf.mxu2 }
 0x3be   :  { %v1522_v30 = vsel %vm563_vm11, %v8046_v18, 0.0 }
 0x3bf   :  { %6669 = vpow2.f32 %v1463_v24  ;;  %1523 = vadd.xlane.f32.xlu0 %v1522_v30  ;;  %v1467_v7 = vmul.f32 1.442695, %v1429_v56  ;;  %v1459_v30 = vmul.f32 1.442695, %v1425_v26 }
 0x3c1   :  { %1361 = vmax.xlane.f32.xlu1 %v1360_v33  ;;  %v8063_v59 = vpop.f32.mrf.mxu3  ;;  %6671 = vpow2.f32 %v1467_v7  ;;  %v8077_v7 = vadd.f32 %v915_v19, %v7930_v11 }
 0x3c2   :  { %v1350_v45 = vpop.xlane.xlu2 %1349  ;;  %6673 = vpow2.f32 %v1459_v30 }
 0x3c3   :  { %v1430_v47 = vsub.f32 %v7944_v5, %v1350_v45  ;;  %v1426_v5 = vsub.f32 %v7921_v28, %v1338_v61  ;;  %v1387_v45 = vsel %vm563_vm11, %v8074_v37, -inf  ;;  %v8092_v28 = vadd.f32 %v8005_v62, %v7915_v27 }
 0x3c5   :  { %v8065_v24 = vpop.eup %6669  ;;  %v1013_v54 = vpop.f32.mrf.mxu2  ;;  %v1469_v56 = vmul.f32 1.442695, %v1430_v47  ;;  %v1461_v3 = vmul.f32 1.442695, %v1426_v5  ;;  %v1369_v47 = vsel %vm563_vm11, %v8077_v7, -inf }
 0x3c6   :  { %v1531_v14 = vsel %vm563_vm11, %v8065_v24, 0.0 }
 0x3c7   :  { %1364 = vmax.xlane.f32.xlu0 %v1363_v51  ;;  %1532 = vadd.xlane.f32.xlu2 %v1531_v14  ;;  %v8080_v26 = vpop.eup %6671  ;;  %6675 = vpow2.f32 %v1469_v56  ;;  %v1411_v56 = vsel %vm563_vm11, %v8092_v28, -inf }
 0x3c8   :  { %v1537_v51 = vsel %vm563_vm11, %v8080_v26, 0.0  ;;  %v8088_v19 = vpop.eup %6673  ;;  %6677 = vpow2.f32 %v1461_v3 }
 0x3c9   :  { %1388 = vmax.xlane.f32.xlu1 %v1387_v45  ;;  %v1133_v33 = vpop.f32.mrf.mxu3  ;;  %v1525_v14 = vsel %vm563_vm11, %v8088_v19, 0.0  ;;  %v1344_v45 = vpop.xlane.xlu1 %1343 }
 0x3ca   :  { %v1428_v3 = vsub.f32 %v7826_v29, %v1344_v45  ;;  %v8125_v45 = vadd.f32 %v8036_v52, %v7819_v16  ;;  %v1359_v0 = vpop.xlane.xlu2 %1358 }
 0x3cd   :  { %v1107_v61 = vpop.f32.mrf.mxu2  ;;  %v8094_v30 = vpop.eup %6675 }
 0x3ce   :  { %v1540_v5 = vsel %vm563_vm11, %v8094_v30, 0.0  ;;  %v8102_v33 = vpop.eup %6677 }
 0x3cf   :  { %1538 = vadd.xlane.f32.xlu0 %v1537_v51  ;;  %1370 = vmax.xlane.f32.xlu2 %v1369_v47  ;;  %v8107_v51 = vadd.f32 %v8013_v32, %v7896_v9  ;;  %v8111_v47 = vadd.f32 %v8039_v58, %v7907_v43  ;;  %v8121_v32 = vadd.f32 %v7985_v34, %v7896_v9  ;;  %v1414_v34 = vsel %vm563_vm11, %v8125_v45, -inf }
 0x3d1   :  { %1526 = vadd.xlane.f32.xlu1 %v1525_v14  ;;  %v1227_v54 = vpop.f32.mrf.mxu3  ;;  %v1528_v14 = vsel %vm563_vm11, %v8102_v33, 0.0  ;;  %v1384_v29 = vsel %vm563_vm11, %v8111_v47, -inf }
 0x3d5   :  { %v1109_v62 = vpop.f32.mrf.mxu2 }
 0x3d6   :  { %v1378_v62 = vsel %vm563_vm11, %v8121_v32, -inf }
 0x3d7   :  { %1412 = vmax.xlane.f32.xlu0 %v1411_v56  ;;  %1541 = vadd.xlane.f32.xlu2 %v1540_v5  ;;  %v1465_v56 = vmul.f32 1.442695, %v1428_v3  ;;  %v1402_v5 = vsel %vm563_vm11, %v8107_v51, -inf }
 0x3d9   :  { %1529 = vadd.xlane.f32.xlu1 %v1528_v14  ;;  %v1229_v27 = vpop.f32.mrf.mxu3  ;;  %6679 = vpow2.f32 %v1465_v56 }
 0x3da   :  { %v8128_v27 = vadd.f32 %v1107_v61, %v7930_v11  ;;  %v8140_v61 = vadd.f32 %v8063_v59, %v7935_v8 }
 0x3dc   :  { %v1393_v14 = vsel %vm563_vm11, %v8128_v27, -inf }
 0x3dd   :  { %v1203_v58 = vpop.f32.mrf.mxu2 }
 0x3df   :  { %1403 = vmax.xlane.f32.xlu0 %v1402_v5  ;;  %1385 = vmax.xlane.f32.xlu2 %v1384_v29  ;;  %v1377_v5 = vpop.xlane.xlu0 %1376  ;;  %v8136_v56 = vpop.eup %6679 }
 0x3e0   :  { %v1439_v29 = vsub.f32 %v7955_v57, %v1377_v5  ;;  %v1433_v57 = vsub.f32 %v7961_v4, %v1359_v0  ;;  %v8156_v5 = vadd.f32 %v1203_v58, %v7798_v63  ;;  %v1368_v4 = vpop.xlane.xlu2 %1367 }
 0x3e1   :  { %1379 = vmax.xlane.f32.xlu1 %v1378_v62  ;;  %v1323_v3 = vpop.f32.mrf.mxu3  ;;  %v1534_v62 = vsel %vm563_vm11, %v8136_v56, 0.0 }
 0x3e2   :  { %v1487_v36 = vmul.f32 1.442695, %v1439_v29 }
 0x3e4   :  { %6681 = vpow2.f32 %v1487_v36  ;;  %v8166_v36 = vadd.f32 %v8055_v6, %v7798_v63 }
 0x3e5   :  { %v1205_v52 = vpop.f32.mrf.mxu2 }
 0x3e7   :  { %1415 = vmax.xlane.f32.xlu0 %v1414_v34  ;;  %1394 = vmax.xlane.f32.xlu2 %v1393_v14  ;;  %v1396_v34 = vsel %vm563_vm11, %v8140_v61, -inf  ;;  %v8149_v14 = vadd.f32 %v8029_v10, %v7935_v8  ;;  %v1475_v10 = vmul.f32 1.442695, %v1433_v57  ;;  %v1381_v57 = vsel %vm563_vm11, %v8166_v36, -inf }
 0x3e9   :  { %1535 = vadd.xlane.f32.xlu1 %v1534_v62  ;;  %v1325_v9 = vpop.f32.mrf.mxu3  ;;  %v1405_v62 = vsel %vm563_vm11, %v8156_v5, -inf  ;;  %6683 = vpow2.f32 %v1475_v10  ;;  %v8182_v10 = vadd.f32 %v8003_v35, %v7819_v16  ;;  %v8192_v35 = vadd.f32 %v1323_v3, %v7935_v8 }
 0x3ea   :  { %v1372_v9 = vsel %vm563_vm11, %v8149_v14, -inf  ;;  %v8168_v0 = vpop.eup %6681 }
 0x3ed   :  { %v1299_v52 = vpop.f32.mrf.mxu2 }
 0x3ee   :  { %v8152_v59 = vadd.f32 %v1299_v52, %v7930_v11  ;;  %v8172_v52 = vadd.f32 %v1227_v54, %v7907_v43 }
 0x3ef   :  { %1397 = vmax.xlane.f32.xlu2 %v1396_v34  ;;  %v1436_v34 = vsub.f32 %v7975_v60, %v1368_v4  ;;  %v1353_v60 = vpop.xlane.xlu1 %1352  ;;  %v8184_v54 = vpop.eup %6683  ;;  %v1390_v4 = vsel %vm563_vm11, %v8182_v10, -inf }
 0x3f0   :  { %v1417_v29 = vsel %vm563_vm11, %v8152_v59, -inf }
 0x3f1   :  { %1373 = vmax.xlane.f32.xlu1 %v1372_v9  ;;  %1418 = vmax.xlane.f32.xlu0 %v1417_v29  ;;  %v1567_v9 = vsel %vm563_vm11, %v8168_v0, 0.0  ;;  %v1481_v6 = vmul.f32 1.442695, %v1436_v34  ;;  %v1408_v29 = vsel %vm563_vm11, %v8172_v52, -inf }
 0x3f3   :  { %6685 = vpow2.f32 %v1481_v6 }
 0x3f5   :  { %v1301_v58 = vpop.f32.mrf.mxu2 }
 0x3f6   :  { %v1549_v58 = vsel %vm563_vm11, %v8184_v54, 0.0 }
 0x3f7   :  { %1406 = vmax.xlane.f32.xlu2 %v1405_v62  ;;  %v1431_v62 = vsub.f32 %v7867_v53, %v1353_v60  ;;  %v1420_v53 = vsel %vm563_vm11, %v8192_v35, -inf }
 0x3f9   :  { %1382 = vmax.xlane.f32.xlu1 %v1381_v57  ;;  %1568 = vadd.xlane.f32.xlu0 %v1567_v9  ;;  %v1471_v34 = vmul.f32 1.442695, %v1431_v62  ;;  %v1356_v57 = vpop.xlane.xlu0 %1355  ;;  %v8194_v9 = vpop.eup %6685 }
 0x3fa   :  { %v1558_v6 = vsel %vm563_vm11, %v8194_v9, 0.0 }
 0x3fb   :  { %6687 = vpow2.f32 %v1471_v34  ;;  %v1401_v34 = vpop.xlane.xlu2 %1400 }
 0x3ff   :  { %1409 = vmax.xlane.f32.xlu2 %v1408_v29  ;;  %v1432_v29 = vsub.f32 %v7970_v15, %v1356_v57 }
 0x401   :  { %1391 = vmax.xlane.f32.xlu1 %v1390_v4  ;;  %1550 = vadd.xlane.f32.xlu0 %v1549_v58  ;;  %v1473_v60 = vmul.f32 1.442695, %v1432_v29  ;;  %v8201_v4 = vpop.eup %6687 }
 0x402   :  { %v1543_v3 = vsel %vm563_vm11, %v8201_v4, 0.0 }
 0x403   :  { %6689 = vpow2.f32 %v1473_v60 }
 0x409   :  { %1421 = vmax.xlane.f32.xlu1 %v1420_v53  ;;  %1559 = vadd.xlane.f32.xlu0 %v1558_v6  ;;  %v8205_v62 = vpop.eup %6689 }
 0x40a   :  { %v1546_v15 = vsel %vm563_vm11, %v8205_v62, 0.0 }
 0x411   :  { %1544 = vadd.xlane.f32.xlu1 %v1543_v3 }
 0x419   :  { %1547 = vadd.xlane.f32.xlu1 %v1546_v15 }
 0x41d   :  { %2258 = vrot.lane.b32.xlu0 %v7613_v55, %s7171_s26  ;;  %v1886_v55 = vsel %vm1716_vm12, %v7996_v2, 0 }
 0x42c   :  { %v1521_v58 = vpop.xlane.xlu1 %1520 }
 0x42d   :  { %6691 = vrcp.f32 %v1521_v58 }
 0x432   :  { %v1524_v57 = vpop.xlane.xlu0 %1523 }
 0x433   :  { %6693 = vrcp.f32 %v1524_v57  ;;  %v6692_v29 = vpop.eup %6691 }
 0x434   :  { %v1647_v53 = vmul.f32 %v6692_v29, %v8041_v40  ;;  %v1362_v6 = vpop.xlane.xlu1 %1361  ;;  %v1907_v40 = vsel %vm1716_vm12, %v8001_v12, 0 }
 0x435   :  { %v1434_v60 = vsub.f32 %v8052_v25, %v1362_v6 }
 0x436   :  { %v1679_v8 = vpack.c.bf16 %v1647_v53, %v1647_v53 }
 0x437   :  { %v1477_v43 = vmul.f32 1.442695, %v1434_v60 }
 0x438   :  { %6144 = vmatmul.msk.bf16.vlgmr.msrb.gmra.mxu0 %vm563_vm11, %v1679_v8 }
 0x439   :  { %v6694_v3 = vpop.eup %6693  ;;  %1895 = vmatpush.bf16.msrb.mxu0 %v1886_v55 }
 0x43a   :  { %v1648_v11 = vmul.f32 %v6694_v3, %v8046_v18  ;;  %v1365_v15 = vpop.xlane.xlu0 %1364  ;;  %v1533_v63 = vpop.xlane.xlu2 %1532 }
 0x43b   :  { %6695 = vrcp.f32 %v1533_v63  ;;  %v1435_v2 = vsub.f32 %v8059_v41, %v1365_v15  ;;  %v1447_v41 = vsub.f32 %v7992_v31, %v1401_v34 }
 0x43c   :  { %v1680_v58 = vpack.c.bf16 %v1648_v11, %v1648_v11  ;;  %6697 = vpow2.f32 %v1477_v43  ;;  %v1389_v25 = vpop.xlane.xlu1 %1388 }
 0x43d   :  { %v1443_v18 = vsub.f32 %v8074_v37, %v1389_v25  ;;  %v1479_v60 = vmul.f32 1.442695, %v1435_v2 }
 0x43e   :  { %6145 = vmatmul.msk.bf16.vlgmr.msra.gmra.mxu1 %vm563_vm11, %v1680_v58 }
 0x43f   :  { %1916 = vmatpush.bf16.msra.mxu1 %v1907_v40  ;;  %v1495_v63 = vmul.f32 1.442695, %v1443_v18  ;;  %v1503_v18 = vmul.f32 1.442695, %v1447_v41 }
 0x441   :  { %v6696_v57 = vpop.eup %6695  ;;  %6699 = vpow2.f32 %v1495_v63 }
 0x442   :  { %v8221_v29 = vpop.eup %6697  ;;  %v1539_v53 = vpop.xlane.xlu0 %1538  ;;  %v1651_v12 = vmul.f32 %v6696_v57, %v8065_v24 }
 0x443   :  { %v1371_v8 = vpop.xlane.xlu2 %1370  ;;  %v1552_v11 = vsel %vm563_vm11, %v8221_v29, 0.0 }
 0x444   :  { %v1437_v43 = vsub.f32 %v8077_v7, %v1371_v8  ;;  %1553 = vadd.xlane.f32.xlu1 %v1552_v11  ;;  %v1527_v37 = vpop.xlane.xlu1 %1526  ;;  %v1683_v3 = vpack.c.bf16 %v1651_v12, %v1651_v12  ;;  %v1970_v7 = vsel %vm1716_vm12, %v7854_v49, 0  ;;  %v1928_v8 = vsel %vm1716_vm12, %v7844_v50, 0 }
 0x446   :  { %v1483_v6 = vmul.f32 1.442695, %v1437_v43 }
 0x447   :  { %v8228_v55 = vpop.eup %6699 }
 0x448   :  { %6701 = vpow2.f32 %v1483_v6  ;;  %6148 = vmatmul.msk.bf16.vlgmr.msra.gmra.mxu0 %vm563_vm11, %v1683_v3  ;;  %v1579_v24 = vsel %vm563_vm11, %v8228_v55, 0.0 }
 0x449   :  { %6703 = vrcp.f32 %v1527_v37  ;;  %1979 = vmatpush.bf16.msra.mxu0 %v1970_v7 }
 0x44a   :  { %6705 = vpow2.f32 %v1479_v60  ;;  %v8233_v58 = vpop.xlane.xlu0 %1412 }
 0x44b   :  { %v1542_v15 = vpop.xlane.xlu2 %1541 }
 0x44c   :  { %1580 = vadd.xlane.f32.xlu1 %v1579_v24  ;;  %v1530_v57 = vpop.xlane.xlu1 %1529  ;;  %v1949_v24 = vsel %vm1716_vm12, %v8007_v20, 0 }
 0x44d   :  { %6707 = vrcp.f32 %v1530_v57 }
 0x44e   :  { %v8238_v40 = vpop.eup %6701  ;;  %6709 = vpow2.f32 %v1503_v18 }
 0x44f   :  { %v6704_v25 = vpop.eup %6703  ;;  %v1561_v31 = vsel %vm563_vm11, %v8238_v40, 0.0  ;;  %6711 = vrcp.f32 %v1539_v53 }
 0x450   :  { %v1649_v34 = vmul.f32 %v6704_v25, %v8088_v19  ;;  %1562 = vadd.xlane.f32.xlu2 %v1561_v31  ;;  %v8243_v49 = vpop.eup %6705  ;;  %6713 = vrcp.f32 %v1542_v15  ;;  %v2012_v15 = vsel %vm1716_vm12, %v8009_v42, 0 }
 0x451   :  { %v1555_v43 = vsel %vm563_vm11, %v8243_v49, 0.0 }
 0x452   :  { %v1681_v2 = vpack.c.bf16 %v1649_v34, %v1649_v34  ;;  %v8250_v19 = vpop.xlane.xlu0 %1403 }
 0x453   :  { %v1386_v63 = vpop.xlane.xlu2 %1385  ;;  %v6708_v11 = vpop.eup %6707 }
 0x454   :  { %6146 = vmatmul.msk.bf16.vlgmr.msrb.gmra.mxu2 %vm563_vm11, %v1681_v2  ;;  %1556 = vadd.xlane.f32.xlu1 %v1555_v43  ;;  %v1650_v12 = vmul.f32 %v6708_v11, %v8102_v33  ;;  %v1380_v6 = vpop.xlane.xlu1 %1379  ;;  %v8253_v60 = vpop.eup %6709  ;;  %v1442_v53 = vsub.f32 %v8111_v47, %v1386_v63 }
 0x455   :  { %1937 = vmatpush.bf16.msrb.mxu2 %v1928_v8  ;;  %v1440_v37 = vsub.f32 %v8121_v32, %v1380_v6  ;;  %v6712_v50 = vpop.eup %6711  ;;  %v1591_v33 = vsel %vm563_vm11, %v8253_v60, 0.0 }
 0x456   :  { %v1682_v3 = vpack.c.bf16 %v1650_v12, %v1650_v12  ;;  %v1653_v32 = vmul.f32 %v6712_v50, %v8080_v26  ;;  %v1493_v25 = vmul.f32 1.442695, %v1442_v53  ;;  %v6714_v34 = vpop.eup %6713 }
 0x457   :  { %v1489_v41 = vmul.f32 1.442695, %v1440_v37  ;;  %v1654_v63 = vmul.f32 %v6714_v34, %v8094_v30  ;;  %v1991_v30 = vsel %vm1716_vm12, %v8011_v17, 0 }
 0x458   :  { %6147 = vmatmul.msk.bf16.vlgmr.msrb.gmra.mxu3 %vm563_vm11, %v1682_v3  ;;  %v1685_v57 = vpack.c.bf16 %v1653_v32, %v1653_v32 }
 0x459   :  { %6715 = vpow2.f32 %v1489_v41  ;;  %1958 = vmatpush.bf16.msrb.mxu3 %v1949_v24 }
 0x45a   :  { %v8263_v18 = vpop.xlane.xlu0 %1415 }
 0x45b   :  { %v1395_v7 = vpop.xlane.xlu2 %1394 }
 0x45c   :  { %1592 = vadd.xlane.f32.xlu1 %v1591_v33  ;;  %v1536_v31 = vpop.xlane.xlu1 %1535  ;;  %v1445_v2 = vsub.f32 %v8128_v27, %v1395_v7  ;;  %v1686_v27 = vpack.c.bf16 %v1654_v63, %v1654_v63  ;;  %v2033_v7 = vsel %vm1716_vm12, %v8027_v48, 0 }
 0x45d   :  { %6717 = vrcp.f32 %v1536_v31 }
 0x45e   :  { %6719 = vpow2.f32 %v1493_v25  ;;  %v1499_v43 = vmul.f32 1.442695, %v1445_v2 }
 0x45f   :  { %v8265_v20 = vpop.eup %6715 }
 0x460   :  { %v1570_v26 = vsel %vm563_vm11, %v8265_v20, 0.0  ;;  %6721 = vpow2.f32 %v1499_v43 }
 0x461   :  { %1571 = vadd.xlane.f32.xlu2 %v1570_v26 }
 0x463   :  { %v8267_v47 = vpop.xlane.xlu2 %1397  ;;  %v6718_v8 = vpop.eup %6717 }
 0x464   :  { %6150 = vmatmul.msk.bf16.vlgmr.msra.gmra.mxu2 %vm563_vm11, %v1685_v57  ;;  %v1374_v11 = vpop.xlane.xlu1 %1373  ;;  %v8276_v12 = vpop.xlane.xlu0 %1418  ;;  %v1652_v6 = vmul.f32 %v6718_v8, %v8136_v56 }
 0x465   :  { %2021 = vmatpush.bf16.msra.mxu2 %v2012_v15  ;;  %v1438_v42 = vsub.f32 %v8149_v14, %v1374_v11  ;;  %v8280_v37 = vpop.eup %6719 }
 0x466   :  { %v1684_v3 = vpack.c.bf16 %v1652_v6, %v1652_v6  ;;  %v1576_v56 = vsel %vm563_vm11, %v8280_v37, 0.0  ;;  %v8295_v53 = vpop.eup %6721 }
 0x467   :  { %v1485_v50 = vmul.f32 1.442695, %v1438_v42  ;;  %v1585_v34 = vsel %vm563_vm11, %v8295_v53, 0.0 }
 0x468   :  { %6151 = vmatmul.msk.bf16.vlgmr.msra.gmra.mxu3 %vm563_vm11, %v1686_v27  ;;  %6149 = vmatmul.msk.bf16.vlgmr.msrb.gmra.mxu1 %vm563_vm11, %v1684_v3 }
 0x469   :  { %6723 = vpow2.f32 %v1485_v50  ;;  %2042 = vmatpush.bf16.msra.mxu3 %v2033_v7  ;;  %2000 = vmatpush.bf16.msrb.mxu1 %v1991_v30  ;;  %v2096_v50 = vsel %vm1716_vm12, %v8017_v38, 0 }
 0x46a   :  { %1577 = vadd.xlane.f32.xlu2 %v1576_v56 }
 0x46b   :  { %v8282_v41 = vpop.xlane.xlu2 %1406 }
 0x46c   :  { %v1383_v14 = vpop.xlane.xlu1 %1382  ;;  %v8292_v24 = vpop.xlane.xlu0 %1568 }
 0x46d   :  { %v1441_v48 = vsub.f32 %v8166_v36, %v1383_v14  ;;  %v1451_v14 = vsub.f32 %v8092_v28, %v8233_v58  ;;  %v2054_v28 = vsel %vm1716_vm12, %v7862_v21, 0  ;;  %v2075_v21 = vsel %vm1716_vm12, %v8015_v22, 0 }
 0x46e   :  { %v1452_v22 = vsub.f32 %v8125_v45, %v8263_v18 }
 0x46f   :  { %v8297_v33 = vpop.eup %6723  ;;  %v1491_v32 = vmul.f32 1.442695, %v1441_v48 }
 0x470   :  { %v1564_v31 = vsel %vm563_vm11, %v8297_v33, 0.0 }
 0x471   :  { %6725 = vpow2.f32 %v1491_v32  ;;  %1565 = vadd.xlane.f32.xlu1 %v1564_v31 }
 0x472   :  { %1586 = vadd.xlane.f32.xlu2 %v1585_v34 }
 0x473   :  { %v1410_v17 = vpop.xlane.xlu2 %1409 }
 0x474   :  { %v1450_v25 = vsub.f32 %v8172_v52, %v1410_v17  ;;  %v1392_v36 = vpop.xlane.xlu1 %1391  ;;  %v1551_v15 = vpop.xlane.xlu0 %1550  ;;  %v1448_v52 = vsub.f32 %v8107_v51, %v8250_v19  ;;  %v1446_v19 = vsub.f32 %v8140_v61, %v8267_v47  ;;  %v1511_v47 = vmul.f32 1.442695, %v1451_v14 }
 0x475   :  { %v1444_v2 = vsub.f32 %v8182_v10, %v1392_v36 }
 0x476   :  { %v1509_v57 = vmul.f32 1.442695, %v1450_v25  ;;  %v1505_v6 = vmul.f32 1.442695, %v1448_v52 }
 0x477   :  { %v8305_v26 = vpop.eup %6725  ;;  %v1497_v63 = vmul.f32 1.442695, %v1444_v2 }
 0x478   :  { %6727 = vpow2.f32 %v1509_v57  ;;  %v1573_v8 = vsel %vm563_vm11, %v8305_v26, 0.0 }
 0x479   :  { %6729 = vrcp.f32 %v1551_v15  ;;  %1574 = vadd.xlane.f32.xlu0 %v1573_v8  ;;  %v1453_v8 = vsub.f32 %v8152_v59, %v8276_v12 }
 0x47a   :  { %6731 = vpow2.f32 %v1497_v63  ;;  %v2159_v63 = vsel %vm1716_vm12, %v7873_v44, 0 }
 0x47b   :  { %6733 = vpow2.f32 %v1505_v6 }
 0x47c   :  { %v8316_v27 = vpop.xlane.xlu1 %1421  ;;  %v1560_v34 = vpop.xlane.xlu0 %1559 }
 0x47d   :  { %v1454_v44 = vsub.f32 %v8192_v35, %v8316_v27 }
 0x47e   :  { %v8311_v43 = vpop.eup %6727 }
 0x47f   :  { %v6730_v11 = vpop.eup %6729  ;;  %v1600_v42 = vsel %vm563_vm11, %v8311_v43, 0.0 }
 0x480   :  { %v1657_v10 = vmul.f32 %v6730_v11, %v8184_v54  ;;  %1601 = vadd.xlane.f32.xlu2 %v1600_v42  ;;  %v8318_v51 = vpop.eup %6731  ;;  %v1501_v54 = vmul.f32 1.442695, %v1446_v19 }
 0x481   :  { %v1582_v7 = vsel %vm563_vm11, %v8318_v51, 0.0  ;;  %v8327_v56 = vpop.eup %6733 }
 0x482   :  { %v1689_v3 = vpack.c.bf16 %v1657_v10, %v1657_v10  ;;  %1583 = vadd.xlane.f32.xlu0 %v1582_v7  ;;  %v1594_v61 = vsel %vm563_vm11, %v8327_v56, 0.0 }
 0x484   :  { %6154 = vmatmul.msk.bf16.vlgmr.msrb.gmra.mxu2 %vm563_vm11, %v1689_v3  ;;  %v1545_v30 = vpop.xlane.xlu1 %1544 }
 0x485   :  { %2105 = vmatpush.bf16.msrb.mxu2 %v2096_v50  ;;  %6735 = vrcp.f32 %v1545_v30 }
 0x486   :  { %6737 = vpow2.f32 %v1501_v54  ;;  %v2117_v54 = vsel %vm1716_vm12, %v8019_v13, 0 }
 0x48a   :  { %1595 = vadd.xlane.f32.xlu0 %v1594_v61  ;;  %2279 = vrot.lane.b32.xlu1 %v7756_v46, %s7171_s26 }
 0x48b   :  { %v6736_v38 = vpop.eup %6735 }
 0x48c   :  { %v1655_v48 = vmul.f32 %v6736_v38, %v8201_v4  ;;  %v1548_v32 = vpop.xlane.xlu1 %1547  ;;  %v8336_v17 = vpop.eup %6737 }
 0x48d   :  { %6739 = vrcp.f32 %v1548_v32  ;;  %v1588_v58 = vsel %vm563_vm11, %v8336_v17, 0.0 }
 0x48e   :  { %v1687_v25 = vpack.c.bf16 %v1655_v48, %v1655_v48  ;;  %6741 = vpow2.f32 %v1511_v47 }
 0x48f   :  { %6743 = vrcp.f32 %v1560_v34 }
 0x490   :  { %6152 = vmatmul.msk.bf16.vlgmr.msrb.gmra.mxu0 %vm563_vm11, %v1687_v25  ;;  %v10240_v25 = vld [vmem:[#allocation33_spill] sm:$0xff] }
 0x491   :  { %2063 = vmatpush.bf16.msrb.mxu0 %v2054_v28  ;;  %v2180_v13 = vsel %vm1716_vm12, %v10240_v25, 0 }
 0x492   :  { %1589 = vadd.xlane.f32.xlu0 %v1588_v58 }
 0x493   :  { %v6740_v46 = vpop.eup %6739 }
 0x494   :  { %v1656_v31 = vmul.f32 %v6740_v46, %v8205_v62  ;;  %v8346_v4 = vpop.eup %6741  ;;  %v1449_v62 = vsub.f32 %v8156_v5, %v8282_v41  ;;  %v1513_v5 = vmul.f32 1.442695, %v1452_v22 }
 0x495   :  { %v1603_v36 = vsel %vm563_vm11, %v8346_v4, 0.0  ;;  %v6744_v15 = vpop.eup %6743 }
 0x496   :  { %v1688_v57 = vpack.c.bf16 %v1656_v31, %v1656_v31  ;;  %v1507_v2 = vmul.f32 1.442695, %v1449_v62  ;;  %v10241_v31 = vld [vmem:[#allocation34_spill] sm:$0xff] }
 0x497   :  { %v2138_v34 = vsel %vm1716_vm12, %v10241_v31, 0 }
 0x498   :  { %2300 = vrot.lane.b32.xlu2 %v7667_v23, %s7171_s26  ;;  %6153 = vmatmul.msk.bf16.vlgmr.msra.gmra.mxu1 %vm563_vm11, %v1688_v57  ;;  %v1660_v23 = vmul.f32 %v6744_v15, %v8194_v9  ;;  %6745 = vpow2.f32 %v1507_v2  ;;  %v1515_v9 = vmul.f32 1.442695, %v1453_v8  ;;  %v10243_v8 = vld [vmem:[#allocation35_spill] sm:$0xff] }
 0x499   :  { %2084 = vmatpush.bf16.msra.mxu1 %v2075_v21  ;;  %6747 = vpow2.f32 %v1513_v5  ;;  %v2222_v5 = vsel %vm1716_vm12, %v10243_v8, 0 }
 0x49a   :  { %1604 = vadd.xlane.f32.xlu0 %v1603_v36  ;;  %v1692_v52 = vpack.c.bf16 %v1660_v23, %v1660_v23  ;;  %6749 = vpow2.f32 %v1515_v9  ;;  %v10244_v9 = vld [vmem:[#allocation36_spill] sm:$0xff] }
 0x49e   :  { %v8365_v41 = vpop.eup %6745 }
 0x49f   :  { %v1597_v11 = vsel %vm563_vm11, %v8365_v41, 0.0  ;;  %v8375_v59 = vpop.eup %6747 }
 0x4a0   :  { %v8379_v6 = vpop.eup %6749  ;;  %v1606_v42 = vsel %vm563_vm11, %v8375_v59, 0.0 }
 0x4a1   :  { %v1609_v3 = vsel %vm563_vm11, %v8379_v6, 0.0 }
 0x4a8   :  { %6157 = vmatmul.msk.bf16.vlgmr.msrb.gmra.mxu1 %vm563_vm11, %v1692_v52 }
 0x4a9   :  { %2168 = vmatpush.bf16.msrb.mxu1 %v2159_v63  ;;  %v10242_v63 = vld [vmem:[#allocation25_spill] sm:$0xff] }
 0x4ae   :  { %2321 = vrot.lane.b32.xlu0 %v7723_v1, %s7171_s26  ;;  %v1517_v1 = vmul.f32 1.442695, %v1454_v44  ;;  %v2243_v44 = vsel %vm1716_vm12, %v10244_v9, 0 }
 0x4b4   :  { %1598 = vadd.xlane.f32.xlu1 %v1597_v11  ;;  %v2259_v11 = vpop.permute.xlu0 %2258 }
 0x4b5   :  { %v8371_v18 = vpop.f32.mrf.mxu0 }
 0x4b6   :  { %2342 = vrot.lane.b32.xlu0 %v7773_v39, %s7171_s26 }
 0x4b7   :  { %v1554_v45 = vpop.xlane.xlu1 %1553 }
 0x4b8   :  { %6751 = vrcp.f32 %v1554_v45 }
 0x4b9   :  { %6753 = vpow2.f32 %v1517_v1 }
 0x4bb   :  { %v8377_v12 = vpop.f32.mrf.mxu1 }
 0x4bc   :  { %1607 = vadd.xlane.f32.xlu1 %v1606_v42 }
 0x4bd   :  { %v1731_v39 = vpop.f32.mrf.mxu0 }
 0x4be   :  { %v6752_v35 = vpop.eup %6751 }
 0x4bf   :  { %v1658_v10 = vmul.f32 %v6752_v35, %v8221_v29  ;;  %v1581_v27 = vpop.xlane.xlu1 %1580  ;;  %v8386_v7 = vpop.eup %6753 }
 0x4c0   :  { %v1612_v29 = vsel %vm563_vm11, %v8386_v7, 0.0 }
 0x4c1   :  { %1610 = vadd.xlane.f32.xlu2 %v1609_v3  ;;  %v1690_v19 = vpack.c.bf16 %v1658_v10, %v1658_v10 }
 0x4c3   :  { %v1563_v50 = vpop.xlane.xlu2 %1562  ;;  %v1752_v30 = vpop.f32.mrf.mxu1  ;;  %6155 = vmatmul.msk.bf16.vlgmr.msrb.gmra.mxu3 %vm563_vm11, %v1690_v19 }
 0x4c4   :  { %6755 = vrcp.f32 %v1563_v50  ;;  %2126 = vmatpush.bf16.msrb.mxu3 %v2117_v54  ;;  %1613 = vadd.xlane.f32.xlu1 %v1612_v29 }
 0x4c5   :  { %v8393_v61 = vpop.f32.mrf.mxu0 }
 0x4c7   :  { %v1557_v14 = vpop.xlane.xlu1 %1556 }
 0x4c8   :  { %6757 = vrcp.f32 %v1557_v14 }
 0x4c9   :  { %6759 = vrcp.f32 %v8292_v24 }
 0x4ca   :  { %v6756_v38 = vpop.eup %6755 }
 0x4cb   :  { %v1661_v47 = vmul.f32 %v6756_v38, %v8238_v40  ;;  %v10245_v38 = vld [vmem:[#allocation37_spill] sm:$0xff] }
 0x4cd   :  { %v1693_v48 = vpack.c.bf16 %v1661_v47, %v1661_v47  ;;  %v1815_v58 = vpop.f32.mrf.mxu0  ;;  %v2201_v47 = vsel %vm1716_vm12, %v10245_v38, 0 }
 0x4ce   :  { %v6758_v32 = vpop.eup %6757 }
 0x4cf   :  { %6158 = vmatmul.msk.bf16.vlgmr.msra.gmra.mxu2 %vm563_vm11, %v1693_v48  ;;  %v1659_v28 = vmul.f32 %v6758_v32, %v8243_v49  ;;  %v6760_v21 = vpop.eup %6759  ;;  %v1593_v23 = vpop.xlane.xlu1 %1592 }
 0x4d0   :  { %2189 = vmatpush.bf16.msra.mxu2 %v2180_v13  ;;  %v1663_v36 = vmul.f32 %v6760_v21, %v8168_v0 }
 0x4d1   :  { %v1691_v46 = vpack.c.bf16 %v1659_v28, %v1659_v28 }
 0x4d2   :  { %v1695_v24 = vpack.c.bf16 %v1663_v36, %v1663_v36 }
 0x4d3   :  { %6156 = vmatmul.msk.bf16.vlgmr.msra.gmra.mxu0 %vm563_vm11, %v1691_v46  ;;  %v2264_v46 = vsel %vm1716_vm12, %v2259_v11, 0 }
 0x4d4   :  { %2147 = vmatpush.bf16.msra.mxu0 %v2138_v34  ;;  %v1572_v57 = vpop.xlane.xlu2 %1571 }
 0x4d5   :  { %6761 = vrcp.f32 %v1572_v57 }
 0x4d6   :  { %6763 = vrcp.f32 %v1581_v27 }
 0x4d7   :  { %v8404_v40 = vpop.f32.mrf.mxu2 }
 0x4db   :  { %v6762_v15 = vpop.eup %6761  ;;  %v8407_v62 = vpop.f32.mrf.mxu3 }
 0x4dc   :  { %v1664_v2 = vmul.f32 %v6762_v15, %v8265_v20  ;;  %v6764_v35 = vpop.eup %6763 }
 0x4dd   :  { %v1578_v52 = vpop.xlane.xlu2 %1577  ;;  %2363 = vrot.lane.b32.xlu1 %v10242_v63, %s7171_s26  ;;  %v1667_v10 = vmul.f32 %v6764_v35, %v8228_v55 }
 0x4de   :  { %v1696_v22 = vpack.c.bf16 %v1664_v2, %v1664_v2 }
 0x4df   :  { %v1773_v49 = vpop.f32.mrf.mxu2  ;;  %v1699_v54 = vpack.c.bf16 %v1667_v10, %v1667_v10 }
 0x4e0   :  { %6161 = vmatmul.msk.bf16.vlgmr.msra.gmra.mxu1 %vm563_vm11, %v1696_v22 }
 0x4e1   :  { %2252 = vmatpush.bf16.msra.mxu1 %v2243_v44 }
 0x4e3   :  { %6160 = vmatmul.msk.bf16.vlgmr.msrb.gmra.mxu0 %vm563_vm11, %v1695_v24  ;;  %v1794_v0 = vpop.f32.mrf.mxu3 }
 0x4e4   :  { %2231 = vmatpush.bf16.msrb.mxu0 %v2222_v5  ;;  %v1566_v45 = vpop.xlane.xlu1 %1565 }
 0x4e5   :  { %6765 = vrcp.f32 %v1566_v45  ;;  %v8420_v1 = vpop.f32.mrf.mxu1  ;;  %v1587_v42 = vpop.xlane.xlu2 %1586 }
 0x4e7   :  { %v8418_v20 = vpop.f32.mrf.mxu2 }
 0x4eb   :  { %v6766_v3 = vpop.eup %6765  ;;  %v8423_v19 = vpop.f32.mrf.mxu3 }
 0x4ec   :  { %v1662_v27 = vmul.f32 %v6766_v3, %v8297_v33  ;;  %v1575_v50 = vpop.xlane.xlu0 %1574 }
 0x4ed   :  { %6767 = vrcp.f32 %v1575_v50  ;;  %v1836_v29 = vpop.f32.mrf.mxu1 }
 0x4ee   :  { %v1694_v30 = vpack.c.bf16 %v1662_v27, %v1662_v27  ;;  %6769 = vrcp.f32 %v1578_v52 }
 0x4ef   :  { %v1857_v39 = vpop.f32.mrf.mxu2  ;;  %6771 = vrcp.f32 %v1593_v23 }
 0x4f0   :  { %6159 = vmatmul.msk.bf16.vlgmr.msra.gmra.mxu3 %vm563_vm11, %v1694_v30 }
 0x4f1   :  { %2210 = vmatpush.bf16.msra.mxu3 %v2201_v47 }
 0x4f3   :  { %v1602_v14 = vpop.xlane.xlu2 %1601  ;;  %6164 = vmatmul.msk.bf16.vlgmr.msra.gmra.mxu0 %vm563_vm11, %v1699_v54  ;;  %v6768_v55 = vpop.eup %6767 }
 0x4f4   :  { %v1878_v48 = vpop.f32.mrf.mxu3  ;;  %v1665_v33 = vmul.f32 %v6768_v55, %v8305_v26  ;;  %v6770_v13 = vpop.eup %6769 }
 0x4f5   :  { %v1584_v32 = vpop.xlane.xlu0 %1583  ;;  %v6772_v58 = vpop.eup %6771  ;;  %v1666_v34 = vmul.f32 %v6770_v13, %v8280_v37 }
 0x4f6   :  { %6773 = vrcp.f32 %v1584_v32  ;;  %v1697_v25 = vpack.c.bf16 %v1665_v33, %v1665_v33  ;;  %v1671_v26 = vmul.f32 %v6772_v58, %v8253_v60 }
 0x4f7   :  { %6775 = vrcp.f32 %v1587_v42  ;;  %v1698_v49 = vpack.c.bf16 %v1666_v34, %v1666_v34 }
 0x4f8   :  { %6162 = vmatmul.msk.bf16.vlgmr.msrb.gmra.mxu2 %vm563_vm11, %v1697_v25  ;;  %v1703_v52 = vpack.c.bf16 %v1671_v26, %v1671_v26 }
 0x4f9   :  { %2273 = vmatpush.bf16.msrb.mxu2 %v2264_v46 }
 0x4fb   :  { %v2301_v28 = vpop.permute.xlu2 %2300 }
 0x4fc   :  { %v2306_v31 = vsel %vm1716_vm12, %v2301_v28, 0  ;;  %v6774_v57 = vpop.eup %6773  ;;  %v2280_v15 = vpop.permute.xlu1 %2279 }
 0x4fd   :  { %2315 = vmatpush.bf16.msra.mxu0 %v2306_v31  ;;  %v1668_v21 = vmul.f32 %v6774_v57, %v8318_v51  ;;  %v1596_v36 = vpop.xlane.xlu0 %1595  ;;  %v6776_v2 = vpop.eup %6775  ;;  %v2285_v63 = vsel %vm1716_vm12, %v2280_v15, 0 }
 0x4fe   :  { %6777 = vrcp.f32 %v1596_v36  ;;  %v1669_v60 = vmul.f32 %v6776_v2, %v8295_v53 }
 0x4ff   :  { %v1700_v23 = vpack.c.bf16 %v1668_v21, %v1668_v21 }
 0x500   :  { %6163 = vmatmul.msk.bf16.vlgmr.msrb.gmra.mxu3 %vm563_vm11, %v1698_v49  ;;  %v1701_v24 = vpack.c.bf16 %v1669_v60, %v1669_v60 }
 0x501   :  { %6165 = vmatmul.msk.bf16.vlgmr.msrb.gmra.mxu1 %vm563_vm11, %v1700_v23  ;;  %2294 = vmatpush.bf16.msrb.mxu3 %v2285_v63 }
 0x503   :  { %6168 = vmatmul.msk.bf16.vlgmr.msrb.gmra.mxu0 %vm563_vm11, %v1703_v52 }
 0x504   :  { %v6778_v22 = vpop.eup %6777 }
 0x505   :  { %v1590_v51 = vpop.xlane.xlu0 %1589  ;;  %v1672_v8 = vmul.f32 %v6778_v22, %v8327_v56 }
 0x506   :  { %6779 = vrcp.f32 %v1590_v51 }
 0x507   :  { %v8442_v37 = vpop.f32.mrf.mxu2  ;;  %v1704_v45 = vpack.c.bf16 %v1672_v8, %v1672_v8 }
 0x508   :  { %6166 = vmatmul.msk.bf16.vlgmr.msra.gmra.mxu2 %vm563_vm11, %v1701_v24 }
 0x50c   :  { %v6780_v5 = vpop.eup %6779 }
 0x50d   :  { %v1670_v44 = vmul.f32 %v6780_v5, %v8336_v17  ;;  %v1605_v0 = vpop.xlane.xlu0 %1604  ;;  %v1897_v11 = vpop.f32.mrf.mxu0 }
 0x50e   :  { %6781 = vrcp.f32 %v1605_v0 }
 0x50f   :  { %v1941_v9 = vpop.f32.mrf.mxu2  ;;  %v1702_v35 = vpack.c.bf16 %v1670_v44, %v1670_v44  ;;  %6783 = vrcp.f32 %v1602_v14 }
 0x511   :  { %6167 = vmatmul.msk.bf16.vlgmr.msra.gmra.mxu3 %vm563_vm11, %v1702_v35  ;;  %6169 = vmatmul.msk.bf16.vlgmr.msra.gmra.mxu1 %vm563_vm11, %v1704_v45 }
 0x514   :  { %v6782_v53 = vpop.eup %6781 }
 0x515   :  { %v1675_v42 = vmul.f32 %v6782_v53, %v8346_v4  ;;  %v1899_v10 = vpop.f32.mrf.mxu0  ;;  %v1918_v3 = vpop.f32.mrf.mxu1 }
 0x516   :  { %v6462_v39 = vpack.i.bf16 %v1918_v3, %v1897_v11  ;;  %v6784_v27 = vpop.eup %6783 }
 0x517   :  { %v1707_v56 = vpack.c.bf16 %v1675_v42, %v1675_v42  ;;  %v1674_v17 = vmul.f32 %v6784_v27, %v8311_v43 }
 0x518   :  { %6463 = vrot.lane.b32.xlu0 %v6462_v39, %s7184_s5 }
 0x519   :  { %6172 = vmatmul.msk.bf16.vlgmr.msra.gmra.mxu0 %vm563_vm11, %v1707_v56  ;;  %v1706_v54 = vpack.c.bf16 %v1674_v17, %v1674_v17 }
 0x51d   :  { %v1920_v50 = vpop.f32.mrf.mxu1 }
 0x520   :  { %v2322_v30 = vpop.permute.xlu0 %2321 }
 0x521   :  { %v2327_v29 = vsel %vm1716_vm12, %v2322_v30, 0  ;;  %6171 = vmatmul.msk.bf16.vlgmr.msrb.gmra.mxu3 %vm563_vm11, %v1706_v54 }
 0x522   :  { %2336 = vmatpush.bf16.msrb.mxu1 %v2327_v29 }
 0x525   :  { %v8455_v4 = vpop.f32.mrf.mxu1 }
 0x527   :  { %v1599_v38 = vpop.xlane.xlu1 %1598 }
 0x528   :  { %v2343_v14 = vpop.permute.xlu0 %2342  ;;  %6785 = vrcp.f32 %v1599_v38 }
 0x529   :  { %v2348_v47 = vsel %vm1716_vm12, %v2343_v14, 0 }
 0x52a   :  { %2357 = vmatpush.bf16.msra.mxu2 %v2348_v47 }
 0x52d   :  { %v2004_v55 = vpop.f32.mrf.mxu1 }
 0x52e   :  { %v6786_v48 = vpop.eup %6785 }
 0x52f   :  { %v1673_v43 = vmul.f32 %v6786_v48, %v8365_v41  ;;  %v1608_v33 = vpop.xlane.xlu1 %1607 }
 0x530   :  { %6787 = vrcp.f32 %v1608_v33 }
 0x531   :  { %v1705_v32 = vpack.c.bf16 %v1673_v43, %v1673_v43 }
 0x533   :  { %6170 = vmatmul.msk.bf16.vlgmr.msrb.gmra.mxu2 %vm563_vm11, %v1705_v32 }
 0x534   :  { %v1611_v25 = vpop.xlane.xlu2 %1610 }
 0x535   :  { %6789 = vrcp.f32 %v1611_v25 }
 0x536   :  { %v6788_v13 = vpop.eup %6787 }
 0x537   :  { %v1676_v28 = vmul.f32 %v6788_v13, %v8375_v59  ;;  %v1614_v57 = vpop.xlane.xlu1 %1613 }
 0x538   :  { %6791 = vrcp.f32 %v1614_v57 }
 0x539   :  { %v1708_v58 = vpack.c.bf16 %v1676_v28, %v1676_v28 }
 0x53b   :  { %v6790_v46 = vpop.eup %6789  ;;  %6173 = vmatmul.msk.bf16.vlgmr.msrb.gmra.mxu1 %vm563_vm11, %v1708_v58 }
 0x53c   :  { %v1677_v31 = vmul.f32 %v6790_v46, %v8379_v6 }
 0x53e   :  { %v1709_v34 = vpack.c.bf16 %v1677_v31, %v1677_v31  ;;  %v6792_v21 = vpop.eup %6791 }
 0x53f   :  { %v1678_v49 = vmul.f32 %v6792_v21, %v8386_v7  ;;  %v6365_v21 = vld [vmem:[#allocation5] sm:$0xff] }
 0x541   :  { %v1710_v6 = vpack.c.bf16 %v1678_v49, %v1678_v49 }
 0x543   :  { %6174 = vmatmul.msk.bf16.vlgmr.msra.gmra.mxu2 %vm563_vm11, %v1709_v34 }
 0x546   :  { %v1960_v26 = vpop.f32.mrf.mxu3 }
 0x547   :  { %v6477_v41 = vpack.i.bf16 %v1960_v26, %v8442_v37  ;;  %v6366_v26 = vld [vmem:[#allocation5 + $0x8] sm:$0xff] }
 0x548   :  { %2545 = vmatpush.bf16.msrb.mxu0 %v6366_v26 }
 0x54c   :  { %2546 = vmatpush.bf16.msrb.mxu0 %v6365_v21 }
 0x54e   :  { %v1962_v36 = vpop.f32.mrf.mxu3 }
 0x54f   :  { %v2364_v2 = vpop.permute.xlu1 %2363 }
 0x550   :  { %v1981_v15 = vpop.f32.mrf.mxu0  ;;  %v2369_v52 = vsel %vm1716_vm12, %v2364_v2, 0 }
 0x551   :  { %v6492_v59 = vpack.i.bf16 %v8455_v4, %v1981_v15  ;;  %2378 = vmatpush.bf16.msra.mxu3 %v2369_v52 }
 0x552   :  { %v2023_v23 = vpop.f32.mrf.mxu2 }
 0x554   :  { %6175 = vmatmul.msk.bf16.vlgmr.msra.gmra.mxu3 %vm563_vm11, %v1710_v6 }
 0x558   :  { %v1983_v63 = vpop.f32.mrf.mxu0 }
 0x55a   :  { %v2025_v60 = vpop.f32.mrf.mxu2 }
 0x55d   :  { %v2086_v37 = vpop.f32.mrf.mxu1 }
 0x560   :  { %v2065_v51 = vpop.f32.mrf.mxu0 }
 0x561   :  { %v6467_v24 = vpack.i.bf16 %v2086_v37, %v2065_v51 }
 0x563   :  { %6468 = vrot.lane.b32.xlu0 %v6467_v24, %s7174_s17 }
 0x565   :  { %v2088_v8 = vpop.f32.mrf.mxu1 }
 0x568   :  { %v2067_v22 = vpop.f32.mrf.mxu0 }
 0x570   :  { %v2149_v7 = vpop.f32.mrf.mxu0 }
 0x573   :  { %v2044_v5 = vpop.f32.mrf.mxu3 }
 0x574   :  { %v6507_v29 = vpack.i.bf16 %v2044_v5, %v2023_v23 }
 0x578   :  { %v2151_v9 = vpop.f32.mrf.mxu0 }
 0x57b   :  { %v2046_v44 = vpop.f32.mrf.mxu3  ;;  %v2107_v0 = vpop.f32.mrf.mxu2 }
 0x57e   :  { %v2170_v11 = vpop.f32.mrf.mxu1 }
 0x57f   :  { %v6497_v27 = vpack.i.bf16 %v2170_v11, %v2149_v7 }
 0x580   :  { %v2233_v45 = vpop.f32.mrf.mxu0 }
 0x583   :  { %v2109_v35 = vpop.f32.mrf.mxu2  ;;  %v2128_v53 = vpop.f32.mrf.mxu3 }
 0x584   :  { %v6482_v42 = vpack.i.bf16 %v2128_v53, %v2107_v0 }
 0x586   :  { %v2172_v10 = vpop.f32.mrf.mxu1  ;;  %6483 = vrot.lane.b32.xlu1 %v6482_v42, %s7174_s17 }
 0x588   :  { %v2235_v3 = vpop.f32.mrf.mxu0 }
 0x58a   :  { %v6464_v36 = vpop.permute.xlu0 %6463 }
 0x58b   :  { %v2130_v56 = vpop.f32.mrf.mxu3  ;;  %v2191_v39 = vpop.f32.mrf.mxu2  ;;  %v6466_v49 = vunpack.i.h.bf16 %v6464_v36 }
 0x58d   :  { %v2481_v6 = vsel %vm563_vm11, %v8377_v12, %v6466_v49 }
 0x58e   :  { %v2254_v17 = vpop.f32.mrf.mxu1  ;;  %6498 = vrot.lane.b32.xlu1 %v6497_v27, %s7174_s17 }
 0x58f   :  { %v6472_v50 = vpack.i.bf16 %v2254_v17, %v2233_v45 }
 0x591   :  { %6473 = vrot.lane.b32.xlu0 %v6472_v50, %s7185_s27 }
 0x593   :  { %v2193_v54 = vpop.f32.mrf.mxu2 }
 0x594   :  { %v2212_v30 = vpop.f32.mrf.mxu3 }
 0x595   :  { %v6512_v58 = vpack.i.bf16 %v2212_v30, %v2191_v39 }
 0x596   :  { %v2256_v4 = vpop.f32.mrf.mxu1  ;;  %v2317_v14 = vpop.f32.mrf.mxu0  ;;  %6508 = vrot.lane.b32.xlu1 %v6507_v29, %s7184_s5 }
 0x599   :  { %6478 = vrot.lane.b32.xlu0 %v6477_v41, %s7184_s5 }
 0x59c   :  { %v2214_v38 = vpop.f32.mrf.mxu3 }
 0x59e   :  { %v2319_v47 = vpop.f32.mrf.mxu0 }
 0x5a1   :  { %6493 = vrot.lane.b32.xlu0 %v6492_v59, %s7184_s5  ;;  %v6465_v59 = vunpack.i.l.bf16 %v6464_v36 }
 0x5a3   :  { %v2480_v63 = vsel %vm563_vm11, %v8371_v18, %v6465_v59 }
 0x5a4   :  { %v2296_v55 = vpop.f32.mrf.mxu3 }
 0x5ac   :  { %v2298_v48 = vpop.f32.mrf.mxu3 }
 0x5b6   :  { %v2275_v43 = vpop.f32.mrf.mxu2 }
 0x5b7   :  { %v6487_v33 = vpack.i.bf16 %v2296_v55, %v2275_v43 }
 0x5b8   :  { %v2338_v32 = vpop.f32.mrf.mxu1 }
 0x5b9   :  { %v6502_v25 = vpack.i.bf16 %v2338_v32, %v2317_v14  ;;  %6488 = vrot.lane.b32.xlu2 %v6487_v33, %s7185_s27 }
 0x5bb   :  { %6503 = vrot.lane.b32.xlu0 %v6502_v25, %s7185_s27 }
 0x5be   :  { %v2277_v13 = vpop.f32.mrf.mxu2 }
 0x5c0   :  { %v2340_v28 = vpop.f32.mrf.mxu1 }
 0x5c3   :  { %6513 = vrot.lane.b32.xlu0 %v6512_v58, %s7174_s17 }
 0x5c6   :  { %v2359_v46 = vpop.f32.mrf.mxu2 }
 0x5ce   :  { %v2361_v31 = vpop.f32.mrf.mxu2 }
 0x5d5   :  { %v6469_v15 = vpop.permute.xlu0 %6468 }
 0x5d6   :  { %v6471_v23 = vunpack.i.h.bf16 %v6469_v15  ;;  %v6470_v2 = vunpack.i.l.bf16 %v6469_v15 }
 0x5d7   :  { %v2380_v34 = vpop.f32.mrf.mxu3 }
 0x5d8   :  { %v6517_v57 = vpack.i.bf16 %v2380_v34, %v2359_v46  ;;  %v2490_v37 = vsel %vm2488_vm13, %v2481_v6, %v6471_v23  ;;  %v2489_v24 = vsel %vm2488_vm13, %v2480_v63, %v6470_v2  ;;  %v10246_v2 = vld [vmem:[#allocation18_spill] sm:$0xff] }
 0x5da   :  { %6518 = vrot.lane.b32.xlu1 %v6517_v57, %s7185_s27 }
 0x5df   :  { %v2382_v41 = vpop.f32.mrf.mxu3 }
 0x5f8   :  { %v6484_v12 = vpop.permute.xlu1 %6483 }
 0x5f9   :  { %v6486_v11 = vunpack.i.h.bf16 %v6484_v12  ;;  %v6485_v45 = vunpack.i.l.bf16 %v6484_v12 }
 0x603   :  { %v6474_v52 = vpop.permute.xlu0 %6473 }
 0x604   :  { %v6476_v60 = vunpack.i.h.bf16 %v6474_v52  ;;  %v6475_v51 = vunpack.i.l.bf16 %v6474_v52 }
 0x606   :  { %v2499_v22 = vsel %vm2497_vm14, %v2490_v37, %v6476_v60  ;;  %v2498_v8 = vsel %vm2497_vm14, %v2489_v24, %v6475_v51  ;;  %v10247_v51 = vld [vmem:[#allocation17_spill] sm:$0xff] }
 0x607   :  { %v2506_v7 = vpack.c.bf16 %v2499_v22, %v2498_v8 }
 0x609   :  { %6184 = vmatmul.msk.bf16.vlgmr.msrb.gmra.mxu0 %vm178_vm0, %v2506_v7  ;;  %v10248_v7 = vld [vmem:[#allocation19_spill] sm:$0xff] }
 0x60b   :  { %v6479_v5 = vpop.permute.xlu0 %6478 }
 0x60c   :  { %v6481_v9 = vunpack.i.h.bf16 %v6479_v5  ;;  %v6480_v44 = vunpack.i.l.bf16 %v6479_v5 }
 0x60e   :  { %v2483_v18 = vsel %vm563_vm11, %v8407_v62, %v6481_v9  ;;  %v2482_v0 = vsel %vm563_vm11, %v8404_v40, %v6480_v44  ;;  %v6499_v40 = vpop.permute.xlu1 %6498 }
 0x60f   :  { %v2491_v10 = vsel %vm2488_vm13, %v2482_v0, %v6485_v45  ;;  %v2492_v3 = vsel %vm2488_vm13, %v2483_v18, %v6486_v11  ;;  %v6501_v29 = vunpack.i.h.bf16 %v6499_v40  ;;  %v6500_v4 = vunpack.i.l.bf16 %v6499_v40  ;;  %v10249_v18 = vld [vmem:[#allocation20_spill] sm:$0xff]  ;;  %v10252_v40 = vld [vmem:[#allocation23_spill] sm:$0xff] }
 0x613   :  { %v6489_v35 = vpop.permute.xlu2 %6488  ;;  %v6494_v62 = vpop.permute.xlu0 %6493 }
 0x614   :  { %v6491_v53 = vunpack.i.h.bf16 %v6489_v35  ;;  %v6490_v42 = vunpack.i.l.bf16 %v6489_v35  ;;  %v6496_v17 = vunpack.i.h.bf16 %v6494_v62  ;;  %v6495_v50 = vunpack.i.l.bf16 %v6494_v62 }
 0x616   :  { %v2501_v56 = vsel %vm2497_vm14, %v2492_v3, %v6491_v53  ;;  %v2500_v39 = vsel %vm2497_vm14, %v2491_v10, %v6490_v42  ;;  %v2485_v54 = vsel %vm563_vm11, %v8420_v1, %v6496_v17  ;;  %v2484_v30 = vsel %vm563_vm11, %v8393_v61, %v6495_v50  ;;  %v6509_v1 = vpop.permute.xlu1 %6508  ;;  %v10250_v53 = vld [vmem:[#allocation22_spill] sm:$0xff] }
 0x617   :  { %v2507_v27 = vpack.c.bf16 %v2501_v56, %v2500_v39  ;;  %v2493_v55 = vsel %vm2488_vm13, %v2484_v30, %v6500_v4  ;;  %v2494_v48 = vsel %vm2488_vm13, %v2485_v54, %v6501_v29  ;;  %v6511_v13 = vunpack.i.h.bf16 %v6509_v1  ;;  %v10251_v39 = vld [vmem:[#allocation21_spill] sm:$0xff]  ;;  %v10253_v4 = vld [vmem:[#allocation16_spill] sm:$0xff] }
 0x618   :  { %v6510_v61 = vunpack.i.l.bf16 %v6509_v1 }
 0x619   :  { %6185 = vmatmul.msk.bf16.gmra.mxu0 %vm178_vm0, %v2507_v27  ;;  %v2487_v31 = vsel %vm563_vm11, %v8423_v19, %v6511_v13  ;;  %v8519_v19 = vld [vmem:[%s10174_s6] sm:$0x3f] }
 0x61a   :  { %v2486_v34 = vsel %vm563_vm11, %v8418_v20, %v6510_v61  ;;  %v2514_v20 = vperm.slane %v8519_v19, 0 }
 0x62d   :  { %v6504_v14 = vpop.permute.xlu0 %6503 }
 0x62e   :  { %v6506_v38 = vunpack.i.h.bf16 %v6504_v14  ;;  %v6505_v47 = vunpack.i.l.bf16 %v6504_v14 }
 0x630   :  { %v2503_v43 = vsel %vm2497_vm14, %v2494_v48, %v6506_v38  ;;  %v2502_v33 = vsel %vm2497_vm14, %v2493_v55, %v6505_v47 }
 0x631   :  { %v2508_v32 = vpack.c.bf16 %v2503_v43, %v2502_v33 }
 0x633   :  { %6186 = vmatmul.msk.bf16.gmra.mxu0 %vm178_vm0, %v2508_v32 }
 0x635   :  { %v6514_v25 = vpop.permute.xlu0 %6513 }
 0x636   :  { %v6516_v28 = vunpack.i.h.bf16 %v6514_v25  ;;  %v6515_v58 = vunpack.i.l.bf16 %v6514_v25  ;;  %v10254_v25 = vld [vmem:[#allocation24_spill] sm:$0xff] }
 0x638   :  { %v2496_v41 = vsel %vm2488_vm13, %v2487_v31, %v6516_v28  ;;  %v2495_v21 = vsel %vm2488_vm13, %v2486_v34, %v6515_v58 }
 0x64c   :  { %v6519_v46 = vpop.permute.xlu1 %6518 }
 0x64d   :  { %v6521_v57 = vunpack.i.h.bf16 %v6519_v46  ;;  %v6520_v26 = vunpack.i.l.bf16 %v6519_v46 }
 0x64f   :  { %v2505_v36 = vsel %vm2497_vm14, %v2496_v41, %v6521_v57  ;;  %v2504_v15 = vsel %vm2497_vm14, %v2495_v21, %v6520_v26 }
 0x650   :  { %v2509_v49 = vpack.c.bf16 %v2505_v36, %v2504_v15 }
 0x652   :  { %6187 = vmatmul.msk.bf16.gmra.mxu0 %vm178_vm0, %v2509_v49 }
 0x686   :  { %v2548_v59 = vpop.f32.mrf.mxu0 }
 0x687   :  { %v2549_v23 = vadd.f32 %v2548_v59, %v2514_v20 }
 0x689   :  { %v2568_v52 = vadd.f32 %v2549_v23, %v10246_v2 }
 0x68b   :  { %v2576_v6 = vsel %vm178_vm0, %v2568_v52, 0.0 }
 0x68c   :  { %2577 = vadd.xlane.f32.xlu2 %v2576_v6 }
 0x68e   :  { %v2550_v63 = vpop.f32.mrf.mxu0 }
 0x68f   :  { %v2551_v60 = vadd.f32 %v2550_v63, %v2514_v20 }
 0x691   :  { %v2569_v37 = vadd.f32 %v2551_v60, %v10247_v51 }
 0x693   :  { %v2579_v24 = vsel %vm178_vm0, %v2569_v37, 0.0 }
 0x694   :  { %2580 = vadd.xlane.f32.xlu0 %v2579_v24 }
 0x696   :  { %v2553_v22 = vpop.f32.mrf.mxu0 }
 0x697   :  { %v2554_v8 = vadd.f32 %v2553_v22, %v2514_v20 }
 0x699   :  { %v2570_v5 = vadd.f32 %v2554_v8, %v10248_v7 }
 0x69b   :  { %v2582_v9 = vsel %vm178_vm0, %v2570_v5, 0.0 }
 0x69c   :  { %2583 = vadd.xlane.f32.xlu1 %v2582_v9 }
 0x69e   :  { %v2555_v44 = vpop.f32.mrf.mxu0 }
 0x69f   :  { %v2556_v12 = vadd.f32 %v2555_v44, %v2514_v20  ;;  %v6368_v44 = vld [vmem:[#allocation7 + $0x8] sm:$0xff] }
 0x6a0   :  { %2812 = vmatpush.bf16.msra.mxu1 %v6368_v44 }
 0x6a1   :  { %v2571_v0 = vadd.f32 %v2556_v12, %v10249_v18 }
 0x6a3   :  { %v2585_v11 = vsel %vm178_vm0, %v2571_v0, 0.0 }
 0x6a4   :  { %2586 = vadd.xlane.f32.xlu2 %v2585_v11 }
 0x6b0   :  { %v2558_v45 = vpop.f32.mrf.mxu0 }
 0x6b1   :  { %v2559_v35 = vadd.f32 %v2558_v45, %v2514_v20 }
 0x6b3   :  { %v2572_v42 = vadd.f32 %v2559_v35, %v10250_v53 }
 0x6b5   :  { %v2588_v10 = vsel %vm178_vm0, %v2572_v42, 0.0 }
 0x6b6   :  { %2589 = vadd.xlane.f32.xlu0 %v2588_v10 }
 0x6b8   :  { %v2560_v3 = vpop.f32.mrf.mxu0 }
 0x6b9   :  { %v2561_v56 = vadd.f32 %v2560_v3, %v2514_v20 }
 0x6bb   :  { %v2573_v27 = vadd.f32 %v2561_v56, %v10251_v39 }
 0x6bd   :  { %v2591_v62 = vsel %vm178_vm0, %v2573_v27, 0.0 }
 0x6be   :  { %2592 = vadd.xlane.f32.xlu1 %v2591_v62 }
 0x6cf   :  { %v2563_v17 = vpop.f32.mrf.mxu0 }
 0x6d0   :  { %v2564_v50 = vadd.f32 %v2563_v17, %v2514_v20 }
 0x6d2   :  { %v2574_v54 = vadd.f32 %v2564_v50, %v10252_v40 }
 0x6d4   :  { %v2594_v30 = vsel %vm178_vm0, %v2574_v54, 0.0 }
 0x6d5   :  { %2595 = vadd.xlane.f32.xlu1 %v2594_v30 }
 0x6d7   :  { %v2565_v47 = vpop.f32.mrf.mxu0 }
 0x6d8   :  { %v2566_v48 = vadd.f32 %v2565_v47, %v2514_v20 }
 0x6da   :  { %v2575_v13 = vadd.f32 %v2566_v48, %v10254_v25 }
 0x6dc   :  { %v2597_v58 = vsel %vm178_vm0, %v2575_v13, 0.0 }
 0x6ff   :  { %v2578_v29 = vpop.xlane.xlu2 %2577 }
 0x700   :  { %v2600_v14 = vmul.f32 %v2578_v29, %v10253_v4 }
 0x702   :  { %v8537_v38 = vsub.f32 %v2568_v52, %v2600_v14 }
 0x704   :  { %v2616_v55 = vmul.f32 %v8537_v38, %v8537_v38 }
 0x706   :  { %v2624_v43 = vsel %vm178_vm0, %v2616_v55, 0.0 }
 0x707   :  { %v2581_v33 = vpop.xlane.xlu0 %2580  ;;  %2625 = vadd.xlane.f32.xlu2 %v2624_v43 }
 0x708   :  { %v2601_v32 = vmul.f32 %v2581_v33, %v10253_v4 }
 0x70a   :  { %v8543_v1 = vsub.f32 %v2569_v37, %v2601_v32 }
 0x70c   :  { %v2617_v61 = vmul.f32 %v8543_v1, %v8543_v1 }
 0x70e   :  { %v2627_v28 = vsel %vm178_vm0, %v2617_v61, 0.0 }
 0x70f   :  { %2628 = vadd.xlane.f32.xlu0 %v2627_v28  ;;  %2598 = vadd.xlane.f32.xlu2 %v2597_v58  ;;  %v2584_v46 = vpop.xlane.xlu1 %2583 }
 0x710   :  { %v2602_v31 = vmul.f32 %v2584_v46, %v10253_v4 }
 0x712   :  { %v8551_v34 = vsub.f32 %v2570_v5, %v2602_v31 }
 0x714   :  { %v2618_v57 = vmul.f32 %v8551_v34, %v8551_v34 }
 0x716   :  { %v2630_v26 = vsel %vm178_vm0, %v2618_v57, 0.0 }
 0x717   :  { %v2587_v41 = vpop.xlane.xlu2 %2586  ;;  %2631 = vadd.xlane.f32.xlu0 %v2630_v26  ;;  %v8595_v26 = vperm.slane %v8519_v19, 2 }
 0x718   :  { %v2603_v21 = vmul.f32 %v2587_v41, %v10253_v4 }
 0x71a   :  { %v8557_v36 = vsub.f32 %v2571_v0, %v2603_v21  ;;  %v6367_v0 = vld [vmem:[#allocation7] sm:$0xff] }
 0x71b   :  { %2813 = vmatpush.bf16.msra.mxu1 %v6367_v0 }
 0x71c   :  { %v2619_v15 = vmul.f32 %v8557_v36, %v8557_v36 }
 0x71e   :  { %v2633_v49 = vsel %vm178_vm0, %v2619_v15, 0.0 }
 0x71f   :  { %2634 = vadd.xlane.f32.xlu1 %v2633_v49 }
 0x729   :  { %v2590_v20 = vpop.xlane.xlu0 %2589 }
 0x72a   :  { %v2604_v59 = vmul.f32 %v2590_v20, %v10253_v4 }
 0x72c   :  { %v8563_v23 = vsub.f32 %v2572_v42, %v2604_v59 }
 0x72e   :  { %v2620_v2 = vmul.f32 %v8563_v23, %v8563_v23 }
 0x730   :  { %v2636_v52 = vsel %vm178_vm0, %v2620_v2, 0.0 }
 0x731   :  { %2637 = vadd.xlane.f32.xlu2 %v2636_v52  ;;  %v2593_v6 = vpop.xlane.xlu1 %2592 }
 0x732   :  { %v2605_v63 = vmul.f32 %v2593_v6, %v10253_v4 }
 0x734   :  { %v8569_v60 = vsub.f32 %v2573_v27, %v2605_v63 }
 0x736   :  { %v2621_v51 = vmul.f32 %v8569_v60, %v8569_v60 }
 0x738   :  { %v2639_v37 = vsel %vm178_vm0, %v2621_v51, 0.0 }
 0x739   :  { %2640 = vadd.xlane.f32.xlu0 %v2639_v37 }
 0x748   :  { %v2596_v24 = vpop.xlane.xlu1 %2595 }
 0x749   :  { %v2606_v22 = vmul.f32 %v2596_v24, %v10253_v4 }
 0x74b   :  { %v8575_v8 = vsub.f32 %v2574_v54, %v2606_v22 }
 0x74d   :  { %v2622_v7 = vmul.f32 %v8575_v8, %v8575_v8 }
 0x74f   :  { %v2642_v5 = vsel %vm178_vm0, %v2622_v7, 0.0 }
 0x750   :  { %2643 = vadd.xlane.f32.xlu1 %v2642_v5 }
 0x77a   :  { %v2626_v9 = vpop.xlane.xlu2 %2625 }
 0x77b   :  { %v2648_v12 = vmul.f32 %v2626_v9, %v10253_v4 }
 0x77d   :  { %v2656_v18 = vadd.f32 1e-12, %v2648_v12 }
 0x77f   :  { %6793 = vrsqrt.f32 %v2656_v18  ;;  %vm2670_vm1 = vweird.f32 %v2656_v18 }
 0x782   :  { %v2629_v11 = vpop.xlane.xlu0 %2628  ;;  %v2599_v45 = vpop.xlane.xlu2 %2598 }
 0x783   :  { %v2649_v35 = vmul.f32 %v2629_v11, %v10253_v4  ;;  %v2607_v53 = vmul.f32 %v2599_v45, %v10253_v4 }
 0x785   :  { %v6794_v42 = vpop.eup %6793  ;;  %v2657_v10 = vadd.f32 1e-12, %v2649_v35  ;;  %v8583_v3 = vsub.f32 %v2575_v13, %v2607_v53  ;;  %v8591_v13 = vperm.slane %v8519_v19, 1 }
 0x786   :  { %v2665_v56 = vmul.f32 %v6794_v42, %v2656_v18  ;;  %vm2671_vm15 = vweird.f32 %v6794_v42 }
 0x787   :  { %6795 = vrsqrt.f32 %v2657_v10  ;;  %v2623_v39 = vmul.f32 %v8583_v3, %v8583_v3  ;;  %vm2672_vm2 = vmor %vm2670_vm1, %vm2671_vm15  ;;  %vm2680_vm4 = vweird.f32 %v2657_v10 }
 0x788   :  { %v2666_v27 = vmul.f32 %v6794_v42, %v2665_v56 }
 0x789   :  { %v2645_v62 = vsel %vm178_vm0, %v2623_v39, 0.0 }
 0x78a   :  { %v2667_v17 = vmul.f32 0.5, %v2666_v27  ;;  %2646 = vadd.xlane.f32.xlu2 %v2645_v62  ;;  %v2632_v50 = vpop.xlane.xlu0 %2631 }
 0x78b   :  { %v2650_v54 = vmul.f32 %v2632_v50, %v10253_v4 }
 0x78c   :  { %v2668_v40 = vsub.f32 1.5, %v2667_v17 }
 0x78d   :  { %v6796_v30 = vpop.eup %6795  ;;  %v2658_v47 = vadd.f32 1e-12, %v2650_v54 }
 0x78e   :  { %v2669_v29 = vmul.f32 %v6794_v42, %v2668_v40  ;;  %v2675_v14 = vmul.f32 %v6796_v30, %v2657_v10  ;;  %vm2681_vm3 = vweird.f32 %v6796_v30 }
 0x78f   :  { %6797 = vrsqrt.f32 %v2658_v47  ;;  %vm2682_vm5 = vmor %vm2680_vm4, %vm2681_vm3  ;;  %vm2690_vm7 = vweird.f32 %v2658_v47 }
 0x790   :  { %v2676_v55 = vmul.f32 %v6796_v30, %v2675_v14  ;;  %v2673_v48 = vsel %vm2672_vm2, %v6794_v42, %v2669_v29 }
 0x791   :  { %v2744_v61 = vmul.f32 %v2673_v48, %v8537_v38 }
 0x792   :  { %v2677_v43 = vmul.f32 0.5, %v2676_v55  ;;  %v2635_v33 = vpop.xlane.xlu1 %2634 }
 0x793   :  { %v2651_v25 = vmul.f32 %v2635_v33, %v10253_v4  ;;  %v2753_v41 = vmul.f32 %v8591_v13, %v2744_v61 }
 0x794   :  { %v2678_v32 = vsub.f32 1.5, %v2677_v43 }
 0x795   :  { %v6798_v28 = vpop.eup %6797  ;;  %v2659_v46 = vadd.f32 1e-12, %v2651_v25  ;;  %v8601_v38 = vadd.f32 %v8595_v26, %v2753_v41 }
 0x796   :  { %v2679_v58 = vmul.f32 %v6796_v30, %v2678_v32  ;;  %v2685_v31 = vmul.f32 %v6798_v28, %v2658_v47  ;;  %vm2691_vm6 = vweird.f32 %v6798_v28 }
 0x797   :  { %6799 = vrsqrt.f32 %v2659_v46  ;;  %vm2692_vm8 = vmor %vm2690_vm7, %vm2691_vm6  ;;  %vm2700_vm10 = vweird.f32 %v2659_v46 }
 0x798   :  { %v2683_v57 = vsel %vm2682_vm5, %v6796_v30, %v2679_v58  ;;  %v2686_v15 = vmul.f32 %v6798_v28, %v2685_v31 }
 0x799   :  { %v2745_v21 = vmul.f32 %v2683_v57, %v8543_v1 }
 0x79a   :  { %v2687_v20 = vmul.f32 0.5, %v2686_v15 }
 0x79b   :  { %v2754_v49 = vmul.f32 %v8591_v13, %v2745_v21 }
 0x79c   :  { %v2688_v2 = vsub.f32 1.5, %v2687_v20 }
 0x79d   :  { %v8604_v59 = vadd.f32 %v8595_v26, %v2754_v49  ;;  %v6800_v52 = vpop.eup %6799 }
 0x79e   :  { %v2689_v63 = vmul.f32 %v6798_v28, %v2688_v2  ;;  %v2695_v51 = vmul.f32 %v6800_v52, %v2659_v46  ;;  %vm2701_vm9 = vweird.f32 %v6800_v52 }
 0x79f   :  { %v2770_v6 = vpack.c.bf16 %v8604_v59, %v8601_v38  ;;  %vm2702_vm15 = vmor %vm2700_vm10, %vm2701_vm9 }
 0x7a0   :  { %v2696_v1 = vmul.f32 %v6800_v52, %v2695_v51  ;;  %v2693_v37 = vsel %vm2692_vm8, %v6798_v28, %v2689_v63 }
 0x7a1   :  { %6196 = vmatmul.msk.bf16.vlgmr.msra.gmra.mxu1 %vm178_vm0, %v2770_v6  ;;  %v2746_v5 = vmul.f32 %v2693_v37, %v8551_v34 }
 0x7a2   :  { %v2697_v24 = vmul.f32 0.5, %v2696_v1 }
 0x7a3   :  { %v2755_v11 = vmul.f32 %v8591_v13, %v2746_v5  ;;  %v6372_v5 = vld [vmem:[%s10177_s9 + $0x18] sm:$0xff] }
 0x7a4   :  { %v2698_v22 = vsub.f32 1.5, %v2697_v24  ;;  %v2638_v7 = vpop.xlane.xlu2 %2637  ;;  %2961 = vmatpush.bf16.msrb.mxu2 %v6372_v5 }
 0x7a5   :  { %v2652_v9 = vmul.f32 %v2638_v7, %v10253_v4  ;;  %v8616_v42 = vadd.f32 %v8595_v26, %v2755_v11 }
 0x7a6   :  { %v2699_v44 = vmul.f32 %v6800_v52, %v2698_v22 }
 0x7a7   :  { %v2660_v12 = vadd.f32 1e-12, %v2652_v9 }
 0x7a8   :  { %v2703_v18 = vsel %vm2702_vm15, %v6800_v52, %v2699_v44 }
 0x7a9   :  { %v2747_v0 = vmul.f32 %v2703_v18, %v8557_v36  ;;  %6801 = vrsqrt.f32 %v2660_v12  ;;  %vm2710_vm2 = vweird.f32 %v2660_v12  ;;  %v6371_v18 = vld [vmem:[%s10177_s9 + $0x10] sm:$0xff] }
 0x7aa   :  { %2962 = vmatpush.bf16.msrb.mxu2 %v6371_v18 }
 0x7ab   :  { %v2756_v45 = vmul.f32 %v8591_v13, %v2747_v0 }
 0x7ac   :  { %v2641_v35 = vpop.xlane.xlu0 %2640 }
 0x7ad   :  { %v2653_v53 = vmul.f32 %v2641_v35, %v10253_v4  ;;  %v8619_v34 = vadd.f32 %v8595_v26, %v2756_v45  ;;  %v6370_v45 = vld [vmem:[%s10177_s9 + $0x8] sm:$0xff] }
 0x7ae   :  { %v8660_v35 = vld [vmem:[#allocation8] ss:$0 sm:$0xff]  ;;  %2963 = vmatpush.bf16.msrb.mxu2 %v6370_v45 }
 0x7af   :  { %v6802_v10 = vpop.eup %6801  ;;  %v2661_v56 = vadd.f32 1e-12, %v2653_v53  ;;  %v2771_v39 = vpack.c.bf16 %v8619_v34, %v8616_v42 }
 0x7b0   :  { %v2705_v36 = vmul.f32 %v6802_v10, %v2660_v12  ;;  %vm2711_vm1 = vweird.f32 %v6802_v10 }
 0x7b1   :  { %6803 = vrsqrt.f32 %v2661_v56  ;;  %6197 = vmatmul.msk.bf16.gmra.mxu1 %vm178_vm0, %v2771_v39  ;;  %vm2712_vm3 = vmor %vm2710_vm2, %vm2711_vm1  ;;  %vm2720_vm5 = vweird.f32 %v2661_v56  ;;  %vm2944_vm2 = vcmask 523264  }
 0x7b2   :  { %v2706_v27 = vmul.f32 %v6802_v10, %v2705_v36 }
 0x7b4   :  { %v2707_v62 = vmul.f32 0.5, %v2706_v27 }
 0x7b6   :  { %v2708_v17 = vsub.f32 1.5, %v2707_v62 }
 0x7b7   :  { %v6804_v50 = vpop.eup %6803 }
 0x7b8   :  { %v2709_v40 = vmul.f32 %v6802_v10, %v2708_v17  ;;  %v2715_v54 = vmul.f32 %v6804_v50, %v2661_v56  ;;  %vm2721_vm4 = vweird.f32 %v6804_v50 }
 0x7b9   :  { %vm2722_vm6 = vmor %vm2720_vm5, %vm2721_vm4 }
 0x7ba   :  { %v2716_v30 = vmul.f32 %v6804_v50, %v2715_v54  ;;  %v2713_v29 = vsel %vm2712_vm3, %v6802_v10, %v2709_v40 }
 0x7bb   :  { %v2748_v55 = vmul.f32 %v2713_v29, %v8563_v23 }
 0x7bc   :  { %v2717_v14 = vmul.f32 0.5, %v2716_v30 }
 0x7bd   :  { %v2757_v32 = vmul.f32 %v8591_v13, %v2748_v55 }
 0x7be   :  { %v2718_v47 = vsub.f32 1.5, %v2717_v14 }
 0x7bf   :  { %v8629_v61 = vadd.f32 %v8595_v26, %v2757_v32 }
 0x7c0   :  { %v2719_v48 = vmul.f32 %v6804_v50, %v2718_v47 }
 0x7c2   :  { %v2723_v43 = vsel %vm2722_vm6, %v6804_v50, %v2719_v48 }
 0x7c3   :  { %v2749_v33 = vmul.f32 %v2723_v43, %v8569_v60  ;;  %v2644_v23 = vpop.xlane.xlu1 %2643 }
 0x7c4   :  { %v2654_v46 = vmul.f32 %v2644_v23, %v10253_v4 }
 0x7c5   :  { %v2758_v25 = vmul.f32 %v8591_v13, %v2749_v33 }
 0x7c6   :  { %v2662_v31 = vadd.f32 1e-12, %v2654_v46 }
 0x7c7   :  { %v8632_v28 = vadd.f32 %v8595_v26, %v2758_v25 }
 0x7c8   :  { %6805 = vrsqrt.f32 %v2662_v31  ;;  %vm2730_vm8 = vweird.f32 %v2662_v31 }
 0x7c9   :  { %v2772_v58 = vpack.c.bf16 %v8632_v28, %v8629_v61 }
 0x7cb   :  { %6198 = vmatmul.msk.bf16.gmra.mxu1 %vm178_vm0, %v2772_v58 }
 0x7ce   :  { %v6806_v60 = vpop.eup %6805 }
 0x7cf   :  { %v2725_v57 = vmul.f32 %v6806_v60, %v2662_v31  ;;  %vm2731_vm7 = vweird.f32 %v6806_v60 }
 0x7d0   :  { %vm2732_vm9 = vmor %vm2730_vm8, %vm2731_vm7 }
 0x7d1   :  { %v2726_v41 = vmul.f32 %v6806_v60, %v2725_v57 }
 0x7d3   :  { %v2727_v20 = vmul.f32 0.5, %v2726_v41 }
 0x7d5   :  { %v2728_v2 = vsub.f32 1.5, %v2727_v20 }
 0x7d7   :  { %v2729_v6 = vmul.f32 %v6806_v60, %v2728_v2 }
 0x7d9   :  { %v2733_v1 = vsel %vm2732_vm9, %v6806_v60, %v2729_v6 }
 0x7da   :  { %v2750_v22 = vmul.f32 %v2733_v1, %v8575_v8 }
 0x7dc   :  { %v2759_v12 = vmul.f32 %v8591_v13, %v2750_v22 }
 0x7de   :  { %v8650_v8 = vadd.f32 %v8595_v26, %v2759_v12 }
 0x7fd   :  { %v2647_v21 = vpop.xlane.xlu2 %2646 }
 0x7fe   :  { %v2655_v15 = vmul.f32 %v2647_v21, %v10253_v4 }
 0x800   :  { %v2663_v49 = vadd.f32 1e-12, %v2655_v15 }
 0x802   :  { %6807 = vrsqrt.f32 %v2663_v49  ;;  %vm2740_vm15 = vweird.f32 %v2663_v49 }
 0x808   :  { %v6808_v52 = vpop.eup %6807 }
 0x809   :  { %v2735_v63 = vmul.f32 %v6808_v52, %v2663_v49  ;;  %vm2741_vm10 = vweird.f32 %v6808_v52 }
 0x80a   :  { %vm2742_vm1 = vmor %vm2740_vm15, %vm2741_vm10 }
 0x80b   :  { %v2736_v51 = vmul.f32 %v6808_v52, %v2735_v63 }
 0x80d   :  { %v2737_v37 = vmul.f32 0.5, %v2736_v51 }
 0x80f   :  { %v2738_v24 = vsub.f32 1.5, %v2737_v37 }
 0x811   :  { %v2739_v7 = vmul.f32 %v6808_v52, %v2738_v24 }
 0x813   :  { %v2743_v9 = vsel %vm2742_vm1, %v6808_v52, %v2739_v7 }
 0x814   :  { %v2751_v44 = vmul.f32 %v2743_v9, %v8583_v3 }
 0x816   :  { %v2760_v0 = vmul.f32 %v8591_v13, %v2751_v44  ;;  %v6369_v13 = vld [vmem:[%s10177_s9] sm:$0xff] }
 0x817   :  { %2964 = vmatpush.bf16.msrb.mxu2 %v6369_v13 }
 0x818   :  { %v8653_v11 = vadd.f32 %v8595_v26, %v2760_v0 }
 0x81a   :  { %v2773_v3 = vpack.c.bf16 %v8653_v11, %v8650_v8 }
 0x81c   :  { %6199 = vmatmul.msk.bf16.gmra.mxu1 %vm178_vm0, %v2773_v3 }
 0x81e   :  { %v2815_v53 = vpop.f32.mrf.mxu1 }
 0x81f   :  { %v2816_v26 = vadd.f32 %v8660_v35, %v2815_v53 }
 0x821   :  { %v2843_v10 = vmul.f32 0.044715, %v2816_v26  ;;  %v2835_v31 = vmul.f32 0.5, %v2816_v26 }
 0x823   :  { %v2851_v56 = vmul.f32 %v2843_v10, %v2816_v26 }
 0x825   :  { %v2859_v39 = vmul.f32 %v2851_v56, %v2816_v26 }
 0x826   :  { %v2817_v36 = vpop.f32.mrf.mxu1 }
 0x827   :  { %v2867_v27 = vadd.f32 %v2859_v39, %v2816_v26  ;;  %v2818_v62 = vadd.f32 %v8660_v35, %v2817_v36 }
 0x829   :  { %v2844_v17 = vmul.f32 0.044715, %v2818_v62  ;;  %v2875_v50 = vmul.f32 0.7978846, %v2867_v27  ;;  %v2836_v60 = vmul.f32 0.5, %v2818_v62 }
 0x82b   :  { %v2852_v40 = vmul.f32 %v2844_v17, %v2818_v62  ;;  %6809 = vtanh.f32 %v2875_v50 }
 0x82d   :  { %v2860_v54 = vmul.f32 %v2852_v40, %v2818_v62 }
 0x82e   :  { %v2820_v29 = vpop.f32.mrf.mxu1 }
 0x82f   :  { %v2868_v30 = vadd.f32 %v2860_v54, %v2818_v62  ;;  %v2821_v14 = vadd.f32 %v8660_v35, %v2820_v29 }
 0x831   :  { %v2876_v47 = vmul.f32 0.7978846, %v2868_v30  ;;  %v2845_v55 = vmul.f32 0.044715, %v2821_v14  ;;  %v6810_v43 = vpop.eup %6809  ;;  %v2837_v7 = vmul.f32 0.5, %v2821_v14 }
 0x832   :  { %v2891_v25 = vadd.f32 1.0, %v6810_v43 }
 0x833   :  { %6811 = vtanh.f32 %v2876_v47  ;;  %v2853_v48 = vmul.f32 %v2845_v55, %v2821_v14 }
 0x834   :  { %v2899_v21 = vmul.f32 %v2891_v25, %v2835_v31 }
 0x835   :  { %v2861_v33 = vmul.f32 %v2853_v48, %v2821_v14 }
 0x836   :  { %v2822_v32 = vpop.f32.mrf.mxu1 }
 0x837   :  { %v2869_v58 = vadd.f32 %v2861_v33, %v2821_v14  ;;  %v2823_v23 = vadd.f32 %v8660_v35, %v2822_v32 }
 0x839   :  { %v6812_v46 = vpop.eup %6811  ;;  %v2846_v41 = vmul.f32 0.044715, %v2823_v23  ;;  %v2877_v49 = vmul.f32 0.7978846, %v2869_v58  ;;  %v2838_v5 = vmul.f32 0.5, %v2823_v23 }
 0x83a   :  { %v2892_v57 = vadd.f32 1.0, %v6812_v46 }
 0x83b   :  { %v2854_v20 = vmul.f32 %v2846_v41, %v2823_v23  ;;  %6813 = vtanh.f32 %v2877_v49 }
 0x83c   :  { %v2900_v15 = vmul.f32 %v2892_v57, %v2836_v60 }
 0x83d   :  { %v2862_v2 = vmul.f32 %v2854_v20, %v2823_v23 }
 0x83e   :  { %v2907_v52 = vpack.c.bf16 %v2900_v15, %v2899_v21 }
 0x83f   :  { %v2870_v6 = vadd.f32 %v2862_v2, %v2823_v23 }
 0x840   :  { %6216 = vmatmul.msk.bf16.vlgmr.msrb.gmra.mxu2 %vm2944_vm2, %v2907_v52 }
 0x841   :  { %v2878_v63 = vmul.f32 0.7978846, %v2870_v6  ;;  %v6814_v51 = vpop.eup %6813 }
 0x842   :  { %v2893_v37 = vadd.f32 1.0, %v6814_v51 }
 0x843   :  { %6815 = vtanh.f32 %v2878_v63 }
 0x844   :  { %v2901_v12 = vmul.f32 %v2893_v37, %v2837_v7 }
 0x848   :  { %v2825_v1 = vpop.f32.mrf.mxu1 }
 0x849   :  { %v6816_v24 = vpop.eup %6815  ;;  %v2826_v22 = vadd.f32 %v8660_v35, %v2825_v1 }
 0x84a   :  { %v2894_v9 = vadd.f32 1.0, %v6816_v24 }
 0x84b   :  { %v2847_v44 = vmul.f32 0.044715, %v2826_v22  ;;  %v2839_v54 = vmul.f32 0.5, %v2826_v22 }
 0x84c   :  { %v2902_v18 = vmul.f32 %v2894_v9, %v2838_v5 }
 0x84d   :  { %v2855_v0 = vmul.f32 %v2847_v44, %v2826_v22 }
 0x84e   :  { %v2908_v45 = vpack.c.bf16 %v2902_v18, %v2901_v12 }
 0x84f   :  { %v2863_v3 = vmul.f32 %v2855_v0, %v2826_v22 }
 0x850   :  { %v2827_v13 = vpop.f32.mrf.mxu1  ;;  %6217 = vmatmul.msk.bf16.gmra.mxu2 %vm2944_vm2, %v2908_v45 }
 0x851   :  { %v2871_v53 = vadd.f32 %v2863_v3, %v2826_v22  ;;  %v2828_v26 = vadd.f32 %v8660_v35, %v2827_v13 }
 0x853   :  { %v2848_v10 = vmul.f32 0.044715, %v2828_v26  ;;  %v2879_v56 = vmul.f32 0.7978846, %v2871_v53  ;;  %v2840_v30 = vmul.f32 0.5, %v2828_v26 }
 0x855   :  { %v2856_v39 = vmul.f32 %v2848_v10, %v2828_v26  ;;  %6817 = vtanh.f32 %v2879_v56 }
 0x857   :  { %v2864_v36 = vmul.f32 %v2856_v39, %v2828_v26 }
 0x859   :  { %v2872_v27 = vadd.f32 %v2864_v36, %v2828_v26 }
 0x85b   :  { %v2880_v62 = vmul.f32 0.7978846, %v2872_v27  ;;  %v6818_v17 = vpop.eup %6817 }
 0x85c   :  { %v2895_v50 = vadd.f32 1.0, %v6818_v17 }
 0x85d   :  { %6819 = vtanh.f32 %v2880_v62 }
 0x85e   :  { %v2903_v14 = vmul.f32 %v2895_v50, %v2839_v54 }
 0x863   :  { %v6820_v40 = vpop.eup %6819 }
 0x864   :  { %v2896_v29 = vadd.f32 1.0, %v6820_v40 }
 0x866   :  { %v2904_v47 = vmul.f32 %v2896_v29, %v2840_v30 }
 0x868   :  { %v2909_v55 = vpack.c.bf16 %v2904_v47, %v2903_v14 }
 0x86a   :  { %6218 = vmatmul.msk.bf16.gmra.mxu2 %vm2944_vm2, %v2909_v55 }
 0x899   :  { %v2830_v48 = vpop.f32.mrf.mxu1 }
 0x89a   :  { %v2831_v43 = vadd.f32 %v8660_v35, %v2830_v48 }
 0x89c   :  { %v2849_v33 = vmul.f32 0.044715, %v2831_v43  ;;  %v2841_v52 = vmul.f32 0.5, %v2831_v43 }
 0x89e   :  { %v2857_v32 = vmul.f32 %v2849_v33, %v2831_v43 }
 0x8a0   :  { %v2865_v25 = vmul.f32 %v2857_v32, %v2831_v43 }
 0x8a1   :  { %v2832_v58 = vpop.f32.mrf.mxu1 }
 0x8a2   :  { %v2873_v23 = vadd.f32 %v2865_v25, %v2831_v43  ;;  %v2833_v46 = vadd.f32 %v8660_v35, %v2832_v58  ;;  %v2919_v35 = vperm.slane %v8519_v19, 3 }
 0x8a4   :  { %v2850_v31 = vmul.f32 0.044715, %v2833_v46  ;;  %v2881_v60 = vmul.f32 0.7978846, %v2873_v23  ;;  %v2842_v6 = vmul.f32 0.5, %v2833_v46 }
 0x8a6   :  { %v2858_v57 = vmul.f32 %v2850_v31, %v2833_v46  ;;  %6821 = vtanh.f32 %v2881_v60 }
 0x8a8   :  { %v2866_v41 = vmul.f32 %v2858_v57, %v2833_v46 }
 0x8aa   :  { %v2874_v21 = vadd.f32 %v2866_v41, %v2833_v46 }
 0x8ac   :  { %v2882_v15 = vmul.f32 0.7978846, %v2874_v21  ;;  %v6822_v49 = vpop.eup %6821 }
 0x8ad   :  { %v2897_v20 = vadd.f32 1.0, %v6822_v49 }
 0x8ae   :  { %6823 = vtanh.f32 %v2882_v15 }
 0x8af   :  { %v2905_v51 = vmul.f32 %v2897_v20, %v2841_v52 }
 0x8b4   :  { %v6824_v2 = vpop.eup %6823 }
 0x8b5   :  { %v2898_v63 = vadd.f32 1.0, %v6824_v2 }
 0x8b7   :  { %v2906_v1 = vmul.f32 %v2898_v63, %v2842_v6 }
 0x8b9   :  { %v2910_v37 = vpack.c.bf16 %v2906_v1, %v2905_v51 }
 0x8bb   :  { %6219 = vmatmul.msk.bf16.gmra.mxu2 %vm2944_vm2, %v2910_v37 }
 0x8c3   :  { %v2966_v24 = vpop.f32.mrf.mxu2 }
 0x8c4   :  { %v2967_v22 = vadd.f32 %v2966_v24, %v2919_v35 }
 0x8c6   :  { %v2986_v7 = vadd.f32 %v2967_v22, %v8601_v38 }
 0x8c8   :  { %v2994_v5 = vsel %vm178_vm0, %v2986_v7, 0.0 }
 0x8c9   :  { %2995 = vadd.xlane.f32.xlu0 %v2994_v5  ;;  %v6374_v5 = vld [vmem:[%s10171_s3 + $0x18] sm:$0xff] }
 0x8ca   :  { %3234 = vmatpush.bf16.msrb.mxu3 %v6374_v5 }
 0x8cb   :  { %v2968_v9 = vpop.f32.mrf.mxu2 }
 0x8cc   :  { %v2969_v44 = vadd.f32 %v2968_v9, %v2919_v35 }
 0x8ce   :  { %v2987_v12 = vadd.f32 %v2969_v44, %v8604_v59 }
 0x8d0   :  { %v2997_v18 = vsel %vm178_vm0, %v2987_v12, 0.0 }
 0x8d1   :  { %2998 = vadd.xlane.f32.xlu1 %v2997_v18 }
 0x8d3   :  { %v2971_v0 = vpop.f32.mrf.mxu2 }
 0x8d4   :  { %v2972_v45 = vadd.f32 %v2971_v0, %v2919_v35  ;;  %v6373_v0 = vld [vmem:[%s10171_s3 + $0x10] sm:$0xff] }
 0x8d5   :  { %3235 = vmatpush.bf16.msrb.mxu3 %v6373_v0 }
 0x8d6   :  { %v2988_v3 = vadd.f32 %v2972_v45, %v8616_v42 }
 0x8d8   :  { %v3000_v13 = vsel %vm178_vm0, %v2988_v3, 0.0 }
 0x8d9   :  { %3001 = vadd.xlane.f32.xlu2 %v3000_v13 }
 0x8db   :  { %v2973_v53 = vpop.f32.mrf.mxu2 }
 0x8dc   :  { %v2974_v26 = vadd.f32 %v2973_v53, %v2919_v35 }
 0x8de   :  { %v2989_v38 = vadd.f32 %v2974_v26, %v8619_v34 }
 0x8e0   :  { %v3003_v10 = vsel %vm178_vm0, %v2989_v38, 0.0 }
 0x8e1   :  { %3004 = vadd.xlane.f32.xlu0 %v3003_v10 }
 0x8ed   :  { %v2976_v56 = vpop.f32.mrf.mxu2 }
 0x8ee   :  { %v2977_v39 = vadd.f32 %v2976_v56, %v2919_v35 }
 0x8f0   :  { %v2990_v59 = vadd.f32 %v2977_v39, %v8629_v61 }
 0x8f2   :  { %v3006_v36 = vsel %vm178_vm0, %v2990_v59, 0.0 }
 0x8f3   :  { %3007 = vadd.xlane.f32.xlu1 %v3006_v36 }
 0x8f5   :  { %v2978_v27 = vpop.f32.mrf.mxu2 }
 0x8f6   :  { %v2979_v62 = vadd.f32 %v2978_v27, %v2919_v35 }
 0x8f8   :  { %v2991_v42 = vadd.f32 %v2979_v62, %v8632_v28 }
 0x8fa   :  { %v3009_v17 = vsel %vm178_vm0, %v2991_v42, 0.0 }
 0x8fb   :  { %3010 = vadd.xlane.f32.xlu2 %v3009_v17 }
 0x93c   :  { %v2996_v50 = vpop.xlane.xlu0 %2995 }
 0x93d   :  { %v3018_v34 = vmul.f32 %v2996_v50, %v10253_v4 }
 0x93e   :  { %v2981_v40 = vpop.f32.mrf.mxu2 }
 0x93f   :  { %v8692_v54 = vsub.f32 %v2986_v7, %v3018_v34  ;;  %v2982_v30 = vadd.f32 %v2981_v40, %v2919_v35 }
 0x941   :  { %v2992_v29 = vadd.f32 %v2982_v30, %v8650_v8  ;;  %v3034_v61 = vmul.f32 %v8692_v54, %v8692_v54 }
 0x943   :  { %v3042_v14 = vsel %vm178_vm0, %v3034_v61, 0.0  ;;  %v3012_v47 = vsel %vm178_vm0, %v2992_v29, 0.0 }
 0x944   :  { %3043 = vadd.xlane.f32.xlu0 %v3042_v14  ;;  %3013 = vadd.xlane.f32.xlu2 %v3012_v47  ;;  %v2999_v28 = vpop.xlane.xlu1 %2998 }
 0x945   :  { %v3019_v55 = vmul.f32 %v2999_v28, %v10253_v4 }
 0x946   :  { %v2983_v48 = vpop.f32.mrf.mxu2 }
 0x947   :  { %v8700_v43 = vsub.f32 %v2987_v12, %v3019_v55  ;;  %v2984_v33 = vadd.f32 %v2983_v48, %v2919_v35 }
 0x949   :  { %v2993_v32 = vadd.f32 %v2984_v33, %v8653_v11  ;;  %v3035_v8 = vmul.f32 %v8700_v43, %v8700_v43 }
 0x94b   :  { %v3015_v25 = vsel %vm178_vm0, %v2993_v32, 0.0  ;;  %v3045_v58 = vsel %vm178_vm0, %v3035_v8, 0.0 }
 0x94c   :  { %3016 = vadd.xlane.f32.xlu0 %v3015_v25  ;;  %3046 = vadd.xlane.f32.xlu1 %v3045_v58  ;;  %v3002_v23 = vpop.xlane.xlu2 %3001 }
 0x94d   :  { %v3020_v46 = vmul.f32 %v3002_v23, %v10253_v4 }
 0x94f   :  { %v8708_v31 = vsub.f32 %v2988_v3, %v3020_v46 }
 0x951   :  { %v3036_v60 = vmul.f32 %v8708_v31, %v8708_v31 }
 0x953   :  { %v3048_v57 = vsel %vm178_vm0, %v3036_v60, 0.0 }
 0x954   :  { %v3005_v11 = vpop.xlane.xlu0 %3004  ;;  %3049 = vadd.xlane.f32.xlu1 %v3048_v57  ;;  %v8758_v57 = vperm.slane %v8519_v19, 5 }
 0x955   :  { %v3021_v41 = vmul.f32 %v3005_v11, %v10253_v4 }
 0x957   :  { %v8714_v21 = vsub.f32 %v2989_v38, %v3021_v41 }
 0x959   :  { %v3037_v15 = vmul.f32 %v8714_v21, %v8714_v21 }
 0x95b   :  { %v3051_v49 = vsel %vm178_vm0, %v3037_v15, 0.0 }
 0x95c   :  { %3052 = vadd.xlane.f32.xlu2 %v3051_v49 }
 0x966   :  { %v3008_v20 = vpop.xlane.xlu1 %3007 }
 0x967   :  { %v3022_v2 = vmul.f32 %v3008_v20, %v10253_v4 }
 0x969   :  { %v8720_v52 = vsub.f32 %v2990_v59, %v3022_v2 }
 0x96b   :  { %v3038_v6 = vmul.f32 %v8720_v52, %v8720_v52 }
 0x96d   :  { %v3054_v63 = vsel %vm178_vm0, %v3038_v6, 0.0 }
 0x96e   :  { %v3011_v51 = vpop.xlane.xlu2 %3010  ;;  %3055 = vadd.xlane.f32.xlu0 %v3054_v63 }
 0x96f   :  { %v3023_v1 = vmul.f32 %v3011_v51, %v10253_v4 }
 0x971   :  { %v8726_v37 = vsub.f32 %v2991_v42, %v3023_v1 }
 0x973   :  { %v3039_v35 = vmul.f32 %v8726_v37, %v8726_v37 }
 0x975   :  { %v3057_v24 = vsel %vm178_vm0, %v3039_v35, 0.0 }
 0x976   :  { %3058 = vadd.xlane.f32.xlu1 %v3057_v24 }
 0x9b7   :  { %v3044_v22 = vpop.xlane.xlu0 %3043  ;;  %v3014_v7 = vpop.xlane.xlu2 %3013 }
 0x9b8   :  { %v3066_v9 = vmul.f32 %v3044_v22, %v10253_v4  ;;  %v3024_v44 = vmul.f32 %v3014_v7, %v10253_v4 }
 0x9ba   :  { %v3074_v12 = vadd.f32 1e-12, %v3066_v9  ;;  %v8736_v18 = vsub.f32 %v2992_v29, %v3024_v44 }
 0x9bc   :  { %6825 = vrsqrt.f32 %v3074_v12  ;;  %v3040_v45 = vmul.f32 %v8736_v18, %v8736_v18  ;;  %vm3088_vm4 = vweird.f32 %v3074_v12 }
 0x9be   :  { %v3060_v3 = vsel %vm178_vm0, %v3040_v45, 0.0 }
 0x9bf   :  { %v3017_v13 = vpop.xlane.xlu0 %3016  ;;  %3061 = vadd.xlane.f32.xlu2 %v3060_v3  ;;  %v3047_v53 = vpop.xlane.xlu1 %3046 }
 0x9c0   :  { %v3025_v26 = vmul.f32 %v3017_v13, %v10253_v4  ;;  %v3067_v38 = vmul.f32 %v3047_v53, %v10253_v4 }
 0x9c2   :  { %v6826_v10 = vpop.eup %6825  ;;  %v8746_v56 = vsub.f32 %v2993_v32, %v3025_v26  ;;  %v3075_v39 = vadd.f32 1e-12, %v3067_v38  ;;  %v8754_v32 = vperm.slane %v8519_v19, 4 }
 0x9c3   :  { %v3083_v59 = vmul.f32 %v6826_v10, %v3074_v12  ;;  %vm3089_vm3 = vweird.f32 %v6826_v10 }
 0x9c4   :  { %6827 = vrsqrt.f32 %v3075_v39  ;;  %v3041_v36 = vmul.f32 %v8746_v56, %v8746_v56  ;;  %vm3090_vm5 = vmor %vm3088_vm4, %vm3089_vm3  ;;  %vm3098_vm7 = vweird.f32 %v3075_v39 }
 0x9c5   :  { %v3084_v27 = vmul.f32 %v6826_v10, %v3083_v59 }
 0x9c6   :  { %v3063_v62 = vsel %vm178_vm0, %v3041_v36, 0.0 }
 0x9c7   :  { %v3085_v42 = vmul.f32 0.5, %v3084_v27  ;;  %3064 = vadd.xlane.f32.xlu0 %v3063_v62  ;;  %v3050_v17 = vpop.xlane.xlu1 %3049 }
 0x9c8   :  { %v3068_v34 = vmul.f32 %v3050_v17, %v10253_v4 }
 0x9c9   :  { %v3086_v50 = vsub.f32 1.5, %v3085_v42 }
 0x9ca   :  { %v6828_v40 = vpop.eup %6827  ;;  %v3076_v61 = vadd.f32 1e-12, %v3068_v34 }
 0x9cb   :  { %v3087_v30 = vmul.f32 %v6826_v10, %v3086_v50  ;;  %v3093_v29 = vmul.f32 %v6828_v40, %v3075_v39  ;;  %vm3099_vm6 = vweird.f32 %v6828_v40 }
 0x9cc   :  { %6829 = vrsqrt.f32 %v3076_v61  ;;  %vm3100_vm8 = vmor %vm3098_vm7, %vm3099_vm6  ;;  %vm3108_vm10 = vweird.f32 %v3076_v61 }
 0x9cd   :  { %v3094_v14 = vmul.f32 %v6828_v40, %v3093_v29  ;;  %v3091_v47 = vsel %vm3090_vm5, %v6826_v10, %v3087_v30 }
 0x9ce   :  { %v3162_v8 = vmul.f32 %v3091_v47, %v8692_v54 }
 0x9cf   :  { %v3095_v28 = vmul.f32 0.5, %v3094_v14  ;;  %v3053_v55 = vpop.xlane.xlu2 %3052 }
 0x9d0   :  { %v3069_v33 = vmul.f32 %v3053_v55, %v10253_v4  ;;  %v3171_v11 = vmul.f32 %v8754_v32, %v3162_v8 }
 0x9d1   :  { %v3096_v48 = vsub.f32 1.5, %v3095_v28 }
 0x9d2   :  { %v6830_v25 = vpop.eup %6829  ;;  %v3077_v23 = vadd.f32 1e-12, %v3069_v33  ;;  %v8764_v54 = vadd.f32 %v8758_v57, %v3171_v11 }
 0x9d3   :  { %v3097_v58 = vmul.f32 %v6828_v40, %v3096_v48  ;;  %v3103_v46 = vmul.f32 %v6830_v25, %v3076_v61  ;;  %vm3109_vm9 = vweird.f32 %v6830_v25 }
 0x9d4   :  { %6831 = vrsqrt.f32 %v3077_v23  ;;  %10255 = vst [vmem:[#allocation33_spill] sm:$0xff] %v8764_v54  ;;  %vm3110_vm15 = vmor %vm3108_vm10, %vm3109_vm9  ;;  %vm3118_vm3 = vweird.f32 %v3077_v23 }
 0x9d5   :  { %v3101_v60 = vsel %vm3100_vm8, %v6828_v40, %v3097_v58  ;;  %v3104_v15 = vmul.f32 %v6830_v25, %v3103_v46 }
 0x9d6   :  { %v3163_v41 = vmul.f32 %v3101_v60, %v8700_v43 }
 0x9d7   :  { %v3105_v20 = vmul.f32 0.5, %v3104_v15 }
 0x9d8   :  { %v3172_v49 = vmul.f32 %v8754_v32, %v3163_v41 }
 0x9d9   :  { %v3106_v6 = vsub.f32 1.5, %v3105_v20 }
 0x9da   :  { %v8767_v2 = vadd.f32 %v8758_v57, %v3172_v49  ;;  %v6832_v63 = vpop.eup %6831 }
 0x9db   :  { %v3107_v51 = vmul.f32 %v6830_v25, %v3106_v6  ;;  %v3113_v1 = vmul.f32 %v6832_v63, %v3077_v23  ;;  %vm3119_vm1 = vweird.f32 %v6832_v63 }
 0x9dc   :  { %10256 = vst [vmem:[#allocation34_spill] sm:$0xff] %v8767_v2  ;;  %v3190_v19 = vpack.c.bf16 %v8767_v2, %v8764_v54  ;;  %vm3120_vm4 = vmor %vm3118_vm3, %vm3119_vm1 }
 0x9dd   :  { %v3114_v43 = vmul.f32 %v6832_v63, %v3113_v1  ;;  %v3111_v35 = vsel %vm3110_vm15, %v6830_v25, %v3107_v51 }
 0x9de   :  { %6234 = vmatmul.msk.bf16.vlgmr.msrb.gmra.mxu3 %vm178_vm0, %v3190_v19  ;;  %v3164_v5 = vmul.f32 %v3111_v35, %v8708_v31 }
 0x9df   :  { %v3115_v24 = vmul.f32 0.5, %v3114_v43 }
 0x9e0   :  { %v3173_v3 = vmul.f32 %v8754_v32, %v3164_v5 }
 0x9e1   :  { %v3116_v22 = vsub.f32 1.5, %v3115_v24  ;;  %v3056_v7 = vpop.xlane.xlu0 %3055 }
 0x9e2   :  { %v3070_v9 = vmul.f32 %v3056_v7, %v10253_v4  ;;  %v8779_v38 = vadd.f32 %v8758_v57, %v3173_v3 }
 0x9e3   :  { %v3117_v44 = vmul.f32 %v6832_v63, %v3116_v22 }
 0x9e4   :  { %v3078_v12 = vadd.f32 1e-12, %v3070_v9  ;;  %10257 = vst [vmem:[#allocation25_spill] sm:$0xff] %v8779_v38 }
 0x9e5   :  { %v3121_v0 = vsel %vm3120_vm4, %v6832_v63, %v3117_v44 }
 0x9e6   :  { %v3165_v45 = vmul.f32 %v3121_v0, %v8714_v21  ;;  %6833 = vrsqrt.f32 %v3078_v12  ;;  %vm3128_vm6 = vweird.f32 %v3078_v12 }
 0x9e8   :  { %v3174_v13 = vmul.f32 %v8754_v32, %v3165_v45 }
 0x9e9   :  { %v3059_v53 = vpop.xlane.xlu1 %3058 }
 0x9ea   :  { %v3071_v26 = vmul.f32 %v3059_v53, %v10253_v4  ;;  %v8782_v31 = vadd.f32 %v8758_v57, %v3174_v13 }
 0x9ec   :  { %10258 = vst [vmem:[#allocation35_spill] sm:$0xff] %v8782_v31  ;;  %v6834_v10 = vpop.eup %6833  ;;  %v3079_v39 = vadd.f32 1e-12, %v3071_v26  ;;  %v3191_v59 = vpack.c.bf16 %v8782_v31, %v8779_v38 }
 0x9ed   :  { %v3123_v21 = vmul.f32 %v6834_v10, %v3078_v12  ;;  %vm3129_vm5 = vweird.f32 %v6834_v10 }
 0x9ee   :  { %6835 = vrsqrt.f32 %v3079_v39  ;;  %6235 = vmatmul.msk.bf16.gmra.mxu3 %vm178_vm0, %v3191_v59  ;;  %vm3130_vm7 = vmor %vm3128_vm6, %vm3129_vm5  ;;  %vm3138_vm9 = vweird.f32 %v3079_v39 }
 0x9ef   :  { %v3124_v36 = vmul.f32 %v6834_v10, %v3123_v21 }
 0x9f1   :  { %v3125_v27 = vmul.f32 0.5, %v3124_v36 }
 0x9f3   :  { %v3126_v62 = vsub.f32 1.5, %v3125_v27 }
 0x9f4   :  { %v6836_v42 = vpop.eup %6835 }
 0x9f5   :  { %v3127_v17 = vmul.f32 %v6834_v10, %v3126_v62  ;;  %v3133_v50 = vmul.f32 %v6836_v42, %v3079_v39  ;;  %vm3139_vm8 = vweird.f32 %v6836_v42 }
 0x9f6   :  { %vm3140_vm10 = vmor %vm3138_vm9, %vm3139_vm8 }
 0x9f7   :  { %v3134_v34 = vmul.f32 %v6836_v42, %v3133_v50  ;;  %v3131_v40 = vsel %vm3130_vm7, %v6834_v10, %v3127_v17 }
 0x9f8   :  { %v3166_v61 = vmul.f32 %v3131_v40, %v8720_v52 }
 0x9f9   :  { %v3135_v30 = vmul.f32 0.5, %v3134_v34 }
 0x9fa   :  { %v3175_v55 = vmul.f32 %v8754_v32, %v3166_v61 }
 0x9fb   :  { %v3136_v29 = vsub.f32 1.5, %v3135_v30 }
 0x9fc   :  { %v8792_v33 = vadd.f32 %v8758_v57, %v3175_v55 }
 0x9fd   :  { %v3137_v14 = vmul.f32 %v6836_v42, %v3136_v29 }
 0x9fe   :  { %10259 = vst [vmem:[#allocation36_spill] sm:$0xff] %v8792_v33 }
 0x9ff   :  { %v3141_v47 = vsel %vm3140_vm10, %v6836_v42, %v3137_v14 }
 0xa00   :  { %v3167_v28 = vmul.f32 %v3141_v47, %v8726_v37 }
 0xa02   :  { %v3176_v48 = vmul.f32 %v8754_v32, %v3167_v28 }
 0xa04   :  { %v8795_v8 = vadd.f32 %v8758_v57, %v3176_v48 }
 0xa06   :  { %10260 = vst [vmem:[#allocation37_spill] sm:$0xff] %v8795_v8  ;;  %v3192_v25 = vpack.c.bf16 %v8795_v8, %v8792_v33 }
 0xa08   :  { %6236 = vmatmul.msk.bf16.gmra.mxu3 %vm178_vm0, %v3192_v25 }
 0xa32   :  { %v3062_v52 = vpop.xlane.xlu2 %3061 }
 0xa33   :  { %v3072_v58 = vmul.f32 %v3062_v52, %v10253_v4 }
 0xa35   :  { %v3080_v23 = vadd.f32 1e-12, %v3072_v58 }
 0xa37   :  { %6837 = vrsqrt.f32 %v3080_v23  ;;  %vm3148_vm1 = vweird.f32 %v3080_v23 }
 0xa3a   :  { %v3065_v37 = vpop.xlane.xlu0 %3064 }
 0xa3b   :  { %v3073_v46 = vmul.f32 %v3065_v37, %v10253_v4 }
 0xa3d   :  { %v6838_v60 = vpop.eup %6837  ;;  %v3081_v11 = vadd.f32 1e-12, %v3073_v46 }
 0xa3e   :  { %v3143_v41 = vmul.f32 %v6838_v60, %v3080_v23  ;;  %vm3149_vm15 = vweird.f32 %v6838_v60 }
 0xa3f   :  { %6839 = vrsqrt.f32 %v3081_v11  ;;  %vm3150_vm3 = vmor %vm3148_vm1, %vm3149_vm15  ;;  %vm3158_vm5 = vweird.f32 %v3081_v11 }
 0xa40   :  { %v3144_v15 = vmul.f32 %v6838_v60, %v3143_v41 }
 0xa42   :  { %v3145_v49 = vmul.f32 0.5, %v3144_v15 }
 0xa44   :  { %v3146_v20 = vsub.f32 1.5, %v3145_v49 }
 0xa45   :  { %v6840_v6 = vpop.eup %6839 }
 0xa46   :  { %v3147_v63 = vmul.f32 %v6838_v60, %v3146_v20  ;;  %v3153_v19 = vmul.f32 %v6840_v6, %v3081_v11  ;;  %vm3159_vm4 = vweird.f32 %v6840_v6 }
 0xa47   :  { %vm3160_vm6 = vmor %vm3158_vm5, %vm3159_vm4 }
 0xa48   :  { %v3154_v51 = vmul.f32 %v6840_v6, %v3153_v19  ;;  %v3151_v1 = vsel %vm3150_vm3, %v6838_v60, %v3147_v63 }
 0xa49   :  { %v3168_v24 = vmul.f32 %v3151_v1, %v8736_v18  ;;  %v6644_v18 = vld [vmem:[%s10172_s4 + $0x1] ss:$0 sm:$0xff] }
 0xa4a   :  { %v3155_v43 = vmul.f32 0.5, %v3154_v51 }
 0xa4b   :  { %v3177_v9 = vmul.f32 %v8754_v32, %v3168_v24 }
 0xa4c   :  { %v3156_v35 = vsub.f32 1.5, %v3155_v43 }
 0xa4d   :  { %v8807_v12 = vadd.f32 %v8758_v57, %v3177_v9 }
 0xa4e   :  { %v3157_v22 = vmul.f32 %v6840_v6, %v3156_v35 }
 0xa4f   :  { %10261 = vst [vmem:[#allocation18_spill] sm:$0xff] %v8807_v12 }
 0xa50   :  { %v3161_v7 = vsel %vm3160_vm6, %v6840_v6, %v3157_v22 }
 0xa51   :  { %v3169_v5 = vmul.f32 %v3161_v7, %v8746_v56 }
 0xa53   :  { %v3178_v44 = vmul.f32 %v8754_v32, %v3169_v5 }
 0xa55   :  { %v8810_v0 = vadd.f32 %v8758_v57, %v3178_v44 }
 0xa57   :  { %10262 = vst [vmem:[#allocation17_spill] sm:$0xff] %v8810_v0  ;;  %v3193_v45 = vpack.c.bf16 %v8810_v0, %v8807_v12 }
 0xa59   :  { %6237 = vmatmul.msk.bf16.gmra.mxu3 %vm178_vm0, %v3193_v45 }
 0xa61   :  { %v3237_v56 = vpop.f32.mrf.mxu3 }
 0xa62   :  { %v3238_v3 = vadd.f32 %v6644_v18, %v3237_v56 }
 0xa64   :  { %v3337_v13 = vpack.c.bf16 %v3238_v3, %v3238_v3 }
 0xa66   :  { %v3370_v53 = vunpack.c.l.b16 %v3337_v13 }
 0xa68   :  { %v8818_v32 = vpack.c.b16 %v3370_v53, %v3370_v53 }
 0xa69   :  { %v3239_v26 = vpop.f32.mrf.mxu3 }
 0xa6a   :  { %v3240_v10 = vadd.f32 %v6644_v18, %v3239_v26  ;;  %3372 = vrot.lane.b32.xlu0 %v8818_v32, %s7180_s30 }
 0xa6c   :  { %v8822_v57 = vpack.c.bf16 %v3240_v10, %v3240_v10  ;;  %v6527_v39 = vpack.i.bf16 %v3240_v10, %v3238_v3 }
 0xa6e   :  { %6528 = vrot.lane.b32.xlu2 %v6527_v39, %s7183_s15  ;;  %6523 = vrot.lane.b32.xlu1 %v6527_v39, %s7181_s13  ;;  %v3394_v59 = vunpack.c.l.b16 %v8822_v57 }
 0xa70   :  { %v8827_v27 = vpack.c.b16 %v3394_v59, %v3394_v59 }
 0xa71   :  { %v3242_v21 = vpop.f32.mrf.mxu3 }
 0xa72   :  { %v3243_v36 = vadd.f32 %v6644_v18, %v3242_v21 }
 0xa74   :  { %v8829_v62 = vpack.c.bf16 %v3243_v36, %v3243_v36 }
 0xa76   :  { %6533 = vrot.lane.b32.xlu2 %v6527_v39, %s7182_s14  ;;  %3396 = vrot.lane.b32.xlu1 %v8827_v27, %s7180_s30  ;;  %v3418_v42 = vunpack.c.l.b16 %v8829_v62 }
 0xa78   :  { %v8835_v17 = vpack.c.b16 %v3418_v42, %v3418_v42 }
 0xa79   :  { %v3244_v50 = vpop.f32.mrf.mxu3 }
 0xa7a   :  { %v3245_v34 = vadd.f32 %v6644_v18, %v3244_v50  ;;  %3420 = vrot.lane.b32.xlu0 %v8835_v17, %s7180_s30 }
 0xa7c   :  { %v8839_v40 = vpack.c.bf16 %v3245_v34, %v3245_v34  ;;  %v6537_v30 = vpack.i.bf16 %v3245_v34, %v3243_v36 }
 0xa7e   :  { %6538 = vrot.lane.b32.xlu2 %v6537_v30, %s7181_s13  ;;  %v3442_v29 = vunpack.c.l.b16 %v8839_v40 }
 0xa80   :  { %v8843_v61 = vpack.c.b16 %v3442_v29, %v3442_v29 }
 0xa82   :  { %3444 = vrot.lane.b32.xlu1 %v8843_v61, %s7180_s30 }
 0xa86   :  { %6543 = vrot.lane.b32.xlu2 %v6537_v30, %s7183_s15 }
 0xa8b   :  { %v3247_v14 = vpop.f32.mrf.mxu3 }
 0xa8c   :  { %v3248_v47 = vadd.f32 %v6644_v18, %v3247_v14 }
 0xa8e   :  { %v8848_v28 = vpack.c.bf16 %v3248_v47, %v3248_v47  ;;  %6548 = vrot.lane.b32.xlu2 %v6537_v30, %s7182_s14 }
 0xa90   :  { %v3466_v55 = vunpack.c.l.b16 %v8848_v28 }
 0xa92   :  { %v8852_v48 = vpack.c.b16 %v3466_v55, %v3466_v55 }
 0xa93   :  { %v3249_v25 = vpop.f32.mrf.mxu3 }
 0xa94   :  { %v3250_v52 = vadd.f32 %v6644_v18, %v3249_v25  ;;  %3468 = vrot.lane.b32.xlu0 %v8852_v48, %s7180_s30 }
 0xa96   :  { %v8856_v58 = vpack.c.bf16 %v3250_v52, %v3250_v52  ;;  %v6552_v23 = vpack.i.bf16 %v3250_v52, %v3248_v47 }
 0xa98   :  { %6553 = vrot.lane.b32.xlu2 %v6552_v23, %s7181_s13  ;;  %v3490_v37 = vunpack.c.l.b16 %v8856_v58 }
 0xa9a   :  { %v8860_v46 = vpack.c.b16 %v3490_v37, %v3490_v37 }
 0xa9c   :  { %3492 = vrot.lane.b32.xlu1 %v8860_v46, %s7180_s30  ;;  %6563 = vrot.lane.b32.xlu0 %v6552_v23, %s7182_s14 }
 0xaa0   :  { %6558 = vrot.lane.b32.xlu2 %v6552_v23, %s7183_s15 }
 0xac8   :  { %v6529_v60 = vpop.permute.xlu2 %6528 }
 0xac9   :  { %v6530_v26 = vunpack.i.l.bf16 %v6529_v60  ;;  %v6531_v25 = vunpack.i.h.bf16 %v6529_v60 }
 0xacb   :  { %v8899_v50 = vpack.c.bf16 %v6530_v26, %v6530_v26  ;;  %v8924_v60 = vpack.c.bf16 %v6531_v25, %v6531_v25 }
 0xad0   :  { %v6534_v11 = vpop.permute.xlu2 %6533 }
 0xad1   :  { %v6535_v24 = vunpack.i.l.bf16 %v6534_v11 }
 0xad3   :  { %v8882_v56 = vpack.c.bf16 %v6535_v24, %v6535_v24 }
 0xad5   :  { %v3946_v59 = vunpack.c.l.b16 %v8882_v56 }
 0xad7   :  { %v8902_v30 = vpack.c.b16 %v3946_v59, %v3946_v59 }
 0xad8   :  { %v8875_v35 = vpop.permute.xlu2 %6538 }
 0xad9   :  { %v6540_v37 = vunpack.i.l.bf16 %v8875_v35 }
 0xadc   :  { %v3373_v41 = vpop.permute.xlu0 %3372  ;;  %v3252_v15 = vpop.f32.mrf.mxu3 }
 0xadd   :  { %v3378_v49 = vsel %vm563_vm11, %v3373_v41, 0  ;;  %v3253_v20 = vadd.f32 %v6644_v18, %v3252_v15 }
 0xade   :  { %3387 = vmatpush.bf16.xpose.msra.mxu0 %v3378_v49 }
 0xadf   :  { %v8867_v6 = vpack.c.bf16 %v3253_v20, %v3253_v20 }
 0xae0   :  { %v6524_v63 = vpop.permute.xlu1 %6523  ;;  %v6544_v42 = vpop.permute.xlu2 %6543 }
 0xae1   :  { %v3514_v19 = vunpack.c.l.b16 %v8867_v6  ;;  %v6525_v22 = vunpack.i.l.bf16 %v6524_v63  ;;  %v6526_v21 = vunpack.i.h.bf16 %v6524_v63  ;;  %v6545_v47 = vunpack.i.l.bf16 %v6544_v42 }
 0xae3   :  { %v8870_v51 = vpack.c.b16 %v3514_v19, %v3514_v19  ;;  %v8884_v3 = vpack.c.bf16 %v6525_v22, %v6525_v22  ;;  %v8904_v29 = vpack.c.bf16 %v6526_v21, %v6526_v21  ;;  %v8920_v41 = vpack.c.bf16 %v6545_v47, %v6545_v47 }
 0xae4   :  { %v3254_v1 = vpop.f32.mrf.mxu3  ;;  %v3778_v19 = vunpack.c.l.b16 %v8924_v60 }
 0xae5   :  { %v3255_v43 = vadd.f32 %v6644_v18, %v3254_v1  ;;  %6238 = vmatmul.msk.bf16.vlgmr.msra.gmra.mxu0 %vm563_vm11, %v3337_v13  ;;  %3516 = vrot.lane.b32.xlu0 %v8870_v51, %s7180_s30  ;;  %v6536_v18 = vunpack.i.h.bf16 %v6534_v11  ;;  %v3562_v36 = vunpack.c.l.b16 %v8884_v3  ;;  %v3586_v11 = vunpack.c.l.b16 %v8904_v29 }
 0xae6   :  { %v3802_v63 = vunpack.c.l.b16 %v8920_v41  ;;  %v6541_v1 = vunpack.i.h.bf16 %v8875_v35  ;;  %v6546_v35 = vunpack.i.h.bf16 %v6544_v42 }
 0xae7   :  { %v8877_v7 = vpack.c.bf16 %v3255_v43, %v3255_v43  ;;  %v6567_v5 = vpack.i.bf16 %v3255_v43, %v3253_v20  ;;  %v8891_v10 = vpack.c.bf16 %v6536_v18, %v6536_v18  ;;  %v8906_v14 = vpack.c.b16 %v3562_v36, %v3562_v36 }
 0xae8   :  { %v3397_v9 = vpop.permute.xlu1 %3396  ;;  %v6549_v15 = vpop.permute.xlu2 %6548  ;;  %v8928_v20 = vpack.c.bf16 %v6540_v37, %v6540_v37  ;;  %v8942_v24 = vpack.c.b16 %v3802_v63, %v3802_v63  ;;  %v8960_v36 = vpack.c.bf16 %v6546_v35, %v6546_v35 }
 0xae9   :  { %v3402_v44 = vsel %vm563_vm11, %v3397_v9, 0  ;;  %6568 = vrot.lane.b32.xlu2 %v6567_v5, %s7181_s13  ;;  %v3538_v45 = vunpack.c.l.b16 %v8877_v7  ;;  %v3970_v34 = vunpack.c.l.b16 %v8891_v10  ;;  %v6550_v22 = vunpack.i.l.bf16 %v6549_v15 }
 0xaea   :  { %3411 = vmatpush.bf16.xpose.msrb.mxu1 %v3402_v44  ;;  %v3610_v43 = vunpack.c.l.b16 %v8928_v20  ;;  %v8946_v9 = vpack.c.b16 %v3778_v19, %v3778_v19  ;;  %v8948_v44 = vpack.c.bf16 %v6541_v1, %v6541_v1  ;;  %v3826_v42 = vunpack.c.l.b16 %v8960_v36 }
 0xaeb   :  { %v8886_v13 = vpack.c.b16 %v3538_v45, %v3538_v45  ;;  %v8916_v23 = vpack.c.b16 %v3970_v34, %v3970_v34  ;;  %v8950_v18 = vpack.c.bf16 %v6550_v22, %v6550_v22 }
 0xaec   :  { %v3421_v53 = vpop.permute.xlu0 %3420  ;;  %v3611_v45 = vpack.c.b16 %v3610_v43, %v3610_v43  ;;  %v8977_v43 = vpack.c.b16 %v3826_v42, %v3826_v42 }
 0xaed   :  { %3540 = vrot.lane.b32.xlu1 %v8886_v13, %s7180_s30  ;;  %6578 = vrot.lane.b32.xlu0 %v6567_v5, %s7182_s14  ;;  %v3426_v39 = vsel %vm563_vm11, %v3421_v53, 0  ;;  %v6551_v53 = vunpack.i.h.bf16 %v6549_v15  ;;  %v3994_v26 = vunpack.c.l.b16 %v8950_v18 }
 0xaee   :  { %3435 = vmatpush.bf16.xpose.msra.mxu2 %v3426_v39 }
 0xaef   :  { %v8962_v34 = vpack.c.bf16 %v6551_v53, %v6551_v53  ;;  %v8964_v47 = vpack.c.b16 %v3994_v26, %v3994_v26 }
 0xaf1   :  { %6573 = vrot.lane.b32.xlu2 %v6567_v5, %s7183_s15  ;;  %6239 = vmatmul.msk.bf16.vlgmr.msrb.gmra.mxu1 %vm563_vm11, %v8822_v57  ;;  %v3754_v57 = vunpack.c.l.b16 %v8899_v50  ;;  %v4018_v25 = vunpack.c.l.b16 %v8962_v34 }
 0xaf2   :  { %v6554_v5 = vpop.permute.xlu2 %6553 }
 0xaf3   :  { %v8926_v49 = vpack.c.b16 %v3754_v57, %v3754_v57  ;;  %v6555_v57 = vunpack.i.l.bf16 %v6554_v5  ;;  %v8979_v22 = vpack.c.b16 %v4018_v25, %v4018_v25 }
 0xaf4   :  { %v3445_v55 = vpop.permute.xlu1 %3444 }
 0xaf5   :  { %3948 = vrot.lane.b32.xlu1 %v8902_v30, %s7180_s30  ;;  %3564 = vrot.lane.b32.xlu0 %v8906_v14, %s7180_s30  ;;  %v3450_v52 = vsel %vm563_vm11, %v3445_v55, 0 }
 0xaf6   :  { %6240 = vmatmul.msk.bf16.vlgmr.msra.gmra.mxu2 %vm563_vm11, %v8829_v62  ;;  %3459 = vmatpush.bf16.xpose.msra.mxu3 %v3450_v52  ;;  %v8930_v62 = vpack.c.b16 %v3586_v11, %v3586_v11 }
 0xaf9   :  { %3972 = vrot.lane.b32.xlu2 %v8916_v23, %s7180_s30 }
 0xafa   :  { %v6559_v55 = vpop.permute.xlu2 %6558 }
 0xafb   :  { %v6560_v52 = vunpack.i.l.bf16 %v6559_v55  ;;  %v6561_v19 = vunpack.i.h.bf16 %v6559_v55 }
 0xafd   :  { %3588 = vrot.lane.b32.xlu1 %v8930_v62, %s7180_s30  ;;  %3756 = vrot.lane.b32.xlu0 %v8926_v49, %s7180_s30  ;;  %v8983_v35 = vpack.c.bf16 %v6560_v52, %v6560_v52 }
 0xafe   :  { %6241 = vmatmul.msk.bf16.vlgmr.msra.gmra.mxu3 %vm563_vm11, %v8839_v40  ;;  %v3634_v40 = vunpack.c.l.b16 %v8948_v44 }
 0xaff   :  { %v3850_v55 = vunpack.c.l.b16 %v8983_v35 }
 0xb00   :  { %v8958_v21 = vpack.c.b16 %v3634_v40, %v3634_v40  ;;  %v8981_v40 = vpack.c.bf16 %v6555_v57, %v6555_v57 }
 0xb01   :  { %3804 = vrot.lane.b32.xlu2 %v8942_v24, %s7180_s30  ;;  %v9003_v52 = vpack.c.b16 %v3850_v55, %v3850_v55 }
 0xb05   :  { %3780 = vrot.lane.b32.xlu1 %v8946_v9, %s7180_s30  ;;  %3612 = vrot.lane.b32.xlu0 %v3611_v45, %s7180_s30 }
 0xb06   :  { %v3469_v39 = vpop.permute.xlu0 %3468 }
 0xb07   :  { %v3474_v59 = vsel %vm563_vm11, %v3469_v39, 0  ;;  %v6556_v39 = vunpack.i.h.bf16 %v6554_v5 }
 0xb08   :  { %3483 = vmatpush.bf16.xpose.msrb.mxu0 %v3474_v59  ;;  %v3658_v59 = vunpack.c.l.b16 %v8981_v40 }
 0xb09   :  { %v9001_v25 = vpack.c.bf16 %v6556_v39, %v6556_v39 }
 0xb0a   :  { %v3659_v57 = vpack.c.b16 %v3658_v59, %v3658_v59 }
 0xb0d   :  { %3636 = vrot.lane.b32.xlu1 %v8958_v21, %s7180_s30  ;;  %3996 = vrot.lane.b32.xlu0 %v8964_v47, %s7180_s30 }
 0xb0e   :  { %v6564_v37 = vpop.permute.xlu0 %6563  ;;  %v3493_v11 = vpop.permute.xlu1 %3492 }
 0xb0f   :  { %v6565_v15 = vunpack.i.l.bf16 %v6564_v37  ;;  %v3498_v63 = vsel %vm563_vm11, %v3493_v11, 0  ;;  %6242 = vmatmul.msk.bf16.vlgmr.msrb.gmra.mxu0 %vm563_vm11, %v8848_v28  ;;  %v8990_v28 = vpack.c.bf16 %v6561_v19, %v6561_v19  ;;  %v3682_v11 = vunpack.c.l.b16 %v9001_v25 }
 0xb10   :  { %3507 = vmatpush.bf16.xpose.msra.mxu1 %v3498_v63 }
 0xb11   :  { %v8975_v1 = vpack.c.bf16 %v6565_v15, %v6565_v15  ;;  %v3874_v42 = vunpack.c.l.b16 %v8990_v28 }
 0xb13   :  { %v4042_v53 = vunpack.c.l.b16 %v8975_v1  ;;  %v9008_v5 = vpack.c.b16 %v3874_v42, %v3874_v42 }
 0xb15   :  { %4020 = vrot.lane.b32.xlu1 %v8979_v22, %s7180_s30  ;;  %3828 = vrot.lane.b32.xlu0 %v8977_v43, %s7180_s30  ;;  %v8992_v26 = vpack.c.b16 %v4042_v53, %v4042_v53 }
 0xb17   :  { %4044 = vrot.lane.b32.xlu2 %v8992_v26, %s7180_s30  ;;  %6243 = vmatmul.msk.bf16.vlgmr.msra.gmra.mxu1 %vm563_vm11, %v8856_v58  ;;  %v9013_v58 = vpack.c.b16 %v3682_v11, %v3682_v11 }
 0xb1d   :  { %3852 = vrot.lane.b32.xlu1 %v9003_v52, %s7180_s30  ;;  %3660 = vrot.lane.b32.xlu0 %v3659_v57, %s7180_s30 }
 0xb1f   :  { %3876 = vrot.lane.b32.xlu2 %v9008_v5, %s7180_s30 }
 0xb25   :  { %3684 = vrot.lane.b32.xlu1 %v9013_v58, %s7180_s30 }
 0xb27   :  { %4542 = vrot.lane.b32.xlu2 %v8827_v27, %s7171_s26  ;;  %v6566_v27 = vunpack.i.h.bf16 %v6564_v37 }
 0xb29   :  { %v9032_v39 = vpack.c.bf16 %v6566_v27, %v6566_v27 }
 0xb2b   :  { %v4066_v55 = vunpack.c.l.b16 %v9032_v39 }
 0xb2d   :  { %4563 = vrot.lane.b32.xlu1 %v8835_v17, %s7171_s26 }
 0xb2f   :  { %4605 = vrot.lane.b32.xlu2 %v8852_v48, %s7171_s26 }
 0xb35   :  { %4668 = vrot.lane.b32.xlu1 %v8886_v13, %s7171_s26 }
 0xb37   :  { %4710 = vrot.lane.b32.xlu2 %v8930_v62, %s7171_s26 }
 0xb3d   :  { %4731 = vrot.lane.b32.xlu1 %v3611_v45, %s7171_s26 }
 0xb43   :  { %v6569_v15 = vpop.permute.xlu2 %6568 }
 0xb44   :  { %v6570_v63 = vunpack.i.l.bf16 %v6569_v15 }
 0xb45   :  { %4773 = vrot.lane.b32.xlu1 %v3659_v57, %s7171_s26 }
 0xb46   :  { %v9029_v19 = vpack.c.bf16 %v6570_v63, %v6570_v63  ;;  %v9046_v63 = vpack.c.b16 %v4066_v55, %v4066_v55 }
 0xb48   :  { %v3706_v17 = vunpack.c.l.b16 %v9029_v19 }
 0xb4a   :  { %v3707_v53 = vpack.c.b16 %v3706_v17, %v3706_v17 }
 0xb4b   :  { %v6574_v48 = vpop.permute.xlu2 %6573 }
 0xb4c   :  { %v6576_v59 = vunpack.i.h.bf16 %v6574_v48  ;;  %v6575_v13 = vunpack.i.l.bf16 %v6574_v48  ;;  %3708 = vrot.lane.b32.xlu0 %v3707_v53, %s7180_s30 }
 0xb4e   :  { %v9035_v62 = vpack.c.bf16 %v6576_v59, %v6576_v59  ;;  %v9037_v45 = vpack.c.bf16 %v6575_v13, %v6575_v13 }
 0xb50   :  { %v3922_v42 = vunpack.c.l.b16 %v9035_v62  ;;  %v3898_v37 = vunpack.c.l.b16 %v9037_v45 }
 0xb52   :  { %v9042_v57 = vpack.c.b16 %v3922_v42, %v3922_v42  ;;  %v9044_v11 = vpack.c.b16 %v3898_v37, %v3898_v37  ;;  %v6571_v42 = vunpack.i.h.bf16 %v6569_v15 }
 0xb54   :  { %3924 = vrot.lane.b32.xlu2 %v9042_v57, %s7180_s30  ;;  %3900 = vrot.lane.b32.xlu1 %v9044_v11, %s7180_s30 }
 0xb55   :  { %4068 = vrot.lane.b32.xlu0 %v9046_v63, %s7180_s30 }
 0xb57   :  { %v3517_v27 = vpop.permute.xlu0 %3516 }
 0xb58   :  { %v3522_v17 = vsel %vm563_vm11, %v3517_v27, 0 }
 0xb59   :  { %3531 = vmatpush.bf16.xpose.msrb.mxu2 %v3522_v17 }
 0xb5c   :  { %4815 = vrot.lane.b32.xlu2 %v3707_v53, %s7171_s26 }
 0xb5d   :  { %4521 = vrot.lane.b32.xlu0 %v8818_v32, %s7171_s26  ;;  %v9070_v32 = vpack.c.bf16 %v6571_v42, %v6571_v42 }
 0xb5f   :  { %v6579_v48 = vpop.permute.xlu0 %6578  ;;  %v3541_v59 = vpop.permute.xlu1 %3540 }
 0xb60   :  { %v6580_v13 = vunpack.i.l.bf16 %v6579_v48  ;;  %v3546_v55 = vsel %vm563_vm11, %v3541_v59, 0  ;;  %6244 = vmatmul.msk.bf16.vlgmr.msrb.gmra.mxu2 %vm563_vm11, %v8867_v6 }
 0xb61   :  { %3555 = vmatpush.bf16.xpose.msrb.mxu3 %v3546_v55 }
 0xb62   :  { %v9061_v37 = vpack.c.bf16 %v6580_v13, %v6580_v13  ;;  %v9063_v0 = vpop.f32.mrf.mxu0  ;;  %v6581_v13 = vunpack.i.h.bf16 %v6579_v48 }
 0xb64   :  { %v4090_v27 = vunpack.c.l.b16 %v9061_v37  ;;  %4878 = vrot.lane.b32.xlu2 %v8946_v9, %s7171_s26  ;;  %v3730_v9 = vunpack.c.l.b16 %v9070_v32 }
 0xb65   :  { %4584 = vrot.lane.b32.xlu0 %v8843_v61, %s7171_s26 }
 0xb66   :  { %v9072_v53 = vpack.c.b16 %v4090_v27, %v4090_v27  ;;  %v3731_v61 = vpack.c.b16 %v3730_v9, %v3730_v9 }
 0xb67   :  { %v9074_v17 = vpop.permute.xlu1 %3948  ;;  %v3565_v6 = vpop.permute.xlu0 %3564 }
 0xb68   :  { %v3570_v15 = vsel %vm563_vm11, %v3565_v6, 0  ;;  %6245 = vmatmul.msk.bf16.vlgmr.msrb.gmra.mxu3 %vm563_vm11, %v8877_v7  ;;  %4092 = vrot.lane.b32.xlu1 %v9072_v53, %s7180_s30  ;;  %v9092_v6 = vpack.c.bf16 %v6581_v13, %v6581_v13  ;;  %v3973_v13 = vpop.permute.xlu2 %3972 }
 0xb69   :  { %3579 = vmatpush.bf16.xpose.msra.mxu0 %v3570_v15 }
 0xb6a   :  { %v3391_v59 = vpop.f32.mrf.mxu0 }
 0xb6c   :  { %4920 = vrot.lane.b32.xlu2 %v8977_v43, %s7171_s26 }
 0xb6d   :  { %4626 = vrot.lane.b32.xlu0 %v8860_v46, %s7171_s26  ;;  %v4114_v46 = vunpack.c.l.b16 %v9092_v6 }
 0xb6e   :  { %v9086_v55 = vpop.f32.mrf.mxu1 }
 0xb6f   :  { %v3589_v42 = vpop.permute.xlu1 %3588  ;;  %v3757_v27 = vpop.permute.xlu0 %3756  ;;  %v9104_v59 = vpack.c.b16 %v4114_v46, %v4114_v46 }
 0xb70   :  { %v3594_v7 = vsel %vm563_vm11, %v3589_v42, 0  ;;  %3732 = vrot.lane.b32.xlu1 %v3731_v61, %s7180_s30  ;;  %6246 = vmatmul.msk.bf16.vlgmr.msra.gmra.mxu0 %vm563_vm11, %v8884_v3  ;;  %v3805_v46 = vpop.permute.xlu2 %3804 }
 0xb71   :  { %3603 = vmatpush.bf16.xpose.msrb.mxu1 %v3594_v7  ;;  %10263 = vst [vmem:[#allocation19_spill] sm:$0xff] %v9104_v59 }
 0xb74   :  { %4941 = vrot.lane.b32.xlu2 %v9003_v52, %s7171_s26 }
 0xb75   :  { %4647 = vrot.lane.b32.xlu0 %v8870_v51, %s7171_s26 }
 0xb76   :  { %v3415_v43 = vpop.f32.mrf.mxu1 }
 0xb77   :  { %v3781_v48 = vpop.permute.xlu1 %3780  ;;  %v3613_v15 = vpop.permute.xlu0 %3612 }
 0xb78   :  { %v3618_v9 = vsel %vm563_vm11, %v3613_v15, 0  ;;  %4857 = vrot.lane.b32.xlu1 %v8926_v49, %s7171_s26  ;;  %6247 = vmatmul.msk.bf16.vlgmr.msrb.gmra.mxu1 %vm563_vm11, %v8904_v29  ;;  %v3762_v15 = vsel %vm563_vm11, %v3757_v27, 0 }
 0xb79   :  { %v3437_v3 = vpop.f32.mrf.mxu2  ;;  %3627 = vmatpush.bf16.xpose.msra.mxu2 %v3618_v9  ;;  %v4045_v9 = vpop.permute.xlu2 %4044 }
 0xb7c   :  { %4116 = vrot.lane.b32.xlu2 %v9104_v59, %s7180_s30 }
 0xb7d   :  { %4689 = vrot.lane.b32.xlu0 %v8906_v14, %s7171_s26 }
 0xb7f   :  { %v3637_v51 = vpop.permute.xlu1 %3636  ;;  %v9110_v52 = vpop.permute.xlu0 %3996 }
 0xb80   :  { %v3642_v42 = vsel %vm563_vm11, %v3637_v51, 0  ;;  %4962 = vrot.lane.b32.xlu1 %v9008_v5, %s7171_s26  ;;  %6248 = vmatmul.msk.bf16.vlgmr.msra.gmra.mxu2 %vm563_vm11, %v8928_v20 }
 0xb81   :  { %v3439_v29 = vpop.f32.mrf.mxu2  ;;  %v9117_v49 = vpop.f32.mrf.mxu3  ;;  %3651 = vmatpush.bf16.xpose.msra.mxu3 %v3642_v42 }
 0xb82   :  { %v3786_v29 = vsel %vm563_vm11, %v3781_v48, 0  ;;  %v3877_v27 = vpop.permute.xlu2 %3876  ;;  %v3954_v48 = vsel %vm563_vm11, %v9074_v17, 0 }
 0xb84   :  { %4836 = vrot.lane.b32.xlu2 %v3731_v61, %s7171_s26 }
 0xb85   :  { %4752 = vrot.lane.b32.xlu0 %v8958_v21, %s7171_s26 }
 0xb87   :  { %v9122_v14 = vpop.permute.xlu1 %4020  ;;  %v9124_v7 = vpop.permute.xlu0 %3828 }
 0xb88   :  { %6249 = vmatmul.msk.bf16.vlgmr.msra.gmra.mxu3 %vm563_vm11, %v8948_v44 }
 0xb89   :  { %v3463_v5 = vpop.f32.mrf.mxu3 }
 0xb8a   :  { %v3882_v5 = vsel %vm563_vm11, %v3877_v27, 0 }
 0xb8c   :  { %5004 = vrot.lane.b32.xlu2 %v9042_v57, %s7171_s26  ;;  %v3485_v20 = vpop.f32.mrf.mxu0 }
 0xb8d   :  { %4794 = vrot.lane.b32.xlu0 %v9013_v58, %s7171_s26 }
 0xb8f   :  { %v3853_v61 = vpop.permute.xlu1 %3852  ;;  %v3661_v43 = vpop.permute.xlu0 %3660 }
 0xb90   :  { %v3666_v21 = vsel %vm563_vm11, %v3661_v43, 0  ;;  %v3858_v57 = vsel %vm563_vm11, %v3853_v61, 0  ;;  %v10264_v61 = vld [vmem:[#allocation28_spill] sm:$0xff] }
 0xb91   :  { %3675 = vmatpush.bf16.xpose.msrb.mxu0 %v3666_v21 }
 0xb94   :  { %v3487_v44 = vpop.f32.mrf.mxu0  ;;  %v3509_v51 = vpop.f32.mrf.mxu1 }
 0xb95   :  { %4899 = vrot.lane.b32.xlu0 %v8942_v24, %s7171_s26 }
 0xb97   :  { %v3685_v42 = vpop.permute.xlu1 %3684 }
 0xb98   :  { %v3690_v58 = vsel %vm563_vm11, %v3685_v42, 0  ;;  %6250 = vmatmul.msk.bf16.vlgmr.msrb.gmra.mxu0 %vm563_vm11, %v8981_v40  ;;  %v9150_v40 = vadd.f32 %v9086_v55, %v10264_v61  ;;  %v10265_v55 = vld [vmem:[#allocation26_spill] sm:$0xff] }
 0xb99   :  { %3771 = vmatpush.bf16.xpose.msra.mxu0 %v3762_v15  ;;  %3699 = vmatpush.bf16.xpose.msra.mxu1 %v3690_v58  ;;  %v9169_v17 = vadd.f32 %v3437_v3, %v10265_v55  ;;  %v10266_v3 = vld [vmem:[#allocation30_spill] sm:$0xff]  ;;  %v3810_v58 = vsel %vm563_vm11, %v3805_v46, 0 }
 0xb9b   :  { %v4143_v44 = vsel %vm563_vm11, %v9169_v17, -inf }
 0xb9c   :  { %v3511_v24 = vpop.f32.mrf.mxu1 }
 0xb9d   :  { %4983 = vrot.lane.b32.xlu0 %v9044_v11, %s7171_s26  ;;  %v4140_v11 = vsel %vm563_vm11, %v9150_v40, -inf }
 0xb9f   :  { %v9144_v43 = vpop.permute.xlu1 %4563 }
 0xba0   :  { %6251 = vmatmul.msk.bf16.vlgmr.msra.gmra.mxu1 %vm563_vm11, %v9001_v25  ;;  %v9163_v25 = vadd.f32 %v3509_v51, %v7819_v16 }
 0xba1   :  { %3867 = vmatpush.bf16.xpose.msrb.mxu0 %v3858_v57  ;;  %3795 = vmatpush.bf16.xpose.msrb.mxu1 %v3786_v29 }
 0xba5   :  { %5025 = vrot.lane.b32.xlu0 %v8902_v30, %s7171_s26  ;;  %v3978_v30 = vsel %vm563_vm11, %v3973_v13, 0  ;;  %v9183_v13 = vadd.f32 %v3485_v20, %v10266_v3 }
 0xba7   :  { %v9160_v21 = vpop.permute.xlu1 %4668  ;;  %v4149_v51 = vsel %vm563_vm11, %v9183_v13, -inf }
 0xba8   :  { %6254 = vmatmul.msk.bf16.vlgmr.msra.gmra.mxu0 %vm563_vm11, %v8899_v50  ;;  %v4152_v50 = vsel %vm563_vm11, %v9163_v25, -inf }
 0xba9   :  { %3891 = vmatpush.bf16.xpose.msra.mxu1 %v3882_v5  ;;  %3963 = vmatpush.bf16.xpose.msra.mxu0 %v3954_v48  ;;  %v4002_v48 = vsel %vm563_vm11, %v9110_v52, 0 }
 0xbaa   :  { %4141 = vmax.xlane.f32.xlu1 %v4140_v11 }
 0xbad   :  { %5046 = vrot.lane.b32.xlu0 %v8916_v23, %s7171_s26  ;;  %v4050_v23 = vsel %vm563_vm11, %v4045_v9, 0 }
 0xbaf   :  { %v9175_v15 = vpop.permute.xlu1 %4731 }
 0xbb0   :  { %6255 = vmatmul.msk.bf16.vlgmr.msrb.gmra.mxu1 %vm563_vm11, %v8924_v60  ;;  %v4543_v60 = vpop.permute.xlu2 %4542 }
 0xbb1   :  { %3987 = vmatpush.bf16.xpose.msrb.mxu1 %v3978_v30  ;;  %v10267_v30 = vld [vmem:[#allocation27_spill] sm:$0xff] }
 0xbb2   :  { %4153 = vmax.xlane.f32.xlu1 %v4152_v50 }
 0xbb5   :  { %5067 = vrot.lane.b32.xlu0 %v8964_v47, %s7171_s26  ;;  %4144 = vmax.xlane.f32.xlu2 %v4143_v44 }
 0xbb7   :  { %v9189_v42 = vpop.permute.xlu1 %4773 }
 0xbb8   :  { %6258 = vmatmul.msk.bf16.vlgmr.msrb.gmra.mxu0 %vm563_vm11, %v8983_v35  ;;  %v4606_v20 = vpop.permute.xlu2 %4605 }
 0xbb9   :  { %4059 = vmatpush.bf16.xpose.msrb.mxu0 %v4050_v23 }
 0xbbd   :  { %4150 = vmax.xlane.f32.xlu2 %v4149_v51 }
 0xbbe   :  { %v3709_v57 = vpop.permute.xlu0 %3708 }
 0xbbf   :  { %v3714_v47 = vsel %vm563_vm11, %v3709_v57, 0 }
 0xbc0   :  { %3723 = vmatpush.bf16.xpose.msrb.mxu2 %v3714_v47  ;;  %6259 = vmatmul.msk.bf16.vlgmr.msra.gmra.mxu1 %vm563_vm11, %v8990_v28  ;;  %v9201_v46 = vpop.permute.xlu2 %4710  ;;  %v4548_v28 = vsel %vm1716_vm12, %v4543_v60, 0  ;;  %v3834_v47 = vsel %vm563_vm11, %v9124_v7, 0 }
 0xbc6   :  { %v3901_v35 = vpop.permute.xlu1 %3900 }
 0xbc7   :  { %v3906_v9 = vsel %vm563_vm11, %v3901_v35, 0  ;;  %v4069_v29 = vpop.permute.xlu0 %4068  ;;  %6252 = vmatmul.msk.bf16.vlgmr.msrb.gmra.mxu2 %vm563_vm11, %v9029_v19 }
 0xbc8   :  { %3819 = vmatpush.bf16.xpose.msra.mxu2 %v3810_v58  ;;  %v4074_v27 = vsel %vm563_vm11, %v4069_v29, 0  ;;  %6262 = vmatmul.msk.bf16.vlgmr.msra.gmra.mxu0 %vm563_vm11, %v8882_v56  ;;  %v3925_v19 = vpop.permute.xlu2 %3924  ;;  %v4611_v56 = vsel %vm1716_vm12, %v4606_v20, 0 }
 0xbc9   :  { %4083 = vmatpush.bf16.xpose.msra.mxu1 %v4074_v27  ;;  %v10270_v27 = vld [vmem:[#allocation32_spill] sm:$0xff] }
 0xbcf   :  { %v4522_v24 = vpop.permute.xlu0 %4521 }
 0xbd0   :  { %3915 = vmatpush.bf16.xpose.msrb.mxu2 %v3906_v9  ;;  %v4527_v5 = vsel %vm1716_vm12, %v4522_v24, 0  ;;  %6263 = vmatmul.msk.bf16.vlgmr.msrb.gmra.mxu1 %vm563_vm11, %v8891_v10  ;;  %v9218_v10 = vadd.f32 %v9063_v0, %v10267_v30  ;;  %v9222_v23 = vpop.permute.xlu2 %4815  ;;  %v3930_v9 = vsel %vm563_vm11, %v3925_v19, 0 }
 0xbd1   :  { %4536 = vmatpush.bf16.msra.mxu0 %v4527_v5  ;;  %4557 = vmatpush.bf16.msrb.mxu1 %v4548_v28 }
 0xbd2   :  { %v4137_v52 = vsel %vm563_vm11, %v9218_v10, -inf }
 0xbd7   :  { %v9209_v11 = vpop.permute.xlu0 %4584  ;;  %6256 = vmatmul.msk.bf16.vlgmr.msra.gmra.mxu2 %vm563_vm11, %v8920_v41 }
 0xbd8   :  { %4011 = vmatpush.bf16.xpose.msra.mxu2 %v4002_v48  ;;  %6266 = vmatmul.msk.bf16.vlgmr.msrb.gmra.mxu0 %vm563_vm11, %v8975_v1  ;;  %v10268_v1 = vld [vmem:[#allocation29_spill] sm:$0xff] }
 0xbd9   :  { %4620 = vmatpush.bf16.msrb.mxu0 %v4611_v56  ;;  %v9229_v60 = vadd.f32 %v9117_v49, %v10268_v1  ;;  %v10269_v49 = vld [vmem:[#allocation31_spill] sm:$0xff] }
 0xbda   :  { %v4093_v50 = vpop.permute.xlu1 %4092 }
 0xbdb   :  { %v4146_v58 = vsel %vm563_vm11, %v9229_v60, -inf  ;;  %v4098_v20 = vsel %vm563_vm11, %v4093_v50, 0 }
 0xbdf   :  { %4138 = vmax.xlane.f32.xlu0 %v4137_v52  ;;  %v4627_v44 = vpop.permute.xlu0 %4626 }
 0xbe0   :  { %v4632_v41 = vsel %vm1716_vm12, %v4627_v44, 0  ;;  %6267 = vmatmul.msk.bf16.vlgmr.msra.gmra.mxu1 %vm563_vm11, %v9032_v39  ;;  %v9239_v39 = vpop.permute.xlu2 %4878 }
 0xbe1   :  { %4641 = vmatpush.bf16.msra.mxu1 %v4632_v41  ;;  %v4569_v41 = vsel %vm1716_vm12, %v9144_v43, 0 }
 0xbe2   :  { %v3733_v0 = vpop.permute.xlu1 %3732 }
 0xbe3   :  { %v3738_v51 = vsel %vm563_vm11, %v3733_v0, 0  ;;  %v3533_v57 = vpop.f32.mrf.mxu2 }
 0xbe4   :  { %3747 = vmatpush.bf16.xpose.msrb.mxu3 %v3738_v51  ;;  %v9242_v35 = vadd.f32 %v3533_v57, %v10269_v49  ;;  %v4026_v57 = vsel %vm563_vm11, %v9122_v14, 0 }
 0xbe6   :  { %v4155_v5 = vsel %vm563_vm11, %v9242_v35, -inf }
 0xbe7   :  { %4147 = vmax.xlane.f32.xlu0 %v4146_v58  ;;  %6260 = vmatmul.msk.bf16.vlgmr.msrb.gmra.mxu2 %vm563_vm11, %v9037_v45  ;;  %v4648_v51 = vpop.permute.xlu0 %4647 }
 0xbe8   :  { %4107 = vmatpush.bf16.xpose.msrb.mxu2 %v4098_v20  ;;  %v9259_v56 = vpop.permute.xlu2 %4920 }
 0xbea   :  { %v9286_v14 = vpop.permute.xlu1 %4857 }
 0xbeb   :  { %v3535_v7 = vpop.f32.mrf.mxu2  ;;  %v3557_v29 = vpop.f32.mrf.mxu3  ;;  %6253 = vmatmul.msk.bf16.vlgmr.msrb.gmra.mxu3 %vm563_vm11, %v9070_v32 }
 0xbec   :  { %3843 = vmatpush.bf16.xpose.msra.mxu3 %v3834_v47  ;;  %v9248_v24 = vadd.f32 %v3557_v29, %v10270_v27  ;;  %v4653_v7 = vsel %vm1716_vm12, %v4648_v51, 0 }
 0xbed   :  { %v3581_v28 = vpop.f32.mrf.mxu0 }
 0xbee   :  { %v9251_v45 = vadd.f32 %v3581_v28, %v10267_v30  ;;  %v4158_v48 = vsel %vm563_vm11, %v9248_v24, -inf }
 0xbef   :  { %4156 = vmax.xlane.f32.xlu0 %v4155_v5  ;;  %4159 = vmax.xlane.f32.xlu2 %v4158_v48  ;;  %v9276_v20 = vpop.permute.xlu0 %4689 }
 0xbf0   :  { %v4161_v19 = vsel %vm563_vm11, %v9251_v45, -inf  ;;  %v9274_v58 = vpop.permute.xlu2 %4941 }
 0xbf1   :  { %4162 = vmax.xlane.f32.xlu1 %v4161_v19  ;;  %10271 = vst [vmem:[#allocation20_spill] sm:$0xff] %v9274_v58 }
 0xbf3   :  { %v3559_v32 = vpop.f32.mrf.mxu3 }
 0xbf4   :  { %3939 = vmatpush.bf16.xpose.msrb.mxu3 %v3930_v9  ;;  %v9295_v32 = vpop.permute.xlu1 %4962 }
 0xbf5   :  { %v3583_v50 = vpop.f32.mrf.mxu0  ;;  %v3605_v52 = vpop.f32.mrf.mxu1 }
 0xbf6   :  { %v9262_v44 = vadd.f32 %v3605_v52, %v10264_v61 }
 0xbf7   :  { %6264 = vmatmul.msk.bf16.vlgmr.msra.gmra.mxu2 %vm563_vm11, %v8950_v18  ;;  %v9293_v48 = vpop.permute.xlu0 %4752 }
 0xbf8   :  { %4578 = vmatpush.bf16.msra.mxu2 %v4569_v41  ;;  %v4164_v0 = vsel %vm563_vm11, %v9262_v44, -inf  ;;  %v4590_v41 = vsel %vm1716_vm12, %v9209_v11, 0 }
 0xbf9   :  { %4165 = vmax.xlane.f32.xlu0 %v4164_v0 }
 0xbfb   :  { %6257 = vmatmul.msk.bf16.vlgmr.msra.gmra.mxu3 %vm563_vm11, %v8960_v36  ;;  %v4117_v36 = vpop.permute.xlu2 %4116 }
 0xbfc   :  { %4035 = vmatpush.bf16.xpose.msra.mxu3 %v4026_v57  ;;  %v4122_v29 = vsel %vm563_vm11, %v4117_v36, 0 }
 0xbfd   :  { %v3607_v47 = vpop.f32.mrf.mxu1 }
 0xbff   :  { %v9299_v52 = vpop.permute.xlu0 %4794 }
 0xc03   :  { %v3629_v43 = vpop.f32.mrf.mxu2 }
 0xc04   :  { %v9279_v18 = vadd.f32 %v3629_v43, %v10265_v55 }
 0xc06   :  { %v4167_v9 = vsel %vm563_vm11, %v9279_v18, -inf }
 0xc07   :  { %4168 = vmax.xlane.f32.xlu2 %v4167_v9  ;;  %6268 = vmatmul.msk.bf16.vlgmr.msrb.gmra.mxu2 %vm563_vm11, %v9061_v37  ;;  %v9297_v37 = vpop.permute.xlu2 %4836  ;;  %v9313_v11 = vpop.permute.xlu0 %4899 }
 0xc08   :  { %4662 = vmatpush.bf16.msrb.mxu2 %v4653_v7 }
 0xc0b   :  { %v3631_v28 = vpop.f32.mrf.mxu2  ;;  %v9289_v5 = vpop.f32.mrf.mxu3  ;;  %6261 = vmatmul.msk.bf16.vlgmr.msrb.gmra.mxu3 %vm563_vm11, %v9035_v62 }
 0xc0c   :  { %4131 = vmatpush.bf16.xpose.msrb.mxu3 %v4122_v29 }
 0xc0f   :  { %v9309_v43 = vpop.permute.xlu2 %5004 }
 0xc10   :  { %10272 = vst [vmem:[#allocation22_spill] sm:$0xff] %v9309_v43 }
 0xc13   :  { %v3655_v19 = vpop.f32.mrf.mxu3 }
 0xc15   :  { %v3677_v50 = vpop.f32.mrf.mxu0 }
 0xc1b   :  { %6265 = vmatmul.msk.bf16.vlgmr.msra.gmra.mxu3 %vm563_vm11, %v8962_v34 }
 0xc1c   :  { %4599 = vmatpush.bf16.msra.mxu3 %v4590_v41  ;;  %v9323_v41 = vpop.permute.xlu0 %4983 }
 0xc1d   :  { %v3701_v0 = vpop.f32.mrf.mxu1  ;;  %v4142_v62 = vpop.xlane.xlu1 %4141 }
 0xc1e   :  { %v9306_v51 = vadd.f32 %v3701_v0, %v7819_v16  ;;  %v4234_v57 = vsub.f32 %v9150_v40, %v4142_v62  ;;  %v3679_v47 = vpop.f32.mrf.mxu0  ;;  %v4674_v40 = vsel %vm1716_vm12, %v9160_v21, 0  ;;  %v9326_v0 = vadd.f32 %v3677_v50, %v10266_v3 }
 0xc20   :  { %v4267_v9 = vmul.f32 1.442695, %v4234_v57  ;;  %v4176_v7 = vsel %vm563_vm11, %v9306_v51, -inf }
 0xc21   :  { %4177 = vmax.xlane.f32.xlu2 %v4176_v7  ;;  %v4173_v7 = vsel %vm563_vm11, %v9326_v0, -inf }
 0xc22   :  { %6841 = vpow2.f32 %v4267_v9 }
 0xc25   :  { %v3703_v34 = vpop.f32.mrf.mxu1 }
 0xc26   :  { %v3773_v36 = vpop.f32.mrf.mxu0 }
 0xc27   :  { %v9334_v34 = vadd.f32 %v3773_v36, %v10267_v30 }
 0xc28   :  { %v9315_v29 = vpop.eup %6841  ;;  %v4145_v28 = vpop.xlane.xlu2 %4144 }
 0xc29   :  { %v4332_v19 = vsel %vm563_vm11, %v9315_v29, 0.0 }
 0xc2a   :  { %4333 = vadd.xlane.f32.xlu0 %v4332_v19  ;;  %v9336_v19 = vpop.permute.xlu0 %5025 }
 0xc2b   :  { %6269 = vmatmul.msk.bf16.vlgmr.msrb.gmra.mxu3 %vm563_vm11, %v9092_v6  ;;  %10273 = vst [vmem:[#allocation21_spill] sm:$0xff] %v9336_v19 }
 0xc2c   :  { %4683 = vmatpush.bf16.msrb.mxu3 %v4674_v40  ;;  %v4185_v40 = vsel %vm563_vm11, %v9334_v34, -inf }
 0xc2d   :  { %v9328_v62 = vpop.f32.mrf.mxu1 }
 0xc2e   :  { %v3775_v57 = vpop.f32.mrf.mxu0 }
 0xc30   :  { %v4151_v47 = vpop.xlane.xlu2 %4150 }
 0xc31   :  { %v4237_v9 = vsub.f32 %v9183_v13, %v4151_v47 }
 0xc32   :  { %4174 = vmax.xlane.f32.xlu0 %v4173_v7 }
 0xc33   :  { %v4273_v21 = vmul.f32 1.442695, %v4237_v9  ;;  %v9348_v9 = vpop.permute.xlu0 %5046 }
 0xc34   :  { %10274 = vst [vmem:[#allocation23_spill] sm:$0xff] %v9348_v9 }
 0xc35   :  { %6843 = vpow2.f32 %v4273_v21  ;;  %v3799_v6 = vpop.f32.mrf.mxu1 }
 0xc36   :  { %v9338_v50 = vpop.f32.mrf.mxu0 }
 0xc3a   :  { %4186 = vmax.xlane.f32.xlu0 %v4185_v40 }
 0xc3b   :  { %v9342_v57 = vpop.eup %6843  ;;  %v9352_v6 = vpop.permute.xlu0 %5067 }
 0xc3c   :  { %v4341_v13 = vsel %vm563_vm11, %v9342_v57, 0.0  ;;  %10275 = vst [vmem:[#allocation24_spill] sm:$0xff] %v9352_v6 }
 0xc3d   :  { %v9346_v47 = vpop.f32.mrf.mxu1  ;;  %4342 = vadd.xlane.f32.xlu2 %v4341_v13 }
 0xc3e   :  { %v3871_v36 = vpop.f32.mrf.mxu0 }
 0xc45   :  { %v3895_v7 = vpop.f32.mrf.mxu1 }
 0xc46   :  { %v9350_v21 = vpop.f32.mrf.mxu0 }
 0xc4a   :  { %v3725_v4 = vpop.f32.mrf.mxu2 }
 0xc4b   :  { %v9355_v12 = vadd.f32 %v3725_v4, %v10269_v49  ;;  %v4235_v4 = vsub.f32 %v9169_v17, %v4145_v28 }
 0xc4d   :  { %v3989_v40 = vpop.f32.mrf.mxu1  ;;  %v4179_v8 = vsel %vm563_vm11, %v9355_v12, -inf }
 0xc4e   :  { %v3967_v33 = vpop.f32.mrf.mxu0  ;;  %4180 = vmax.xlane.f32.xlu2 %v4179_v8  ;;  %v4269_v8 = vmul.f32 1.442695, %v4235_v4 }
 0xc52   :  { %v4139_v31 = vpop.xlane.xlu0 %4138  ;;  %v3727_v13 = vpop.f32.mrf.mxu2 }
 0xc53   :  { %v4233_v36 = vsub.f32 %v9218_v10, %v4139_v31  ;;  %v9369_v31 = vadd.f32 %v9289_v5, %v10268_v1 }
 0xc55   :  { %v4265_v38 = vmul.f32 1.442695, %v4233_v36  ;;  %v3991_v7 = vpop.f32.mrf.mxu1  ;;  %v4170_v4 = vsel %vm563_vm11, %v9369_v31, -inf }
 0xc56   :  { %v4061_v2 = vpop.f32.mrf.mxu0 }
 0xc57   :  { %6845 = vpow2.f32 %v4265_v38 }
 0xc58   :  { %6847 = vpow2.f32 %v4269_v8 }
 0xc5a   :  { %v4148_v54 = vpop.xlane.xlu0 %4147  ;;  %v9360_v6 = vpop.f32.mrf.mxu2 }
 0xc5b   :  { %v4236_v17 = vsub.f32 %v9229_v60, %v4148_v54 }
 0xc5d   :  { %v9362_v43 = vpop.eup %6845  ;;  %v4085_v59 = vpop.f32.mrf.mxu1  ;;  %v4271_v5 = vmul.f32 1.442695, %v4236_v17 }
 0xc5e   :  { %v4063_v9 = vpop.f32.mrf.mxu0  ;;  %v4329_v33 = vsel %vm563_vm11, %v9362_v43, 0.0  ;;  %v9376_v58 = vpop.eup %6847 }
 0xc5f   :  { %4330 = vadd.xlane.f32.xlu1 %v4329_v33  ;;  %v4154_v33 = vpop.xlane.xlu1 %4153 }
 0xc62   :  { %v4157_v10 = vpop.xlane.xlu0 %4156  ;;  %v4160_v38 = vpop.xlane.xlu2 %4159 }
 0xc63   :  { %v4239_v13 = vsub.f32 %v9242_v35, %v4157_v10  ;;  %v4240_v36 = vsub.f32 %v9248_v24, %v4160_v38  ;;  %v3823_v7 = vpop.f32.mrf.mxu2  ;;  %v4238_v24 = vsub.f32 %v9163_v25, %v4154_v33 }
 0xc65   :  { %v4277_v28 = vmul.f32 1.442695, %v4239_v13  ;;  %v4279_v9 = vmul.f32 1.442695, %v4240_v36  ;;  %v4087_v19 = vpop.f32.mrf.mxu1  ;;  %v4275_v13 = vmul.f32 1.442695, %v4238_v24  ;;  %v9390_v36 = vadd.f32 %v3989_v40, %v10264_v61 }
 0xc66   :  { %v4335_v19 = vsel %vm563_vm11, %v9376_v58, 0.0 }
 0xc67   :  { %6849 = vpow2.f32 %v4277_v28  ;;  %4171 = vmax.xlane.f32.xlu1 %v4170_v4  ;;  %v9399_v4 = vadd.f32 %v4061_v2, %v10266_v3  ;;  %v9414_v2 = vadd.f32 %v9328_v62, %v10264_v61 }
 0xc68   :  { %6851 = vpow2.f32 %v4279_v9  ;;  %v4212_v9 = vsel %vm563_vm11, %v9390_v36, -inf }
 0xc69   :  { %6853 = vpow2.f32 %v4271_v5 }
 0xc6a   :  { %6855 = vpow2.f32 %v4275_v13  ;;  %v9417_v13 = vadd.f32 %v4085_v59, %v7819_v16 }
 0xc6b   :  { %v3917_v35 = vpop.f32.mrf.mxu2 }
 0xc6c   :  { %v4224_v61 = vsel %vm563_vm11, %v9417_v13, -inf }
 0xc6d   :  { %v9378_v10 = vpop.eup %6849 }
 0xc6e   :  { %v9381_v54 = vpop.eup %6851  ;;  %v3749_v60 = vpop.f32.mrf.mxu3  ;;  %v4347_v8 = vsel %vm563_vm11, %v9378_v10, 0.0 }
 0xc6f   :  { %4336 = vadd.xlane.f32.xlu1 %v4335_v19  ;;  %4348 = vadd.xlane.f32.xlu0 %v4347_v8  ;;  %v4350_v38 = vsel %vm563_vm11, %v9381_v54, 0.0  ;;  %v9392_v25 = vpop.eup %6853  ;;  %v4221_v19 = vsel %vm563_vm11, %v9399_v4, -inf }
 0xc70   :  { %4351 = vadd.xlane.f32.xlu2 %v4350_v38  ;;  %v4338_v28 = vsel %vm563_vm11, %v9392_v25, 0.0  ;;  %v9401_v5 = vpop.eup %6855 }
 0xc71   :  { %v4344_v24 = vsel %vm563_vm11, %v9401_v5, 0.0 }
 0xc73   :  { %v3919_v7 = vpop.f32.mrf.mxu2 }
 0xc76   :  { %v3751_v17 = vpop.f32.mrf.mxu3 }
 0xc77   :  { %4339 = vadd.xlane.f32.xlu1 %v4338_v28  ;;  %4213 = vmax.xlane.f32.xlu0 %v4212_v9  ;;  %v9421_v28 = vadd.f32 %v9350_v21, %v10267_v30  ;;  %v9437_v21 = vadd.f32 %v3917_v35, %v10269_v49 }
 0xc79   :  { %v4209_v62 = vsel %vm563_vm11, %v9421_v28, -inf }
 0xc7a   :  { %v4169_v7 = vpop.xlane.xlu2 %4168 }
 0xc7b   :  { %v4013_v40 = vpop.f32.mrf.mxu2  ;;  %v4243_v9 = vsub.f32 %v9279_v18, %v4169_v7 }
 0xc7d   :  { %v4285_v59 = vmul.f32 1.442695, %v4243_v9  ;;  %v9447_v9 = vadd.f32 %v9338_v50, %v10266_v3 }
 0xc7e   :  { %v3845_v33 = vpop.f32.mrf.mxu3 }
 0xc7f   :  { %v9408_v8 = vadd.f32 %v3845_v33, %v10268_v1  ;;  %4345 = vadd.xlane.f32.xlu1 %v4344_v24  ;;  %4222 = vmax.xlane.f32.xlu0 %v4221_v19  ;;  %v4188_v24 = vsel %vm563_vm11, %v9414_v2, -inf  ;;  %v9431_v19 = vadd.f32 %v3749_v60, %v10270_v27  ;;  %6857 = vpow2.f32 %v4285_v59 }
 0xc80   :  { %v4203_v60 = vsel %vm563_vm11, %v9437_v21, -inf }
 0xc81   :  { %v4194_v38 = vsel %vm563_vm11, %v9408_v8, -inf  ;;  %v4182_v7 = vsel %vm563_vm11, %v9431_v19, -inf }
 0xc82   :  { %4195 = vmax.xlane.f32.xlu2 %v4194_v38 }
 0xc83   :  { %v4015_v17 = vpop.f32.mrf.mxu2 }
 0xc86   :  { %v3847_v33 = vpop.f32.mrf.mxu3 }
 0xc87   :  { %4189 = vmax.xlane.f32.xlu1 %v4188_v24  ;;  %4225 = vmax.xlane.f32.xlu0 %v4224_v61  ;;  %v4166_v24 = vpop.xlane.xlu0 %4165 }
 0xc8a   :  { %4210 = vmax.xlane.f32.xlu2 %v4209_v62 }
 0xc8b   :  { %v4109_v30 = vpop.f32.mrf.mxu2 }
 0xc8c   :  { %v9434_v18 = vadd.f32 %v4109_v30, %v10269_v49  ;;  %v9449_v49 = vpop.eup %6857  ;;  %v4197_v30 = vsel %vm563_vm11, %v9447_v9, -inf }
 0xc8e   :  { %v3941_v38 = vpop.f32.mrf.mxu3  ;;  %v4227_v17 = vsel %vm563_vm11, %v9434_v18, -inf }
 0xc8f   :  { %4183 = vmax.xlane.f32.xlu1 %v4182_v7  ;;  %4228 = vmax.xlane.f32.xlu0 %v4227_v17  ;;  %v9452_v61 = vadd.f32 %v3941_v38, %v10270_v27  ;;  %v4359_v7 = vsel %vm563_vm11, %v9449_v49, 0.0  ;;  %v9463_v38 = vadd.f32 %v9360_v6, %v10265_v55  ;;  %v4163_v17 = vpop.xlane.xlu1 %4162 }
 0xc91   :  { %v4206_v50 = vsel %vm563_vm11, %v9452_v61, -inf }
 0xc92   :  { %4204 = vmax.xlane.f32.xlu2 %v4203_v60  ;;  %v9467_v60 = vadd.f32 %v4013_v40, %v10265_v55  ;;  %v9479_v55 = vadd.f32 %v9346_v47, %v7819_v16 }
 0xc93   :  { %v4111_v35 = vpop.f32.mrf.mxu2 }
 0xc94   :  { %v4178_v33 = vpop.xlane.xlu2 %4177 }
 0xc95   :  { %v4246_v59 = vsub.f32 %v9306_v51, %v4178_v33  ;;  %v4241_v51 = vsub.f32 %v9251_v45, %v4163_v17  ;;  %v4215_v45 = vsel %vm563_vm11, %v9467_v60, -inf }
 0xc96   :  { %v3943_v62 = vpop.f32.mrf.mxu3 }
 0xc97   :  { %v4291_v3 = vmul.f32 1.442695, %v4246_v59  ;;  %4198 = vmax.xlane.f32.xlu1 %v4197_v30  ;;  %4360 = vadd.xlane.f32.xlu0 %v4359_v7  ;;  %v4191_v59 = vsel %vm563_vm11, %v9463_v38, -inf  ;;  %v4281_v30 = vmul.f32 1.442695, %v4241_v51  ;;  %v4200_v51 = vsel %vm563_vm11, %v9479_v55, -inf }
 0xc99   :  { %6859 = vpow2.f32 %v4291_v3 }
 0xc9a   :  { %4207 = vmax.xlane.f32.xlu2 %v4206_v50 }
 0xc9d   :  { %v4334_v35 = vpop.xlane.xlu0 %4333 }
 0xc9e   :  { %6861 = vrcp.f32 %v4334_v35  ;;  %v4037_v33 = vpop.f32.mrf.mxu3 }
 0xc9f   :  { %v9471_v62 = vpop.eup %6859  ;;  %4192 = vmax.xlane.f32.xlu1 %v4191_v59  ;;  %6863 = vpow2.f32 %v4281_v30  ;;  %v9483_v3 = vadd.f32 %v4037_v33, %v10268_v1  ;;  %v4716_v59 = vsel %vm1716_vm12, %v9201_v46, 0  ;;  %v4242_v1 = vsub.f32 %v9262_v44, %v4166_v24 }
 0xca0   :  { %v4368_v6 = vsel %vm563_vm11, %v9471_v62, 0.0 }
 0xca1   :  { %4369 = vadd.xlane.f32.xlu0 %v4368_v6  ;;  %v4218_v16 = vsel %vm563_vm11, %v9483_v3, -inf }
 0xca2   :  { %4216 = vmax.xlane.f32.xlu2 %v4215_v45  ;;  %v4283_v45 = vmul.f32 1.442695, %v4242_v1 }
 0xca4   :  { %v6862_v40 = vpop.eup %6861 }
 0xca5   :  { %v4458_v7 = vmul.f32 %v6862_v40, %v9315_v29  ;;  %v4175_v50 = vpop.xlane.xlu0 %4174  ;;  %v9492_v29 = vpop.eup %6863 }
 0xca6   :  { %v4039_v17 = vpop.f32.mrf.mxu3  ;;  %v4353_v30 = vsel %vm563_vm11, %v9492_v29, 0.0 }
 0xca7   :  { %v4490_v35 = vpack.c.bf16 %v4458_v7, %v4458_v7  ;;  %4201 = vmax.xlane.f32.xlu1 %v4200_v51 }
 0xca9   :  { %6271 = vmatmul.msk.bf16.vlgmr.msrb.gmra.mxu1 %vm563_vm11, %v4490_v35 }
 0xcaa   :  { %4725 = vmatpush.bf16.msrb.mxu1 %v4716_v59  ;;  %4219 = vmax.xlane.f32.xlu2 %v4218_v16 }
 0xcad   :  { %v4187_v47 = vpop.xlane.xlu0 %4186 }
 0xcae   :  { %v4249_v33 = vsub.f32 %v9334_v34, %v4187_v47  ;;  %v4133_v6 = vpop.f32.mrf.mxu3 }
 0xcaf   :  { %4354 = vadd.xlane.f32.xlu1 %v4353_v30  ;;  %v9499_v40 = vadd.f32 %v4133_v6, %v10270_v27 }
 0xcb0   :  { %v4297_v46 = vmul.f32 1.442695, %v4249_v33  ;;  %v4343_v34 = vpop.xlane.xlu2 %4342 }
 0xcb1   :  { %v4230_v17 = vsel %vm563_vm11, %v9499_v40, -inf }
 0xcb2   :  { %6865 = vpow2.f32 %v4297_v46 }
 0xcb3   :  { %6867 = vpow2.f32 %v4283_v45 }
 0xcb6   :  { %v4135_v7 = vpop.f32.mrf.mxu3 }
 0xcb7   :  { %4231 = vmax.xlane.f32.xlu1 %v4230_v17 }
 0xcb8   :  { %v9503_v44 = vpop.eup %6865 }
 0xcb9   :  { %v4377_v24 = vsel %vm563_vm11, %v9503_v44, 0.0  ;;  %v9507_v51 = vpop.eup %6867 }
 0xcba   :  { %4378 = vadd.xlane.f32.xlu0 %v4377_v24  ;;  %v4356_v35 = vsel %vm563_vm11, %v9507_v51, 0.0  ;;  %v4245_v24 = vsub.f32 %v9326_v0, %v4175_v50 }
 0xcbf   :  { %4357 = vadd.xlane.f32.xlu1 %v4356_v35  ;;  %v4289_v35 = vmul.f32 1.442695, %v4245_v24 }
 0xcc1   :  { %v4181_v27 = vpop.xlane.xlu2 %4180 }
 0xcc2   :  { %v4247_v59 = vsub.f32 %v9355_v12, %v4181_v27  ;;  %v4695_v12 = vsel %vm1716_vm12, %v9276_v20, 0 }
 0xcc4   :  { %v4293_v16 = vmul.f32 1.442695, %v4247_v59 }
 0xcc6   :  { %6869 = vpow2.f32 %v4293_v16 }
 0xccc   :  { %v9512_v1 = vpop.eup %6869 }
 0xccd   :  { %v4371_v47 = vsel %vm563_vm11, %v9512_v1, 0.0 }
 0xcce   :  { %4372 = vadd.xlane.f32.xlu2 %v4371_v47 }
 0xcd2   :  { %v4331_v33 = vpop.xlane.xlu1 %4330 }
 0xcd3   :  { %6871 = vrcp.f32 %v4331_v33 }
 0xcd4   :  { %6873 = vrcp.f32 %v4343_v34 }
 0xcd9   :  { %v6872_v6 = vpop.eup %6871 }
 0xcda   :  { %v4457_v30 = vmul.f32 %v6872_v6, %v9362_v43  ;;  %v4172_v46 = vpop.xlane.xlu1 %4171  ;;  %v6874_v43 = vpop.eup %6873 }
 0xcdb   :  { %v4244_v45 = vsub.f32 %v9369_v31, %v4172_v46  ;;  %v4461_v20 = vmul.f32 %v6874_v43, %v9342_v57 }
 0xcdc   :  { %v4489_v7 = vpack.c.bf16 %v4457_v30, %v4457_v30 }
 0xcdd   :  { %v4287_v17 = vmul.f32 1.442695, %v4244_v45  ;;  %v4493_v6 = vpack.c.bf16 %v4461_v20, %v4461_v20  ;;  %v4737_v45 = vsel %vm1716_vm12, %v9175_v15, 0 }
 0xcde   :  { %6270 = vmatmul.msk.bf16.vlgmr.msra.gmra.mxu0 %vm563_vm11, %v4489_v7  ;;  %v4779_v7 = vsel %vm1716_vm12, %v9189_v42, 0 }
 0xcdf   :  { %6875 = vpow2.f32 %v4287_v17  ;;  %4704 = vmatpush.bf16.msra.mxu0 %v4695_v12 }
 0xce2   :  { %v4337_v27 = vpop.xlane.xlu1 %4336  ;;  %v4349_v59 = vpop.xlane.xlu0 %4348 }
 0xce3   :  { %6877 = vrcp.f32 %v4337_v27  ;;  %v4352_v46 = vpop.xlane.xlu2 %4351  ;;  %v4758_v27 = vsel %vm1716_vm12, %v9293_v48, 0 }
 0xce4   :  { %6879 = vpow2.f32 %v4289_v35 }
 0xce5   :  { %v9522_v16 = vpop.eup %6875 }
 0xce6   :  { %v4362_v31 = vsel %vm563_vm11, %v9522_v16, 0.0 }
 0xce7   :  { %4363 = vadd.xlane.f32.xlu1 %v4362_v31 }
 0xce9   :  { %v6878_v0 = vpop.eup %6877 }
 0xcea   :  { %v4459_v50 = vmul.f32 %v6878_v0, %v9376_v58  ;;  %v4340_v34 = vpop.xlane.xlu1 %4339  ;;  %v9528_v47 = vpop.xlane.xlu0 %4213 }
 0xceb   :  { %6881 = vrcp.f32 %v4340_v34  ;;  %v9530_v33 = vpop.eup %6879 }
 0xcec   :  { %v4491_v30 = vpack.c.bf16 %v4459_v50, %v4459_v50  ;;  %6883 = vrcp.f32 %v4349_v59  ;;  %v4365_v58 = vsel %vm563_vm11, %v9530_v33, 0.0 }
 0xcee   :  { %6272 = vmatmul.msk.bf16.vlgmr.msra.gmra.mxu2 %vm563_vm11, %v4491_v30  ;;  %6274 = vmatmul.msk.bf16.vlgmr.msrb.gmra.mxu0 %vm563_vm11, %v4493_v6 }
 0xcef   :  { %4746 = vmatpush.bf16.msra.mxu2 %v4737_v45  ;;  %4788 = vmatpush.bf16.msrb.mxu0 %v4779_v7 }
 0xcf0   :  { %4366 = vadd.xlane.f32.xlu1 %v4365_v58 }
 0xcf1   :  { %v6882_v57 = vpop.eup %6881 }
 0xcf2   :  { %v4460_v17 = vmul.f32 %v6882_v57, %v9392_v25  ;;  %v4346_v12 = vpop.xlane.xlu1 %4345  ;;  %v9541_v24 = vpop.xlane.xlu0 %4222 }
 0xcf3   :  { %6885 = vrcp.f32 %v4346_v12  ;;  %v6884_v42 = vpop.eup %6883  ;;  %v4842_v12 = vsel %vm1716_vm12, %v9297_v37, 0 }
 0xcf4   :  { %v4492_v15 = vpack.c.bf16 %v4460_v17, %v4460_v17  ;;  %6887 = vrcp.f32 %v4352_v46  ;;  %v4463_v59 = vmul.f32 %v6884_v42, %v9378_v10  ;;  %v4821_v46 = vsel %vm1716_vm12, %v9222_v23, 0 }
 0xcf5   :  { %v4196_v35 = vpop.xlane.xlu2 %4195  ;;  %v4800_v10 = vsel %vm1716_vm12, %v9299_v52, 0 }
 0xcf6   :  { %6273 = vmatmul.msk.bf16.vlgmr.msra.gmra.mxu3 %vm563_vm11, %v4492_v15  ;;  %v4495_v50 = vpack.c.bf16 %v4463_v59, %v4463_v59  ;;  %v4252_v30 = vsub.f32 %v9408_v8, %v4196_v35 }
 0xcf7   :  { %4767 = vmatpush.bf16.msra.mxu3 %v4758_v27 }
 0xcf9   :  { %v6886_v43 = vpop.eup %6885 }
 0xcfa   :  { %v4462_v31 = vmul.f32 %v6886_v43, %v9401_v5  ;;  %v4190_v25 = vpop.xlane.xlu1 %4189  ;;  %v9548_v20 = vpop.xlane.xlu0 %4225 }
 0xcfb   :  { %v4250_v0 = vsub.f32 %v9414_v2, %v4190_v25  ;;  %v6888_v6 = vpop.eup %6887  ;;  %v4303_v2 = vmul.f32 1.442695, %v4252_v30 }
 0xcfc   :  { %v4494_v34 = vpack.c.bf16 %v4462_v31, %v4462_v31  ;;  %v4464_v5 = vmul.f32 %v6888_v6, %v9381_v54 }
 0xcfd   :  { %v4299_v48 = vmul.f32 1.442695, %v4250_v0  ;;  %v9552_v45 = vpop.xlane.xlu2 %4210 }
 0xcfe   :  { %6275 = vmatmul.msk.bf16.vlgmr.msra.gmra.mxu1 %vm563_vm11, %v4494_v34  ;;  %6276 = vmatmul.msk.bf16.vlgmr.msrb.gmra.mxu2 %vm563_vm11, %v4495_v50  ;;  %v4496_v57 = vpack.c.bf16 %v4464_v5, %v4464_v5 }
 0xcff   :  { %6889 = vpow2.f32 %v4299_v48  ;;  %4809 = vmatpush.bf16.msra.mxu1 %v4800_v10  ;;  %4830 = vmatpush.bf16.msrb.mxu2 %v4821_v46  ;;  %v4905_v46 = vsel %vm1716_vm12, %v9313_v11, 0 }
 0xd00   :  { %6891 = vpow2.f32 %v4303_v2 }
 0xd02   :  { %v4184_v8 = vpop.xlane.xlu1 %4183  ;;  %v9561_v7 = vpop.xlane.xlu0 %4228 }
 0xd03   :  { %v4248_v58 = vsub.f32 %v9431_v19, %v4184_v8 }
 0xd05   :  { %v9564_v23 = vpop.eup %6889  ;;  %v4295_v52 = vmul.f32 1.442695, %v4248_v58  ;;  %v4205_v17 = vpop.xlane.xlu2 %4204 }
 0xd06   :  { %v4255_v15 = vsub.f32 %v9437_v21, %v4205_v17  ;;  %6277 = vmatmul.msk.bf16.vlgmr.msrb.gmra.mxu3 %vm563_vm11, %v4496_v57  ;;  %v4380_v54 = vsel %vm563_vm11, %v9564_v23, 0.0  ;;  %v9574_v27 = vpop.eup %6891 }
 0xd07   :  { %6893 = vpow2.f32 %v4295_v52  ;;  %4851 = vmatpush.bf16.msrb.mxu3 %v4842_v12  ;;  %4381 = vadd.xlane.f32.xlu2 %v4380_v54  ;;  %v4386_v21 = vsel %vm563_vm11, %v9574_v27, 0.0 }
 0xd08   :  { %v4309_v19 = vmul.f32 1.442695, %v4255_v15 }
 0xd0a   :  { %v9572_v42 = vpop.xlane.xlu1 %4198  ;;  %v4361_v35 = vpop.xlane.xlu0 %4360 }
 0xd0b   :  { %6895 = vrcp.f32 %v4361_v35 }
 0xd0c   :  { %6897 = vpow2.f32 %v4309_v19 }
 0xd0d   :  { %v9576_v59 = vpop.eup %6893  ;;  %v4208_v37 = vpop.xlane.xlu2 %4207 }
 0xd0e   :  { %v4374_v43 = vsel %vm563_vm11, %v9576_v59, 0.0  ;;  %v4256_v15 = vsub.f32 %v9452_v61, %v4208_v37 }
 0xd0f   :  { %4387 = vadd.xlane.f32.xlu2 %v4386_v21  ;;  %4375 = vadd.xlane.f32.xlu1 %v4374_v43 }
 0xd10   :  { %v4311_v19 = vmul.f32 1.442695, %v4256_v15 }
 0xd11   :  { %v6896_v31 = vpop.eup %6895 }
 0xd12   :  { %v4467_v25 = vmul.f32 %v6896_v31, %v9449_v49  ;;  %v4193_v0 = vpop.xlane.xlu1 %4192  ;;  %v9583_v50 = vpop.eup %6897  ;;  %v4261_v31 = vsub.f32 %v9399_v4, %v9541_v24 }
 0xd13   :  { %v4251_v34 = vsub.f32 %v9463_v38, %v4193_v0  ;;  %v4395_v10 = vsel %vm563_vm11, %v9583_v50, 0.0  ;;  %v4258_v38 = vsub.f32 %v9390_v36, %v9528_v47 }
 0xd14   :  { %v4499_v6 = vpack.c.bf16 %v4467_v25, %v4467_v25 }
 0xd15   :  { %v4301_v30 = vmul.f32 1.442695, %v4251_v34  ;;  %v9586_v48 = vpop.xlane.xlu2 %4216  ;;  %v4315_v17 = vmul.f32 1.442695, %v4258_v38  ;;  %v4253_v38 = vsub.f32 %v9447_v9, %v9572_v42  ;;  %v4989_v9 = vsel %vm1716_vm12, %v9323_v41, 0 }
 0xd16   :  { %6280 = vmatmul.msk.bf16.vlgmr.msra.gmra.mxu2 %vm563_vm11, %v4499_v6  ;;  %v4968_v42 = vsel %vm1716_vm12, %v9295_v32, 0  ;;  %v4262_v32 = vsub.f32 %v9417_v13, %v9548_v20 }
 0xd17   :  { %6899 = vpow2.f32 %v4301_v30  ;;  %4914 = vmatpush.bf16.msra.mxu2 %v4905_v46  ;;  %4396 = vadd.xlane.f32.xlu2 %v4395_v10  ;;  %v4370_v46 = vpop.xlane.xlu0 %4369 }
 0xd1a   :  { %v4202_v49 = vpop.xlane.xlu1 %4201 }
 0xd1b   :  { %v4254_v5 = vsub.f32 %v9479_v55, %v4202_v49  ;;  %v4884_v49 = vsel %vm1716_vm12, %v9239_v39, 0  ;;  %v4257_v39 = vsub.f32 %v9421_v28, %v9552_v45  ;;  %v4259_v28 = vsub.f32 %v9467_v60, %v9586_v48 }
 0xd1c   :  { %v4263_v45 = vsub.f32 %v9434_v18, %v9561_v7 }
 0xd1d   :  { %v9594_v2 = vpop.eup %6899  ;;  %v4307_v8 = vmul.f32 1.442695, %v4254_v5  ;;  %v4220_v58 = vpop.xlane.xlu2 %4219  ;;  %v4317_v41 = vmul.f32 1.442695, %v4259_v28  ;;  %v10278_v28 = vld [vmem:[#allocation23_spill] sm:$0xff] }
 0xd1e   :  { %v4260_v11 = vsub.f32 %v9483_v3, %v4220_v58  ;;  %v4383_v57 = vsel %vm563_vm11, %v9594_v2, 0.0 }
 0xd1f   :  { %6901 = vpow2.f32 %v4307_v8  ;;  %4384 = vadd.xlane.f32.xlu0 %v4383_v57 }
 0xd20   :  { %v4319_v52 = vmul.f32 1.442695, %v4260_v11 }
 0xd22   :  { %6903 = vpow2.f32 %v4319_v52  ;;  %v4355_v12 = vpop.xlane.xlu1 %4354 }
 0xd23   :  { %6905 = vrcp.f32 %v4355_v12  ;;  %v4313_v12 = vmul.f32 1.442695, %v4257_v39  ;;  %v10277_v39 = vld [vmem:[#allocation21_spill] sm:$0xff] }
 0xd24   :  { %6907 = vpow2.f32 %v4315_v17 }
 0xd25   :  { %v9601_v55 = vpop.eup %6901  ;;  %6909 = vpow2.f32 %v4311_v19 }
 0xd26   :  { %v9604_v36 = vpop.f32.mrf.mxu1  ;;  %v4392_v3 = vsel %vm563_vm11, %v9601_v55, 0.0 }
 0xd27   :  { %4393 = vadd.xlane.f32.xlu0 %v4392_v3 }
 0xd28   :  { %v9608_v47 = vpop.eup %6903  ;;  %5088 = vrot.lane.b32.xlu1 %v8979_v22, %s7171_s26  ;;  %v4863_v22 = vsel %vm1716_vm12, %v9286_v14, 0 }
 0xd29   :  { %v6906_v54 = vpop.eup %6905  ;;  %v4410_v35 = vsel %vm563_vm11, %v9608_v47, 0.0 }
 0xd2a   :  { %v4465_v21 = vmul.f32 %v6906_v54, %v9492_v29  ;;  %v9615_v43 = vpop.xlane.xlu1 %4231  ;;  %4411 = vadd.xlane.f32.xlu2 %v4410_v35  ;;  %v9617_v61 = vpop.eup %6907  ;;  %v4321_v29 = vmul.f32 1.442695, %v4261_v31  ;;  %v4325_v54 = vmul.f32 1.442695, %v4263_v45 }
 0xd2b   :  { %v4404_v0 = vsel %vm563_vm11, %v9617_v61, 0.0  ;;  %v9626_v6 = vpop.eup %6909  ;;  %v4264_v13 = vsub.f32 %v9499_v40, %v9615_v43 }
 0xd2c   :  { %v4497_v37 = vpack.c.bf16 %v4465_v21, %v4465_v21  ;;  %v4398_v4 = vsel %vm563_vm11, %v9626_v6, 0.0 }
 0xd2e   :  { %6278 = vmatmul.msk.bf16.vlgmr.msra.gmra.mxu0 %vm563_vm11, %v4497_v37  ;;  %v4561_v25 = vpop.f32.mrf.mxu1  ;;  %v4327_v37 = vmul.f32 1.442695, %v4264_v13 }
 0xd2f   :  { %4872 = vmatpush.bf16.msra.mxu0 %v4863_v22  ;;  %4405 = vadd.xlane.f32.xlu0 %v4404_v0  ;;  %v4926_v22 = vsel %vm1716_vm12, %v9259_v56, 0  ;;  %v4379_v56 = vpop.xlane.xlu0 %4378 }
 0xd32   :  { %v4358_v34 = vpop.xlane.xlu1 %4357 }
 0xd33   :  { %6911 = vrcp.f32 %v4358_v34 }
 0xd34   :  { %6913 = vpow2.f32 %v4321_v29 }
 0xd35   :  { %6915 = vrcp.f32 %v4370_v46 }
 0xd37   :  { %4399 = vadd.xlane.f32.xlu0 %v4398_v4 }
 0xd39   :  { %v6912_v24 = vpop.eup %6911 }
 0xd3a   :  { %v4466_v14 = vmul.f32 %v6912_v24, %v9507_v51  ;;  %v9631_v30 = vpop.eup %6913  ;;  %v4305_v51 = vmul.f32 1.442695, %v4253_v38  ;;  %v10276_v24 = vld [vmem:[#allocation20_spill] sm:$0xff] }
 0xd3b   :  { %v4413_v5 = vsel %vm563_vm11, %v9631_v30, 0.0  ;;  %v6916_v58 = vpop.eup %6915 }
 0xd3c   :  { %v4498_v10 = vpack.c.bf16 %v4466_v14, %v4466_v14  ;;  %v4470_v57 = vmul.f32 %v6916_v58, %v9471_v62  ;;  %v4947_v14 = vsel %vm1716_vm12, %v10276_v24, 0 }
 0xd3e   :  { %6279 = vmatmul.msk.bf16.vlgmr.msrb.gmra.mxu1 %vm563_vm11, %v4498_v10  ;;  %v4502_v15 = vpack.c.bf16 %v4470_v57, %v4470_v57  ;;  %v5031_v57 = vsel %vm1716_vm12, %v10277_v39, 0 }
 0xd3f   :  { %4893 = vmatpush.bf16.msrb.mxu1 %v4884_v49  ;;  %4414 = vadd.xlane.f32.xlu0 %v4413_v5 }
 0xd41   :  { %v4373_v8 = vpop.xlane.xlu2 %4372 }
 0xd42   :  { %6917 = vrcp.f32 %v4373_v8  ;;  %5109 = vrot.lane.b32.xlu2 %v8992_v26, %s7171_s26 }
 0xd43   :  { %6919 = vpow2.f32 %v4305_v51 }
 0xd44   :  { %6921 = vpow2.f32 %v4313_v12 }
 0xd45   :  { %6923 = vpow2.f32 %v4317_v41 }
 0xd48   :  { %v6918_v11 = vpop.eup %6917 }
 0xd49   :  { %v4471_v52 = vmul.f32 %v6918_v11, %v9512_v1  ;;  %v9649_v26 = vpop.eup %6919 }
 0xd4a   :  { %v4389_v62 = vsel %vm563_vm11, %v9649_v26, 0.0  ;;  %v9660_v1 = vpop.eup %6921 }
 0xd4b   :  { %v4503_v17 = vpack.c.bf16 %v4471_v52, %v4471_v52  ;;  %v4401_v60 = vsel %vm563_vm11, %v9660_v1, 0.0  ;;  %v9672_v19 = vpop.eup %6923 }
 0xd4c   :  { %v4407_v20 = vsel %vm563_vm11, %v9672_v19, 0.0 }
 0xd4d   :  { %6284 = vmatmul.msk.bf16.vlgmr.msrb.gmra.mxu2 %vm563_vm11, %v4503_v17 }
 0xd4e   :  { %6283 = vmatmul.msk.bf16.vlgmr.msra.gmra.mxu1 %vm563_vm11, %v4502_v15  ;;  %4998 = vmatpush.bf16.msrb.mxu2 %v4989_v9 }
 0xd4f   :  { %4977 = vmatpush.bf16.msra.mxu1 %v4968_v42 }
 0xd52   :  { %4390 = vadd.xlane.f32.xlu1 %v4389_v62  ;;  %v5052_v62 = vsel %vm1716_vm12, %v10278_v28, 0 }
 0xd53   :  { %5130 = vrot.lane.b32.xlu0 %v9046_v63, %s7171_s26  ;;  %v4323_v63 = vmul.f32 1.442695, %v4262_v32 }
 0xd5a   :  { %v4364_v48 = vpop.xlane.xlu1 %4363  ;;  %4402 = vadd.xlane.f32.xlu1 %v4401_v60 }
 0xd5b   :  { %6925 = vrcp.f32 %v4364_v48  ;;  %v9668_v3 = vpop.f32.mrf.mxu0  ;;  %5151 = vrot.lane.b32.xlu0 %v9072_v53, %s7171_s26  ;;  %v10279_v48 = vld [vmem:[#allocation19_spill] sm:$0xff] }
 0xd5c   :  { %6927 = vpow2.f32 %v4323_v63 }
 0xd5d   :  { %6929 = vpow2.f32 %v4325_v54  ;;  %v10280_v54 = vld [vmem:[#allocation22_spill] sm:$0xff] }
 0xd5e   :  { %v5010_v13 = vsel %vm1716_vm12, %v10280_v54, 0 }
 0xd61   :  { %v6926_v18 = vpop.eup %6925 }
 0xd62   :  { %v4468_v7 = vmul.f32 %v6926_v18, %v9522_v16  ;;  %4408 = vadd.xlane.f32.xlu1 %v4407_v20  ;;  %v9679_v31 = vpop.eup %6927 }
 0xd63   :  { %v4367_v35 = vpop.xlane.xlu1 %4366  ;;  %v4540_v21 = vpop.f32.mrf.mxu0  ;;  %v4416_v16 = vsel %vm563_vm11, %v9679_v31, 0.0 }
 0xd64   :  { %v4500_v53 = vpack.c.bf16 %v4468_v7, %v4468_v7  ;;  %6931 = vrcp.f32 %v4367_v35  ;;  %v9684_v40 = vpop.eup %6929 }
 0xd65   :  { %6933 = vpow2.f32 %v4327_v37  ;;  %v4419_v25 = vsel %vm563_vm11, %v9684_v40, 0.0 }
 0xd66   :  { %6281 = vmatmul.msk.bf16.vlgmr.msra.gmra.mxu3 %vm563_vm11, %v4500_v53  ;;  %6935 = vrcp.f32 %v4379_v56 }
 0xd67   :  { %4935 = vmatpush.bf16.msra.mxu3 %v4926_v22 }
 0xd6a   :  { %v6932_v43 = vpop.eup %6931  ;;  %4417 = vadd.xlane.f32.xlu1 %v4416_v16 }
 0xd6b   :  { %v4469_v0 = vmul.f32 %v6932_v43, %v9530_v33  ;;  %v9691_v29 = vpop.f32.mrf.mxu0  ;;  %4420 = vadd.xlane.f32.xlu2 %v4419_v25  ;;  %v9693_v4 = vpop.eup %6933 }
 0xd6c   :  { %v4422_v10 = vsel %vm563_vm11, %v9693_v4, 0.0  ;;  %v6936_v49 = vpop.eup %6935 }
 0xd6d   :  { %v4501_v34 = vpack.c.bf16 %v4469_v0, %v4469_v0  ;;  %v4473_v5 = vmul.f32 %v6936_v49, %v9503_v44  ;;  %v10281_v0 = vld [vmem:[#allocation24_spill] sm:$0xff] }
 0xd6e   :  { %v5073_v56 = vsel %vm1716_vm12, %v10281_v0, 0 }
 0xd6f   :  { %6282 = vmatmul.msk.bf16.vlgmr.msrb.gmra.mxu0 %vm563_vm11, %v4501_v34  ;;  %v4505_v11 = vpack.c.bf16 %v4473_v5, %v4473_v5 }
 0xd70   :  { %4956 = vmatpush.bf16.msrb.mxu0 %v4947_v14 }
 0xd71   :  { %v9698_v46 = vpop.f32.mrf.mxu2 }
 0xd72   :  { %4423 = vadd.xlane.f32.xlu1 %v4422_v10 }
 0xd73   :  { %v4624_v33 = vpop.f32.mrf.mxu0 }
 0xd79   :  { %v4582_v38 = vpop.f32.mrf.mxu2  ;;  %v9703_v8 = vpop.f32.mrf.mxu3 }
 0xd7a   :  { %v4382_v51 = vpop.xlane.xlu2 %4381 }
 0xd7b   :  { %6937 = vrcp.f32 %v4382_v51  ;;  %v9705_v58 = vpop.f32.mrf.mxu1 }
 0xd7f   :  { %6286 = vmatmul.msk.bf16.vlgmr.msra.gmra.mxu0 %vm563_vm11, %v4505_v11 }
 0xd80   :  { %5040 = vmatpush.bf16.msra.mxu0 %v5031_v57 }
 0xd81   :  { %v6938_v52 = vpop.eup %6937  ;;  %v4603_v17 = vpop.f32.mrf.mxu3 }
 0xd82   :  { %v9710_v12 = vpop.f32.mrf.mxu2  ;;  %v4474_v44 = vmul.f32 %v6938_v52, %v9564_v23  ;;  %v4376_v15 = vpop.xlane.xlu1 %4375 }
 0xd83   :  { %v4645_v9 = vpop.f32.mrf.mxu1  ;;  %6939 = vrcp.f32 %v4376_v15  ;;  %v4388_v23 = vpop.xlane.xlu2 %4387 }
 0xd84   :  { %v4506_v42 = vpack.c.bf16 %v4474_v44, %v4474_v44  ;;  %6941 = vrcp.f32 %v4388_v23 }
 0xd86   :  { %6287 = vmatmul.msk.bf16.vlgmr.msrb.gmra.mxu1 %vm563_vm11, %v4506_v42 }
 0xd87   :  { %5061 = vmatpush.bf16.msrb.mxu1 %v5052_v62 }
 0xd89   :  { %v9716_v32 = vpop.f32.mrf.mxu3  ;;  %v6940_v45 = vpop.eup %6939 }
 0xd8a   :  { %v4666_v41 = vpop.f32.mrf.mxu2  ;;  %v4472_v60 = vmul.f32 %v6940_v45, %v9576_v59  ;;  %v6942_v7 = vpop.eup %6941 }
 0xd8b   :  { %5172 = vrot.lane.b32.xlu1 %v10279_v48, %s7171_s26  ;;  %v4476_v21 = vmul.f32 %v6942_v7, %v9574_v27  ;;  %v4397_v22 = vpop.xlane.xlu2 %4396 }
 0xd8c   :  { %v4504_v63 = vpack.c.bf16 %v4472_v60, %v4472_v60 }
 0xd8d   :  { %v4508_v25 = vpack.c.bf16 %v4476_v21, %v4476_v21 }
 0xd8e   :  { %6285 = vmatmul.msk.bf16.vlgmr.msrb.gmra.mxu3 %vm563_vm11, %v4504_v63 }
 0xd8f   :  { %5019 = vmatpush.bf16.msrb.mxu3 %v5010_v13 }
 0xd91   :  { %v4687_v18 = vpop.f32.mrf.mxu3 }
 0xd92   :  { %v4385_v20 = vpop.xlane.xlu0 %4384 }
 0xd93   :  { %6943 = vrcp.f32 %v4385_v20 }
 0xd99   :  { %v6944_v35 = vpop.eup %6943  ;;  %v9725_v59 = vpop.f32.mrf.mxu2 }
 0xd9a   :  { %v4475_v37 = vmul.f32 %v6944_v35, %v9594_v2  ;;  %v4394_v53 = vpop.xlane.xlu0 %4393  ;;  %v5089_v43 = vpop.permute.xlu1 %5088 }
 0xd9b   :  { %6945 = vrcp.f32 %v4394_v53  ;;  %v5094_v34 = vsel %vm1716_vm12, %v5089_v43, 0 }
 0xd9c   :  { %v4507_v16 = vpack.c.bf16 %v4475_v37, %v4475_v37  ;;  %6947 = vrcp.f32 %v4397_v22 }
 0xd9d   :  { %v4412_v17 = vpop.xlane.xlu2 %4411 }
 0xd9e   :  { %6288 = vmatmul.msk.bf16.vlgmr.msra.gmra.mxu2 %vm563_vm11, %v4507_v16  ;;  %6289 = vmatmul.msk.bf16.vlgmr.msra.gmra.mxu3 %vm563_vm11, %v4508_v25 }
 0xd9f   :  { %5082 = vmatpush.bf16.msra.mxu2 %v5073_v56  ;;  %5103 = vmatpush.bf16.msra.mxu3 %v5094_v34 }
 0xda1   :  { %v6946_v27 = vpop.eup %6945  ;;  %v4750_v2 = vpop.f32.mrf.mxu2 }
 0xda2   :  { %v4478_v24 = vmul.f32 %v6946_v27, %v9601_v55  ;;  %v4406_v14 = vpop.xlane.xlu0 %4405  ;;  %v6948_v33 = vpop.eup %6947 }
 0xda3   :  { %6949 = vrcp.f32 %v4406_v14  ;;  %v4479_v49 = vmul.f32 %v6948_v33, %v9583_v50 }
 0xda4   :  { %v4510_v10 = vpack.c.bf16 %v4478_v24, %v4478_v24 }
 0xda5   :  { %v4511_v51 = vpack.c.bf16 %v4479_v49, %v4479_v49  ;;  %v5110_v18 = vpop.permute.xlu2 %5109 }
 0xda6   :  { %6291 = vmatmul.msk.bf16.vlgmr.msra.gmra.mxu1 %vm563_vm11, %v4510_v10  ;;  %v5115_v35 = vsel %vm1716_vm12, %v5110_v18, 0 }
 0xda9   :  { %v6950_v11 = vpop.eup %6949 }
 0xdaa   :  { %v4400_v5 = vpop.xlane.xlu0 %4399  ;;  %v4482_v39 = vmul.f32 %v6950_v11, %v9617_v61 }
 0xdab   :  { %6951 = vrcp.f32 %v4400_v5  ;;  %v4706_v38 = vpop.f32.mrf.mxu0 }
 0xdac   :  { %v4514_v44 = vpack.c.bf16 %v4482_v39, %v4482_v39  ;;  %6953 = vrcp.f32 %v4412_v17 }
 0xdae   :  { %6292 = vmatmul.msk.bf16.vlgmr.msrb.gmra.mxu2 %vm563_vm11, %v4511_v51 }
 0xdb1   :  { %v6952_v57 = vpop.eup %6951 }
 0xdb2   :  { %v4480_v55 = vmul.f32 %v6952_v57, %v9626_v6  ;;  %v6954_v42 = vpop.eup %6953  ;;  %v4415_v28 = vpop.xlane.xlu0 %4414 }
 0xdb3   :  { %v4708_v52 = vpop.f32.mrf.mxu0  ;;  %v4484_v61 = vmul.f32 %v6954_v42, %v9608_v47 }
 0xdb4   :  { %v4512_v15 = vpack.c.bf16 %v4480_v55, %v4480_v55 }
 0xdb5   :  { %v4516_v41 = vpack.c.bf16 %v4484_v61, %v4484_v61 }
 0xdb6   :  { %6293 = vmatmul.msk.bf16.vlgmr.msrb.gmra.mxu3 %vm563_vm11, %v4512_v15  ;;  %6295 = vmatmul.msk.bf16.vlgmr.msrb.gmra.mxu1 %vm563_vm11, %v4514_v44 }
 0xdbb   :  { %v4727_v50 = vpop.f32.mrf.mxu1 }
 0xdbc   :  { %v6582_v9 = vpack.i.bf16 %v4727_v50, %v4706_v38 }
 0xdbe   :  { %6583 = vrot.lane.b32.xlu0 %v6582_v9, %s7184_s5 }
 0xdc3   :  { %v4729_v62 = vpop.f32.mrf.mxu1 }
 0xdc5   :  { %v4391_v6 = vpop.xlane.xlu1 %4390  ;;  %v5131_v45 = vpop.permute.xlu0 %5130 }
 0xdc6   :  { %6955 = vrcp.f32 %v4391_v6  ;;  %v5136_v60 = vsel %vm1716_vm12, %v5131_v45, 0  ;;  %6297 = vmatmul.msk.bf16.vlgmr.msra.gmra.mxu3 %vm563_vm11, %v4516_v41 }
 0xdc7   :  { %5145 = vmatpush.bf16.msra.mxu1 %v5136_v60 }
 0xdcb   :  { %v9745_v48 = vpop.f32.mrf.mxu1 }
 0xdcc   :  { %v6956_v23 = vpop.eup %6955 }
 0xdcd   :  { %v4477_v63 = vmul.f32 %v6956_v23, %v9649_v26  ;;  %v4403_v54 = vpop.xlane.xlu1 %4402  ;;  %v5152_v13 = vpop.permute.xlu0 %5151 }
 0xdce   :  { %v5157_v47 = vsel %vm1716_vm12, %v5152_v13, 0  ;;  %6957 = vrcp.f32 %v4403_v54 }
 0xdcf   :  { %v4509_v20 = vpack.c.bf16 %v4477_v63, %v4477_v63  ;;  %5166 = vmatpush.bf16.msrb.mxu2 %v5157_v47 }
 0xdd0   :  { %v9749_v7 = vpop.f32.mrf.mxu2 }
 0xdd1   :  { %6290 = vmatmul.msk.bf16.vlgmr.msrb.gmra.mxu0 %vm563_vm11, %v4509_v20 }
 0xdd2   :  { %5124 = vmatpush.bf16.msrb.mxu0 %v5115_v35 }
 0xdd3   :  { %v4813_v21 = vpop.f32.mrf.mxu1 }
 0xdd4   :  { %v6958_v53 = vpop.eup %6957 }
 0xdd5   :  { %v4409_v37 = vpop.xlane.xlu1 %4408  ;;  %v4481_v22 = vmul.f32 %v6958_v53, %v9660_v1 }
 0xdd6   :  { %6959 = vrcp.f32 %v4409_v37 }
 0xdd7   :  { %v4513_v0 = vpack.c.bf16 %v4481_v22, %v4481_v22 }
 0xdd8   :  { %v4834_v26 = vpop.f32.mrf.mxu2 }
 0xddc   :  { %v6960_v16 = vpop.eup %6959 }
 0xddd   :  { %v4483_v43 = vmul.f32 %v6960_v16, %v9672_v19  ;;  %v4418_v25 = vpop.xlane.xlu1 %4417 }
 0xdde   :  { %6961 = vrcp.f32 %v4418_v25  ;;  %v4421_v34 = vpop.xlane.xlu2 %4420 }
 0xddf   :  { %v4515_v56 = vpack.c.bf16 %v4483_v43, %v4483_v43  ;;  %6963 = vrcp.f32 %v4415_v28 }
 0xde0   :  { %6965 = vrcp.f32 %v4421_v34 }
 0xde1   :  { %6294 = vmatmul.msk.bf16.vlgmr.msra.gmra.mxu0 %vm563_vm11, %v4513_v0  ;;  %6296 = vmatmul.msk.bf16.vlgmr.msra.gmra.mxu2 %vm563_vm11, %v4515_v56 }
 0xde4   :  { %v6962_v27 = vpop.eup %6961 }
 0xde5   :  { %v4486_v2 = vmul.f32 %v6962_v27, %v9679_v31  ;;  %v6964_v24 = vpop.eup %6963  ;;  %v4424_v11 = vpop.xlane.xlu1 %4423 }
 0xde6   :  { %v6966_v1 = vpop.eup %6965  ;;  %v4485_v19 = vmul.f32 %v6964_v24, %v9631_v30  ;;  %6967 = vrcp.f32 %v4424_v11 }
 0xde7   :  { %v4518_v14 = vpack.c.bf16 %v4486_v2, %v4486_v2  ;;  %v4487_v33 = vmul.f32 %v6966_v1, %v9684_v40 }
 0xde8   :  { %v4517_v38 = vpack.c.bf16 %v4485_v19, %v4485_v19 }
 0xde9   :  { %v4769_v10 = vpop.f32.mrf.mxu3  ;;  %6299 = vmatmul.msk.bf16.vlgmr.msra.gmra.mxu1 %vm563_vm11, %v4518_v14  ;;  %v4519_v51 = vpack.c.bf16 %v4487_v33, %v4487_v33 }
 0xdea   :  { %v6597_v56 = vpack.i.bf16 %v4769_v10, %v9725_v59  ;;  %v6376_v10 = vld [vmem:[#allocation5 + $0x18] sm:$0xff] }
 0xdeb   :  { %5353 = vmatpush.bf16.msra.mxu0 %v6376_v10 }
 0xdec   :  { %v4790_v49 = vpop.f32.mrf.mxu0  ;;  %v6968_v57 = vpop.eup %6967 }
 0xded   :  { %v6612_v5 = vpack.i.bf16 %v9745_v48, %v4790_v49  ;;  %v4488_v55 = vmul.f32 %v6968_v57, %v9693_v4 }
 0xdef   :  { %v4520_v17 = vpack.c.bf16 %v4488_v55, %v4488_v55 }
 0xdf1   :  { %v4771_v39 = vpop.f32.mrf.mxu3  ;;  %6298 = vmatmul.msk.bf16.vlgmr.msrb.gmra.mxu0 %vm563_vm11, %v4517_v38  ;;  %6300 = vmatmul.msk.bf16.vlgmr.msrb.gmra.mxu2 %vm563_vm11, %v4519_v51  ;;  %v6375_v38 = vld [vmem:[#allocation5 + $0x10] sm:$0xff] }
 0xdf2   :  { %5354 = vmatpush.bf16.msra.mxu0 %v6375_v38 }
 0xdf4   :  { %v4792_v31 = vpop.f32.mrf.mxu0 }
 0xdfc   :  { %v4874_v52 = vpop.f32.mrf.mxu0 }
 0xdfd   :  { %v5173_v30 = vpop.permute.xlu1 %5172 }
 0xdfe   :  { %v5178_v40 = vsel %vm1716_vm12, %v5173_v30, 0 }
 0xdff   :  { %5187 = vmatpush.bf16.msrb.mxu3 %v5178_v40 }
 0xe02   :  { %6301 = vmatmul.msk.bf16.vlgmr.msrb.gmra.mxu3 %vm563_vm11, %v4520_v17 }
 0xe03   :  { %v4895_v44 = vpop.f32.mrf.mxu1 }
 0xe04   :  { %v4876_v15 = vpop.f32.mrf.mxu0  ;;  %v6587_v50 = vpack.i.bf16 %v4895_v44, %v4874_v52 }
 0xe06   :  { %6588 = vrot.lane.b32.xlu0 %v6587_v50, %s7174_s17 }
 0xe0b   :  { %v4897_v9 = vpop.f32.mrf.mxu1 }
 0xe11   :  { %v4853_v42 = vpop.f32.mrf.mxu3 }
 0xe12   :  { %v6627_v28 = vpack.i.bf16 %v4853_v42, %v9749_v7 }
 0xe19   :  { %v4855_v61 = vpop.f32.mrf.mxu3 }
 0xe21   :  { %v4916_v62 = vpop.f32.mrf.mxu2  ;;  %v4937_v4 = vpop.f32.mrf.mxu3 }
 0xe22   :  { %v6602_v41 = vpack.i.bf16 %v4937_v4, %v4916_v62 }
 0xe23   :  { %v4979_v6 = vpop.f32.mrf.mxu1 }
 0xe24   :  { %6603 = vrot.lane.b32.xlu1 %v6602_v41, %s7174_s17 }
 0xe29   :  { %v4918_v45 = vpop.f32.mrf.mxu2  ;;  %v4939_v60 = vpop.f32.mrf.mxu3 }
 0xe2b   :  { %v4981_v48 = vpop.f32.mrf.mxu1 }
 0xe30   :  { %v6584_v51 = vpop.permute.xlu0 %6583 }
 0xe31   :  { %v5000_v23 = vpop.f32.mrf.mxu2  ;;  %v6585_v39 = vunpack.i.l.bf16 %v6584_v51 }
 0xe33   :  { %v5063_v63 = vpop.f32.mrf.mxu1  ;;  %v5289_v30 = vsel %vm563_vm11, %v9668_v3, %v6585_v39 }
 0xe39   :  { %v5002_v54 = vpop.f32.mrf.mxu2  ;;  %v5021_v13 = vpop.f32.mrf.mxu3 }
 0xe3a   :  { %v6632_v18 = vpack.i.bf16 %v5021_v13, %v5000_v23 }
 0xe3b   :  { %v5065_v47 = vpop.f32.mrf.mxu1 }
 0xe41   :  { %v5023_v20 = vpop.f32.mrf.mxu3 }
 0xe49   :  { %v5105_v35 = vpop.f32.mrf.mxu3 }
 0xe4e   :  { %v4958_v21 = vpop.f32.mrf.mxu0 }
 0xe4f   :  { %v6617_v7 = vpack.i.bf16 %v4979_v6, %v4958_v21 }
 0xe51   :  { %6618 = vrot.lane.b32.xlu1 %v6617_v7, %s7174_s17  ;;  %v5107_v37 = vpop.f32.mrf.mxu3 }
 0xe56   :  { %v4960_v53 = vpop.f32.mrf.mxu0 }
 0xe59   :  { %6628 = vrot.lane.b32.xlu1 %v6627_v28, %s7184_s5 }
 0xe5e   :  { %v5042_v26 = vpop.f32.mrf.mxu0 }
 0xe5f   :  { %v6592_v22 = vpack.i.bf16 %v5063_v63, %v5042_v26 }
 0xe61   :  { %6593 = vrot.lane.b32.xlu0 %v6592_v22, %s7185_s27 }
 0xe64   :  { %v5084_v16 = vpop.f32.mrf.mxu2 }
 0xe65   :  { %v6607_v43 = vpack.i.bf16 %v5105_v35, %v5084_v16 }
 0xe66   :  { %v5044_v25 = vpop.f32.mrf.mxu0  ;;  %v5147_v0 = vpop.f32.mrf.mxu1 }
 0xe67   :  { %6608 = vrot.lane.b32.xlu2 %v6607_v43, %s7185_s27 }
 0xe69   :  { %6598 = vrot.lane.b32.xlu0 %v6597_v56, %s7184_s5 }
 0xe6c   :  { %v5086_v34 = vpop.f32.mrf.mxu2 }
 0xe6e   :  { %v5126_v27 = vpop.f32.mrf.mxu0  ;;  %v5149_v2 = vpop.f32.mrf.mxu1 }
 0xe6f   :  { %v6622_v1 = vpack.i.bf16 %v5147_v0, %v5126_v27 }
 0xe71   :  { %6613 = vrot.lane.b32.xlu0 %v6612_v5, %s7184_s5  ;;  %v6586_v5 = vunpack.i.h.bf16 %v6584_v51 }
 0xe73   :  { %v5290_v52 = vsel %vm563_vm11, %v9604_v36, %v6586_v5  ;;  %v9819_v5 = vld [vmem:[%s10174_s6 + $0x8] sm:$0x3f] }
 0xe74   :  { %v5168_v24 = vpop.f32.mrf.mxu2 }
 0xe76   :  { %v5128_v14 = vpop.f32.mrf.mxu0 }
 0xe78   :  { %v6589_v11 = vpop.permute.xlu0 %6588 }
 0xe79   :  { %6623 = vrot.lane.b32.xlu0 %v6622_v1, %s7185_s27  ;;  %v6591_v31 = vunpack.i.h.bf16 %v6589_v11  ;;  %v6590_v57 = vunpack.i.l.bf16 %v6589_v11 }
 0xe7b   :  { %v5297_v44 = vsel %vm2488_vm13, %v5289_v30, %v6590_v57  ;;  %v5298_v15 = vsel %vm2488_vm13, %v5290_v52, %v6591_v31  ;;  %v10282_v31 = vld [vmem:[#allocation33_spill] sm:$0xff] }
 0xe7c   :  { %v5170_v19 = vpop.f32.mrf.mxu2 }
 0xe81   :  { %6633 = vrot.lane.b32.xlu0 %v6632_v18, %s7174_s17 }
 0xe85   :  { %v5189_v33 = vpop.f32.mrf.mxu3 }
 0xe86   :  { %v6637_v49 = vpack.i.bf16 %v5189_v33, %v5168_v24 }
 0xe88   :  { %6638 = vrot.lane.b32.xlu1 %v6637_v49, %s7185_s27 }
 0xe8d   :  { %v5191_v59 = vpop.f32.mrf.mxu3 }
 0xe96   :  { %v6604_v61 = vpop.permute.xlu1 %6603 }
 0xe97   :  { %v6606_v41 = vunpack.i.h.bf16 %v6604_v61  ;;  %v6605_v6 = vunpack.i.l.bf16 %v6604_v61 }
 0xec1   :  { %v6609_v45 = vpop.permute.xlu2 %6608 }
 0xec2   :  { %v6611_v23 = vunpack.i.h.bf16 %v6609_v45  ;;  %v6610_v63 = vunpack.i.l.bf16 %v6609_v45  ;;  %v10286_v45 = vld [vmem:[#allocation36_spill] sm:$0xff] }
 0xed3   :  { %v6594_v55 = vpop.permute.xlu0 %6593 }
 0xed4   :  { %v6596_v40 = vunpack.i.h.bf16 %v6594_v55  ;;  %v6595_v17 = vunpack.i.l.bf16 %v6594_v55 }
 0xed6   :  { %v5305_v50 = vsel %vm2497_vm14, %v5297_v44, %v6595_v17  ;;  %v5306_v9 = vsel %vm2497_vm14, %v5298_v15, %v6596_v40  ;;  %v10283_v40 = vld [vmem:[#allocation34_spill] sm:$0xff] }
 0xed7   :  { %v5313_v42 = vpack.c.bf16 %v5306_v9, %v5305_v50  ;;  %v10284_v9 = vld [vmem:[#allocation25_spill] sm:$0xff] }
 0xed9   :  { %6310 = vmatmul.msk.bf16.vlgmr.msra.gmra.mxu0 %vm178_vm0, %v5313_v42 }
 0xedb   :  { %v6599_v28 = vpop.permute.xlu0 %6598 }
 0xedc   :  { %v6601_v62 = vunpack.i.h.bf16 %v6599_v28  ;;  %v6600_v36 = vunpack.i.l.bf16 %v6599_v28 }
 0xede   :  { %v5292_v3 = vsel %vm563_vm11, %v9703_v8, %v6601_v62  ;;  %v5291_v4 = vsel %vm563_vm11, %v9698_v46, %v6600_v36  ;;  %v6619_v8 = vpop.permute.xlu1 %6618  ;;  %v10285_v36 = vld [vmem:[#allocation35_spill] sm:$0xff] }
 0xedf   :  { %v5300_v60 = vsel %vm2488_vm13, %v5292_v3, %v6606_v41  ;;  %v5299_v48 = vsel %vm2488_vm13, %v5291_v4, %v6605_v6  ;;  %v6621_v26 = vunpack.i.h.bf16 %v6619_v8  ;;  %v6620_v22 = vunpack.i.l.bf16 %v6619_v8 }
 0xee0   :  { %v5307_v13 = vsel %vm2497_vm14, %v5299_v48, %v6610_v63  ;;  %v5308_v18 = vsel %vm2497_vm14, %v5300_v60, %v6611_v23 }
 0xee1   :  { %v5314_v47 = vpack.c.bf16 %v5308_v18, %v5307_v13 }
 0xee3   :  { %v6614_v54 = vpop.permute.xlu0 %6613 }
 0xee4   :  { %v6616_v20 = vunpack.i.h.bf16 %v6614_v54  ;;  %v6615_v46 = vunpack.i.l.bf16 %v6614_v54  ;;  %v10287_v54 = vld [vmem:[#allocation37_spill] sm:$0xff] }
 0xee6   :  { %v5294_v21 = vsel %vm563_vm11, %v9705_v58, %v6616_v20  ;;  %v5293_v7 = vsel %vm563_vm11, %v9691_v29, %v6615_v46  ;;  %v6629_v56 = vpop.permute.xlu1 %6628  ;;  %v10288_v20 = vld [vmem:[#allocation18_spill] sm:$0xff] }
 0xee7   :  { %v5301_v16 = vsel %vm2488_vm13, %v5293_v7, %v6620_v22  ;;  %v5302_v43 = vsel %vm2488_vm13, %v5294_v21, %v6621_v26  ;;  %v6631_v2 = vunpack.i.h.bf16 %v6629_v56  ;;  %v6630_v29 = vunpack.i.l.bf16 %v6629_v56  ;;  %v10289_v7 = vld [vmem:[#allocation16_spill] sm:$0xff]  ;;  %v10290_v56 = vld [vmem:[#allocation17_spill] sm:$0xff] }
 0xee9   :  { %6311 = vmatmul.msk.bf16.gmra.mxu0 %vm178_vm0, %v5314_v47  ;;  %v5296_v33 = vsel %vm563_vm11, %v9716_v32, %v6631_v2  ;;  %v5295_v49 = vsel %vm563_vm11, %v9710_v12, %v6630_v29  ;;  %v5322_v32 = vperm.slane %v9819_v5, 0 }
 0xeeb   :  { %v6624_v35 = vpop.permute.xlu0 %6623 }
 0xeec   :  { %v6626_v37 = vunpack.i.h.bf16 %v6624_v35  ;;  %v6625_v53 = vunpack.i.l.bf16 %v6624_v35 }
 0xeee   :  { %v5309_v25 = vsel %vm2497_vm14, %v5301_v16, %v6625_v53  ;;  %v5310_v0 = vsel %vm2497_vm14, %v5302_v43, %v6626_v37 }
 0xeef   :  { %v5315_v34 = vpack.c.bf16 %v5310_v0, %v5309_v25 }
 0xef3   :  { %v6634_v58 = vpop.permute.xlu0 %6633 }
 0xef4   :  { %v6636_v24 = vunpack.i.h.bf16 %v6634_v58  ;;  %v6635_v14 = vunpack.i.l.bf16 %v6634_v58 }
 0xef6   :  { %v5304_v59 = vsel %vm2488_vm13, %v5296_v33, %v6636_v24  ;;  %v5303_v10 = vsel %vm2488_vm13, %v5295_v49, %v6635_v14 }
 0xef9   :  { %6312 = vmatmul.msk.bf16.gmra.mxu0 %vm178_vm0, %v5315_v34 }
 0xefa   :  { %v6639_v27 = vpop.permute.xlu1 %6638 }
 0xefb   :  { %v6641_v1 = vunpack.i.h.bf16 %v6639_v27  ;;  %v6640_v19 = vunpack.i.l.bf16 %v6639_v27 }
 0xefd   :  { %v5311_v38 = vsel %vm2497_vm14, %v5303_v10, %v6640_v19  ;;  %v5312_v51 = vsel %vm2497_vm14, %v5304_v59, %v6641_v1 }
 0xefe   :  { %v5316_v11 = vpack.c.bf16 %v5312_v51, %v5311_v38 }
 0xf09   :  { %6313 = vmatmul.msk.bf16.gmra.mxu0 %vm178_vm0, %v5316_v11 }
 0xf56   :  { %v5356_v39 = vpop.f32.mrf.mxu0 }
 0xf57   :  { %v5357_v12 = vadd.f32 %v5356_v39, %v5322_v32 }
 0xf59   :  { %v5376_v57 = vadd.f32 %v5357_v12, %v10282_v31 }
 0xf5b   :  { %v5384_v55 = vsel %vm178_vm0, %v5376_v57, 0.0 }
 0xf5c   :  { %5385 = vadd.xlane.f32.xlu2 %v5384_v55 }
 0xf5e   :  { %v5358_v52 = vpop.f32.mrf.mxu0 }
 0xf5f   :  { %v5359_v30 = vadd.f32 %v5358_v52, %v5322_v32 }
 0xf61   :  { %v5377_v17 = vadd.f32 %v5359_v30, %v10283_v40 }
 0xf63   :  { %v5387_v44 = vsel %vm178_vm0, %v5377_v17, 0.0 }
 0xf64   :  { %5388 = vadd.xlane.f32.xlu0 %v5387_v44 }
 0xf66   :  { %v5361_v15 = vpop.f32.mrf.mxu0 }
 0xf67   :  { %v5362_v50 = vadd.f32 %v5361_v15, %v5322_v32 }
 0xf69   :  { %v5378_v42 = vadd.f32 %v5362_v50, %v10284_v9 }
 0xf6b   :  { %v5390_v28 = vsel %vm178_vm0, %v5378_v42, 0.0 }
 0xf6c   :  { %5391 = vadd.xlane.f32.xlu1 %v5390_v28  ;;  %v6378_v28 = vld [vmem:[#allocation7 + $0x18] sm:$0xff] }
 0xf6d   :  { %5622 = vmatpush.bf16.msrb.mxu1 %v6378_v28 }
 0xf6e   :  { %v5363_v61 = vpop.f32.mrf.mxu0 }
 0xf6f   :  { %v5364_v62 = vadd.f32 %v5363_v61, %v5322_v32 }
 0xf71   :  { %v5379_v3 = vadd.f32 %v5364_v62, %v10285_v36  ;;  %v6377_v36 = vld [vmem:[#allocation7 + $0x10] sm:$0xff] }
 0xf72   :  { %5623 = vmatpush.bf16.msrb.mxu1 %v6377_v36 }
 0xf73   :  { %v5393_v4 = vsel %vm178_vm0, %v5379_v3, 0.0 }
 0xf74   :  { %5394 = vadd.xlane.f32.xlu2 %v5393_v4 }
 0xf76   :  { %v5366_v41 = vpop.f32.mrf.mxu0 }
 0xf77   :  { %v5367_v6 = vadd.f32 %v5366_v41, %v5322_v32 }
 0xf79   :  { %v5380_v60 = vadd.f32 %v5367_v6, %v10286_v45 }
 0xf7b   :  { %v5396_v48 = vsel %vm178_vm0, %v5380_v60, 0.0 }
 0xf7c   :  { %5397 = vadd.xlane.f32.xlu0 %v5396_v48 }
 0xf7e   :  { %v5368_v23 = vpop.f32.mrf.mxu0 }
 0xf7f   :  { %v5369_v63 = vadd.f32 %v5368_v23, %v5322_v32 }
 0xf81   :  { %v5381_v13 = vadd.f32 %v5369_v63, %v10287_v54 }
 0xf83   :  { %v5399_v18 = vsel %vm178_vm0, %v5381_v13, 0.0 }
 0xf84   :  { %5400 = vadd.xlane.f32.xlu1 %v5399_v18 }
 0xf86   :  { %v5371_v47 = vpop.f32.mrf.mxu0 }
 0xf87   :  { %v5372_v8 = vadd.f32 %v5371_v47, %v5322_v32 }
 0xf89   :  { %v5382_v46 = vadd.f32 %v5372_v8, %v10288_v20 }
 0xf8b   :  { %v5402_v35 = vsel %vm178_vm0, %v5382_v46, 0.0 }
 0xf8c   :  { %5403 = vadd.xlane.f32.xlu1 %v5402_v35 }
 0xf8e   :  { %v5373_v26 = vpop.f32.mrf.mxu0 }
 0xf8f   :  { %v5374_v16 = vadd.f32 %v5373_v26, %v5322_v32 }
 0xf91   :  { %v5383_v34 = vadd.f32 %v5374_v16, %v10290_v56 }
 0xf93   :  { %v5405_v29 = vsel %vm178_vm0, %v5383_v34, 0.0 }
 0xfcf   :  { %v5386_v21 = vpop.xlane.xlu2 %5385 }
 0xfd0   :  { %v5408_v37 = vmul.f32 %v5386_v21, %v10289_v7 }
 0xfd2   :  { %v9837_v53 = vsub.f32 %v5376_v57, %v5408_v37 }
 0xfd4   :  { %v5424_v22 = vmul.f32 %v9837_v53, %v9837_v53 }
 0xfd6   :  { %v5432_v43 = vsel %vm178_vm0, %v5424_v22, 0.0 }
 0xfd7   :  { %v5389_v25 = vpop.xlane.xlu0 %5388  ;;  %5433 = vadd.xlane.f32.xlu2 %v5432_v43 }
 0xfd8   :  { %v5409_v0 = vmul.f32 %v5389_v25, %v10289_v7 }
 0xfda   :  { %v9844_v58 = vsub.f32 %v5377_v17, %v5409_v0 }
 0xfdc   :  { %v5425_v27 = vmul.f32 %v9844_v58, %v9844_v58 }
 0xfde   :  { %v5435_v2 = vsel %vm178_vm0, %v5425_v27, 0.0 }
 0xfdf   :  { %v5392_v24 = vpop.xlane.xlu1 %5391  ;;  %5436 = vadd.xlane.f32.xlu0 %v5435_v2  ;;  %5406 = vadd.xlane.f32.xlu2 %v5405_v29 }
 0xfe0   :  { %v5410_v14 = vmul.f32 %v5392_v24, %v10289_v7 }
 0xfe2   :  { %v9851_v1 = vsub.f32 %v5378_v42, %v5410_v14 }
 0xfe4   :  { %v5426_v19 = vmul.f32 %v9851_v1, %v9851_v1 }
 0xfe6   :  { %v5438_v33 = vsel %vm178_vm0, %v5426_v19, 0.0 }
 0xfe7   :  { %5439 = vadd.xlane.f32.xlu0 %v5438_v33  ;;  %v5395_v49 = vpop.xlane.xlu2 %5394  ;;  %v9895_v33 = vperm.slane %v9819_v5, 2 }
 0xfe8   :  { %v5411_v59 = vmul.f32 %v5395_v49, %v10289_v7 }
 0xfea   :  { %v9857_v10 = vsub.f32 %v5379_v3, %v5411_v59 }
 0xfec   :  { %v5427_v38 = vmul.f32 %v9857_v10, %v9857_v10 }
 0xfee   :  { %v5441_v51 = vsel %vm178_vm0, %v5427_v38, 0.0 }
 0xfef   :  { %v5398_v11 = vpop.xlane.xlu0 %5397  ;;  %5442 = vadd.xlane.f32.xlu1 %v5441_v51 }
 0xff0   :  { %v5412_v32 = vmul.f32 %v5398_v11, %v10289_v7 }
 0xff2   :  { %v9863_v39 = vsub.f32 %v5380_v60, %v5412_v32 }
 0xff4   :  { %v5428_v12 = vmul.f32 %v9863_v39, %v9863_v39 }
 0xff6   :  { %v5444_v31 = vsel %vm178_vm0, %v5428_v12, 0.0 }
 0xff7   :  { %v5401_v57 = vpop.xlane.xlu1 %5400  ;;  %5445 = vadd.xlane.f32.xlu2 %v5444_v31 }
 0xff8   :  { %v5413_v55 = vmul.f32 %v5401_v57, %v10289_v7 }
 0xffa   :  { %v9869_v52 = vsub.f32 %v5381_v13, %v5413_v55 }
 0xffc   :  { %v5429_v30 = vmul.f32 %v9869_v52, %v9869_v52 }
 0xffe   :  { %v5447_v40 = vsel %vm178_vm0, %v5429_v30, 0.0 }
 0xfff   :  { %v5404_v17 = vpop.xlane.xlu1 %5403  ;;  %5448 = vadd.xlane.f32.xlu0 %v5447_v40 }
0x1000   :  { %v5414_v44 = vmul.f32 %v5404_v17, %v10289_v7 }
0x1002   :  { %v9875_v15 = vsub.f32 %v5382_v46, %v5414_v44 }
0x1004   :  { %v5430_v50 = vmul.f32 %v9875_v15, %v9875_v15 }
0x1006   :  { %v5450_v9 = vsel %vm178_vm0, %v5430_v50, 0.0 }
0x1007   :  { %5451 = vadd.xlane.f32.xlu1 %v5450_v9 }
0x104a   :  { %v5434_v42 = vpop.xlane.xlu2 %5433 }
0x104b   :  { %v5456_v61 = vmul.f32 %v5434_v42, %v10289_v7 }
0x104d   :  { %v5464_v62 = vadd.f32 1e-12, %v5456_v61 }
0x104f   :  { %6969 = vrsqrt.f32 %v5464_v62  ;;  %vm5478_vm12 = vweird.f32 %v5464_v62 }
0x1052   :  { %v5437_v3 = vpop.xlane.xlu0 %5436  ;;  %v5407_v4 = vpop.xlane.xlu2 %5406 }
0x1053   :  { %v5457_v41 = vmul.f32 %v5437_v3, %v10289_v7  ;;  %v5415_v6 = vmul.f32 %v5407_v4, %v10289_v7 }
0x1055   :  { %v6970_v45 = vpop.eup %6969  ;;  %v5465_v60 = vadd.f32 1e-12, %v5457_v41  ;;  %v9883_v48 = vsub.f32 %v5383_v34, %v5415_v6  ;;  %v9891_v34 = vperm.slane %v9819_v5, 1 }
0x1056   :  { %v5473_v23 = vmul.f32 %v6970_v45, %v5464_v62  ;;  %vm5479_vm11 = vweird.f32 %v6970_v45 }
0x1057   :  { %6971 = vrsqrt.f32 %v5465_v60  ;;  %v5431_v63 = vmul.f32 %v9883_v48, %v9883_v48  ;;  %vm5480_vm13 = vmor %vm5478_vm12, %vm5479_vm11  ;;  %vm5488_vm7 = vweird.f32 %v5465_v60 }
0x1058   :  { %v5474_v54 = vmul.f32 %v6970_v45, %v5473_v23 }
0x1059   :  { %v5453_v13 = vsel %vm178_vm0, %v5431_v63, 0.0 }
0x105a   :  { %v5475_v18 = vmul.f32 0.5, %v5474_v54  ;;  %v5440_v47 = vpop.xlane.xlu0 %5439  ;;  %5454 = vadd.xlane.f32.xlu2 %v5453_v13 }
0x105b   :  { %v5458_v8 = vmul.f32 %v5440_v47, %v10289_v7 }
0x105c   :  { %v5476_v20 = vsub.f32 1.5, %v5475_v18 }
0x105d   :  { %v6972_v46 = vpop.eup %6971  ;;  %v5466_v35 = vadd.f32 1e-12, %v5458_v8 }
0x105e   :  { %v5477_v21 = vmul.f32 %v6970_v45, %v5476_v20  ;;  %v5483_v37 = vmul.f32 %v6972_v46, %v5465_v60  ;;  %vm5489_vm14 = vweird.f32 %v6972_v46 }
0x105f   :  { %6973 = vrsqrt.f32 %v5466_v35  ;;  %vm5490_vm8 = vmor %vm5488_vm7, %vm5489_vm14  ;;  %vm5498_vm10 = vweird.f32 %v5466_v35 }
0x1060   :  { %v5484_v26 = vmul.f32 %v6972_v46, %v5483_v37  ;;  %v5481_v22 = vsel %vm5480_vm13, %v6970_v45, %v5477_v21 }
0x1061   :  { %v5552_v27 = vmul.f32 %v5481_v22, %v9837_v53 }
0x1062   :  { %v5485_v16 = vmul.f32 0.5, %v5484_v26  ;;  %v5443_v43 = vpop.xlane.xlu1 %5442 }
0x1063   :  { %v5459_v25 = vmul.f32 %v5443_v43, %v10289_v7  ;;  %v5561_v49 = vmul.f32 %v9891_v34, %v5552_v27 }
0x1064   :  { %v5486_v0 = vsub.f32 1.5, %v5485_v16 }
0x1065   :  { %v6974_v56 = vpop.eup %6973  ;;  %v5467_v2 = vadd.f32 1e-12, %v5459_v25  ;;  %v9902_v31 = vadd.f32 %v9895_v33, %v5561_v49 }
0x1066   :  { %v5487_v29 = vmul.f32 %v6972_v46, %v5486_v0  ;;  %v5493_v24 = vmul.f32 %v6974_v56, %v5466_v35  ;;  %vm5499_vm9 = vweird.f32 %v6974_v56 }
0x1067   :  { %6975 = vrsqrt.f32 %v5467_v2  ;;  %vm5500_vm15 = vmor %vm5498_vm10, %vm5499_vm9  ;;  %vm5508_vm3 = vweird.f32 %v5467_v2 }
0x1068   :  { %v5491_v14 = vsel %vm5490_vm8, %v6972_v46, %v5487_v29  ;;  %v5494_v19 = vmul.f32 %v6974_v56, %v5493_v24 }
0x1069   :  { %v5553_v59 = vmul.f32 %v5491_v14, %v9844_v58 }
0x106a   :  { %v5495_v38 = vmul.f32 0.5, %v5494_v19  ;;  %v5446_v51 = vpop.xlane.xlu2 %5445 }
0x106b   :  { %v5562_v11 = vmul.f32 %v9891_v34, %v5553_v59  ;;  %v5460_v53 = vmul.f32 %v5446_v51, %v10289_v7 }
0x106c   :  { %v5496_v32 = vsub.f32 1.5, %v5495_v38 }
0x106d   :  { %v6976_v12 = vpop.eup %6975  ;;  %v9905_v57 = vadd.f32 %v9895_v33, %v5562_v11  ;;  %v5468_v55 = vadd.f32 1e-12, %v5460_v53 }
0x106e   :  { %v5497_v30 = vmul.f32 %v6974_v56, %v5496_v32  ;;  %v5503_v40 = vmul.f32 %v6976_v12, %v5467_v2  ;;  %vm5509_vm1 = vweird.f32 %v6976_v12 }
0x106f   :  { %v5578_v58 = vpack.c.bf16 %v9905_v57, %v9902_v31  ;;  %6977 = vrsqrt.f32 %v5468_v55  ;;  %vm5510_vm4 = vmor %vm5508_vm3, %vm5509_vm1  ;;  %vm5518_vm6 = vweird.f32 %v5468_v55 }
0x1070   :  { %v5504_v17 = vmul.f32 %v6976_v12, %v5503_v40  ;;  %v5501_v44 = vsel %vm5500_vm15, %v6974_v56, %v5497_v30 }
0x1071   :  { %6322 = vmatmul.msk.bf16.vlgmr.msrb.gmra.mxu1 %vm178_vm0, %v5578_v58  ;;  %v5554_v62 = vmul.f32 %v5501_v44, %v9851_v1  ;;  %v6382_v44 = vld [vmem:[%s10177_s9 + $0x38] sm:$0xff] }
0x1072   :  { %v5505_v50 = vmul.f32 0.5, %v5504_v17  ;;  %v5449_v9 = vpop.xlane.xlu0 %5448  ;;  %5771 = vmatpush.bf16.msra.mxu2 %v6382_v44 }
0x1073   :  { %v5461_v42 = vmul.f32 %v5449_v9, %v10289_v7  ;;  %v5563_v60 = vmul.f32 %v9891_v34, %v5554_v62 }
0x1074   :  { %v5506_v28 = vsub.f32 1.5, %v5505_v50 }
0x1075   :  { %v6978_v61 = vpop.eup %6977  ;;  %v5469_v36 = vadd.f32 1e-12, %v5461_v42  ;;  %v9916_v18 = vadd.f32 %v9895_v33, %v5563_v60 }
0x1076   :  { %v5507_v3 = vmul.f32 %v6976_v12, %v5506_v28  ;;  %v5513_v4 = vmul.f32 %v6978_v61, %v5468_v55  ;;  %vm5519_vm5 = vweird.f32 %v6978_v61  ;;  %v6381_v28 = vld [vmem:[%s10177_s9 + $0x30] sm:$0xff] }
0x1077   :  { %6979 = vrsqrt.f32 %v5469_v36  ;;  %vm5520_vm11 = vmor %vm5518_vm6, %vm5519_vm5  ;;  %vm5528_vm13 = vweird.f32 %v5469_v36  ;;  %5772 = vmatpush.bf16.msra.mxu2 %v6381_v28 }
0x1078   :  { %v5511_v41 = vsel %vm5510_vm4, %v6976_v12, %v5507_v3  ;;  %v5514_v6 = vmul.f32 %v6978_v61, %v5513_v4  ;;  %v9960_v3 = vld [vmem:[#allocation8 + $0x1] ss:$0 sm:$0xff] }
0x1079   :  { %v5555_v45 = vmul.f32 %v5511_v41, %v9857_v10 }
0x107a   :  { %v5515_v23 = vmul.f32 0.5, %v5514_v6 }
0x107b   :  { %v5564_v63 = vmul.f32 %v9891_v34, %v5555_v45 }
0x107c   :  { %v5516_v54 = vsub.f32 1.5, %v5515_v23 }
0x107d   :  { %v6980_v13 = vpop.eup %6979  ;;  %v9919_v1 = vadd.f32 %v9895_v33, %v5564_v63 }
0x107e   :  { %v5517_v47 = vmul.f32 %v6978_v61, %v5516_v54  ;;  %v5523_v8 = vmul.f32 %v6980_v13, %v5469_v36  ;;  %vm5529_vm12 = vweird.f32 %v6980_v13  ;;  %v6380_v36 = vld [vmem:[%s10177_s9 + $0x28] sm:$0xff] }
0x107f   :  { %v5579_v20 = vpack.c.bf16 %v9919_v1, %v9916_v18  ;;  %vm5530_vm14 = vmor %vm5528_vm13, %vm5529_vm12  ;;  %5773 = vmatpush.bf16.msra.mxu2 %v6380_v36 }
0x1080   :  { %v5524_v10 = vmul.f32 %v6980_v13, %v5523_v8  ;;  %v5521_v46 = vsel %vm5520_vm11, %v6978_v61, %v5517_v47 }
0x1081   :  { %6323 = vmatmul.msk.bf16.gmra.mxu1 %vm178_vm0, %v5579_v20  ;;  %v5556_v37 = vmul.f32 %v5521_v46, %v9863_v39  ;;  %v5452_v39 = vpop.xlane.xlu1 %5451 }
0x1082   :  { %v5525_v35 = vmul.f32 0.5, %v5524_v10  ;;  %v5462_v2 = vmul.f32 %v5452_v39, %v10289_v7 }
0x1083   :  { %v5565_v43 = vmul.f32 %v9891_v34, %v5556_v37 }
0x1084   :  { %v5526_v21 = vsub.f32 1.5, %v5525_v35  ;;  %v5470_v29 = vadd.f32 1e-12, %v5462_v2 }
0x1085   :  { %v9929_v0 = vadd.f32 %v9895_v33, %v5565_v43 }
0x1086   :  { %v5527_v26 = vmul.f32 %v6980_v13, %v5526_v21  ;;  %6981 = vrsqrt.f32 %v5470_v29  ;;  %vm5538_vm8 = vweird.f32 %v5470_v29 }
0x1088   :  { %v5531_v22 = vsel %vm5530_vm14, %v6980_v13, %v5527_v26 }
0x1089   :  { %v5557_v16 = vmul.f32 %v5531_v22, %v9869_v52 }
0x108b   :  { %v5566_v25 = vmul.f32 %v9891_v34, %v5557_v16 }
0x108c   :  { %v6982_v52 = vpop.eup %6981 }
0x108d   :  { %v9932_v56 = vadd.f32 %v9895_v33, %v5566_v25  ;;  %v5533_v24 = vmul.f32 %v6982_v52, %v5470_v29  ;;  %vm5539_vm7 = vweird.f32 %v6982_v52 }
0x108e   :  { %vm5540_vm9 = vmor %vm5538_vm8, %vm5539_vm7 }
0x108f   :  { %v5580_v27 = vpack.c.bf16 %v9932_v56, %v9929_v0  ;;  %v5534_v14 = vmul.f32 %v6982_v52, %v5533_v24 }
0x1091   :  { %6324 = vmatmul.msk.bf16.gmra.mxu1 %vm178_vm0, %v5580_v27  ;;  %v5535_v38 = vmul.f32 0.5, %v5534_v14 }
0x1093   :  { %v5536_v51 = vsub.f32 1.5, %v5535_v38 }
0x1095   :  { %v5537_v53 = vmul.f32 %v6982_v52, %v5536_v51 }
0x1097   :  { %v5541_v55 = vsel %vm5540_vm9, %v6982_v52, %v5537_v53 }
0x1098   :  { %v5558_v58 = vmul.f32 %v5541_v55, %v9875_v15 }
0x109a   :  { %v5567_v42 = vmul.f32 %v9891_v34, %v5558_v58 }
0x109c   :  { %v9950_v15 = vadd.f32 %v9895_v33, %v5567_v42 }
0x10cd   :  { %v5455_v19 = vpop.xlane.xlu2 %5454 }
0x10ce   :  { %v5463_v49 = vmul.f32 %v5455_v19, %v10289_v7 }
0x10d0   :  { %v5471_v59 = vadd.f32 1e-12, %v5463_v49 }
0x10d2   :  { %6983 = vrsqrt.f32 %v5471_v59  ;;  %vm5548_vm15 = vweird.f32 %v5471_v59 }
0x10d8   :  { %v6984_v11 = vpop.eup %6983 }
0x10d9   :  { %v5543_v32 = vmul.f32 %v6984_v11, %v5471_v59  ;;  %vm5549_vm10 = vweird.f32 %v6984_v11 }
0x10da   :  { %vm5550_vm1 = vmor %vm5548_vm15, %vm5549_vm10 }
0x10db   :  { %v5544_v12 = vmul.f32 %v6984_v11, %v5543_v32 }
0x10dd   :  { %v5545_v30 = vmul.f32 0.5, %v5544_v12 }
0x10df   :  { %v5546_v40 = vsub.f32 1.5, %v5545_v30 }
0x10e1   :  { %v5547_v17 = vmul.f32 %v6984_v11, %v5546_v40 }
0x10e3   :  { %v5551_v50 = vsel %vm5550_vm1, %v6984_v11, %v5547_v17 }
0x10e4   :  { %v5559_v9 = vmul.f32 %v5551_v50, %v9883_v48 }
0x10e6   :  { %v5568_v61 = vmul.f32 %v9891_v34, %v5559_v9  ;;  %v6379_v34 = vld [vmem:[%s10177_s9 + $0x20] sm:$0xff] }
0x10e7   :  { %5774 = vmatpush.bf16.msra.mxu2 %v6379_v34 }
0x10e8   :  { %v9953_v62 = vadd.f32 %v9895_v33, %v5568_v61 }
0x10ea   :  { %v5581_v48 = vpack.c.bf16 %v9953_v62, %v9950_v15 }
0x10ec   :  { %6325 = vmatmul.msk.bf16.gmra.mxu1 %vm178_vm0, %v5581_v48 }
0x10ee   :  { %v5625_v4 = vpop.f32.mrf.mxu1 }
0x10ef   :  { %v5626_v33 = vadd.f32 %v9960_v3, %v5625_v4 }
0x10f1   :  { %v5653_v41 = vmul.f32 0.044715, %v5626_v33  ;;  %v5645_v29 = vmul.f32 0.5, %v5626_v33 }
0x10f3   :  { %v5661_v6 = vmul.f32 %v5653_v41, %v5626_v33 }
0x10f5   :  { %v5669_v45 = vmul.f32 %v5661_v6, %v5626_v33 }
0x10f6   :  { %v5627_v60 = vpop.f32.mrf.mxu1 }
0x10f7   :  { %v5677_v23 = vadd.f32 %v5669_v45, %v5626_v33  ;;  %v5628_v63 = vadd.f32 %v9960_v3, %v5627_v60 }
0x10f9   :  { %v5654_v54 = vmul.f32 0.044715, %v5628_v63  ;;  %v5685_v13 = vmul.f32 0.7978846, %v5677_v23  ;;  %v5646_v52 = vmul.f32 0.5, %v5628_v63 }
0x10fb   :  { %v5662_v47 = vmul.f32 %v5654_v54, %v5628_v63  ;;  %6985 = vtanh.f32 %v5685_v13 }
0x10fd   :  { %v5670_v8 = vmul.f32 %v5662_v47, %v5628_v63 }
0x10fe   :  { %v5630_v20 = vpop.f32.mrf.mxu1 }
0x10ff   :  { %v5678_v10 = vadd.f32 %v5670_v8, %v5628_v63  ;;  %v5631_v46 = vadd.f32 %v9960_v3, %v5630_v20 }
0x1101   :  { %v5686_v35 = vmul.f32 0.7978846, %v5678_v10  ;;  %v5655_v21 = vmul.f32 0.044715, %v5631_v46  ;;  %v6986_v26 = vpop.eup %6985  ;;  %v5647_v61 = vmul.f32 0.5, %v5631_v46 }
0x1102   :  { %v5701_v27 = vadd.f32 1.0, %v6986_v26 }
0x1103   :  { %6987 = vtanh.f32 %v5686_v35  ;;  %v5663_v37 = vmul.f32 %v5655_v21, %v5631_v46 }
0x1104   :  { %v5709_v49 = vmul.f32 %v5701_v27, %v5645_v29 }
0x1105   :  { %v5671_v22 = vmul.f32 %v5663_v37, %v5631_v46 }
0x1106   :  { %v5632_v16 = vpop.f32.mrf.mxu1 }
0x1107   :  { %v5679_v43 = vadd.f32 %v5671_v22, %v5631_v46  ;;  %v5633_v25 = vadd.f32 %v9960_v3, %v5632_v16 }
0x1109   :  { %v6988_v39 = vpop.eup %6987  ;;  %v5656_v2 = vmul.f32 0.044715, %v5633_v25  ;;  %v5687_v14 = vmul.f32 0.7978846, %v5679_v43  ;;  %v5648_v36 = vmul.f32 0.5, %v5633_v25 }
0x110a   :  { %v5702_v24 = vadd.f32 1.0, %v6988_v39 }
0x110b   :  { %v5664_v19 = vmul.f32 %v5656_v2, %v5633_v25  ;;  %6989 = vtanh.f32 %v5687_v14 }
0x110c   :  { %v5710_v59 = vmul.f32 %v5702_v24, %v5646_v52 }
0x110d   :  { %v5672_v38 = vmul.f32 %v5664_v19, %v5633_v25 }
0x110e   :  { %v5717_v51 = vpack.c.bf16 %v5710_v59, %v5709_v49  ;;  %v5635_v11 = vpop.f32.mrf.mxu1 }
0x110f   :  { %v5680_v53 = vadd.f32 %v5672_v38, %v5633_v25  ;;  %v5636_v32 = vadd.f32 %v9960_v3, %v5635_v11 }
0x1110   :  { %6350 = vmatmul.msk.bf16.vlgmr.msra.gmra.mxu2 %vm2944_vm2, %v5717_v51 }
0x1111   :  { %v5688_v12 = vmul.f32 0.7978846, %v5680_v53  ;;  %v5657_v55 = vmul.f32 0.044715, %v5636_v32  ;;  %v6990_v40 = vpop.eup %6989  ;;  %v5649_v47 = vmul.f32 0.5, %v5636_v32 }
0x1112   :  { %v5703_v9 = vadd.f32 1.0, %v6990_v40 }
0x1113   :  { %v5665_v30 = vmul.f32 %v5657_v55, %v5636_v32  ;;  %6991 = vtanh.f32 %v5688_v12 }
0x1114   :  { %v5711_v33 = vmul.f32 %v5703_v9, %v5647_v61 }
0x1115   :  { %v5673_v58 = vmul.f32 %v5665_v30, %v5636_v32 }
0x1116   :  { %v5637_v17 = vpop.f32.mrf.mxu1 }
0x1117   :  { %v5681_v44 = vadd.f32 %v5673_v58, %v5636_v32  ;;  %v5638_v50 = vadd.f32 %v9960_v3, %v5637_v17 }
0x1119   :  { %v6992_v42 = vpop.eup %6991  ;;  %v5658_v28 = vmul.f32 0.044715, %v5638_v50  ;;  %v5689_v34 = vmul.f32 0.7978846, %v5681_v44  ;;  %v5650_v8 = vmul.f32 0.5, %v5638_v50 }
0x111a   :  { %v5704_v48 = vadd.f32 1.0, %v6992_v42 }
0x111b   :  { %v5666_v4 = vmul.f32 %v5658_v28, %v5638_v50  ;;  %6993 = vtanh.f32 %v5689_v34 }
0x111c   :  { %v5712_v41 = vmul.f32 %v5704_v48, %v5648_v36 }
0x111d   :  { %v5674_v6 = vmul.f32 %v5666_v4, %v5638_v50 }
0x111e   :  { %v5718_v45 = vpack.c.bf16 %v5712_v41, %v5711_v33 }
0x111f   :  { %v5682_v60 = vadd.f32 %v5674_v6, %v5638_v50 }
0x1120   :  { %6351 = vmatmul.msk.bf16.gmra.mxu2 %vm2944_vm2, %v5718_v45 }
0x1121   :  { %v5690_v23 = vmul.f32 0.7978846, %v5682_v60  ;;  %v6994_v63 = vpop.eup %6993 }
0x1122   :  { %v5705_v54 = vadd.f32 1.0, %v6994_v63 }
0x1123   :  { %6995 = vtanh.f32 %v5690_v23 }
0x1124   :  { %v5713_v10 = vmul.f32 %v5705_v54, %v5649_v47 }
0x1129   :  { %v6996_v13 = vpop.eup %6995 }
0x112a   :  { %v5706_v20 = vadd.f32 1.0, %v6996_v13 }
0x112c   :  { %v5714_v46 = vmul.f32 %v5706_v20, %v5650_v8 }
0x112e   :  { %v5719_v35 = vpack.c.bf16 %v5714_v46, %v5713_v10 }
0x1130   :  { %6352 = vmatmul.msk.bf16.gmra.mxu2 %vm2944_vm2, %v5719_v35 }
0x1169   :  { %v5640_v21 = vpop.f32.mrf.mxu1 }
0x116a   :  { %v5641_v37 = vadd.f32 %v9960_v3, %v5640_v21 }
0x116c   :  { %v5659_v26 = vmul.f32 0.044715, %v5641_v37  ;;  %v5651_v38 = vmul.f32 0.5, %v5641_v37 }
0x116e   :  { %v5667_v22 = vmul.f32 %v5659_v26, %v5641_v37 }
0x1170   :  { %v5675_v16 = vmul.f32 %v5667_v22, %v5641_v37 }
0x1171   :  { %v5642_v43 = vpop.f32.mrf.mxu1 }
0x1172   :  { %v5683_v25 = vadd.f32 %v5675_v16, %v5641_v37  ;;  %v5643_v27 = vadd.f32 %v9960_v3, %v5642_v43  ;;  %v5730_v3 = vperm.slane %v9819_v5, 3 }
0x1174   :  { %v5660_v39 = vmul.f32 0.044715, %v5643_v27  ;;  %v5691_v2 = vmul.f32 0.7978846, %v5683_v25  ;;  %v5652_v51 = vmul.f32 0.5, %v5643_v27 }
0x1176   :  { %v5668_v29 = vmul.f32 %v5660_v39, %v5643_v27  ;;  %6997 = vtanh.f32 %v5691_v2 }
0x1178   :  { %v5676_v52 = vmul.f32 %v5668_v29, %v5643_v27 }
0x117a   :  { %v5684_v24 = vadd.f32 %v5676_v52, %v5643_v27 }
0x117c   :  { %v5692_v14 = vmul.f32 0.7978846, %v5684_v24  ;;  %v6998_v19 = vpop.eup %6997 }
0x117d   :  { %v5707_v49 = vadd.f32 1.0, %v6998_v19 }
0x117e   :  { %6999 = vtanh.f32 %v5692_v14 }
0x117f   :  { %v5715_v53 = vmul.f32 %v5707_v49, %v5651_v38 }
0x1184   :  { %v7000_v59 = vpop.eup %6999 }
0x1185   :  { %v5708_v11 = vadd.f32 1.0, %v7000_v59 }
0x1187   :  { %v5716_v32 = vmul.f32 %v5708_v11, %v5652_v51 }
0x1189   :  { %v5720_v12 = vpack.c.bf16 %v5716_v32, %v5715_v53 }
0x118b   :  { %6353 = vmatmul.msk.bf16.gmra.mxu2 %vm2944_vm2, %v5720_v12 }
0x1193   :  { %v5776_v55 = vpop.f32.mrf.mxu2 }
0x1194   :  { %v5777_v30 = vadd.f32 %v5776_v55, %v5730_v3 }
0x1196   :  { %v5796_v40 = vadd.f32 %v5777_v30, %v9902_v31 }
0x1198   :  { %v5804_v58 = vsel %vm178_vm0, %v5796_v40, 0.0 }
0x1199   :  { %5805 = vadd.xlane.f32.xlu2 %v5804_v58 }
0x119b   :  { %v5778_v17 = vpop.f32.mrf.mxu2 }
0x119c   :  { %v5779_v44 = vadd.f32 %v5778_v17, %v5730_v3 }
0x119e   :  { %v5797_v50 = vadd.f32 %v5779_v44, %v9905_v57 }
0x11a0   :  { %v5807_v9 = vsel %vm178_vm0, %v5797_v50, 0.0 }
0x11a1   :  { %5808 = vadd.xlane.f32.xlu0 %v5807_v9 }
0x11a3   :  { %v5781_v42 = vpop.f32.mrf.mxu2 }
0x11a4   :  { %v5782_v28 = vadd.f32 %v5781_v42, %v5730_v3 }
0x11a6   :  { %v5798_v61 = vadd.f32 %v5782_v28, %v9916_v18 }
0x11a8   :  { %v5810_v5 = vsel %vm178_vm0, %v5798_v61, 0.0 }
0x11a9   :  { %5811 = vadd.xlane.f32.xlu1 %v5810_v5 }
0x11ab   :  { %v5783_v36 = vpop.f32.mrf.mxu2 }
0x11ac   :  { %v5784_v48 = vadd.f32 %v5783_v36, %v5730_v3 }
0x11ae   :  { %v5799_v31 = vadd.f32 %v5784_v48, %v9919_v1 }
0x11b0   :  { %v5813_v34 = vsel %vm178_vm0, %v5799_v31, 0.0 }
0x11b1   :  { %5814 = vadd.xlane.f32.xlu0 %v5813_v34 }
0x11b3   :  { %v5786_v4 = vpop.f32.mrf.mxu2 }
0x11b4   :  { %v5787_v33 = vadd.f32 %v5786_v4, %v5730_v3 }
0x11b6   :  { %v5800_v57 = vadd.f32 %v5787_v33, %v9929_v0 }
0x11b8   :  { %v5816_v41 = vsel %vm178_vm0, %v5800_v57, 0.0 }
0x11b9   :  { %5817 = vadd.xlane.f32.xlu1 %v5816_v41 }
0x11bb   :  { %v5788_v6 = vpop.f32.mrf.mxu2 }
0x11bc   :  { %v5789_v45 = vadd.f32 %v5788_v6, %v5730_v3 }
0x11be   :  { %v5801_v18 = vadd.f32 %v5789_v45, %v9932_v56 }
0x11c0   :  { %v5819_v60 = vsel %vm178_vm0, %v5801_v18, 0.0 }
0x11c1   :  { %5820 = vadd.xlane.f32.xlu2 %v5819_v60 }
0x120c   :  { %v5806_v13 = vpop.xlane.xlu2 %5805 }
0x120d   :  { %v5828_v20 = vmul.f32 %v5806_v13, %v10289_v7 }
0x120e   :  { %v5791_v23 = vpop.f32.mrf.mxu2 }
0x120f   :  { %v5792_v63 = vadd.f32 %v5791_v23, %v5730_v3  ;;  %v10000_v21 = vsub.f32 %v5796_v40, %v5828_v20 }
0x1211   :  { %v5802_v1 = vadd.f32 %v5792_v63, %v9950_v15  ;;  %v5844_v43 = vmul.f32 %v10000_v21, %v10000_v21 }
0x1213   :  { %v5822_v54 = vsel %vm178_vm0, %v5802_v1, 0.0  ;;  %v5852_v27 = vsel %vm178_vm0, %v5844_v43, 0.0 }
0x1214   :  { %v5809_v47 = vpop.xlane.xlu0 %5808  ;;  %5823 = vadd.xlane.f32.xlu0 %v5822_v54 }
0x1215   :  { %v5829_v0 = vmul.f32 %v5809_v47, %v10289_v7 }
0x1216   :  { %v5793_v8 = vpop.f32.mrf.mxu2 }
0x1217   :  { %v9995_v10 = vsub.f32 %v5797_v50, %v5829_v0  ;;  %v5794_v56 = vadd.f32 %v5793_v8, %v5730_v3 }
0x1219   :  { %v5803_v46 = vadd.f32 %v5794_v56, %v9953_v62  ;;  %v5845_v35 = vmul.f32 %v9995_v10, %v9995_v10 }
0x121b   :  { %v5855_v15 = vsel %vm178_vm0, %v5845_v35, 0.0  ;;  %v5825_v37 = vsel %vm178_vm0, %v5803_v46, 0.0 }
0x121c   :  { %v5812_v26 = vpop.xlane.xlu1 %5811  ;;  %5856 = vadd.xlane.f32.xlu2 %v5855_v15  ;;  %5826 = vadd.xlane.f32.xlu1 %v5825_v37 }
0x121d   :  { %v5830_v22 = vmul.f32 %v5812_v26, %v10289_v7 }
0x121f   :  { %v10005_v16 = vsub.f32 %v5798_v61, %v5830_v22 }
0x1221   :  { %v5846_v62 = vmul.f32 %v10005_v16, %v10005_v16 }
0x1223   :  { %v5858_v25 = vsel %vm178_vm0, %v5846_v62, 0.0 }
0x1224   :  { %v5815_v39 = vpop.xlane.xlu0 %5814  ;;  %5859 = vadd.xlane.f32.xlu0 %v5858_v25  ;;  %5853 = vadd.xlane.f32.xlu1 %v5852_v27 }
0x1225   :  { %v5831_v2 = vmul.f32 %v5815_v39, %v10289_v7 }
0x1227   :  { %v10014_v29 = vsub.f32 %v5799_v31, %v5831_v2 }
0x1229   :  { %v5847_v52 = vmul.f32 %v10014_v29, %v10014_v29 }
0x122b   :  { %v5861_v24 = vsel %vm178_vm0, %v5847_v52, 0.0 }
0x122c   :  { %5862 = vadd.xlane.f32.xlu2 %v5861_v24  ;;  %v5818_v14 = vpop.xlane.xlu1 %5817 }
0x122d   :  { %v5832_v19 = vmul.f32 %v5818_v14, %v10289_v7 }
0x122f   :  { %v10020_v49 = vsub.f32 %v5800_v57, %v5832_v19 }
0x1231   :  { %v5848_v59 = vmul.f32 %v10020_v49, %v10020_v49 }
0x1233   :  { %v5864_v38 = vsel %vm178_vm0, %v5848_v59, 0.0 }
0x1234   :  { %5865 = vadd.xlane.f32.xlu0 %v5864_v38  ;;  %v5821_v51 = vpop.xlane.xlu2 %5820 }
0x1235   :  { %v5833_v11 = vmul.f32 %v5821_v51, %v10289_v7 }
0x1237   :  { %v10026_v53 = vsub.f32 %v5801_v18, %v5833_v11 }
0x1239   :  { %v5849_v32 = vmul.f32 %v10026_v53, %v10026_v53 }
0x123b   :  { %v5867_v12 = vsel %vm178_vm0, %v5849_v32, 0.0 }
0x123c   :  { %5868 = vadd.xlane.f32.xlu1 %v5867_v12 }
0x1287   :  { %v5824_v3 = vpop.xlane.xlu0 %5823 }
0x1288   :  { %v5834_v55 = vmul.f32 %v5824_v3, %v10289_v7 }
0x128a   :  { %v10032_v30 = vsub.f32 %v5802_v1, %v5834_v55 }
0x128c   :  { %v5850_v40 = vmul.f32 %v10032_v30, %v10032_v30 }
0x128e   :  { %v5870_v58 = vsel %vm178_vm0, %v5850_v40, 0.0 }
0x128f   :  { %v5827_v17 = vpop.xlane.xlu1 %5826  ;;  %5871 = vadd.xlane.f32.xlu2 %v5870_v58  ;;  %v5857_v28 = vpop.xlane.xlu2 %5856 }
0x1290   :  { %v5835_v44 = vmul.f32 %v5827_v17, %v10289_v7  ;;  %v5877_v36 = vmul.f32 %v5857_v28, %v10289_v7 }
0x1292   :  { %v10038_v50 = vsub.f32 %v5803_v46, %v5835_v44  ;;  %v5885_v41 = vadd.f32 1e-12, %v5877_v36 }
0x1294   :  { %v5851_v9 = vmul.f32 %v10038_v50, %v10038_v50  ;;  %7001 = vrsqrt.f32 %v5885_v41  ;;  %vm5908_vm4 = vweird.f32 %v5885_v41 }
0x1296   :  { %v5873_v42 = vsel %vm178_vm0, %v5851_v9, 0.0  ;;  %v6384_v9 = vld [vmem:[#allocation10 + $0x8] sm:$0xff] }
0x1297   :  { %5874 = vadd.xlane.f32.xlu0 %v5873_v42  ;;  %v5860_v61 = vpop.xlane.xlu0 %5859  ;;  %v5854_v5 = vpop.xlane.xlu1 %5853  ;;  %6073 = vmatpush.bf16.msra.mxu3 %v6384_v9 }
0x1298   :  { %v5878_v31 = vmul.f32 %v5860_v61, %v10289_v7  ;;  %v5876_v4 = vmul.f32 %v5854_v5, %v10289_v7 }
0x129a   :  { %v5886_v45 = vadd.f32 1e-12, %v5878_v31  ;;  %v10049_v60 = vadd.f32 1e-12, %v5876_v4  ;;  %v10061_v54 = vpop.eup %7001 }
0x129b   :  { %v5903_v20 = vmul.f32 %v10061_v54, %v5885_v41  ;;  %vm5909_vm2 = vweird.f32 %v10061_v54 }
0x129c   :  { %7003 = vrsqrt.f32 %v5886_v45  ;;  %vm10098_vm6 = vmor %vm5908_vm4, %vm5909_vm2  ;;  %vm5918_vm11 = vweird.f32 %v5886_v45  ;;  %vm5898_vm14 = vweird.f32 %v10049_v60 }
0x129d   :  { %7005 = vrsqrt.f32 %v10049_v60  ;;  %v5904_v26 = vmul.f32 %v10061_v54, %v5903_v20 }
0x129f   :  { %v5863_v48 = vpop.xlane.xlu2 %5862  ;;  %v5905_v39 = vmul.f32 0.5, %v5904_v26 }
0x12a0   :  { %v5879_v57 = vmul.f32 %v5863_v48, %v10289_v7 }
0x12a1   :  { %v5906_v51 = vsub.f32 1.5, %v5905_v39 }
0x12a2   :  { %v10051_v23 = vadd.f32 1e-12, %v5879_v57  ;;  %v10063_v13 = vpop.eup %7003 }
0x12a3   :  { %v10065_v47 = vpop.eup %7005  ;;  %v5913_v46 = vmul.f32 %v10063_v13, %v5886_v45  ;;  %v5907_v58 = vmul.f32 %v10061_v54, %v5906_v51  ;;  %vm5919_vm3 = vweird.f32 %v10063_v13 }
0x12a4   :  { %7007 = vrsqrt.f32 %v10051_v23  ;;  %v5893_v35 = vmul.f32 %v10065_v47, %v10049_v60  ;;  %vm5899_vm5 = vweird.f32 %v10065_v47  ;;  %vm10105_vm13 = vmor %vm5918_vm11, %vm5919_vm3  ;;  %vm5928_vm9 = vweird.f32 %v10051_v23 }
0x12a5   :  { %v5914_v43 = vmul.f32 %v10063_v13, %v5913_v46  ;;  %v5911_v4 = vsel %vm10098_vm6, %v10061_v54, %v5907_v58  ;;  %vm10118_vm8 = vmor %vm5898_vm14, %vm5899_vm5 }
0x12a6   :  { %v5894_v62 = vmul.f32 %v10065_v47, %v5893_v35 }
0x12a7   :  { %v5866_v34 = vpop.xlane.xlu0 %5865  ;;  %v5915_v52 = vmul.f32 0.5, %v5914_v43 }
0x12a8   :  { %v5880_v6 = vmul.f32 %v5866_v34, %v10289_v7  ;;  %v5895_v24 = vmul.f32 0.5, %v5894_v62  ;;  %v6383_v34 = vld [vmem:[#allocation10] sm:$0xff] }
0x12a9   :  { %v5916_v32 = vsub.f32 1.5, %v5915_v52  ;;  %6074 = vmatpush.bf16.msra.mxu3 %v6383_v34 }
0x12aa   :  { %v10053_v63 = vadd.f32 1e-12, %v5880_v6  ;;  %v10067_v0 = vpop.eup %7007  ;;  %v5896_v3 = vsub.f32 1.5, %v5895_v24 }
0x12ab   :  { %v5923_v15 = vmul.f32 %v10067_v0, %v10051_v23  ;;  %v5917_v44 = vmul.f32 %v10063_v13, %v5916_v32  ;;  %vm5929_vm12 = vweird.f32 %v10067_v0 }
0x12ac   :  { %7009 = vrsqrt.f32 %v10053_v63  ;;  %v5897_v28 = vmul.f32 %v10065_v47, %v5896_v3  ;;  %vm10130_vm15 = vmor %vm5928_vm9, %vm5929_vm12  ;;  %vm5938_vm1 = vweird.f32 %v10053_v63  ;;  %vm6037_vm9 = vcmask 1043459  }
0x12ad   :  { %v5924_v25 = vmul.f32 %v10067_v0, %v5923_v15 }
0x12af   :  { %v5869_v33 = vpop.xlane.xlu1 %5868  ;;  %v5925_v14 = vmul.f32 0.5, %v5924_v25 }
0x12b0   :  { %v5881_v18 = vmul.f32 %v5869_v33, %v10289_v7 }
0x12b1   :  { %v5926_v55 = vsub.f32 1.5, %v5925_v14 }
0x12b2   :  { %v10055_v1 = vadd.f32 1e-12, %v5881_v18  ;;  %v10069_v8 = vpop.eup %7009  ;;  %v5901_v18 = vsel %vm10118_vm8, %v10065_v47, %v5897_v28  ;;  %vm6034_vm8 = vcmask 1042434  }
0x12b3   :  { %v5933_v37 = vmul.f32 %v10069_v8, %v10053_v63  ;;  %v5927_v61 = vmul.f32 %v10067_v0, %v5926_v55  ;;  %vm5939_vm7 = vweird.f32 %v10069_v8  ;;  %v7017_v63 = vld [vmem:[%s10174_s6 + $0x8] sm:$0x3f]  ;;  %v5972_v46 = vmul.f32 %v5901_v18, %v10000_v21 }
0x12b4   :  { %7011 = vrsqrt.f32 %v10055_v1  ;;  %vm5940_vm2 = vmor %vm5938_vm1, %vm5939_vm7  ;;  %vm5948_vm3 = vweird.f32 %v10055_v1  ;;  %v5980_v54 = vperm.slane %v7017_v63, 4  ;;  %vm6031_vm7 = vcmask 1041409  }
0x12b5   :  { %v5934_v27 = vmul.f32 %v10069_v8, %v5933_v37  ;;  %v5931_v60 = vsel %vm10130_vm15, %v10067_v0, %v5927_v61  ;;  %vm6043_vm15 = vcmask 1045509   ;;  %vm6046_vm1 = vcmask 1046534  }
0x12b6   :  { %v5975_v35 = vmul.f32 %v5931_v60, %v10014_v29  ;;  %v5981_v25 = vmul.f32 %v5980_v54, %v5972_v46 }
0x12b7   :  { %v5935_v59 = vmul.f32 0.5, %v5934_v27 }
0x12b9   :  { %v5936_v40 = vsub.f32 1.5, %v5935_v59 }
0x12ba   :  { %v10072_v56 = vpop.eup %7011 }
0x12bb   :  { %v5943_v22 = vmul.f32 %v10072_v56, %v10055_v1  ;;  %v5937_v48 = vmul.f32 %v10069_v8, %v5936_v40  ;;  %vm5949_vm10 = vweird.f32 %v10072_v56 }
0x12bc   :  { %vm5950_vm4 = vmor %vm5948_vm3, %vm5949_vm10  ;;  %vm6040_vm10 = vcmask 1044484  }
0x12bd   :  { %v5944_v2 = vmul.f32 %v10072_v56, %v5943_v22  ;;  %v5941_v47 = vsel %vm5940_vm2, %v10069_v8, %v5937_v48  ;;  %vm6049_vm2 = vcmask 1047559  }
0x12be   :  { %v5976_v15 = vmul.f32 %v5941_v47, %v10020_v49 }
0x12bf   :  { %v5945_v11 = vmul.f32 0.5, %v5944_v2 }
0x12c0   :  { %v5985_v27 = vmul.f32 %v5980_v54, %v5976_v15 }
0x12c1   :  { %v5946_v17 = vsub.f32 1.5, %v5945_v11 }
0x12c3   :  { %v5947_v57 = vmul.f32 %v10072_v56, %v5946_v17 }
0x12c5   :  { %v5951_v1 = vsel %vm5950_vm4, %v10072_v56, %v5947_v57 }
0x12c6   :  { %v5977_v8 = vmul.f32 %v5951_v1, %v10026_v53 }
0x12c8   :  { %v5986_v29 = vmul.f32 %v5980_v54, %v5977_v8 }
0x1302   :  { %v5872_v19 = vpop.xlane.xlu2 %5871 }
0x1303   :  { %v5882_v38 = vmul.f32 %v5872_v19, %v10289_v7 }
0x1305   :  { %v10090_v12 = vadd.f32 1e-12, %v5882_v38 }
0x1307   :  { %7013 = vrsqrt.f32 %v10090_v12  ;;  %vm5958_vm6 = vweird.f32 %v10090_v12 }
0x130a   :  { %v5875_v5 = vpop.xlane.xlu0 %5874 }
0x130b   :  { %v5883_v31 = vmul.f32 %v5875_v5, %v10289_v7  ;;  %v5921_v7 = vsel %vm10105_vm13, %v10063_v13, %v5917_v44  ;;  %v5973_v13 = vmul.f32 %v5911_v4, %v9995_v10  ;;  %v5989_v10 = vperm.slane %v7017_v63, 5 }
0x130c   :  { %v5974_v0 = vmul.f32 %v5921_v7, %v10005_v16  ;;  %v5984_v16 = vmul.f32 %v5980_v54, %v5975_v35  ;;  %v6646_v35 = vld [vmem:[%s10179_s11] ss:$0 sm:$0xff] }
0x130d   :  { %v7014_v41 = vpop.eup %7013  ;;  %v5891_v45 = vadd.f32 1e-12, %v5883_v31  ;;  %v5982_v26 = vmul.f32 %v5980_v54, %v5973_v13  ;;  %v5990_v24 = vadd.f32 %v5989_v10, %v5981_v25  ;;  %v5994_v19 = vadd.f32 %v5989_v10, %v5985_v27 }
0x130e   :  { %v5953_v23 = vmul.f32 %v7014_v41, %v10090_v12  ;;  %v5983_v22 = vmul.f32 %v5980_v54, %v5974_v0  ;;  %vm5959_vm5 = vweird.f32 %v7014_v41  ;;  %v5993_v14 = vadd.f32 %v5989_v10, %v5984_v16 }
0x130f   :  { %7015 = vrsqrt.f32 %v5891_v45  ;;  %v5991_v39 = vadd.f32 %v5989_v10, %v5982_v26  ;;  %vm5960_vm11 = vmor %vm5958_vm6, %vm5959_vm5  ;;  %v5995_v51 = vadd.f32 %v5989_v10, %v5986_v29  ;;  %v5998_v12 = vpack.c.bf16 %v5990_v24, %v5990_v24 }
0x1310   :  { %v5954_v20 = vmul.f32 %v7014_v41, %v5953_v23  ;;  %v5992_v49 = vadd.f32 %v5989_v10, %v5983_v22  ;;  %v6001_v55 = vpack.c.bf16 %v5993_v14, %v5993_v14  ;;  %v6002_v58 = vpack.c.bf16 %v5994_v19, %v5994_v19 }
0x1311   :  { %v5999_v38 = vpack.c.bf16 %v5991_v39, %v5991_v39  ;;  %vm5968_vm13 = vweird.f32 %v5891_v45  ;;  %v6003_v9 = vpack.c.bf16 %v5995_v51, %v5995_v51  ;;  %v6022_v61 = vunpack.c.l.b16 %v5998_v12 }
0x1312   :  { %v5955_v37 = vmul.f32 0.5, %v5954_v20  ;;  %v6000_v32 = vpack.c.bf16 %v5992_v49, %v5992_v49  ;;  %v6025_v5 = vunpack.c.l.b16 %v6001_v55  ;;  %v6026_v48 = vunpack.c.l.b16 %v6002_v58 }
0x1313   :  { %v6023_v44 = vunpack.c.l.b16 %v5999_v38  ;;  %v6027_v34 = vunpack.c.l.b16 %v6003_v9 }
0x1314   :  { %v5956_v43 = vsub.f32 1.5, %v5955_v37  ;;  %v6024_v42 = vunpack.c.l.b16 %v6000_v32  ;;  %v6036_v7 = vrot.slane %v6025_v5, 5 }
0x1315   :  { %v7016_v62 = vpop.eup %7015  ;;  %v6030_v31 = vrot.slane %v6023_v44, 7  ;;  %v6042_v18 = vrot.slane %v6027_v34, 3 }
0x1316   :  { %v5957_v56 = vmul.f32 %v7014_v41, %v5956_v43  ;;  %v5963_v21 = vmul.f32 %v7016_v62, %v5891_v45  ;;  %vm5969_vm12 = vweird.f32 %v7016_v62  ;;  %v6033_v33 = vrot.slane %v6024_v42, 6 }
0x1317   :  { %vm5970_vm14 = vmor %vm5968_vm13, %vm5969_vm12  ;;  %v6039_v45 = vrot.slane %v6026_v48, 4 }
0x1318   :  { %v5961_v2 = vsel %vm5960_vm11, %v7014_v41, %v5957_v56  ;;  %v5964_v52 = vmul.f32 %v7016_v62, %v5963_v21  ;;  %v6032_v41 = vsel %vm6031_vm7, %v6030_v31, %v6022_v61 }
0x1319   :  { %v5978_v53 = vmul.f32 %v5961_v2, %v10032_v30  ;;  %v6035_v23 = vsel %vm6034_vm8, %v6033_v33, %v6032_v41 }
0x131a   :  { %v5965_v59 = vmul.f32 0.5, %v5964_v52 }
0x131b   :  { %v5987_v11 = vmul.f32 %v5980_v54, %v5978_v53 }
0x131c   :  { %v5966_v3 = vsub.f32 1.5, %v5965_v59 }
0x131d   :  { %v5996_v40 = vadd.f32 %v5989_v10, %v5987_v11 }
0x131e   :  { %v5967_v17 = vmul.f32 %v7016_v62, %v5966_v3 }
0x131f   :  { %v6004_v28 = vpack.c.bf16 %v5996_v40, %v5996_v40 }
0x1320   :  { %v5971_v30 = vsel %vm5970_vm14, %v7016_v62, %v5967_v17 }
0x1321   :  { %v5979_v36 = vmul.f32 %v5971_v30, %v10038_v50  ;;  %v6028_v57 = vunpack.c.l.b16 %v6004_v28  ;;  %v6038_v50 = vsel %vm6037_vm9, %v6036_v7, %v6035_v23 }
0x1322   :  { %v6041_v47 = vsel %vm6040_vm10, %v6039_v45, %v6038_v50 }
0x1323   :  { %v5988_v4 = vmul.f32 %v5980_v54, %v5979_v36  ;;  %v6045_v63 = vrot.slane %v6028_v57, 2  ;;  %v6044_v54 = vsel %vm6043_vm15, %v6042_v18, %v6041_v47 }
0x1325   :  { %v5997_v6 = vadd.f32 %v5989_v10, %v5988_v4  ;;  %v6047_v1 = vsel %vm6046_vm1, %v6045_v63, %v6044_v54 }
0x1327   :  { %v6005_v60 = vpack.c.bf16 %v5997_v6, %v5997_v6 }
0x1329   :  { %v6029_v13 = vunpack.c.l.b16 %v6005_v60 }
0x132b   :  { %v6048_v0 = vrot.slane %v6029_v13, 1 }
0x132d   :  { %v6050_v20 = vsel %vm6049_vm2, %v6048_v0, %v6047_v1 }
0x132e   :  { %v6051_v46 = vpack.c.b16 %v6050_v20, %v6050_v20 }
0x1330   :  { %6362 = vmatmul.msk.bf16.vlgmr.msra.gmra.mxu3 %vm178_vm0, %v6051_v46 }
0x13b3   :  { %v6076_v15 = vpop.f32.mrf.mxu3 }
0x13b4   :  { %v6077_v37 = vadd.f32 %v6646_v35, %v6076_v15 }
0x13b6   :  { %6080 = vst [vmem:[#allocation11] sm:$0xff] %v6077_v37 }
0x13b7   :  { %6091 = dma.vmem_to_hbm [thread:$0]  %s6087_s19, 128, %s6089_s22, [#allocation4]  }
0x13bb   :  { %v6078_v10 = vpop.f32.mrf.mxu3 }
0x13bc   :  { %7168 = dma.done.wait [#allocation4], 128  }
0x13bd   :  { %7169 = vsyncadd [#allocation4], 4294967168 }
0x13be   :  { %6096 = vsyncpa [#allocation3], 1 }
0x13bf   :  { %6097 = vsyncpa [#allocation6], 1 }
0x13c0   :  { %6098 = vsyncpa [#allocation9], 1 }
0x13c1   :  { %6099 = vsyncpa [#allocation4], 1 }

</bundles_post_ra>
